<compile_context>
chip_gen: v7x
topology: tpu7x:2x2x1
jax: 0.10.0
libtpu: 0.0.40
codegen_flags: <defaults>
</compile_context>

<pallas_src>
import functools

import jax
import jax.numpy as jnp
from jax import lax
from jax.experimental import pallas as pl
from jax.experimental.pallas import tpu as pltpu


def _residual_group_kernel(x_ref, cmn_ref, cmp_ref,
                           w1_ref, b1_ref, w2_ref, b2_ref,
                           wd_ref, bd_ref, wu_ref, bu_ref,
                           wf_ref, bf_ref,
                           out_ref,
                           feat_ref, pad_ref, cat_ref,
                           *, H, W, C):
    HW = H * W
    r_step = pl.program_id(1)

    @pl.when(r_step == 0)
    def _init():
        # Zero the padded row buffer once per image (its W-row halos stay zero
        # afterwards: convs only rewrite the middle HW rows) and load this image's
        # input as the running feature map.
        pad_ref[...] = jnp.zeros_like(pad_ref)
        feat_ref[...] = x_ref[...]

    # Hoisted (broadcast once, reused by all three convs of this step).
    cm_neg = jnp.broadcast_to(cmn_ref[...], (HW, C))   # valid mask for dx = -1
    cm_pos = jnp.broadcast_to(cmp_ref[...], (HW, C))   # valid mask for dx = +1

    def conv3x3(x2d, w_ref, b_ref):
        # 3x3 "same" conv as one fused MXU matmul over all 9 taps.
        for dxi, dx in enumerate((-1, 0, 1)):
            if dx == 0:
                xs = x2d
            else:
                # column shift: out[i] = x[i + dx]; invalid columns zeroed by the
                # precomputed 0/1 mask (handles wrap-around across image rows).
                xs = pltpu.roll(x2d, shift=(-dx) % HW, axis=0)
                xs = xs * (cm_neg if dx == -1 else cm_pos)
            xs = xs.astype(jnp.bfloat16)               # MXU-native operand dtype
            pad_ref[pl.ds(W, HW), :] = xs
            for dyi in range(3):                       # dy = dyi - 1
                k = dyi * 3 + dxi                      # matches (ky, kx, cin) flattening
                if dyi == 1:
                    cat_ref[:, k * C:(k + 1) * C] = xs
                else:
                    # row shift via an offset slice of the zero-padded buffer
                    # (no roll, no row mask).
                    cat_ref[:, k * C:(k + 1) * C] = pad_ref[pl.ds(dyi * W, HW), :]
        return jnp.dot(cat_ref[...], w_ref[...],
                       preferred_element_type=jnp.float32) + b_ref[...]

    # ---- one RCAB block (this resblock step's weights) ----
    xin = feat_ref[...]
    t = conv3x3(xin, w1_ref, b1_ref)
    t = jnp.maximum(t, 0.0)                            # ReLU
    t = conv3x3(t, w2_ref, b2_ref)

    # ---- channel attention (CALayer), per image ----
    y = jnp.mean(t, axis=0, keepdims=True)             # global avg pool -> (1, C)
    y = jnp.dot(y.astype(jnp.bfloat16), wd_ref[...],
                preferred_element_type=jnp.float32) + bd_ref[...]
    y = jnp.maximum(y, 0.0)
    y = jnp.dot(y.astype(jnp.bfloat16), wu_ref[...],
                preferred_element_type=jnp.float32) + bu_ref[...]
    y = jax.nn.sigmoid(y)

    feat_ref[...] = t * y + xin                        # RCAB residual

    # ---- tail conv of the ResidualGroup + outer residual ----
    @pl.when(r_step == pl.num_programs(1) - 1)
    def _finish():
        res = conv3x3(feat_ref[...], wf_ref, bf_ref)
        out_ref[...] = res + x_ref[...]


def residual_group_forward(x_nchw, params):
    """ResidualGroup forward. x_nchw: (N, C, H, W) float32 (PyTorch layout)."""
    N, C, H, W = x_nchw.shape
    HW = H * W
    x3 = jnp.transpose(x_nchw, (0, 2, 3, 1)).reshape(N, HW, C).astype(jnp.float32)

    w1s, b1s = params["w1s"], params["b1s"]
    w2s, b2s = params["w2s"], params["b2s"]
    wds, bds = params["wds"], params["bds"]
    wus, bus = params["wus"], params["bus"]
    wf, bf = params["wf"], params["bf"]
    R = w1s.shape[0]
    Cr = wds.shape[-1]
    assert w1s.shape[1:3] == (3, 3), "kernel assumes 3x3 convolutions"
    K9 = 9 * C

    # Pre-reshape conv weights to the fused tap-major (9*C, C) layout and keep all
    # matmul weights in bf16 (MXU-native inputs, f32 accumulation); biases stay f32.
    w1f = w1s.reshape(R, K9, C).astype(jnp.bfloat16)
    w2f = w2s.reshape(R, K9, C).astype(jnp.bfloat16)
    wff = wf.reshape(K9, C).astype(jnp.bfloat16)
    wdb = wds.astype(jnp.bfloat16)
    wub = wus.astype(jnp.bfloat16)

    # Hoisted dx-validity masks (depend only on the column index, computed once).
    col = jnp.arange(HW, dtype=jnp.int32) % W
    cm_neg = (col >= 1).astype(jnp.float32)[:, None]          # dx = -1
    cm_pos = (col <= W - 2).astype(jnp.float32)[:, None]      # dx = +1

    grid_spec = pltpu.PrefetchScalarGridSpec(
        num_scalar_prefetch=0,
        grid=(N, R),
        in_specs=[
            pl.BlockSpec((None, HW, C), lambda b, r: (b, 0, 0)),   # x, per image
            pl.BlockSpec((HW, 1), lambda b, r: (0, 0)),            # col mask dx=-1
            pl.BlockSpec((HW, 1), lambda b, r: (0, 0)),            # col mask dx=+1
            pl.BlockSpec((None, K9, C), lambda b, r: (r, 0, 0)),   # conv1 weight
            pl.BlockSpec((None, 1, C), lambda b, r: (r, 0, 0)),    # conv1 bias
            pl.BlockSpec((None, K9, C), lambda b, r: (r, 0, 0)),   # conv2 weight
            pl.BlockSpec((None, 1, C), lambda b, r: (r, 0, 0)),    # conv2 bias
            pl.BlockSpec((None, C, Cr), lambda b, r: (r, 0, 0)),   # CA down weight
            pl.BlockSpec((None, 1, Cr), lambda b, r: (r, 0, 0)),   # CA down bias
            pl.BlockSpec((None, Cr, C), lambda b, r: (r, 0, 0)),   # CA up weight
            pl.BlockSpec((None, 1, C), lambda b, r: (r, 0, 0)),    # CA up bias
            pl.BlockSpec((K9, C), lambda b, r: (0, 0)),            # tail conv weight
            pl.BlockSpec((1, C), lambda b, r: (0, 0)),             # tail conv bias
        ],
        out_specs=pl.BlockSpec((None, HW, C), lambda b, r: (b, 0, 0)),
        scratch_shapes=[
            pltpu.VMEM((HW, C), jnp.float32),              # running feature map
            pltpu.VMEM((HW + 2 * W, C), jnp.bfloat16),     # zero-padded row buffer
            pltpu.VMEM((HW, K9), jnp.bfloat16),            # fused-tap (im2col) operand
        ],
    )

    # Explicit scoped-VMEM budget: resident per-image buffers + double-buffered
    # weight tiles, with headroom (also raises the 16 MiB v5e default).
    act = HW * C * 4
    wbytes = K9 * C * 2
    resident = (4 * act                          # x + out blocks (double-buffered)
                + act                            # feat scratch (f32)
                + (HW + 2 * W) * C * 2           # padded row buffer (bf16)
                + HW * K9 * 2                    # fused-tap scratch (bf16)
                + 2 * HW * 4                     # column masks
                + 2 * (2 * wbytes + 2 * C * Cr * 2 + (3 * C + Cr) * 4)
                + wbytes + C * 4)                # tail conv weight + bias
    vmem_limit = int(min(64 * 2 ** 20, max(32 * 2 ** 20, 2 * resident)))
    # TODO(synk): for very large images on v7x (64 MiB VMEM), add a spatial row-tile
    # grid axis with 1-row halos and a two-pass channel-attention reduction.

    out3 = pl.pallas_call(
        functools.partial(_residual_group_kernel, H=H, W=W, C=C),
        out_shape=jax.ShapeDtypeStruct((N, HW, C), jnp.float32),
        grid_spec=grid_spec,
        compiler_params=pltpu.CompilerParams(
            dimension_semantics=("parallel", "arbitrary"),
            vmem_limit_bytes=vmem_limit),
    )(x3, cm_neg, cm_pos, w1f, b1s, w2f, b2s, wdb, bds, wub, bus, wff, bf)

    return out3.reshape(N, H, W, C).transpose(0, 3, 1, 2)


def make_params(key, n_feat, reduction, kernel_size, n_resblocks):
    """Deterministic synthetic parameters (HWIO conv layout, (Cin,Cout) 1x1s)."""
    Cr = n_feat // reduction
    ks = jax.random.split(key, 10)
    scale = 0.1

    def nrm(k, shape):
        return scale * jax.random.normal(k, shape, jnp.float32)

    return dict(
        w1s=nrm(ks[0], (n_resblocks, kernel_size, kernel_size, n_feat, n_feat)),
        b1s=nrm(ks[1], (n_resblocks, 1, n_feat)),
        w2s=nrm(ks[2], (n_resblocks, kernel_size, kernel_size, n_feat, n_feat)),
        b2s=nrm(ks[3], (n_resblocks, 1, n_feat)),
        wds=nrm(ks[4], (n_resblocks, n_feat, Cr)),
        bds=nrm(ks[5], (n_resblocks, 1, Cr)),
        wus=nrm(ks[6], (n_resblocks, Cr, n_feat)),
        bus=nrm(ks[7], (n_resblocks, 1, n_feat)),
        wf=nrm(ks[8], (kernel_size, kernel_size, n_feat, n_feat)),
        bf=nrm(ks[9], (1, n_feat)),
    )


def reference_forward(x_nchw, params):
    """Pure-JAX reference mirroring the PyTorch ResidualGroup semantics."""
    x = jnp.transpose(x_nchw, (0, 2, 3, 1)).astype(jnp.float32)  # NHWC

    def conv(v, w, b):
        y = lax.conv_general_dilated(
            v, w, window_strides=(1, 1), padding="SAME",
            dimension_numbers=("NHWC", "HWIO", "NHWC"),
            precision=lax.Precision.HIGHEST)
        return y + b.reshape(1, 1, 1, -1)

    feat = x
    R = params["w1s"].shape[0]
    for i in range(R):
        r = conv(feat, params["w1s"][i], params["b1s"][i, 0])
        r = jnp.maximum(r, 0.0)
        r = conv(r, params["w2s"][i], params["b2s"][i, 0])
        y = jnp.mean(r, axis=(1, 2))                              # AdaptiveAvgPool2d(1)
        y = jnp.maximum(y @ params["wds"][i] + params["bds"][i, 0], 0.0)
        y = jax.nn.sigmoid(y @ params["wus"][i] + params["bus"][i, 0])
        r = r * y[:, None, None, :]
        feat = r + feat
    res = conv(feat, params["wf"], params["bf"][0])
    out = res + x
    return jnp.transpose(out, (0, 3, 1, 2))


if __name__ == "__main__":
    N, C, H, W = 2, 8, 16, 16
    reduction, kernel_size, n_resblocks = 4, 3, 2

    key = jax.random.PRNGKey(0)
    kx, kp = jax.random.split(key)
    x = jax.random.normal(kx, (N, C, H, W), jnp.float32)
    params = make_params(kp, C, reduction, kernel_size, n_resblocks)

    out = jax.block_until_ready(residual_group_forward(x, params))
    ref = jax.block_until_ready(reference_forward(x, params))

    assert out.shape == ref.shape == (N, C, H, W)
    # bf16 MXU inputs (f32 accumulation) -> slightly looser tolerance than pure f32.
    if not jnp.allclose(out, ref, atol=3e-2, rtol=3e-2):
        err = float(jnp.max(jnp.abs(out - ref)))
        raise AssertionError(f"Pallas ResidualGroup mismatch vs reference, max |err|={err}")
    print("KERNEL_OK")
</pallas_src>

<mosaic_0001>
module attributes {stable_mosaic.version = 11 : i64} {
  func.func @_residual_group_kernel(%arg0: i32, %arg1: i32, %arg2: memref<1x256x8xf32, #tpu.memory_space<vmem>>, %arg3: memref<256x1xf32, #tpu.memory_space<vmem>>, %arg4: memref<256x1xf32, #tpu.memory_space<vmem>>, %arg5: memref<1x72x8xbf16, #tpu.memory_space<vmem>>, %arg6: memref<1x1x8xf32, #tpu.memory_space<vmem>>, %arg7: memref<1x72x8xbf16, #tpu.memory_space<vmem>>, %arg8: memref<1x1x8xf32, #tpu.memory_space<vmem>>, %arg9: memref<1x8x2xbf16, #tpu.memory_space<vmem>>, %arg10: memref<1x1x2xf32, #tpu.memory_space<vmem>>, %arg11: memref<1x2x8xbf16, #tpu.memory_space<vmem>>, %arg12: memref<1x1x8xf32, #tpu.memory_space<vmem>>, %arg13: memref<72x8xbf16, #tpu.memory_space<vmem>>, %arg14: memref<1x8xf32, #tpu.memory_space<vmem>>, %arg15: memref<1x256x8xf32, #tpu.memory_space<vmem>>, %arg16: memref<256x8xf32, #tpu.memory_space<vmem>>, %arg17: memref<288x8xbf16, #tpu.memory_space<vmem>>, %arg18: memref<256x72xbf16, #tpu.memory_space<vmem>>) attributes {dimension_semantics = [#tpu.dimension_semantics<parallel>, #tpu.dimension_semantics<arbitrary>], iteration_bounds = array<i64: 2, 2>, scalar_prefetch = 0 : i64, scratch_operands = 3 : i64, tpu.core_type = #tpu.core_type<tc>, window_params = [{transform_indices = @transform_0, window_bounds = array<i64: 1, 256, 8>}, {pipeline_mode = #tpu.pipeline_mode<synchronous>, transform_indices = @transform_1, window_bounds = array<i64: 256, 1>}, {pipeline_mode = #tpu.pipeline_mode<synchronous>, transform_indices = @transform_2, window_bounds = array<i64: 256, 1>}, {transform_indices = @transform_3, window_bounds = array<i64: 1, 72, 8>}, {transform_indices = @transform_4, window_bounds = array<i64: 1, 1, 8>}, {transform_indices = @transform_5, window_bounds = array<i64: 1, 72, 8>}, {transform_indices = @transform_6, window_bounds = array<i64: 1, 1, 8>}, {transform_indices = @transform_7, window_bounds = array<i64: 1, 8, 2>}, {transform_indices = @transform_8, window_bounds = array<i64: 1, 1, 2>}, {transform_indices = @transform_9, window_bounds = array<i64: 1, 2, 8>}, {transform_indices = @transform_10, window_bounds = array<i64: 1, 1, 8>}, {pipeline_mode = #tpu.pipeline_mode<synchronous>, transform_indices = @transform_11, window_bounds = array<i64: 72, 8>}, {pipeline_mode = #tpu.pipeline_mode<synchronous>, transform_indices = @transform_12, window_bounds = array<i64: 1, 8>}, {transform_indices = @transform_13, window_bounds = array<i64: 1, 256, 8>}]} {
    %c0_i32 = arith.constant 0 : i32
    %0 = arith.cmpi eq, %arg1, %c0_i32 : i32
    %1 = arith.extui %0 : i1 to i32
    %c0_i32_0 = arith.constant 0 : i32
    %2 = arith.cmpi ne, %1, %c0_i32_0 : i32
    scf.if %2 {
      %cst_112 = arith.constant 0.000000e+00 : bf16
      %110 = vector.broadcast %cst_112 : bf16 to vector<288x8xbf16>
      %c0_113 = arith.constant 0 : index
      %c0_114 = arith.constant 0 : index
      %111 = vector.load %arg17[%c0_113, %c0_114] : memref<288x8xbf16, #tpu.memory_space<vmem>>, vector<288x8xbf16>
      tpu.vector_store %arg17[%c0_113, %c0_114], %110 {strides = array<i32>} : memref<288x8xbf16, #tpu.memory_space<vmem>>, vector<288x8xbf16>,
      %c0_115 = arith.constant 0 : index
      %c0_116 = arith.constant 0 : index
      %c0_117 = arith.constant 0 : index
      %112 = vector.load %arg2[%c0_115, %c0_116, %c0_117] : memref<1x256x8xf32, #tpu.memory_space<vmem>>, vector<1x256x8xf32>
      %113 = vector.shape_cast %112 : vector<1x256x8xf32> to vector<256x8xf32>
      %c0_118 = arith.constant 0 : index
      %c0_119 = arith.constant 0 : index
      %114 = vector.load %arg16[%c0_118, %c0_119] : memref<256x8xf32, #tpu.memory_space<vmem>>, vector<256x8xf32>
      tpu.vector_store %arg16[%c0_118, %c0_119], %113 {strides = array<i32>} : memref<256x8xf32, #tpu.memory_space<vmem>>, vector<256x8xf32>,
    } else {
    }
    %c0 = arith.constant 0 : index
    %c0_1 = arith.constant 0 : index
    %3 = vector.load %arg3[%c0, %c0_1] : memref<256x1xf32, #tpu.memory_space<vmem>>, vector<256x1xf32>
    %4 = vector.shape_cast %3 : vector<256x1xf32> to vector<256x1xf32>
    %5 = vector.broadcast %4 : vector<256x1xf32> to vector<256x8xf32>
    %c0_2 = arith.constant 0 : index
    %c0_3 = arith.constant 0 : index
    %6 = vector.load %arg4[%c0_2, %c0_3] : memref<256x1xf32, #tpu.memory_space<vmem>>, vector<256x1xf32>
    %7 = vector.shape_cast %6 : vector<256x1xf32> to vector<256x1xf32>
    %8 = vector.broadcast %7 : vector<256x1xf32> to vector<256x8xf32>
    %c0_4 = arith.constant 0 : index
    %c0_5 = arith.constant 0 : index
    %9 = vector.load %arg16[%c0_4, %c0_5] : memref<256x8xf32, #tpu.memory_space<vmem>>, vector<256x8xf32>
    %c1_i32 = arith.constant 1 : i32
    %10 = tpu.dynamic_rotate %9 by %c1_i32 dim 0 : vector<256x8xf32>, i32 -> vector<256x8xf32>
    %11 = arith.mulf %10, %5 : vector<256x8xf32>
    %12 = arith.truncf %11 : vector<256x8xf32> to vector<256x8xbf16>
    %c16 = arith.constant 16 : index
    %c0_6 = arith.constant 0 : index
    %13 = vector.load %arg17[%c16, %c0_6] : memref<288x8xbf16, #tpu.memory_space<vmem>>, vector<256x8xbf16>
    tpu.vector_store %arg17[%c16, %c0_6], %12 {strides = array<i32>} : memref<288x8xbf16, #tpu.memory_space<vmem>>, vector<256x8xbf16>,
    %c0_7 = arith.constant 0 : index
    %c0_8 = arith.constant 0 : index
    %14 = vector.load %arg17[%c0_7, %c0_8] : memref<288x8xbf16, #tpu.memory_space<vmem>>, vector<256x8xbf16>
    %c0_9 = arith.constant 0 : index
    %c0_10 = arith.constant 0 : index
    %15 = vector.load %arg18[%c0_9, %c0_10] : memref<256x72xbf16, #tpu.memory_space<vmem>>, vector<256x8xbf16>
    tpu.vector_store %arg18[%c0_9, %c0_10], %14 {strides = array<i32>} : memref<256x72xbf16, #tpu.memory_space<vmem>>, vector<256x8xbf16>,
    %c0_11 = arith.constant 0 : index
    %c24 = arith.constant 24 : index
    %16 = vector.load %arg18[%c0_11, %c24] : memref<256x72xbf16, #tpu.memory_space<vmem>>, vector<256x8xbf16>
    tpu.vector_store %arg18[%c0_11, %c24], %12 {strides = array<i32>} : memref<256x72xbf16, #tpu.memory_space<vmem>>, vector<256x8xbf16>,
    %c32 = arith.constant 32 : index
    %c0_12 = arith.constant 0 : index
    %17 = vector.load %arg17[%c32, %c0_12] : memref<288x8xbf16, #tpu.memory_space<vmem>>, vector<256x8xbf16>
    %c0_13 = arith.constant 0 : index
    %c48 = arith.constant 48 : index
    %18 = vector.load %arg18[%c0_13, %c48] : memref<256x72xbf16, #tpu.memory_space<vmem>>, vector<256x8xbf16>
    tpu.vector_store %arg18[%c0_13, %c48], %17 {strides = array<i32>} : memref<256x72xbf16, #tpu.memory_space<vmem>>, vector<256x8xbf16>,
    %19 = arith.truncf %9 : vector<256x8xf32> to vector<256x8xbf16>
    %c16_14 = arith.constant 16 : index
    %c0_15 = arith.constant 0 : index
    %20 = vector.load %arg17[%c16_14, %c0_15] : memref<288x8xbf16, #tpu.memory_space<vmem>>, vector<256x8xbf16>
    tpu.vector_store %arg17[%c16_14, %c0_15], %19 {strides = array<i32>} : memref<288x8xbf16, #tpu.memory_space<vmem>>, vector<256x8xbf16>,
    %c0_16 = arith.constant 0 : index
    %c0_17 = arith.constant 0 : index
    %21 = vector.load %arg17[%c0_16, %c0_17] : memref<288x8xbf16, #tpu.memory_space<vmem>>, vector<256x8xbf16>
    %c0_18 = arith.constant 0 : index
    %c8 = arith.constant 8 : index
    %22 = vector.load %arg18[%c0_18, %c8] : memref<256x72xbf16, #tpu.memory_space<vmem>>, vector<256x8xbf16>
    tpu.vector_store %arg18[%c0_18, %c8], %21 {strides = array<i32>} : memref<256x72xbf16, #tpu.memory_space<vmem>>, vector<256x8xbf16>,
    %c0_19 = arith.constant 0 : index
    %c32_20 = arith.constant 32 : index
    %23 = vector.load %arg18[%c0_19, %c32_20] : memref<256x72xbf16, #tpu.memory_space<vmem>>, vector<256x8xbf16>
    tpu.vector_store %arg18[%c0_19, %c32_20], %19 {strides = array<i32>} : memref<256x72xbf16, #tpu.memory_space<vmem>>, vector<256x8xbf16>,
    %c32_21 = arith.constant 32 : index
    %c0_22 = arith.constant 0 : index
    %24 = vector.load %arg17[%c32_21, %c0_22] : memref<288x8xbf16, #tpu.memory_space<vmem>>, vector<256x8xbf16>
    %c0_23 = arith.constant 0 : index
    %c56 = arith.constant 56 : index
    %25 = vector.load %arg18[%c0_23, %c56] : memref<256x72xbf16, #tpu.memory_space<vmem>>, vector<256x8xbf16>
    tpu.vector_store %arg18[%c0_23, %c56], %24 {strides = array<i32>} : memref<256x72xbf16, #tpu.memory_space<vmem>>, vector<256x8xbf16>,
    %c255_i32 = arith.constant 255 : i32
    %26 = tpu.dynamic_rotate %9 by %c255_i32 dim 0 : vector<256x8xf32>, i32 -> vector<256x8xf32>
    %27 = arith.mulf %26, %8 : vector<256x8xf32>
    %28 = arith.truncf %27 : vector<256x8xf32> to vector<256x8xbf16>
    %c16_24 = arith.constant 16 : index
    %c0_25 = arith.constant 0 : index
    %29 = vector.load %arg17[%c16_24, %c0_25] : memref<288x8xbf16, #tpu.memory_space<vmem>>, vector<256x8xbf16>
    tpu.vector_store %arg17[%c16_24, %c0_25], %28 {strides = array<i32>} : memref<288x8xbf16, #tpu.memory_space<vmem>>, vector<256x8xbf16>,
    %c0_26 = arith.constant 0 : index
    %c0_27 = arith.constant 0 : index
    %30 = vector.load %arg17[%c0_26, %c0_27] : memref<288x8xbf16, #tpu.memory_space<vmem>>, vector<256x8xbf16>
    %c0_28 = arith.constant 0 : index
    %c16_29 = arith.constant 16 : index
    %31 = vector.load %arg18[%c0_28, %c16_29] : memref<256x72xbf16, #tpu.memory_space<vmem>>, vector<256x8xbf16>
    tpu.vector_store %arg18[%c0_28, %c16_29], %30 {strides = array<i32>} : memref<256x72xbf16, #tpu.memory_space<vmem>>, vector<256x8xbf16>,
    %c0_30 = arith.constant 0 : index
    %c40 = arith.constant 40 : index
    %32 = vector.load %arg18[%c0_30, %c40] : memref<256x72xbf16, #tpu.memory_space<vmem>>, vector<256x8xbf16>
    tpu.vector_store %arg18[%c0_30, %c40], %28 {strides = array<i32>} : memref<256x72xbf16, #tpu.memory_space<vmem>>, vector<256x8xbf16>,
    %c32_31 = arith.constant 32 : index
    %c0_32 = arith.constant 0 : index
    %33 = vector.load %arg17[%c32_31, %c0_32] : memref<288x8xbf16, #tpu.memory_space<vmem>>, vector<256x8xbf16>
    %c0_33 = arith.constant 0 : index
    %c64 = arith.constant 64 : index
    %34 = vector.load %arg18[%c0_33, %c64] : memref<256x72xbf16, #tpu.memory_space<vmem>>, vector<256x8xbf16>
    tpu.vector_store %arg18[%c0_33, %c64], %33 {strides = array<i32>} : memref<256x72xbf16, #tpu.memory_space<vmem>>, vector<256x8xbf16>,
    %c0_34 = arith.constant 0 : index
    %c0_35 = arith.constant 0 : index
    %35 = vector.load %arg18[%c0_34, %c0_35] : memref<256x72xbf16, #tpu.memory_space<vmem>>, vector<256x72xbf16>
    %c0_36 = arith.constant 0 : index
    %c0_37 = arith.constant 0 : index
    %c0_38 = arith.constant 0 : index
    %36 = vector.load %arg5[%c0_36, %c0_37, %c0_38] : memref<1x72x8xbf16, #tpu.memory_space<vmem>>, vector<1x72x8xbf16>
    %37 = vector.shape_cast %36 : vector<1x72x8xbf16> to vector<72x8xbf16>
    %cst = arith.constant dense<0.000000e+00> : vector<256x8xf32>
    %38 = tpu.matmul %35, %37, %cst {dimension_numbers = #tpu.dot_dimension_numbers<[1], [0], [0], [1], [0, 0, 1, 1], [], []>} : vector<256x72xbf16>, vector<72x8xbf16>, vector<256x8xf32> -> vector<256x8xf32>
    %c0_39 = arith.constant 0 : index
    %c0_40 = arith.constant 0 : index
    %c0_41 = arith.constant 0 : index
    %39 = vector.load %arg6[%c0_39, %c0_40, %c0_41] : memref<1x1x8xf32, #tpu.memory_space<vmem>>, vector<1x1x8xf32>
    %40 = vector.shape_cast %39 : vector<1x1x8xf32> to vector<1x8xf32>
    %41 = vector.broadcast %40 : vector<1x8xf32> to vector<256x8xf32>
    %42 = arith.addf %38, %41 : vector<256x8xf32>
    %cst_42 = arith.constant 0.000000e+00 : f32
    %43 = vector.broadcast %cst_42 : f32 to vector<256x8xf32>
    %44 = arith.maximumf %42, %43 : vector<256x8xf32>
    %c1_i32_43 = arith.constant 1 : i32
    %45 = tpu.dynamic_rotate %44 by %c1_i32_43 dim 0 : vector<256x8xf32>, i32 -> vector<256x8xf32>
    %46 = arith.mulf %45, %5 : vector<256x8xf32>
    %47 = arith.truncf %46 : vector<256x8xf32> to vector<256x8xbf16>
    %c16_44 = arith.constant 16 : index
    %c0_45 = arith.constant 0 : index
    %48 = vector.load %arg17[%c16_44, %c0_45] : memref<288x8xbf16, #tpu.memory_space<vmem>>, vector<256x8xbf16>
    tpu.vector_store %arg17[%c16_44, %c0_45], %47 {strides = array<i32>} : memref<288x8xbf16, #tpu.memory_space<vmem>>, vector<256x8xbf16>,
    %c0_46 = arith.constant 0 : index
    %c0_47 = arith.constant 0 : index
    %49 = vector.load %arg17[%c0_46, %c0_47] : memref<288x8xbf16, #tpu.memory_space<vmem>>, vector<256x8xbf16>
    %c0_48 = arith.constant 0 : index
    %c0_49 = arith.constant 0 : index
    %50 = vector.load %arg18[%c0_48, %c0_49] : memref<256x72xbf16, #tpu.memory_space<vmem>>, vector<256x8xbf16>
    tpu.vector_store %arg18[%c0_48, %c0_49], %49 {strides = array<i32>} : memref<256x72xbf16, #tpu.memory_space<vmem>>, vector<256x8xbf16>,
    %c0_50 = arith.constant 0 : index
    %c24_51 = arith.constant 24 : index
    %51 = vector.load %arg18[%c0_50, %c24_51] : memref<256x72xbf16, #tpu.memory_space<vmem>>, vector<256x8xbf16>
    tpu.vector_store %arg18[%c0_50, %c24_51], %47 {strides = array<i32>} : memref<256x72xbf16, #tpu.memory_space<vmem>>, vector<256x8xbf16>,
    %c32_52 = arith.constant 32 : index
    %c0_53 = arith.constant 0 : index
    %52 = vector.load %arg17[%c32_52, %c0_53] : memref<288x8xbf16, #tpu.memory_space<vmem>>, vector<256x8xbf16>
    %c0_54 = arith.constant 0 : index
    %c48_55 = arith.constant 48 : index
    %53 = vector.load %arg18[%c0_54, %c48_55] : memref<256x72xbf16, #tpu.memory_space<vmem>>, vector<256x8xbf16>
    tpu.vector_store %arg18[%c0_54, %c48_55], %52 {strides = array<i32>} : memref<256x72xbf16, #tpu.memory_space<vmem>>, vector<256x8xbf16>,
    %54 = arith.truncf %44 : vector<256x8xf32> to vector<256x8xbf16>
    %c16_56 = arith.constant 16 : index
    %c0_57 = arith.constant 0 : index
    %55 = vector.load %arg17[%c16_56, %c0_57] : memref<288x8xbf16, #tpu.memory_space<vmem>>, vector<256x8xbf16>
    tpu.vector_store %arg17[%c16_56, %c0_57], %54 {strides = array<i32>} : memref<288x8xbf16, #tpu.memory_space<vmem>>, vector<256x8xbf16>,
    %c0_58 = arith.constant 0 : index
    %c0_59 = arith.constant 0 : index
    %56 = vector.load %arg17[%c0_58, %c0_59] : memref<288x8xbf16, #tpu.memory_space<vmem>>, vector<256x8xbf16>
    %c0_60 = arith.constant 0 : index
    %c8_61 = arith.constant 8 : index
    %57 = vector.load %arg18[%c0_60, %c8_61] : memref<256x72xbf16, #tpu.memory_space<vmem>>, vector<256x8xbf16>
    tpu.vector_store %arg18[%c0_60, %c8_61], %56 {strides = array<i32>} : memref<256x72xbf16, #tpu.memory_space<vmem>>, vector<256x8xbf16>,
    %c0_62 = arith.constant 0 : index
    %c32_63 = arith.constant 32 : index
    %58 = vector.load %arg18[%c0_62, %c32_63] : memref<256x72xbf16, #tpu.memory_space<vmem>>, vector<256x8xbf16>
    tpu.vector_store %arg18[%c0_62, %c32_63], %54 {strides = array<i32>} : memref<256x72xbf16, #tpu.memory_space<vmem>>, vector<256x8xbf16>,
    %c32_64 = arith.constant 32 : index
    %c0_65 = arith.constant 0 : index
    %59 = vector.load %arg17[%c32_64, %c0_65] : memref<288x8xbf16, #tpu.memory_space<vmem>>, vector<256x8xbf16>
    %c0_66 = arith.constant 0 : index
    %c56_67 = arith.constant 56 : index
    %60 = vector.load %arg18[%c0_66, %c56_67] : memref<256x72xbf16, #tpu.memory_space<vmem>>, vector<256x8xbf16>
    tpu.vector_store %arg18[%c0_66, %c56_67], %59 {strides = array<i32>} : memref<256x72xbf16, #tpu.memory_space<vmem>>, vector<256x8xbf16>,
    %c255_i32_68 = arith.constant 255 : i32
    %61 = tpu.dynamic_rotate %44 by %c255_i32_68 dim 0 : vector<256x8xf32>, i32 -> vector<256x8xf32>
    %62 = arith.mulf %61, %8 : vector<256x8xf32>
    %63 = arith.truncf %62 : vector<256x8xf32> to vector<256x8xbf16>
    %c16_69 = arith.constant 16 : index
    %c0_70 = arith.constant 0 : index
    %64 = vector.load %arg17[%c16_69, %c0_70] : memref<288x8xbf16, #tpu.memory_space<vmem>>, vector<256x8xbf16>
    tpu.vector_store %arg17[%c16_69, %c0_70], %63 {strides = array<i32>} : memref<288x8xbf16, #tpu.memory_space<vmem>>, vector<256x8xbf16>,
    %c0_71 = arith.constant 0 : index
    %c0_72 = arith.constant 0 : index
    %65 = vector.load %arg17[%c0_71, %c0_72] : memref<288x8xbf16, #tpu.memory_space<vmem>>, vector<256x8xbf16>
    %c0_73 = arith.constant 0 : index
    %c16_74 = arith.constant 16 : index
    %66 = vector.load %arg18[%c0_73, %c16_74] : memref<256x72xbf16, #tpu.memory_space<vmem>>, vector<256x8xbf16>
    tpu.vector_store %arg18[%c0_73, %c16_74], %65 {strides = array<i32>} : memref<256x72xbf16, #tpu.memory_space<vmem>>, vector<256x8xbf16>,
    %c0_75 = arith.constant 0 : index
    %c40_76 = arith.constant 40 : index
    %67 = vector.load %arg18[%c0_75, %c40_76] : memref<256x72xbf16, #tpu.memory_space<vmem>>, vector<256x8xbf16>
    tpu.vector_store %arg18[%c0_75, %c40_76], %63 {strides = array<i32>} : memref<256x72xbf16, #tpu.memory_space<vmem>>, vector<256x8xbf16>,
    %c32_77 = arith.constant 32 : index
    %c0_78 = arith.constant 0 : index
    %68 = vector.load %arg17[%c32_77, %c0_78] : memref<288x8xbf16, #tpu.memory_space<vmem>>, vector<256x8xbf16>
    %c0_79 = arith.constant 0 : index
    %c64_80 = arith.constant 64 : index
    %69 = vector.load %arg18[%c0_79, %c64_80] : memref<256x72xbf16, #tpu.memory_space<vmem>>, vector<256x8xbf16>
    tpu.vector_store %arg18[%c0_79, %c64_80], %68 {strides = array<i32>} : memref<256x72xbf16, #tpu.memory_space<vmem>>, vector<256x8xbf16>,
    %c0_81 = arith.constant 0 : index
    %c0_82 = arith.constant 0 : index
    %70 = vector.load %arg18[%c0_81, %c0_82] : memref<256x72xbf16, #tpu.memory_space<vmem>>, vector<256x72xbf16>
    %c0_83 = arith.constant 0 : index
    %c0_84 = arith.constant 0 : index
    %c0_85 = arith.constant 0 : index
    %71 = vector.load %arg7[%c0_83, %c0_84, %c0_85] : memref<1x72x8xbf16, #tpu.memory_space<vmem>>, vector<1x72x8xbf16>
    %72 = vector.shape_cast %71 : vector<1x72x8xbf16> to vector<72x8xbf16>
    %cst_86 = arith.constant dense<0.000000e+00> : vector<256x8xf32>
    %73 = tpu.matmul %70, %72, %cst_86 {dimension_numbers = #tpu.dot_dimension_numbers<[1], [0], [0], [1], [0, 0, 1, 1], [], []>} : vector<256x72xbf16>, vector<72x8xbf16>, vector<256x8xf32> -> vector<256x8xf32>
    %c0_87 = arith.constant 0 : index
    %c0_88 = arith.constant 0 : index
    %c0_89 = arith.constant 0 : index
    %74 = vector.load %arg8[%c0_87, %c0_88, %c0_89] : memref<1x1x8xf32, #tpu.memory_space<vmem>>, vector<1x1x8xf32>
    %75 = vector.shape_cast %74 : vector<1x1x8xf32> to vector<1x8xf32>
    %76 = vector.broadcast %75 : vector<1x8xf32> to vector<256x8xf32>
    %77 = arith.addf %73, %76 : vector<256x8xf32>
    %cst_90 = arith.constant dense<0.000000e+00> : vector<8xf32>
    %78 = vector.multi_reduction <add>, %77, %cst_90 [0] : vector<256x8xf32> to vector<8xf32>
    %79 = vector.shape_cast %78 : vector<8xf32> to vector<1x8xf32>
    %cst_91 = arith.constant 2.560000e+02 : f32
    %80 = vector.broadcast %cst_91 : f32 to vector<1x8xf32>
    %81 = arith.divf %79, %80 : vector<1x8xf32>
    %82 = arith.truncf %81 : vector<1x8xf32> to vector<1x8xbf16>
    %c0_92 = arith.constant 0 : index
    %c0_93 = arith.constant 0 : index
    %c0_94 = arith.constant 0 : index
    %83 = vector.load %arg9[%c0_92, %c0_93, %c0_94] : memref<1x8x2xbf16, #tpu.memory_space<vmem>>, vector<1x8x2xbf16>
    %84 = vector.shape_cast %83 : vector<1x8x2xbf16> to vector<8x2xbf16>
    %cst_95 = arith.constant dense<0.000000e+00> : vector<1x2xf32>
    %85 = tpu.matmul %82, %84, %cst_95 {dimension_numbers = #tpu.dot_dimension_numbers<[1], [0], [0], [1], [0, 0, 1, 1], [], []>} : vector<1x8xbf16>, vector<8x2xbf16>, vector<1x2xf32> -> vector<1x2xf32>
    %c0_96 = arith.constant 0 : index
    %c0_97 = arith.constant 0 : index
    %c0_98 = arith.constant 0 : index
    %86 = vector.load %arg10[%c0_96, %c0_97, %c0_98] : memref<1x1x2xf32, #tpu.memory_space<vmem>>, vector<1x1x2xf32>
    %87 = vector.shape_cast %86 : vector<1x1x2xf32> to vector<1x2xf32>
    %88 = arith.addf %85, %87 : vector<1x2xf32>
    %cst_99 = arith.constant 0.000000e+00 : f32
    %89 = vector.broadcast %cst_99 : f32 to vector<1x2xf32>
    %90 = arith.maximumf %88, %89 : vector<1x2xf32>
    %91 = arith.truncf %90 : vector<1x2xf32> to vector<1x2xbf16>
    %c0_100 = arith.constant 0 : index
    %c0_101 = arith.constant 0 : index
    %c0_102 = arith.constant 0 : index
    %92 = vector.load %arg11[%c0_100, %c0_101, %c0_102] : memref<1x2x8xbf16, #tpu.memory_space<vmem>>, vector<1x2x8xbf16>
    %93 = vector.shape_cast %92 : vector<1x2x8xbf16> to vector<2x8xbf16>
    %cst_103 = arith.constant dense<0.000000e+00> : vector<1x8xf32>
    %94 = tpu.matmul %91, %93, %cst_103 {dimension_numbers = #tpu.dot_dimension_numbers<[1], [0], [0], [1], [0, 0, 1, 1], [], []>} : vector<1x2xbf16>, vector<2x8xbf16>, vector<1x8xf32> -> vector<1x8xf32>
    %c0_104 = arith.constant 0 : index
    %c0_105 = arith.constant 0 : index
    %c0_106 = arith.constant 0 : index
    %95 = vector.load %arg12[%c0_104, %c0_105, %c0_106] : memref<1x1x8xf32, #tpu.memory_space<vmem>>, vector<1x1x8xf32>
    %96 = vector.shape_cast %95 : vector<1x1x8xf32> to vector<1x8xf32>
    %97 = arith.addf %94, %96 : vector<1x8xf32>
    %98 = arith.negf %97 : vector<1x8xf32>
    %99 = math.exp %98 : vector<1x8xf32>
    %cst_107 = arith.constant 1.000000e+00 : f32
    %100 = vector.broadcast %cst_107 : f32 to vector<1x8xf32>
    %101 = arith.addf %100, %99 : vector<1x8xf32>
    %102 = arith.divf %100, %101 : vector<1x8xf32>
    %103 = vector.broadcast %102 : vector<1x8xf32> to vector<256x8xf32>
    %104 = arith.mulf %77, %103 : vector<256x8xf32>
    %105 = arith.addf %104, %9 : vector<256x8xf32>
    %c0_108 = arith.constant 0 : index
    %c0_109 = arith.constant 0 : index
    %106 = vector.load %arg16[%c0_108, %c0_109] : memref<256x8xf32, #tpu.memory_space<vmem>>, vector<256x8xf32>
    tpu.vector_store %arg16[%c0_108, %c0_109], %105 {strides = array<i32>} : memref<256x8xf32, #tpu.memory_space<vmem>>, vector<256x8xf32>,
    %c1_i32_110 = arith.constant 1 : i32
    %107 = arith.cmpi eq, %arg1, %c1_i32_110 : i32
    %108 = arith.extui %107 : i1 to i32
    %c0_i32_111 = arith.constant 0 : i32
    %109 = arith.cmpi ne, %108, %c0_i32_111 : i32
    scf.if %109 {
      %c0_112 = arith.constant 0 : index
      %c0_113 = arith.constant 0 : index
      %110 = vector.load %arg16[%c0_112, %c0_113] : memref<256x8xf32, #tpu.memory_space<vmem>>, vector<256x8xf32>
      %c1_i32_114 = arith.constant 1 : i32
      %111 = tpu.dynamic_rotate %110 by %c1_i32_114 dim 0 : vector<256x8xf32>, i32 -> vector<256x8xf32>
      %112 = arith.mulf %111, %5 : vector<256x8xf32>
      %113 = arith.truncf %112 : vector<256x8xf32> to vector<256x8xbf16>
      %c16_115 = arith.constant 16 : index
      %c0_116 = arith.constant 0 : index
      %114 = vector.load %arg17[%c16_115, %c0_116] : memref<288x8xbf16, #tpu.memory_space<vmem>>, vector<256x8xbf16>
      tpu.vector_store %arg17[%c16_115, %c0_116], %113 {strides = array<i32>} : memref<288x8xbf16, #tpu.memory_space<vmem>>, vector<256x8xbf16>,
      %c0_117 = arith.constant 0 : index
      %c0_118 = arith.constant 0 : index
      %115 = vector.load %arg17[%c0_117, %c0_118] : memref<288x8xbf16, #tpu.memory_space<vmem>>, vector<256x8xbf16>
      %c0_119 = arith.constant 0 : index
      %c0_120 = arith.constant 0 : index
      %116 = vector.load %arg18[%c0_119, %c0_120] : memref<256x72xbf16, #tpu.memory_space<vmem>>, vector<256x8xbf16>
      tpu.vector_store %arg18[%c0_119, %c0_120], %115 {strides = array<i32>} : memref<256x72xbf16, #tpu.memory_space<vmem>>, vector<256x8xbf16>,
      %c0_121 = arith.constant 0 : index
      %c24_122 = arith.constant 24 : index
      %117 = vector.load %arg18[%c0_121, %c24_122] : memref<256x72xbf16, #tpu.memory_space<vmem>>, vector<256x8xbf16>
      tpu.vector_store %arg18[%c0_121, %c24_122], %113 {strides = array<i32>} : memref<256x72xbf16, #tpu.memory_space<vmem>>, vector<256x8xbf16>,
      %c32_123 = arith.constant 32 : index
      %c0_124 = arith.constant 0 : index
      %118 = vector.load %arg17[%c32_123, %c0_124] : memref<288x8xbf16, #tpu.memory_space<vmem>>, vector<256x8xbf16>
      %c0_125 = arith.constant 0 : index
      %c48_126 = arith.constant 48 : index
      %119 = vector.load %arg18[%c0_125, %c48_126] : memref<256x72xbf16, #tpu.memory_space<vmem>>, vector<256x8xbf16>
      tpu.vector_store %arg18[%c0_125, %c48_126], %118 {strides = array<i32>} : memref<256x72xbf16, #tpu.memory_space<vmem>>, vector<256x8xbf16>,
      %120 = arith.truncf %110 : vector<256x8xf32> to vector<256x8xbf16>
      %c16_127 = arith.constant 16 : index
      %c0_128 = arith.constant 0 : index
      %121 = vector.load %arg17[%c16_127, %c0_128] : memref<288x8xbf16, #tpu.memory_space<vmem>>, vector<256x8xbf16>
      tpu.vector_store %arg17[%c16_127, %c0_128], %120 {strides = array<i32>} : memref<288x8xbf16, #tpu.memory_space<vmem>>, vector<256x8xbf16>,
      %c0_129 = arith.constant 0 : index
      %c0_130 = arith.constant 0 : index
      %122 = vector.load %arg17[%c0_129, %c0_130] : memref<288x8xbf16, #tpu.memory_space<vmem>>, vector<256x8xbf16>
      %c0_131 = arith.constant 0 : index
      %c8_132 = arith.constant 8 : index
      %123 = vector.load %arg18[%c0_131, %c8_132] : memref<256x72xbf16, #tpu.memory_space<vmem>>, vector<256x8xbf16>
      tpu.vector_store %arg18[%c0_131, %c8_132], %122 {strides = array<i32>} : memref<256x72xbf16, #tpu.memory_space<vmem>>, vector<256x8xbf16>,
      %c0_133 = arith.constant 0 : index
      %c32_134 = arith.constant 32 : index
      %124 = vector.load %arg18[%c0_133, %c32_134] : memref<256x72xbf16, #tpu.memory_space<vmem>>, vector<256x8xbf16>
      tpu.vector_store %arg18[%c0_133, %c32_134], %120 {strides = array<i32>} : memref<256x72xbf16, #tpu.memory_space<vmem>>, vector<256x8xbf16>,
      %c32_135 = arith.constant 32 : index
      %c0_136 = arith.constant 0 : index
      %125 = vector.load %arg17[%c32_135, %c0_136] : memref<288x8xbf16, #tpu.memory_space<vmem>>, vector<256x8xbf16>
      %c0_137 = arith.constant 0 : index
      %c56_138 = arith.constant 56 : index
      %126 = vector.load %arg18[%c0_137, %c56_138] : memref<256x72xbf16, #tpu.memory_space<vmem>>, vector<256x8xbf16>
      tpu.vector_store %arg18[%c0_137, %c56_138], %125 {strides = array<i32>} : memref<256x72xbf16, #tpu.memory_space<vmem>>, vector<256x8xbf16>,
      %c255_i32_139 = arith.constant 255 : i32
      %127 = tpu.dynamic_rotate %110 by %c255_i32_139 dim 0 : vector<256x8xf32>, i32 -> vector<256x8xf32>
      %128 = arith.mulf %127, %8 : vector<256x8xf32>
      %129 = arith.truncf %128 : vector<256x8xf32> to vector<256x8xbf16>
      %c16_140 = arith.constant 16 : index
      %c0_141 = arith.constant 0 : index
      %130 = vector.load %arg17[%c16_140, %c0_141] : memref<288x8xbf16, #tpu.memory_space<vmem>>, vector<256x8xbf16>
      tpu.vector_store %arg17[%c16_140, %c0_141], %129 {strides = array<i32>} : memref<288x8xbf16, #tpu.memory_space<vmem>>, vector<256x8xbf16>,
      %c0_142 = arith.constant 0 : index
      %c0_143 = arith.constant 0 : index
      %131 = vector.load %arg17[%c0_142, %c0_143] : memref<288x8xbf16, #tpu.memory_space<vmem>>, vector<256x8xbf16>
      %c0_144 = arith.constant 0 : index
      %c16_145 = arith.constant 16 : index
      %132 = vector.load %arg18[%c0_144, %c16_145] : memref<256x72xbf16, #tpu.memory_space<vmem>>, vector<256x8xbf16>
      tpu.vector_store %arg18[%c0_144, %c16_145], %131 {strides = array<i32>} : memref<256x72xbf16, #tpu.memory_space<vmem>>, vector<256x8xbf16>,
      %c0_146 = arith.constant 0 : index
      %c40_147 = arith.constant 40 : index
      %133 = vector.load %arg18[%c0_146, %c40_147] : memref<256x72xbf16, #tpu.memory_space<vmem>>, vector<256x8xbf16>
      tpu.vector_store %arg18[%c0_146, %c40_147], %129 {strides = array<i32>} : memref<256x72xbf16, #tpu.memory_space<vmem>>, vector<256x8xbf16>,
      %c32_148 = arith.constant 32 : index
      %c0_149 = arith.constant 0 : index
      %134 = vector.load %arg17[%c32_148, %c0_149] : memref<288x8xbf16, #tpu.memory_space<vmem>>, vector<256x8xbf16>
      %c0_150 = arith.constant 0 : index
      %c64_151 = arith.constant 64 : index
      %135 = vector.load %arg18[%c0_150, %c64_151] : memref<256x72xbf16, #tpu.memory_space<vmem>>, vector<256x8xbf16>
      tpu.vector_store %arg18[%c0_150, %c64_151], %134 {strides = array<i32>} : memref<256x72xbf16, #tpu.memory_space<vmem>>, vector<256x8xbf16>,
      %c0_152 = arith.constant 0 : index
      %c0_153 = arith.constant 0 : index
      %136 = vector.load %arg18[%c0_152, %c0_153] : memref<256x72xbf16, #tpu.memory_space<vmem>>, vector<256x72xbf16>
      %c0_154 = arith.constant 0 : index
      %c0_155 = arith.constant 0 : index
      %137 = vector.load %arg13[%c0_154, %c0_155] : memref<72x8xbf16, #tpu.memory_space<vmem>>, vector<72x8xbf16>
      %cst_156 = arith.constant dense<0.000000e+00> : vector<256x8xf32>
      %138 = tpu.matmul %136, %137, %cst_156 {dimension_numbers = #tpu.dot_dimension_numbers<[1], [0], [0], [1], [0, 0, 1, 1], [], []>} : vector<256x72xbf16>, vector<72x8xbf16>, vector<256x8xf32> -> vector<256x8xf32>
      %c0_157 = arith.constant 0 : index
      %c0_158 = arith.constant 0 : index
      %139 = vector.load %arg14[%c0_157, %c0_158] : memref<1x8xf32, #tpu.memory_space<vmem>>, vector<1x8xf32>
      %140 = vector.broadcast %139 : vector<1x8xf32> to vector<256x8xf32>
      %141 = arith.addf %138, %140 : vector<256x8xf32>
      %c0_159 = arith.constant 0 : index
      %c0_160 = arith.constant 0 : index
      %c0_161 = arith.constant 0 : index
      %142 = vector.load %arg2[%c0_159, %c0_160, %c0_161] : memref<1x256x8xf32, #tpu.memory_space<vmem>>, vector<1x256x8xf32>
      %143 = vector.shape_cast %142 : vector<1x256x8xf32> to vector<256x8xf32>
      %144 = arith.addf %141, %143 : vector<256x8xf32>
      %c0_162 = arith.constant 0 : index
      %c0_163 = arith.constant 0 : index
      %c0_164 = arith.constant 0 : index
      %145 = vector.load %arg15[%c0_162, %c0_163, %c0_164] : memref<1x256x8xf32, #tpu.memory_space<vmem>>, vector<1x256x8xf32>
      %146 = vector.shape_cast %145 : vector<1x256x8xf32> to vector<256x8xf32>
      %147 = vector.shape_cast %144 : vector<256x8xf32> to vector<1x256x8xf32>
      tpu.vector_store %arg15[%c0_162, %c0_163, %c0_164], %147 {strides = array<i32>} : memref<1x256x8xf32, #tpu.memory_space<vmem>>, vector<1x256x8xf32>,
    } else {
    }
    return
  }
  func.func @transform_0(%arg0: i32, %arg1: i32) -> (i32, i32, i32) {
    %c0_i32 = arith.constant 0 : i32
    %c0_i32_0 = arith.constant 0 : i32
    %c0_i32_1 = arith.constant 0 : i32
    return %arg0, %c0_i32, %c0_i32_0 : i32, i32, i32
  }
  func.func @transform_1(%arg0: i32, %arg1: i32) -> (i32, i32) {
    %c0_i32 = arith.constant 0 : i32
    %c0_i32_0 = arith.constant 0 : i32
    %c0_i32_1 = arith.constant 0 : i32
    return %c0_i32, %c0_i32_0 : i32, i32
  }
  func.func @transform_2(%arg0: i32, %arg1: i32) -> (i32, i32) {
    %c0_i32 = arith.constant 0 : i32
    %c0_i32_0 = arith.constant 0 : i32
    %c0_i32_1 = arith.constant 0 : i32
    return %c0_i32, %c0_i32_0 : i32, i32
  }
  func.func @transform_3(%arg0: i32, %arg1: i32) -> (i32, i32, i32) {
    %c0_i32 = arith.constant 0 : i32
    %c0_i32_0 = arith.constant 0 : i32
    %c0_i32_1 = arith.constant 0 : i32
    return %arg1, %c0_i32, %c0_i32_0 : i32, i32, i32
  }
  func.func @transform_4(%arg0: i32, %arg1: i32) -> (i32, i32, i32) {
    %c0_i32 = arith.constant 0 : i32
    %c0_i32_0 = arith.constant 0 : i32
    %c0_i32_1 = arith.constant 0 : i32
    return %arg1, %c0_i32, %c0_i32_0 : i32, i32, i32
  }
  func.func @transform_5(%arg0: i32, %arg1: i32) -> (i32, i32, i32) {
    %c0_i32 = arith.constant 0 : i32
    %c0_i32_0 = arith.constant 0 : i32
    %c0_i32_1 = arith.constant 0 : i32
    return %arg1, %c0_i32, %c0_i32_0 : i32, i32, i32
  }
  func.func @transform_6(%arg0: i32, %arg1: i32) -> (i32, i32, i32) {
    %c0_i32 = arith.constant 0 : i32
    %c0_i32_0 = arith.constant 0 : i32
    %c0_i32_1 = arith.constant 0 : i32
    return %arg1, %c0_i32, %c0_i32_0 : i32, i32, i32
  }
  func.func @transform_7(%arg0: i32, %arg1: i32) -> (i32, i32, i32) {
    %c0_i32 = arith.constant 0 : i32
    %c0_i32_0 = arith.constant 0 : i32
    %c0_i32_1 = arith.constant 0 : i32
    return %arg1, %c0_i32, %c0_i32_0 : i32, i32, i32
  }
  func.func @transform_8(%arg0: i32, %arg1: i32) -> (i32, i32, i32) {
    %c0_i32 = arith.constant 0 : i32
    %c0_i32_0 = arith.constant 0 : i32
    %c0_i32_1 = arith.constant 0 : i32
    return %arg1, %c0_i32, %c0_i32_0 : i32, i32, i32
  }
  func.func @transform_9(%arg0: i32, %arg1: i32) -> (i32, i32, i32) {
    %c0_i32 = arith.constant 0 : i32
    %c0_i32_0 = arith.constant 0 : i32
    %c0_i32_1 = arith.constant 0 : i32
    return %arg1, %c0_i32, %c0_i32_0 : i32, i32, i32
  }
  func.func @transform_10(%arg0: i32, %arg1: i32) -> (i32, i32, i32) {
    %c0_i32 = arith.constant 0 : i32
    %c0_i32_0 = arith.constant 0 : i32
    %c0_i32_1 = arith.constant 0 : i32
    return %arg1, %c0_i32, %c0_i32_0 : i32, i32, i32
  }
  func.func @transform_11(%arg0: i32, %arg1: i32) -> (i32, i32) {
    %c0_i32 = arith.constant 0 : i32
    %c0_i32_0 = arith.constant 0 : i32
    %c0_i32_1 = arith.constant 0 : i32
    return %c0_i32, %c0_i32_0 : i32, i32
  }
  func.func @transform_12(%arg0: i32, %arg1: i32) -> (i32, i32) {
    %c0_i32 = arith.constant 0 : i32
    %c0_i32_0 = arith.constant 0 : i32
    %c0_i32_1 = arith.constant 0 : i32
    return %c0_i32, %c0_i32_0 : i32, i32
  }
  func.func @transform_13(%arg0: i32, %arg1: i32) -> (i32, i32, i32) {
    %c0_i32 = arith.constant 0 : i32
    %c0_i32_0 = arith.constant 0 : i32
    %c0_i32_1 = arith.constant 0 : i32
    return %arg0, %c0_i32, %c0_i32_0 : i32, i32, i32
  }
}

</mosaic_0001>

<bundles_post_ra>
// kernel: tpu_custom_call.1
= control target key start
LH: loop header
LB: loop body
LE: loop exit
PB: predicated region body
PF: predicated region fallthrough
CT: control target
= control target key end

     0   :  { %s6171_s25 = smov 0   ;;  %s6173_s26 = smov 0   ;;  %s10128_s0 = inlined_call_operand.vmem [shape: f32[2,256,8], index: 0, kind: input, shape index: {}]   ;;  %s10129_s1 = inlined_call_operand.vmem [shape: f32[256,1], index: 1, kind: input, shape index: {}]   ;;  %s10130_s2 = inlined_call_operand.vmem [shape: f32[256,1], index: 2, kind: input, shape index: {}]   ;;  %s10131_s3 = inlined_call_operand.vmem [shape: bf16[2,72,8], index: 3, kind: input, shape index: {}]   ;;  %s10132_s4 = inlined_call_operand.vmem [shape: f32[2,1,8], index: 4, kind: input, shape index: {}]   ;;  %s10133_s5 = inlined_call_operand.vmem [shape: bf16[2,72,8], index: 5, kind: input, shape index: {}]   ;;  %s10134_s6 = inlined_call_operand.vmem [shape: f32[2,1,8], index: 6, kind: input, shape index: {}]   ;;  %s10135_s7 = inlined_call_operand.vmem [shape: bf16[2,8,2], index: 7, kind: input, shape index: {}]   ;;  %s10136_s8 = inlined_call_operand.vmem [shape: f32[2,1,2], index: 8, kind: input, shape index: {}]   ;;  %s10137_s9 = inlined_call_operand.vmem [shape: bf16[2,2,8], index: 9, kind: input, shape index: {}]   ;;  %s10138_s10 = inlined_call_operand.vmem [shape: f32[2,1,8], index: 10, kind: input, shape index: {}]   ;;  %s10139_s11 = inlined_call_operand.vmem [shape: bf16[72,8], index: 11, kind: input, shape index: {}]   ;;  %s10140_s12 = inlined_call_operand.vmem [shape: f32[1,8], index: 12, kind: input, shape index: {}]   ;;  %s10141_s13 = inlined_call_operand.vmem [shape: f32[2,256,8], index: 13, kind: output, shape index: {}]  }
   0x1   :  { %10235 = sst [smem:[#allocation86_spill]] %s10128_s0  ;;  %s6175_s27 = smov 0  }
   0x2   :  { %10236 = sst [smem:[#allocation87_spill]] %s10131_s3  ;;  %s6177_s28 = smov 0  }
   0x3   :  { %10237 = sst [smem:[#allocation88_spill]] %s10133_s5  ;;  %s6179_s29 = smov 0  }
   0x4   :  { %10238 = sst [smem:[#allocation89_spill]] %s10139_s11 }
   0x5   :  { %10239 = sst [smem:[#allocation90_spill]] %s10140_s12 }
   0x6 LB: > { %10240 = sst [smem:[#allocation5_spill]] %s6071_s27  ;;  %s32_s30 = sadd.s32 1, %s6071_s27  ;;  %s6079_s29 = sphi %s6179_s29, %s23_s29   ;;  %s6075_s28 = sphi %s6177_s28, %s10482_s28   ;;  %s6071_s27 = sphi %s6175_s27, %s10481_s27   ;;  %s6067_s26 = sphi %s6173_s26, %s10480_s26   ;;  %s6063_s25 = sphi %s6171_s25, %s10479_s25  }
   0x7   : > { %10241 = sst [smem:[#allocation6_spill]] %s6075_s28  ;;  %s35_s14 = sadd.s32 1, %s6075_s28 }
   0x8   : > { %10242 = sst [smem:[#allocation7_spill]] %s6079_s29  ;;  %p33_p0 = scmp.ge.s32.totalorder %s32_s30, 2 }
   0x9   : > { %p5625_p1 = scmp.ge.s32.totalorder %s6079_s29, 1  ;;  %p468_p2 = scmp.lt.s32.totalorder %s6079_s29, 5 }
   0xa   : > { %s10484_s30 = smov (%p33_p0, %s32_s30), 0  ;;  %s10486_s14 = smov (!%p33_p0, %s35_s14), %s6075_s28 }
   0xb   : > { %10243 = sst [smem:[#allocation8_spill]] %s10484_s30  ;;  %p469_p3 = pnand %p5625_p1, %p468_p2 }
   0xc   : > { %p37_p4 = scmp.ge.s32.totalorder %s10486_s14, 2 }
   0xd   : > { %472 = sbr.rel (%p469_p3) target bundleno = 2354 (0x932), region = 72 }
   0xe   : > { %s10488_s14 = smov (%p37_p4, %s10486_s14), 0 }
   0xf   : > { %10244 = sst [smem:[#allocation9_spill]] %s10488_s14 }
  0x14   : > { %p541_p5 = scmp.lt.s32.totalorder %s6067_s26, 1  ;;  %p546_p6 = scmp.lt.s32.totalorder %s6063_s25, 1 }
  0x15   : > { %s10245_s0 = sld [smem:[#allocation86_spill]]  ;;  %s10246_s3 = sld [smem:[#allocation87_spill]] }
  0x16   : > { %s10490_s26 = smov (!%p541_p5, %s6067_s26), 1  ;;  %s10247_s5 = sld [smem:[#allocation88_spill]] }
  0x17   : > { %s6205_s15 = scalar_select %p546_p6, %s6063_s25, 1 }
  0x18   : > { %s5706_s16 = sshll.u32 %s10490_s26, 8  ;;  %p5633_p7 = scmp.ne.s32.totalorder %s6063_s25, 0 }
  0x19   : > { %s5927_s20 = smul.u32 36, %s6205_s15  ;;  %s5630_s18 = sshll.u32 %s6205_s15, 2  ;;  %vm585_vm0 = vcmask (!%p5633_p7), 64512   ;;  %v6081_v3 = vmov (!%p5633_p7), 0  }
  0x1a   : > { %s568_s21 = scalar_lea.vmem %s10136_s8, %s6205_s15  ;;  %s6239_s14 = scalar_lea.vmem %s10135_s7, %s5630_s18  ;;  %586 = vst.msk [vmem:[#allocation3] sm:$0xff] (!%p5633_p7), %vm585_vm0, %v6081_v3  ;;  %587 = vst.msk [vmem:[#allocation3 + $0x8] sm:$0xff] (!%p5633_p7), %vm585_vm0, %v6081_v3 }
  0x1b   : > { %s6210_s19 = scalar_lea.vmem %s10245_s0, %s5706_s16  ;;  %s6224_s29 = scalar_lea.vmem %s10246_s3, %s5927_s20  ;;  %588 = vst.msk [vmem:[#allocation3 + $0x10] sm:$0xff] (!%p5633_p7), %vm585_vm0, %v6081_v3  ;;  %589 = vst.msk [vmem:[#allocation3 + $0x18] sm:$0xff] (!%p5633_p7), %vm585_vm0, %v6081_v3 }
  0x1c   : > { %s6229_s17 = scalar_lea.vmem %s10247_s5, %s5927_s20  ;;  %s571_s27 = scalar_lea.vmem %s10137_s9, %s6205_s15  ;;  %v604_v0 = vld [vmem:[%s6210_s19] sm:$0xff] (!%p5633_p7)  ;;  %v605_v1 = vld [vmem:[%s6210_s19 + $0x8] sm:$0xff] (!%p5633_p7)  ;;  %v606_v2 = vld [vmem:[%s6210_s19 + $0x10] sm:$0xff] (!%p5633_p7)  ;;  %590 = vst.msk [vmem:[#allocation3 + $0x20] sm:$0xff] (!%p5633_p7), %vm585_vm0, %v6081_v3 }
  0x1d   : > { %s574_s12 = scalar_lea.vmem %s10138_s10, %s6205_s15  ;;  %s6252_s5 = scalar_lea.vmem %s10141_s13, %s5706_s16  ;;  %591 = vst.msk [vmem:[#allocation3 + $0x28] sm:$0xff] (!%p5633_p7), %vm585_vm0, %v6081_v3  ;;  %592 = vst.msk [vmem:[#allocation3 + $0x30] sm:$0xff] (!%p5633_p7), %vm585_vm0, %v6081_v3  ;;  %v607_v4 = vld [vmem:[%s6210_s19 + $0x18] sm:$0xff] (!%p5633_p7)  ;;  %v608_v5 = vld [vmem:[%s6210_s19 + $0x20] sm:$0xff] (!%p5633_p7) }
  0x1e   : > { %584 = sbr.rel (%p5633_p7) target bundleno = 52 (0x34), region = 76  ;;  %593 = vst.msk [vmem:[#allocation3 + $0x38] sm:$0xff] (!%p5633_p7), %vm585_vm0, %v6081_v3  ;;  %594 = vst.msk [vmem:[#allocation3 + $0x40] sm:$0xff] (!%p5633_p7), %vm585_vm0, %v6081_v3  ;;  %v609_v6 = vld [vmem:[%s6210_s19 + $0x28] sm:$0xff] (!%p5633_p7)  ;;  %v610_v7 = vld [vmem:[%s6210_s19 + $0x30] sm:$0xff] (!%p5633_p7) }
  0x1f   : > { %595 = vst.msk [vmem:[#allocation3 + $0x48] sm:$0xff] (!%p5633_p7), %vm585_vm0, %v6081_v3  ;;  %596 = vst.msk [vmem:[#allocation3 + $0x50] sm:$0xff] (!%p5633_p7), %vm585_vm0, %v6081_v3  ;;  %v611_v8 = vld [vmem:[%s6210_s19 + $0x38] sm:$0xff] (!%p5633_p7)  ;;  %v612_v9 = vld [vmem:[%s6210_s19 + $0x40] sm:$0xff] (!%p5633_p7) }
  0x20   : > { %597 = vst.msk [vmem:[#allocation3 + $0x58] sm:$0xff] (!%p5633_p7), %vm585_vm0, %v6081_v3  ;;  %598 = vst.msk [vmem:[#allocation3 + $0x60] sm:$0xff] (!%p5633_p7), %vm585_vm0, %v6081_v3  ;;  %v613_v10 = vld [vmem:[%s6210_s19 + $0x48] sm:$0xff] (!%p5633_p7)  ;;  %v614_v11 = vld [vmem:[%s6210_s19 + $0x50] sm:$0xff] (!%p5633_p7) }
  0x21   : > { %599 = vst.msk [vmem:[#allocation3 + $0x68] sm:$0xff] (!%p5633_p7), %vm585_vm0, %v6081_v3  ;;  %600 = vst.msk [vmem:[#allocation3 + $0x70] sm:$0xff] (!%p5633_p7), %vm585_vm0, %v6081_v3  ;;  %v615_v12 = vld [vmem:[%s6210_s19 + $0x58] sm:$0xff] (!%p5633_p7)  ;;  %v616_v13 = vld [vmem:[%s6210_s19 + $0x60] sm:$0xff] (!%p5633_p7) }
  0x22   : > { %601 = vst.msk [vmem:[#allocation3 + $0x78] sm:$0xff] (!%p5633_p7), %vm585_vm0, %v6081_v3  ;;  %602 = vst.msk [vmem:[#allocation3 + $0x80] sm:$0xff] (!%p5633_p7), %vm585_vm0, %v6081_v3  ;;  %v617_v14 = vld [vmem:[%s6210_s19 + $0x68] sm:$0xff] (!%p5633_p7)  ;;  %v618_v15 = vld [vmem:[%s6210_s19 + $0x70] sm:$0xff] (!%p5633_p7) }
  0x23   : > { %603 = vst.msk [vmem:[#allocation3 + $0x88] sm:$0xff] (!%p5633_p7), %vm585_vm0, %v6081_v3  ;;  %636 = vst.msk [vmem:[#allocation2] sm:$0xff] (!%p5633_p7), %vm585_vm0, %v604_v0  ;;  %v619_v16 = vld [vmem:[%s6210_s19 + $0x78] sm:$0xff] (!%p5633_p7)  ;;  %v620_v17 = vld [vmem:[%s6210_s19 + $0x80] sm:$0xff] (!%p5633_p7) }
  0x24   : > { %637 = vst.msk [vmem:[#allocation2 + $0x8] sm:$0xff] (!%p5633_p7), %vm585_vm0, %v605_v1  ;;  %638 = vst.msk [vmem:[#allocation2 + $0x10] sm:$0xff] (!%p5633_p7), %vm585_vm0, %v606_v2  ;;  %v621_v18 = vld [vmem:[%s6210_s19 + $0x88] sm:$0xff] (!%p5633_p7)  ;;  %v622_v19 = vld [vmem:[%s6210_s19 + $0x90] sm:$0xff] (!%p5633_p7) }
  0x25   : > { %639 = vst.msk [vmem:[#allocation2 + $0x18] sm:$0xff] %vm585_vm0, %v607_v4  ;;  %640 = vst.msk [vmem:[#allocation2 + $0x20] sm:$0xff] %vm585_vm0, %v608_v5  ;;  %v623_v20 = vld [vmem:[%s6210_s19 + $0x98] sm:$0xff]  ;;  %v624_v21 = vld [vmem:[%s6210_s19 + $0xa0] sm:$0xff] }
  0x26   : > { %641 = vst.msk [vmem:[#allocation2 + $0x28] sm:$0xff] %vm585_vm0, %v609_v6  ;;  %642 = vst.msk [vmem:[#allocation2 + $0x30] sm:$0xff] %vm585_vm0, %v610_v7  ;;  %v625_v22 = vld [vmem:[%s6210_s19 + $0xa8] sm:$0xff]  ;;  %v626_v23 = vld [vmem:[%s6210_s19 + $0xb0] sm:$0xff] }
  0x27   : > { %643 = vst.msk [vmem:[#allocation2 + $0x38] sm:$0xff] %vm585_vm0, %v611_v8  ;;  %644 = vst.msk [vmem:[#allocation2 + $0x40] sm:$0xff] %vm585_vm0, %v612_v9  ;;  %v627_v24 = vld [vmem:[%s6210_s19 + $0xb8] sm:$0xff]  ;;  %v628_v25 = vld [vmem:[%s6210_s19 + $0xc0] sm:$0xff] }
  0x28   : > { %645 = vst.msk [vmem:[#allocation2 + $0x48] sm:$0xff] %vm585_vm0, %v613_v10  ;;  %646 = vst.msk [vmem:[#allocation2 + $0x50] sm:$0xff] %vm585_vm0, %v614_v11  ;;  %v629_v26 = vld [vmem:[%s6210_s19 + $0xc8] sm:$0xff]  ;;  %v630_v27 = vld [vmem:[%s6210_s19 + $0xd0] sm:$0xff] }
  0x29   : > { %647 = vst.msk [vmem:[#allocation2 + $0x58] sm:$0xff] %vm585_vm0, %v615_v12  ;;  %648 = vst.msk [vmem:[#allocation2 + $0x60] sm:$0xff] %vm585_vm0, %v616_v13  ;;  %v631_v28 = vld [vmem:[%s6210_s19 + $0xd8] sm:$0xff]  ;;  %v632_v29 = vld [vmem:[%s6210_s19 + $0xe0] sm:$0xff] }
  0x2a   : > { %649 = vst.msk [vmem:[#allocation2 + $0x68] sm:$0xff] %vm585_vm0, %v617_v14  ;;  %650 = vst.msk [vmem:[#allocation2 + $0x70] sm:$0xff] %vm585_vm0, %v618_v15  ;;  %v633_v30 = vld [vmem:[%s6210_s19 + $0xe8] sm:$0xff]  ;;  %v634_v31 = vld [vmem:[%s6210_s19 + $0xf0] sm:$0xff] }
  0x2b   : > { %651 = vst.msk [vmem:[#allocation2 + $0x78] sm:$0xff] %vm585_vm0, %v619_v16  ;;  %652 = vst.msk [vmem:[#allocation2 + $0x80] sm:$0xff] %vm585_vm0, %v620_v17  ;;  %v635_v32 = vld [vmem:[%s6210_s19 + $0xf8] sm:$0xff] }
  0x2c   : > { %653 = vst.msk [vmem:[#allocation2 + $0x88] sm:$0xff] %vm585_vm0, %v621_v18  ;;  %654 = vst.msk [vmem:[#allocation2 + $0x90] sm:$0xff] %vm585_vm0, %v622_v19 }
  0x2d   : > { %655 = vst.msk [vmem:[#allocation2 + $0x98] sm:$0xff] %vm585_vm0, %v623_v20  ;;  %656 = vst.msk [vmem:[#allocation2 + $0xa0] sm:$0xff] %vm585_vm0, %v624_v21 }
  0x2e   : > { %657 = vst.msk [vmem:[#allocation2 + $0xa8] sm:$0xff] %vm585_vm0, %v625_v22  ;;  %658 = vst.msk [vmem:[#allocation2 + $0xb0] sm:$0xff] %vm585_vm0, %v626_v23 }
  0x2f   : > { %659 = vst.msk [vmem:[#allocation2 + $0xb8] sm:$0xff] %vm585_vm0, %v627_v24  ;;  %660 = vst.msk [vmem:[#allocation2 + $0xc0] sm:$0xff] %vm585_vm0, %v628_v25 }
  0x30   : > { %661 = vst.msk [vmem:[#allocation2 + $0xc8] sm:$0xff] %vm585_vm0, %v629_v26  ;;  %662 = vst.msk [vmem:[#allocation2 + $0xd0] sm:$0xff] %vm585_vm0, %v630_v27 }
  0x31   : > { %663 = vst.msk [vmem:[#allocation2 + $0xd8] sm:$0xff] %vm585_vm0, %v631_v28  ;;  %664 = vst.msk [vmem:[#allocation2 + $0xe0] sm:$0xff] %vm585_vm0, %v632_v29 }
  0x32   : > { %665 = vst.msk [vmem:[#allocation2 + $0xe8] sm:$0xff] %vm585_vm0, %v633_v30  ;;  %666 = vst.msk [vmem:[#allocation2 + $0xf0] sm:$0xff] %vm585_vm0, %v634_v31 }
  0x33   : > { %667 = vst.msk [vmem:[#allocation2 + $0xf8] sm:$0xff] %vm585_vm0, %v635_v32 }
  0x34 PF: > { %v670_v33 = vld [vmem:[%s10129_s1 + $0x10] sm:$0xff]  ;;  %v668_v34 = vld [vmem:[%s10129_s1] sm:$0xff]  ;;  %v6082_v35 = vmov 0   ;;  %v671_v36 = vld [vmem:[%s10129_s1 + $0x18] sm:$0xff]  ;;  %vm1199_vm1 = vcmask 64512   ;;  %v1116_v31 = vlaneseq  ;;  %s6083_s24 = smov 32   ;;  %s10308_s23 = scalar_lea.vmem %s10132_s4, %s6205_s15 }
  0x35   : > { %5989 = vset.pattern.permute.xlu1 %v6082_v35  ;;  %5988 = vset.pattern.permute.xlu0 %v6082_v35  ;;  %v669_v37 = vld [vmem:[%s10129_s1 + $0x8] sm:$0xff]  ;;  %v672_v39 = vld [vmem:[%s10129_s1 + $0x20] sm:$0xff]  ;;  %v675_v40 = vld [vmem:[%s10129_s1 + $0x38] sm:$0xff]  ;;  %s6084_s28 = smov 8   ;;  %s6085_s20 = smov 24   ;;  %vm2245_vm4 = vcmask 1043456  }
  0x36   : > { %712 = vperm.xlu1 %5989, %v670_v33   ;;  %702 = vperm.xlu0 %5988, %v668_v34   ;;  %v673_v38 = vld [vmem:[%s10129_s1 + $0x28] sm:$0xff]  ;;  %v674_v41 = vld [vmem:[%s10129_s1 + $0x30] sm:$0xff]  ;;  %v676_v43 = vld [vmem:[%s10129_s1 + $0x40] sm:$0xff]  ;;  %s6086_s26 = smov 48   ;;  %s6087_s0 = smov 16   ;;  %vm1312_vm5 = vcmask 261312  }
  0x37   : > { %v677_v42 = vld [vmem:[%s10129_s1 + $0x48] sm:$0xff]  ;;  %v860_v45 = vld [vmem:[%s10130_s2] sm:$0xff]  ;;  %v679_v46 = vld [vmem:[%s10129_s1 + $0x58] sm:$0xff]  ;;  %s6088_s3 = smov 56   ;;  %s6089_s11 = smov 40   ;;  %vm1409_vm6 = vcmask 458112  }
  0x38   : > { %v861_v44 = vld [vmem:[%s10130_s2 + $0x8] sm:$0xff]  ;;  %v678_v47 = vld [vmem:[%s10129_s1 + $0x50] sm:$0xff]  ;;  %v6379_v48 = vld [vmem:[#allocation3] sm:$0xff]  ;;  %vm1538_vm7 = vcmask 130112   ;;  %vm1619_vm8 = vcmask 326912   ;;  %vm1716_vm9 = vcmask 523712  }
  0x39   : > { %1232 = vst.msk [vmem:[#allocation4] sm:$0xff] %vm1199_vm1, %v6379_v48  ;;  %v863_v49 = vld [vmem:[%s10130_s2 + $0x18] sm:$0xff]  ;;  %v862_v50 = vld [vmem:[%s10130_s2 + $0x10] sm:$0xff]  ;;  %v681_v51 = vld [vmem:[%s10129_s1 + $0x68] sm:$0xff]  ;;  %vm1942_vm10 = vcmask 195712   ;;  %vm2023_vm11 = vcmask 392512  }
  0x3a   : > { %717 = vperm.xlu1 %5989, %v671_v36   ;;  %707 = vperm.xlu0 %5988, %v669_v37   ;;  %v680_v52 = vld [vmem:[%s10129_s1 + $0x60] sm:$0xff]  ;;  %v865_v53 = vld [vmem:[%s10130_s2 + $0x28] sm:$0xff]  ;;  %v683_v55 = vld [vmem:[%s10129_s1 + $0x78] sm:$0xff]  ;;  %v6533_v36 = vshrl.u32 %v1116_v31, 7  ;;  %vm2120_vm12 = vcmask 589312   ;;  %vm2196_vm13 = vcmask 588800  }
  0x3b   : > { %v864_v54 = vld [vmem:[%s10130_s2 + $0x20] sm:$0xff]  ;;  %v682_v56 = vld [vmem:[%s10129_s1 + $0x70] sm:$0xff]  ;;  %v867_v57 = vld [vmem:[%s10130_s2 + $0x38] sm:$0xff]  ;;  %vm6092_vm14 = vmmov 0   ;;  %vm3881_vm15 = vcmask 1040384   ;;  %vm3877_vm0 = vcmask 15360  }
  0x3c   : > { %v866_v58 = vld [vmem:[%s10130_s2 + $0x30] sm:$0xff]  ;;  %v685_v59 = vld [vmem:[%s10129_s1 + $0x88] sm:$0xff]  ;;  %v684_v60 = vld [vmem:[%s10129_s1 + $0x80] sm:$0xff]  ;;  %vm1118_vm2 = vcmp.lt.s32.totalorder %v6533_v36, 1  ;;  %vm1765_vm3 = vcmp.lt.s32.totalorder %v6533_v36, 7  ;;  %p5681_p8 = scmp.ne.s32.totalorder %s6063_s25, 1 }
  0x3d   : > { %v869_v61 = vld [vmem:[%s10130_s2 + $0x48] sm:$0xff]  ;;  %v868_v62 = vld [vmem:[%s10130_s2 + $0x40] sm:$0xff]  ;;  %v687_v63 = vld [vmem:[%s10129_s1 + $0x98] sm:$0xff] }
  0x3e   : > { %727 = vperm.xlu1 %5989, %v673_v38   ;;  %722 = vperm.xlu0 %5988, %v672_v39   ;;  %v686_v0 = vld [vmem:[%s10129_s1 + $0x90] sm:$0xff]  ;;  %v871_v1 = vld [vmem:[%s10130_s2 + $0x58] sm:$0xff]  ;;  %v689_v3 = vld [vmem:[%s10129_s1 + $0xa8] sm:$0xff] }
  0x3f   : > { %v870_v2 = vld [vmem:[%s10130_s2 + $0x50] sm:$0xff]  ;;  %v688_v4 = vld [vmem:[%s10129_s1 + $0xa0] sm:$0xff]  ;;  %v873_v5 = vld [vmem:[%s10130_s2 + $0x68] sm:$0xff] }
  0x40   : > { %v872_v6 = vld [vmem:[%s10130_s2 + $0x60] sm:$0xff]  ;;  %v691_v7 = vld [vmem:[%s10129_s1 + $0xb8] sm:$0xff]  ;;  %v690_v8 = vld [vmem:[%s10129_s1 + $0xb0] sm:$0xff] }
  0x41   : > { %v875_v9 = vld [vmem:[%s10130_s2 + $0x78] sm:$0xff]  ;;  %v874_v10 = vld [vmem:[%s10130_s2 + $0x70] sm:$0xff]  ;;  %v693_v11 = vld [vmem:[%s10129_s1 + $0xc8] sm:$0xff] }
  0x42   : > { %737 = vperm.xlu1 %5989, %v675_v40   ;;  %732 = vperm.xlu0 %5988, %v674_v41   ;;  %v692_v12 = vld [vmem:[%s10129_s1 + $0xc0] sm:$0xff]  ;;  %v877_v13 = vld [vmem:[%s10130_s2 + $0x88] sm:$0xff]  ;;  %v695_v15 = vld [vmem:[%s10129_s1 + $0xd8] sm:$0xff] }
  0x43   : > { %v876_v14 = vld [vmem:[%s10130_s2 + $0x80] sm:$0xff]  ;;  %v694_v16 = vld [vmem:[%s10129_s1 + $0xd0] sm:$0xff]  ;;  %v879_v17 = vld [vmem:[%s10130_s2 + $0x98] sm:$0xff] }
  0x44   : > { %v878_v18 = vld [vmem:[%s10130_s2 + $0x90] sm:$0xff]  ;;  %v697_v19 = vld [vmem:[%s10129_s1 + $0xe8] sm:$0xff]  ;;  %v696_v20 = vld [vmem:[%s10129_s1 + $0xe0] sm:$0xff] }
  0x45   : > { %v881_v21 = vld [vmem:[%s10130_s2 + $0xa8] sm:$0xff]  ;;  %v880_v22 = vld [vmem:[%s10130_s2 + $0xa0] sm:$0xff]  ;;  %v699_v23 = vld [vmem:[%s10129_s1 + $0xf8] sm:$0xff] }
  0x46   : > { %747 = vperm.xlu1 %5989, %v677_v42   ;;  %742 = vperm.xlu0 %5988, %v676_v43   ;;  %v698_v24 = vld [vmem:[%s10129_s1 + $0xf0] sm:$0xff]  ;;  %v883_v25 = vld [vmem:[%s10130_s2 + $0xb8] sm:$0xff]  ;;  %v885_v27 = vld [vmem:[%s10130_s2 + $0xc8] sm:$0xff] }
  0x47   : > { %v882_v26 = vld [vmem:[%s10130_s2 + $0xb0] sm:$0xff]  ;;  %v884_v28 = vld [vmem:[%s10130_s2 + $0xc0] sm:$0xff]  ;;  %v887_v29 = vld [vmem:[%s10130_s2 + $0xd8] sm:$0xff] }
  0x48   : > { %v886_v30 = vld [vmem:[%s10130_s2 + $0xd0] sm:$0xff]  ;;  %v889_v32 = vld [vmem:[%s10130_s2 + $0xe8] sm:$0xff]  ;;  %v888_v33 = vld [vmem:[%s10130_s2 + $0xe0] sm:$0xff] }
  0x49   : > { %v891_v34 = vld [vmem:[%s10130_s2 + $0xf8] sm:$0xff]  ;;  %v890_v35 = vld [vmem:[%s10130_s2 + $0xf0] sm:$0xff]  ;;  %v6535_v37 = vld [vmem:[#allocation2 + $0x8] sm:$0xff] }
  0x4a   : > { %899 = vperm.xlu1 %5989, %v861_v44   ;;  %894 = vperm.xlu0 %5988, %v860_v45   ;;  %v6537_v38 = vld [vmem:[#allocation2 + $0x10] sm:$0xff]  ;;  %v6539_v39 = vld [vmem:[#allocation2 + $0x18] sm:$0xff]  ;;  %v6541_v40 = vld [vmem:[#allocation2] sm:$0xff]  ;;  %v1085_v42 = vrot.slane %v6535_v37, 7 }
  0x4b   : > { %v6543_v41 = vld [vmem:[#allocation2 + $0xf8] sm:$0xff]  ;;  %v1086_v43 = vrot.slane %v6537_v38, 7  ;;  %v6550_v44 = vpack.c.bf16 %v6539_v39, %v6537_v38  ;;  %v1084_v45 = vrot.slane %v6541_v40, 7 }
  0x4c   : > { %v6640_v31 = vld [vmem:[#allocation2 + $0x58] sm:$0xff] }
  0x4e   : > { %757 = vperm.xlu1 %5989, %v679_v46   ;;  %752 = vperm.xlu0 %5988, %v678_v47   ;;  %v10147_v46 = vrot.slane %v6543_v41, 7  ;;  %v1087_v47 = vrot.slane %v6539_v39, 7 }
  0x52   : > { %909 = vperm.xlu1 %5989, %v863_v49   ;;  %904 = vperm.xlu0 %5988, %v862_v50   ;;  %v6555_v49 = vld [vmem:[#allocation2 + $0x20] sm:$0xff]  ;;  %v6557_v50 = vld [vmem:[#allocation2 + $0x28] sm:$0xff] }
  0x56   : > { %767 = vperm.xlu1 %5989, %v681_v51   ;;  %762 = vperm.xlu0 %5988, %v680_v52  }
  0x5a   : > { %919 = vperm.xlu1 %5989, %v865_v53   ;;  %914 = vperm.xlu0 %5988, %v864_v54   ;;  %v1148_v53 = vsel %vm1118_vm2, %v1085_v42, %v1086_v43  ;;  %v1088_v54 = vrot.slane %v6555_v49, 7 }
  0x5e   : > { %777 = vperm.xlu1 %5989, %v683_v55   ;;  %772 = vperm.xlu0 %5988, %v682_v56   ;;  %v1150_v55 = vsel %vm1118_vm2, %v10147_v46, %v1084_v45  ;;  %v1147_v56 = vsel %vm1118_vm2, %v1086_v43, %v1087_v47  ;;  %v6658_v43 = vpack.c.bf16 %v6557_v50, %v6555_v49 }
  0x62   : > { %929 = vperm.xlu1 %5989, %v867_v57   ;;  %924 = vperm.xlu0 %5988, %v866_v58   ;;  %v1149_v57 = vsel %vm1118_vm2, %v1084_v45, %v1085_v42  ;;  %v1089_v58 = vrot.slane %v6557_v50, 7 }
  0x66   : > { %787 = vperm.xlu1 %5989, %v685_v59   ;;  %782 = vperm.xlu0 %5988, %v684_v60   ;;  %v6579_v59 = vld [vmem:[#allocation2 + $0x30] sm:$0xff]  ;;  %v6581_v60 = vld [vmem:[#allocation2 + $0x38] sm:$0xff] }
  0x6a   : > { %939 = vperm.xlu1 %5989, %v869_v61   ;;  %934 = vperm.xlu0 %5988, %v868_v62  }
  0x6e   : > { %797 = vperm.xlu1 %5989, %v687_v63   ;;  %792 = vperm.xlu0 %5988, %v686_v0  }
  0x72   : > { %949 = vperm.xlu1 %5989, %v871_v1   ;;  %944 = vperm.xlu0 %5988, %v870_v2  }
  0x76   : > { %807 = vperm.xlu1 %5989, %v689_v3   ;;  %802 = vperm.xlu0 %5988, %v688_v4   ;;  %v1145_v3 = vsel %vm1118_vm2, %v1088_v54, %v1089_v58  ;;  %v1146_v4 = vsel %vm1118_vm2, %v1087_v47, %v1088_v54 }
  0x7a   : > { %959 = vperm.xlu1 %5989, %v873_v5   ;;  %954 = vperm.xlu0 %5988, %v872_v6   ;;  %v1090_v5 = vrot.slane %v6579_v59, 7  ;;  %v1091_v6 = vrot.slane %v6581_v60, 7 }
  0x7e   : > { %817 = vperm.xlu1 %5989, %v691_v7   ;;  %812 = vperm.xlu0 %5988, %v690_v8  }
  0x82   : > { %969 = vperm.xlu1 %5989, %v875_v9   ;;  %964 = vperm.xlu0 %5988, %v874_v10   ;;  %v6597_v9 = vld [vmem:[#allocation2 + $0x40] sm:$0xff]  ;;  %v6599_v10 = vld [vmem:[#allocation2 + $0x48] sm:$0xff] }
  0x86   : > { %827 = vperm.xlu1 %5989, %v693_v11   ;;  %822 = vperm.xlu0 %5988, %v692_v12  }
  0x8a   : > { %979 = vperm.xlu1 %5989, %v877_v13   ;;  %974 = vperm.xlu0 %5988, %v876_v14  }
  0x8e   : > { %837 = vperm.xlu1 %5989, %v695_v15   ;;  %832 = vperm.xlu0 %5988, %v694_v16   ;;  %v1426_v15 = vpack.c.bf16 %v6535_v37, %v6541_v40  ;;  %v1143_v16 = vsel %vm1118_vm2, %v1090_v5, %v1091_v6 }
  0x92   : > { %989 = vperm.xlu1 %5989, %v879_v17   ;;  %984 = vperm.xlu0 %5988, %v878_v18   ;;  %v1144_v17 = vsel %vm1118_vm2, %v1089_v58, %v1090_v5  ;;  %v1092_v18 = vrot.slane %v6597_v9, 7 }
  0x96   : > { %847 = vperm.xlu1 %5989, %v697_v19   ;;  %842 = vperm.xlu0 %5988, %v696_v20   ;;  %v1093_v19 = vrot.slane %v6599_v10, 7 }
  0x9a   : > { %999 = vperm.xlu1 %5989, %v881_v21   ;;  %994 = vperm.xlu0 %5988, %v880_v22  }
  0x9e   : > { %857 = vperm.xlu1 %5989, %v699_v23   ;;  %852 = vperm.xlu0 %5988, %v698_v24  }
  0xa2   : > { %1009 = vperm.xlu1 %5989, %v883_v25   ;;  %1004 = vperm.xlu0 %5988, %v882_v26   ;;  %v1734_v25 = vrot.slane %v6535_v37, 1  ;;  %v1141_v26 = vsel %vm1118_vm2, %v1092_v18, %v1093_v19 }
  0xa6   : > { %1019 = vperm.xlu1 %5989, %v885_v27   ;;  %1014 = vperm.xlu0 %5988, %v884_v28   ;;  %v1142_v27 = vsel %vm1118_vm2, %v1091_v6, %v1092_v18  ;;  %v1735_v28 = vrot.slane %v6537_v38, 1  ;;  %v6697_v6 = vld [vmem:[#allocation2 + $0x60] sm:$0xff] }
  0xa8   : > { %v1795_v45 = vsel %vm1765_vm3, %v1734_v25, %v1735_v28 }
  0xaa   : > { %1029 = vperm.xlu1 %5989, %v887_v29   ;;  %1024 = vperm.xlu0 %5988, %v886_v30   ;;  %v10146_v29 = vrot.slane %v6541_v40, 1  ;;  %v6638_v30 = vld [vmem:[#allocation2 + $0x50] sm:$0xff] }
  0xab   : > { %v1094_v47 = vrot.slane %v6638_v30, 7 }
  0xae   : > { %1039 = vperm.xlu1 %5989, %v889_v32   ;;  %1034 = vperm.xlu0 %5988, %v888_v33  }
  0xb2   : > { %1049 = vperm.xlu1 %5989, %v891_v34   ;;  %1044 = vperm.xlu0 %5988, %v890_v35  }
  0xb5   : > { %v6559_v51 = vpop.permute.xlu1 %712  ;;  %v6561_v52 = vpop.permute.xlu0 %702 }
  0xb6   : > { %10248 = vst [vmem:[#allocation10_spill] sm:$0xff] %v6559_v51  ;;  %10249 = vst [vmem:[#allocation11_spill] sm:$0xff] %v6561_v52  ;;  %1573 = vrot.lane.b32.xlu1 %v6550_v44, %s6083_s24  ;;  %1490 = vrot.lane.b32.xlu0 %v6379_v48, %s6084_s28  ;;  %v1153_v63 = vmul.f32 %v1148_v53, %v6559_v51  ;;  %v1151_v0 = vmul.f32 %v1150_v55, %v6561_v52  ;;  %v1095_v53 = vrot.slane %v6640_v31, 7 }
  0xb9   : > { %v6583_v61 = vpop.permute.xlu1 %717  ;;  %v6585_v62 = vpop.permute.xlu0 %707 }
  0xba   : > { %10250 = vst [vmem:[#allocation12_spill] sm:$0xff] %v6583_v61  ;;  %10251 = vst [vmem:[#allocation13_spill] sm:$0xff] %v6585_v62  ;;  %v1154_v1 = vmul.f32 %v1147_v56, %v6583_v61  ;;  %v1152_v2 = vmul.f32 %v1149_v57, %v6585_v62 }
  0xbc   : > { %v1184_v7 = vpack.c.bf16 %v1154_v1, %v1153_v63  ;;  %v1183_v8 = vpack.c.bf16 %v1152_v2, %v1151_v0  ;;  %v6688_v0 = vpack.c.bf16 %v6581_v60, %v6579_v59  ;;  %v1139_v1 = vsel %vm1118_vm2, %v1094_v47, %v1095_v53 }
  0xbd   : > { %v6601_v11 = vpop.permute.xlu1 %727  ;;  %v6603_v12 = vpop.permute.xlu0 %722  ;;  %v1140_v2 = vsel %vm1118_vm2, %v1093_v19, %v1094_v47  ;;  %v1739_v47 = vrot.slane %v6579_v59, 1 }
  0xbe   : > { %10252 = vst [vmem:[#allocation14_spill] sm:$0xff] %v6601_v11  ;;  %10253 = vst [vmem:[#allocation15_spill] sm:$0xff] %v6603_v12  ;;  %v1156_v13 = vmul.f32 %v1145_v3, %v6601_v11  ;;  %v1155_v14 = vmul.f32 %v1146_v4, %v6603_v12  ;;  %1266 = vrot.lane.b32.xlu1 %v1184_v7, %s6085_s20  ;;  %1264 = vrot.lane.b32.xlu0 %v1183_v8, %s6085_s20  ;;  %v1736_v3 = vrot.slane %v6539_v39, 1  ;;  %v5990_v4 = vld [vmem:[%s6224_s29] sm:$0xff]  }
  0xbf   : > { %1201 = vst.msk [vmem:[#allocation3 + $0x10] sm:$0xff] %vm1199_vm1, %v1184_v7  ;;  %1200 = vst.msk [vmem:[#allocation3 + $0x8] sm:$0xff] %vm1199_vm1, %v1183_v8  ;;  %v6699_v7 = vld [vmem:[#allocation2 + $0x68] sm:$0xff]  ;;  %5775 = vmatprep.subr.bf16.mxu0 %v5990_v4 }
  0xc0   : > { %v6619_v20 = vpack.c.bf16 %v1156_v13, %v1155_v14  ;;  %v1794_v19 = vsel %vm1765_vm3, %v1735_v28, %v1736_v3  ;;  %5776 = vmatpush3.bf16.msra.mxu0 %v5990_v4 }
  0xc1   : > { %v6621_v21 = vpop.permute.xlu1 %737  ;;  %v6623_v22 = vpop.permute.xlu0 %732 }
  0xc2   : > { %10254 = vst [vmem:[#allocation16_spill] sm:$0xff] %v6621_v21  ;;  %10255 = vst [vmem:[#allocation17_spill] sm:$0xff] %v6623_v22  ;;  %v1158_v23 = vmul.f32 %v1143_v16, %v6621_v21  ;;  %v1157_v24 = vmul.f32 %v1144_v17, %v6623_v22  ;;  %1571 = vrot.lane.b32.xlu0 %v1426_v15, %s6083_s24  ;;  %v6717_v17 = vpack.c.bf16 %v6599_v10, %v6597_v9 }
  0xc3   : > { %1202 = vst.msk [vmem:[#allocation3 + $0x18] sm:$0xff] %vm1199_vm1, %v6619_v20 }
  0xc4   : > { %v6642_v32 = vpack.c.bf16 %v1158_v23, %v1157_v24  ;;  %v1096_v23 = vrot.slane %v6697_v6, 7  ;;  %v1097_v24 = vrot.slane %v6699_v7, 7 }
  0xc5   : > { %v6644_v34 = vpop.permute.xlu1 %747  ;;  %v6646_v35 = vpop.permute.xlu0 %742 }
  0xc6   : > { %v1217_v33 = vld [vmem:[#allocation3 + $0x8] sm:$0xff]  ;;  %10256 = vst [vmem:[#allocation18_spill] sm:$0xff] %v6644_v34  ;;  %10257 = vst [vmem:[#allocation19_spill] sm:$0xff] %v6646_v35  ;;  %v1218_v37 = vld [vmem:[#allocation3 + $0x10] sm:$0xff]  ;;  %v1160_v38 = vmul.f32 %v1141_v26, %v6644_v34  ;;  %v1159_v42 = vmul.f32 %v1142_v27, %v6646_v35 }
  0xc7   : > { %1442 = vst.msk [vmem:[#allocation3 + $0x8] sm:$0xff] %vm1199_vm1, %v1426_v15  ;;  %1233 = vst.msk [vmem:[#allocation4 + $0x8] sm:$0xff] %vm1199_vm1, %v1217_v33  ;;  %1361 = vrot.lane.b32.xlu0 %v1218_v37, %s6086_s26 }
  0xc8   : > { %1443 = vst.msk [vmem:[#allocation3 + $0x10] sm:$0xff] %vm1199_vm1, %v6550_v44  ;;  %1234 = vst.msk [vmem:[#allocation4 + $0x10] sm:$0xff] %vm1199_vm1, %v1218_v37  ;;  %v1796_v44 = vsel %vm1765_vm3, %v10146_v29, %v1734_v25  ;;  %v6670_v54 = vpack.c.bf16 %v1160_v38, %v1159_v42  ;;  %v5991_v25 = vld [vmem:[%s6224_s29 + $0x8] sm:$0xff]   ;;  %v1137_v42 = vsel %vm1118_vm2, %v1096_v23, %v1097_v24 }
  0xc9   : > { %1203 = vst.msk [vmem:[#allocation3 + $0x20] sm:$0xff] %vm1199_vm1, %v6642_v32  ;;  %v6672_v55 = vpop.permute.xlu1 %899  ;;  %v6674_v56 = vpop.permute.xlu0 %894  ;;  %5777 = vmatprep.subr.bf16.mxu0 %v5991_v25 }
  0xca   : > { %10258 = vst [vmem:[#allocation20_spill] sm:$0xff] %v6672_v55  ;;  %10259 = vst [vmem:[#allocation21_spill] sm:$0xff] %v6674_v56  ;;  %v1330_v57 = vld [vmem:[#allocation3 + $0x18] sm:$0xff]  ;;  %v1799_v58 = vmul.f32 %v1795_v45, %v6672_v55  ;;  %v1798_v63 = vmul.f32 %v1796_v44, %v6674_v56  ;;  %v1138_v45 = vsel %vm1118_vm2, %v1095_v53, %v1096_v23  ;;  %v1738_v44 = vrot.slane %v6557_v50, 1 }
  0xcb   : > { %1204 = vst.msk [vmem:[#allocation3 + $0x28] sm:$0xff] %vm1199_vm1, %v6670_v54  ;;  %1894 = vrot.lane.b32.xlu0 %v6379_v48, %s6087_s0  ;;  %1363 = vrot.lane.b32.xlu1 %v1330_v57, %s6086_s26  ;;  %1444 = vst.msk [vmem:[#allocation3 + $0x18] sm:$0xff] %vm1199_vm1, %v6658_v43  ;;  %v1737_v48 = vrot.slane %v6555_v49, 1  ;;  %v6768_v50 = vpack.c.bf16 %v6640_v31, %v6638_v30 }
  0xcc   : > { %1235 = vst.msk [vmem:[#allocation4 + $0x18] sm:$0xff] %vm1199_vm1, %v1330_v57  ;;  %v1830_v5 = vpack.c.bf16 %v1799_v58, %v1798_v63  ;;  %5778 = vmatpush3.bf16.msra.mxu0 %v5991_v25  ;;  %v5992_v57 = vld [vmem:[%s6224_s29 + $0x10] sm:$0xff]   ;;  %v1791_v59 = vsel %vm1765_vm3, %v1738_v44, %v1739_v47 }
  0xcd   : > { %v6701_v8 = vpop.permute.xlu1 %757  ;;  %v6703_v13 = vpop.permute.xlu0 %752  ;;  %v1793_v18 = vsel %vm1765_vm3, %v1736_v3, %v1737_v48  ;;  %v6754_v63 = vld [vmem:[#allocation2 + $0x70] sm:$0xff]  ;;  %5779 = vmatprep.subr.bf16.mxu0 %v5992_v57 }
  0xce   : > { %10260 = vst [vmem:[#allocation22_spill] sm:$0xff] %v6701_v8  ;;  %10261 = vst [vmem:[#allocation23_spill] sm:$0xff] %v6703_v13  ;;  %v1459_v15 = vld [vmem:[#allocation3 + $0x8] sm:$0xff]  ;;  %v1162_v39 = vmul.f32 %v1139_v1, %v6701_v8  ;;  %v1161_v49 = vmul.f32 %v1140_v2, %v6703_v13  ;;  %v6756_v1 = vld [vmem:[#allocation2 + $0x78] sm:$0xff] }
  0xcf   : > { %v6705_v14 = vld [vmem:[#allocation3 + $0x10] sm:$0xff]  ;;  %1492 = vrot.lane.b32.xlu1 %v1459_v15, %s6084_s28  ;;  %1846 = vst.msk [vmem:[#allocation3 + $0x8] sm:$0xff] %vm1199_vm1, %v1830_v5 }
  0xd0   : > { %v6707_v16 = vld [vmem:[#allocation3 + $0x20] sm:$0xff]  ;;  %1668 = vrot.lane.b32.xlu0 %v6705_v14, %s6088_s3  ;;  %v6730_v26 = vpack.c.bf16 %v1162_v39, %v1161_v49  ;;  %v1098_v39 = vrot.slane %v6754_v63, 7  ;;  %v1099_v49 = vrot.slane %v6756_v1, 7  ;;  %5780 = vmatpush3.bf16.msra.mxu0 %v5992_v57  ;;  %v1741_v57 = vrot.slane %v6597_v9, 1 }
  0xd1   : > { %1445 = vst.msk [vmem:[#allocation3 + $0x20] sm:$0xff] %vm1199_vm1, %v6688_v0  ;;  %1236 = vst.msk [vmem:[#allocation4 + $0x20] sm:$0xff] %vm1199_vm1, %v6707_v16  ;;  %v6732_v27 = vpop.permute.xlu1 %909  ;;  %v6734_v33 = vpop.permute.xlu0 %904 }
  0xd2   : > { %10262 = vst [vmem:[#allocation24_spill] sm:$0xff] %v6732_v27  ;;  %10263 = vst [vmem:[#allocation25_spill] sm:$0xff] %v6734_v33  ;;  %v6736_v37 = vld [vmem:[#allocation3 + $0x28] sm:$0xff]  ;;  %v1801_v38 = vmul.f32 %v1793_v18, %v6732_v27  ;;  %v1800_v28 = vmul.f32 %v1794_v19, %v6734_v33  ;;  %v6774_v15 = vld [vmem:[#allocation3 + $0x18] sm:$0xff] }
  0xd3   : > { %1446 = vst.msk [vmem:[#allocation3 + $0x28] sm:$0xff] %vm1199_vm1, %v6717_v17  ;;  %1237 = vst.msk [vmem:[#allocation4 + $0x28] sm:$0xff] %vm1199_vm1, %v6736_v37  ;;  %v5993_v18 = vld [vmem:[%s6224_s29 + $0x18] sm:$0xff]  }
  0xd4   : > { %1975 = vrot.lane.b32.xlu0 %v1830_v5, %s6089_s11  ;;  %1205 = vst.msk [vmem:[#allocation3 + $0x30] sm:$0xff] %vm1199_vm1, %v6730_v26  ;;  %v1831_v58 = vpack.c.bf16 %v1801_v38, %v1800_v28  ;;  %v1792_v5 = vsel %vm1765_vm3, %v1737_v48, %v1738_v44  ;;  %5781 = vmatprep.subr.bf16.mxu0 %v5993_v18  ;;  %v1740_v44 = vrot.slane %v6581_v60, 1 }
  0xd5   : > { %v6758_v2 = vpop.permute.xlu1 %767  ;;  %v6760_v3 = vpop.permute.xlu0 %762  ;;  %5782 = vmatpush3.bf16.msra.mxu0 %v5993_v18  ;;  %v6818_v60 = vpack.c.bf16 %v6699_v7, %v6697_v6 }
  0xd6   : > { %10264 = vst [vmem:[#allocation26_spill] sm:$0xff] %v6758_v2  ;;  %10265 = vst [vmem:[#allocation27_spill] sm:$0xff] %v6760_v3  ;;  %v1164_v4 = vmul.f32 %v1137_v42, %v6758_v2  ;;  %v1163_v53 = vmul.f32 %v1138_v45, %v6760_v3  ;;  %1977 = vrot.lane.b32.xlu1 %v1831_v58, %s6089_s11  ;;  %v1135_v42 = vsel %vm1118_vm2, %v1098_v39, %v1099_v49  ;;  %v1863_v62 = vld [vmem:[#allocation3 + $0x8] sm:$0xff] }
  0xd7   : > { %1847 = vst.msk [vmem:[#allocation3 + $0x10] sm:$0xff] %vm1199_vm1, %v1831_v58  ;;  %v1136_v45 = vsel %vm1118_vm2, %v1097_v24, %v1098_v39  ;;  %v1789_v18 = vsel %vm1765_vm3, %v1740_v44, %v1741_v57 }
  0xd8   : > { %v6779_v19 = vpack.c.bf16 %v1164_v4, %v1163_v53  ;;  %v6805_v4 = vld [vmem:[#allocation2 + $0x80] sm:$0xff]  ;;  %v6807_v53 = vld [vmem:[#allocation2 + $0x88] sm:$0xff] }
  0xd9   : > { %v6781_v23 = vpop.permute.xlu1 %919  ;;  %v6783_v25 = vpop.permute.xlu0 %914  ;;  %v6931_v35 = vpack.c.bf16 %v6807_v53, %v6805_v4 }
  0xda   : > { %10266 = vst [vmem:[#allocation28_spill] sm:$0xff] %v6781_v23  ;;  %10267 = vst [vmem:[#allocation29_spill] sm:$0xff] %v6783_v25  ;;  %v1803_v48 = vmul.f32 %v1791_v59, %v6781_v23  ;;  %v1802_v28 = vmul.f32 %v1792_v5, %v6783_v25  ;;  %1670 = vrot.lane.b32.xlu1 %v6774_v15, %s6088_s3  ;;  %v5994_v59 = vld [vmem:[%s6224_s29 + $0x20] ss:$0 sps:$4 sm:$0xff]   ;;  %s6090_s29 = smov 64  }
  0xdb   : > { %v6785_v38 = vld [vmem:[#allocation3 + $0x30] sm:$0xff]  ;;  %1206 = vst.msk [vmem:[#allocation3 + $0x38] sm:$0xff] %vm1199_vm1, %v6779_v19  ;;  %v2247_v39 = vsel %vm2245_vm4, %v5994_v59, 0  ;;  %5923 = vmatprep.subr.msk.bf16.mxu0 %vm2245_vm4, %v5994_v59 }
  0xdc   : > { %1447 = vst.msk [vmem:[#allocation3 + $0x30] sm:$0xff] %vm1199_vm1, %v6768_v50  ;;  %1238 = vst.msk [vmem:[#allocation4 + $0x30] sm:$0xff] %vm1199_vm1, %v6785_v38  ;;  %v6803_v58 = vpack.c.bf16 %v1803_v48, %v1802_v28  ;;  %v1790_v48 = vsel %vm1765_vm3, %v1739_v47, %v1740_v44  ;;  %v1100_v28 = vrot.slane %v6805_v4, 7  ;;  %5784 = vmatpush3.bf16.msra.mxu0 %v2247_v39  ;;  %v1743_v39 = vrot.slane %v6638_v30, 1 }
  0xdd   : > { %v6810_v5 = vpop.permute.xlu1 %777  ;;  %v6812_v29 = vpop.permute.xlu0 %772  ;;  %v6883_v30 = vpack.c.bf16 %v6756_v1, %v6754_v63 }
  0xde   : > { %10268 = vst [vmem:[#allocation30_spill] sm:$0xff] %v6810_v5  ;;  %10269 = vst [vmem:[#allocation31_spill] sm:$0xff] %v6812_v29  ;;  %v6814_v46 = vld [vmem:[#allocation3 + $0x10] sm:$0xff]  ;;  %v1166_v9 = vmul.f32 %v1135_v42, %v6810_v5  ;;  %v1165_v24 = vmul.f32 %v1136_v45, %v6812_v29  ;;  %1268 = vrot.lane.b32.xlu1 %v6619_v20, %s6085_s20  ;;  %v1101_v42 = vrot.slane %v6807_v53, 7 }
  0xdf   : > { %1848 = vst.msk [vmem:[#allocation3 + $0x18] sm:$0xff] %vm1199_vm1, %v6803_v58  ;;  %2072 = vrot.lane.b32.xlu0 %v6814_v46, %s6090_s29 }
  0xe0   : > { %v6836_v45 = vpack.c.bf16 %v1166_v9, %v1165_v24  ;;  %v1133_v59 = vsel %vm1118_vm2, %v1100_v28, %v1101_v42  ;;  %v1134_v9 = vsel %vm1118_vm2, %v1099_v49, %v1100_v28  ;;  %v1742_v24 = vrot.slane %v6599_v10, 1 }
  0xe1   : > { %v6838_v20 = vpop.permute.xlu1 %929  ;;  %v6840_v52 = vpop.permute.xlu0 %924 }
  0xe2   : > { %10270 = vst [vmem:[#allocation32_spill] sm:$0xff] %v6838_v20  ;;  %10271 = vst [vmem:[#allocation33_spill] sm:$0xff] %v6840_v52  ;;  %v6842_v29 = vld [vmem:[#allocation3 + $0x38] sm:$0xff]  ;;  %v1805_v47 = vmul.f32 %v1789_v18, %v6838_v20  ;;  %v1804_v44 = vmul.f32 %v1790_v48, %v6840_v52  ;;  %1896 = vrot.lane.b32.xlu1 %v1863_v62, %s6087_s0  ;;  %v6859_v18 = vld [vmem:[#allocation3 + $0x20] sm:$0xff]  ;;  %v1787_v28 = vsel %vm1765_vm3, %v1742_v24, %v1743_v39 }
  0xe3   : > { %1207 = vst.msk [vmem:[#allocation3 + $0x40] sm:$0xff] %vm1199_vm1, %v6836_v45  ;;  %1448 = vst.msk [vmem:[#allocation3 + $0x38] sm:$0xff] %vm1199_vm1, %v6818_v60  ;;  %v6861_v48 = vld [vmem:[#allocation2 + $0x90] sm:$0xff]  ;;  %v6863_v62 = vld [vmem:[#allocation2 + $0x98] sm:$0xff] }
  0xe4   : > { %1239 = vst.msk [vmem:[#allocation4 + $0x38] sm:$0xff] %vm1199_vm1, %v6842_v29  ;;  %v6865_v2 = vpack.c.bf16 %v1805_v47, %v1804_v44  ;;  %v1788_v47 = vsel %vm1765_vm3, %v1741_v57, %v1742_v24  ;;  %v1102_v44 = vrot.slane %v6861_v48, 7 }
  0xe5   : > { %v6867_v5 = vpop.permute.xlu1 %787  ;;  %v6869_v3 = vpop.permute.xlu0 %782 }
  0xe6   : > { %10272 = vst [vmem:[#allocation34_spill] sm:$0xff] %v6867_v5  ;;  %10273 = vst [vmem:[#allocation35_spill] sm:$0xff] %v6869_v3  ;;  %v6871_v13 = vld [vmem:[#allocation3 + $0x18] sm:$0xff]  ;;  %v1168_v49 = vmul.f32 %v1133_v59, %v6867_v5  ;;  %v1167_v10 = vmul.f32 %v1134_v9, %v6869_v3  ;;  %1270 = vrot.lane.b32.xlu1 %v6642_v32, %s6085_s20  ;;  %v1103_v32 = vrot.slane %v6863_v62, 7 }
  0xe7   : > { %2074 = vrot.lane.b32.xlu0 %v6871_v13, %s6090_s29  ;;  %1849 = vst.msk [vmem:[#allocation3 + $0x20] sm:$0xff] %vm1199_vm1, %v6865_v2  ;;  %v1132_v24 = vsel %vm1118_vm2, %v1101_v42, %v1102_v44 }
  0xe8   : > { %v6891_v59 = vpack.c.bf16 %v1168_v49, %v1167_v10  ;;  %v1131_v57 = vsel %vm1118_vm2, %v1102_v44, %v1103_v32  ;;  %v1744_v49 = vrot.slane %v6640_v31, 1  ;;  %v1745_v10 = vrot.slane %v6697_v6, 1 }
  0xe9   : > { %v6893_v9 = vpop.permute.xlu1 %939  ;;  %v6895_v5 = vpop.permute.xlu0 %934 }
  0xea   : > { %10274 = vst [vmem:[#allocation36_spill] sm:$0xff] %v6893_v9  ;;  %10275 = vst [vmem:[#allocation37_spill] sm:$0xff] %v6895_v5  ;;  %v6897_v3 = vld [vmem:[#allocation3 + $0x40] sm:$0xff]  ;;  %v1807_v34 = vmul.f32 %v1787_v28, %v6893_v9  ;;  %v1806_v8 = vmul.f32 %v1788_v47, %v6895_v5  ;;  %1367 = vrot.lane.b32.xlu1 %v6736_v37, %s6086_s26  ;;  %v6917_v37 = vld [vmem:[#allocation3 + $0x28] sm:$0xff] }
  0xeb   : > { %1208 = vst.msk [vmem:[#allocation3 + $0x48] sm:$0xff] %vm1199_vm1, %v6891_v59  ;;  %1365 = vrot.lane.b32.xlu0 %v6707_v16, %s6086_s26  ;;  %1449 = vst.msk [vmem:[#allocation3 + $0x40] sm:$0xff] %vm1199_vm1, %v6883_v30  ;;  %v6921_v16 = vld [vmem:[#allocation2 + $0xa0] sm:$0xff]  ;;  %v6923_v47 = vld [vmem:[#allocation2 + $0xa8] sm:$0xff] }
  0xec   : > { %1240 = vst.msk [vmem:[#allocation4 + $0x40] sm:$0xff] %vm1199_vm1, %v6897_v3  ;;  %v6919_v28 = vpack.c.bf16 %v1807_v34, %v1806_v8  ;;  %v1785_v34 = vsel %vm1765_vm3, %v1744_v49, %v1745_v10  ;;  %v1786_v8 = vsel %vm1765_vm3, %v1743_v39, %v1744_v49  ;;  %v1104_v42 = vrot.slane %v6921_v16, 7 }
  0xed   : > { %v6925_v9 = vpop.permute.xlu1 %797  ;;  %v6927_v5 = vpop.permute.xlu0 %792  ;;  %v1105_v44 = vrot.slane %v6923_v47, 7  ;;  %v7043_v23 = vpack.c.bf16 %v6923_v47, %v6921_v16 }
  0xee   : > { %10276 = vst [vmem:[#allocation38_spill] sm:$0xff] %v6925_v9  ;;  %10277 = vst [vmem:[#allocation39_spill] sm:$0xff] %v6927_v5  ;;  %v1170_v31 = vmul.f32 %v1131_v57, %v6925_v9  ;;  %v1169_v6 = vmul.f32 %v1132_v24, %v6927_v5  ;;  %1496 = vrot.lane.b32.xlu1 %v6774_v15, %s6084_s28  ;;  %v1130_v49 = vsel %vm1118_vm2, %v1103_v32, %v1104_v42 }
  0xef   : > { %1494 = vrot.lane.b32.xlu0 %v6705_v14, %s6084_s28  ;;  %1850 = vst.msk [vmem:[#allocation3 + $0x28] sm:$0xff] %vm1199_vm1, %v6919_v28  ;;  %v1129_v39 = vsel %vm1118_vm2, %v1104_v42, %v1105_v44 }
  0xf0   : > { %v6947_v57 = vpack.c.bf16 %v1170_v31, %v1169_v6  ;;  %v1746_v31 = vrot.slane %v6699_v7, 1  ;;  %v1747_v6 = vrot.slane %v6754_v63, 1  ;;  %v6995_v7 = vpack.c.bf16 %v6863_v62, %v6861_v48 }
  0xf1   : > { %v6949_v24 = vpop.permute.xlu1 %949  ;;  %v6951_v15 = vpop.permute.xlu0 %944 }
  0xf2   : > { %10278 = vst [vmem:[#allocation40_spill] sm:$0xff] %v6949_v24  ;;  %10279 = vst [vmem:[#allocation41_spill] sm:$0xff] %v6951_v15  ;;  %v6953_v14 = vld [vmem:[#allocation3 + $0x48] sm:$0xff]  ;;  %v1809_v5 = vmul.f32 %v1785_v34, %v6949_v24  ;;  %v1808_v9 = vmul.f32 %v1786_v8, %v6951_v15  ;;  %1577 = vrot.lane.b32.xlu1 %v6688_v0, %s6083_s24  ;;  %v6973_v0 = vld [vmem:[#allocation3 + $0x30] sm:$0xff]  ;;  %v1783_v63 = vsel %vm1765_vm3, %v1746_v31, %v1747_v6 }
  0xf3   : > { %1209 = vst.msk [vmem:[#allocation3 + $0x50] sm:$0xff] %vm1199_vm1, %v6947_v57  ;;  %1575 = vrot.lane.b32.xlu0 %v6658_v43, %s6083_s24  ;;  %1450 = vst.msk [vmem:[#allocation3 + $0x48] sm:$0xff] %vm1199_vm1, %v6931_v35  ;;  %v6977_v43 = vld [vmem:[#allocation2 + $0xb0] sm:$0xff]  ;;  %v6979_v8 = vld [vmem:[#allocation2 + $0xb8] sm:$0xff] }
  0xf4   : > { %1241 = vst.msk [vmem:[#allocation4 + $0x48] sm:$0xff] %vm1199_vm1, %v6953_v14  ;;  %v6975_v34 = vpack.c.bf16 %v1809_v5, %v1808_v9  ;;  %v1784_v5 = vsel %vm1765_vm3, %v1745_v10, %v1746_v31  ;;  %v1106_v9 = vrot.slane %v6977_v43, 7  ;;  %v1107_v42 = vrot.slane %v6979_v8, 7 }
  0xf5   : > { %v6981_v24 = vpop.permute.xlu1 %807  ;;  %v6983_v15 = vpop.permute.xlu0 %802  ;;  %v1748_v31 = vrot.slane %v6756_v1, 1 }
  0xf6   : > { %10280 = vst [vmem:[#allocation42_spill] sm:$0xff] %v6981_v24  ;;  %10281 = vst [vmem:[#allocation43_spill] sm:$0xff] %v6983_v15  ;;  %v1172_v20 = vmul.f32 %v1129_v39, %v6981_v24  ;;  %v1171_v32 = vmul.f32 %v1130_v49, %v6983_v15  ;;  %1674 = vrot.lane.b32.xlu1 %v6917_v37, %s6088_s3  ;;  %v1128_v10 = vsel %vm1118_vm2, %v1105_v44, %v1106_v9  ;;  %v7099_v21 = vld [vmem:[#allocation3 + $0x28] sm:$0xff] }
  0xf7   : > { %1672 = vrot.lane.b32.xlu0 %v6859_v18, %s6088_s3  ;;  %1851 = vst.msk [vmem:[#allocation3 + $0x30] sm:$0xff] %vm1199_vm1, %v6975_v34 }
  0xf8   : > { %v7003_v39 = vpack.c.bf16 %v1172_v20, %v1171_v32  ;;  %v1127_v20 = vsel %vm1118_vm2, %v1106_v9, %v1107_v42  ;;  %v1749_v32 = vrot.slane %v6805_v4, 1 }
  0xf9   : > { %v7005_v49 = vpop.permute.xlu1 %959  ;;  %v7007_v24 = vpop.permute.xlu0 %954 }
  0xfa   : > { %10282 = vst [vmem:[#allocation44_spill] sm:$0xff] %v7005_v49  ;;  %10283 = vst [vmem:[#allocation45_spill] sm:$0xff] %v7007_v24  ;;  %v7009_v15 = vld [vmem:[#allocation3 + $0x50] sm:$0xff]  ;;  %v1811_v52 = vmul.f32 %v1783_v63, %v7005_v49  ;;  %v1810_v22 = vmul.f32 %v1784_v5, %v7007_v24  ;;  %1900 = vrot.lane.b32.xlu1 %v6871_v13, %s6087_s0  ;;  %v7033_v13 = vld [vmem:[#allocation2 + $0xc0] sm:$0xff] }
  0xfb   : > { %1210 = vst.msk [vmem:[#allocation3 + $0x58] sm:$0xff] %vm1199_vm1, %v7003_v39  ;;  %1898 = vrot.lane.b32.xlu0 %v6814_v46, %s6087_s0  ;;  %1451 = vst.msk [vmem:[#allocation3 + $0x50] sm:$0xff] %vm1199_vm1, %v6995_v7  ;;  %v7029_v46 = vld [vmem:[#allocation3 + $0x38] sm:$0xff]  ;;  %v7035_v5 = vld [vmem:[#allocation2 + $0xc8] sm:$0xff]  ;;  %v1108_v44 = vrot.slane %v7033_v13, 7 }
  0xfc   : > { %1242 = vst.msk [vmem:[#allocation4 + $0x50] sm:$0xff] %vm1199_vm1, %v7009_v15  ;;  %v7031_v63 = vpack.c.bf16 %v1811_v52, %v1810_v22  ;;  %v1781_v52 = vsel %vm1765_vm3, %v1748_v31, %v1749_v32  ;;  %v1782_v22 = vsel %vm1765_vm3, %v1747_v6, %v1748_v31  ;;  %v1109_v9 = vrot.slane %v7035_v5, 7 }
  0xfd   : > { %v7037_v49 = vpop.permute.xlu1 %817  ;;  %v7039_v24 = vpop.permute.xlu0 %812  ;;  %v7159_v33 = vpack.c.bf16 %v7035_v5, %v7033_v13 }
  0xfe   : > { %10284 = vst [vmem:[#allocation46_spill] sm:$0xff] %v7037_v49  ;;  %10285 = vst [vmem:[#allocation47_spill] sm:$0xff] %v7039_v24  ;;  %v1174_v1 = vmul.f32 %v1127_v20, %v7037_v49  ;;  %v1173_v4 = vmul.f32 %v1128_v10, %v7039_v24  ;;  %1981 = vrot.lane.b32.xlu1 %v6865_v2, %s6089_s11  ;;  %v7065_v2 = vld [vmem:[#allocation3 + $0x20] sm:$0xff]  ;;  %v1125_v31 = vsel %vm1118_vm2, %v1108_v44, %v1109_v9 }
  0xff   : > { %1979 = vrot.lane.b32.xlu0 %v6803_v58, %s6089_s11  ;;  %1852 = vst.msk [vmem:[#allocation3 + $0x38] sm:$0xff] %vm1199_vm1, %v7031_v63 }
 0x100   : > { %v7059_v20 = vpack.c.bf16 %v1174_v1, %v1173_v4  ;;  %v1126_v1 = vsel %vm1118_vm2, %v1107_v42, %v1108_v44  ;;  %v1750_v4 = vrot.slane %v6807_v53, 1 }
 0x101   : > { %v7061_v10 = vpop.permute.xlu1 %969  ;;  %v7063_v58 = vpop.permute.xlu0 %964 }
 0x102   : > { %10286 = vst [vmem:[#allocation48_spill] sm:$0xff] %v7061_v10  ;;  %10287 = vst [vmem:[#allocation49_spill] sm:$0xff] %v7063_v58  ;;  %v7067_v24 = vld [vmem:[#allocation3 + $0x58] sm:$0xff]  ;;  %v1813_v49 = vmul.f32 %v1781_v52, %v7061_v10  ;;  %v1812_v6 = vmul.f32 %v1782_v22, %v7063_v58  ;;  %1272 = vrot.lane.b32.xlu1 %v6670_v54, %s6085_s20  ;;  %v1751_v52 = vrot.slane %v6861_v48, 1  ;;  %v7087_v54 = vld [vmem:[#allocation3 + $0x40] sm:$0xff] }
 0x103   : > { %1211 = vst.msk [vmem:[#allocation3 + $0x60] sm:$0xff] %vm1199_vm1, %v7059_v20  ;;  %2076 = vrot.lane.b32.xlu0 %v7065_v2, %s6090_s29  ;;  %1452 = vst.msk [vmem:[#allocation3 + $0x58] sm:$0xff] %vm1199_vm1, %v7043_v23  ;;  %v7091_v10 = vld [vmem:[#allocation2 + $0xd0] sm:$0xff]  ;;  %v7093_v58 = vld [vmem:[#allocation2 + $0xd8] sm:$0xff]  ;;  %v7111_v48 = vpack.c.bf16 %v6979_v8, %v6977_v43  ;;  %v1780_v44 = vsel %vm1765_vm3, %v1749_v32, %v1750_v4 }
 0x104   : > { %1243 = vst.msk [vmem:[#allocation4 + $0x58] sm:$0xff] %vm1199_vm1, %v7067_v24  ;;  %v7089_v22 = vpack.c.bf16 %v1813_v49, %v1812_v6  ;;  %v1779_v49 = vsel %vm1765_vm3, %v1750_v4, %v1751_v52  ;;  %v1110_v6 = vrot.slane %v7091_v10, 7 }
 0x105   : > { %v7095_v25 = vpop.permute.xlu1 %827  ;;  %v7097_v11 = vpop.permute.xlu0 %822 }
 0x106   : > { %10288 = vst [vmem:[#allocation50_spill] sm:$0xff] %v7095_v25  ;;  %10289 = vst [vmem:[#allocation51_spill] sm:$0xff] %v7097_v11  ;;  %v1176_v42 = vmul.f32 %v1125_v31, %v7095_v25  ;;  %v1175_v53 = vmul.f32 %v1126_v1, %v7097_v11  ;;  %1274 = vrot.lane.b32.xlu1 %v6730_v26, %s6085_s20  ;;  %v1111_v26 = vrot.slane %v7093_v58, 7 }
 0x107   : > { %2078 = vrot.lane.b32.xlu0 %v7099_v21, %s6090_s29  ;;  %1853 = vst.msk [vmem:[#allocation3 + $0x40] sm:$0xff] %vm1199_vm1, %v7089_v22  ;;  %v1124_v4 = vsel %vm1118_vm2, %v1109_v9, %v1110_v6 }
 0x108   : > { %v7119_v31 = vpack.c.bf16 %v1176_v42, %v1175_v53  ;;  %v1123_v32 = vsel %vm1118_vm2, %v1110_v6, %v1111_v26  ;;  %v1752_v42 = vrot.slane %v6863_v62, 1  ;;  %v1753_v53 = vrot.slane %v6921_v16, 1 }
 0x109   : > { %v7121_v1 = vpop.permute.xlu1 %979  ;;  %v7123_v25 = vpop.permute.xlu0 %974 }
 0x10a   : > { %10290 = vst [vmem:[#allocation52_spill] sm:$0xff] %v7121_v1  ;;  %10291 = vst [vmem:[#allocation53_spill] sm:$0xff] %v7123_v25  ;;  %v7125_v11 = vld [vmem:[#allocation3 + $0x60] sm:$0xff]  ;;  %v1815_v12 = vmul.f32 %v1779_v49, %v7121_v1  ;;  %v1814_v27 = vmul.f32 %v1780_v44, %v7123_v25  ;;  %1371 = vrot.lane.b32.xlu1 %v6842_v29, %s6086_s26  ;;  %v7145_v29 = vld [vmem:[#allocation3 + $0x48] sm:$0xff] }
 0x10b   : > { %1212 = vst.msk [vmem:[#allocation3 + $0x68] sm:$0xff] %vm1199_vm1, %v7119_v31  ;;  %1369 = vrot.lane.b32.xlu0 %v6785_v38, %s6086_s26  ;;  %1453 = vst.msk [vmem:[#allocation3 + $0x60] sm:$0xff] %vm1199_vm1, %v7111_v48  ;;  %v7149_v38 = vld [vmem:[#allocation2 + $0xe0] sm:$0xff]  ;;  %v7151_v44 = vld [vmem:[#allocation2 + $0xe8] sm:$0xff] }
 0x10c   : > { %1244 = vst.msk [vmem:[#allocation4 + $0x60] sm:$0xff] %vm1199_vm1, %v7125_v11  ;;  %v7147_v49 = vpack.c.bf16 %v1815_v12, %v1814_v27  ;;  %v1777_v12 = vsel %vm1765_vm3, %v1752_v42, %v1753_v53  ;;  %v1778_v27 = vsel %vm1765_vm3, %v1751_v52, %v1752_v42  ;;  %v1112_v9 = vrot.slane %v7149_v38, 7 }
 0x10d   : > { %v7153_v1 = vpop.permute.xlu1 %837  ;;  %v7155_v25 = vpop.permute.xlu0 %832  ;;  %v1113_v6 = vrot.slane %v7151_v44, 7 }
 0x10e   : > { %10292 = vst [vmem:[#allocation54_spill] sm:$0xff] %v7153_v1  ;;  %10293 = vst [vmem:[#allocation55_spill] sm:$0xff] %v7155_v25  ;;  %v1178_v62 = vmul.f32 %v1123_v32, %v7153_v1  ;;  %v1177_v16 = vmul.f32 %v1124_v4, %v7155_v25  ;;  %1500 = vrot.lane.b32.xlu1 %v6917_v37, %s6084_s28  ;;  %v1122_v42 = vsel %vm1118_vm2, %v1111_v26, %v1112_v9 }
 0x10f   : > { %1498 = vrot.lane.b32.xlu0 %v6859_v18, %s6084_s28  ;;  %1854 = vst.msk [vmem:[#allocation3 + $0x48] sm:$0xff] %vm1199_vm1, %v7147_v49  ;;  %v1121_v52 = vsel %vm1118_vm2, %v1112_v9, %v1113_v6 }
 0x110   : > { %v7175_v32 = vpack.c.bf16 %v1178_v62, %v1177_v16  ;;  %v1754_v62 = vrot.slane %v6923_v47, 1  ;;  %v1755_v16 = vrot.slane %v6977_v43, 1 }
 0x111   : > { %v7177_v4 = vpop.permute.xlu1 %989  ;;  %v7179_v37 = vpop.permute.xlu0 %984 }
 0x112   : > { %10294 = vst [vmem:[#allocation56_spill] sm:$0xff] %v7177_v4  ;;  %10295 = vst [vmem:[#allocation57_spill] sm:$0xff] %v7179_v37  ;;  %v7181_v18 = vld [vmem:[#allocation3 + $0x68] sm:$0xff]  ;;  %v1817_v25 = vmul.f32 %v1777_v12, %v7177_v4  ;;  %v1816_v1 = vmul.f32 %v1778_v27, %v7179_v37  ;;  %1581 = vrot.lane.b32.xlu1 %v6768_v50, %s6083_s24  ;;  %v7201_v50 = vld [vmem:[#allocation3 + $0x50] sm:$0xff]  ;;  %v1775_v47 = vsel %vm1765_vm3, %v1754_v62, %v1755_v16 }
 0x113   : > { %1213 = vst.msk [vmem:[#allocation3 + $0x70] sm:$0xff] %vm1199_vm1, %v7175_v32  ;;  %1579 = vrot.lane.b32.xlu0 %v6717_v17, %s6083_s24  ;;  %1454 = vst.msk [vmem:[#allocation3 + $0x68] sm:$0xff] %vm1199_vm1, %v7159_v33  ;;  %v7205_v17 = vld [vmem:[#allocation2 + $0xf0] sm:$0xff]  ;;  %v1776_v43 = vsel %vm1765_vm3, %v1753_v53, %v1754_v62  ;;  %v1756_v62 = vrot.slane %v6979_v8, 1 }
 0x114   : > { %1245 = vst.msk [vmem:[#allocation4 + $0x68] sm:$0xff] %vm1199_vm1, %v7181_v18  ;;  %v7203_v12 = vpack.c.bf16 %v1817_v25, %v1816_v1  ;;  %v7221_v25 = vpack.c.bf16 %v7093_v58, %v7091_v10  ;;  %v1114_v26 = vrot.slane %v7205_v17, 7 }
 0x115   : > { %v7207_v27 = vpop.permute.xlu1 %847  ;;  %v7209_v4 = vpop.permute.xlu0 %842 }
 0x116   : > { %10296 = vst [vmem:[#allocation58_spill] sm:$0xff] %v7207_v27  ;;  %10297 = vst [vmem:[#allocation59_spill] sm:$0xff] %v7209_v4  ;;  %v1180_v37 = vmul.f32 %v1121_v52, %v7207_v27  ;;  %v1179_v55 = vmul.f32 %v1122_v42, %v7209_v4  ;;  %1678 = vrot.lane.b32.xlu1 %v7029_v46, %s6088_s3 }
 0x117   : > { %1676 = vrot.lane.b32.xlu0 %v6973_v0, %s6088_s3  ;;  %1855 = vst.msk [vmem:[#allocation3 + $0x50] sm:$0xff] %vm1199_vm1, %v7203_v12 }
 0x118   : > { %v7228_v1 = vpack.c.bf16 %v1180_v37, %v1179_v55  ;;  %v10300_v55 = vrot.slane %v6543_v41, 7  ;;  %v1120_v37 = vsel %vm1118_vm2, %v1113_v6, %v1114_v26 }
 0x119   : > { %v7230_v9 = vpop.permute.xlu1 %999  ;;  %v7232_v52 = vpop.permute.xlu0 %994 }
 0x11a   : > { %10298 = vst [vmem:[#allocation60_spill] sm:$0xff] %v7230_v9  ;;  %10299 = vst [vmem:[#allocation61_spill] sm:$0xff] %v7232_v52  ;;  %v7234_v42 = vld [vmem:[#allocation3 + $0x70] sm:$0xff]  ;;  %v1819_v27 = vmul.f32 %v1775_v47, %v7230_v9  ;;  %v1818_v4 = vmul.f32 %v1776_v43, %v7232_v52  ;;  %1904 = vrot.lane.b32.xlu1 %v7099_v21, %s6087_s0  ;;  %v1119_v53 = vsel %vm1118_vm2, %v1114_v26, %v10300_v55  ;;  %v7256_v47 = vld [vmem:[#allocation3 + $0x58] sm:$0xff] }
 0x11b   : > { %1214 = vst.msk [vmem:[#allocation3 + $0x78] sm:$0xff] %vm1199_vm1, %v7228_v1  ;;  %1902 = vrot.lane.b32.xlu0 %v7065_v2, %s6087_s0  ;;  %1455 = vst.msk [vmem:[#allocation3 + $0x70] sm:$0xff] %vm1199_vm1, %v7221_v25  ;;  %v1757_v2 = vrot.slane %v7033_v13, 1  ;;  %v7266_v52 = vpack.c.bf16 %v7151_v44, %v7149_v38  ;;  %v1774_v13 = vsel %vm1765_vm3, %v1755_v16, %v1756_v62 }
 0x11c   : > { %1246 = vst.msk [vmem:[#allocation4 + $0x70] sm:$0xff] %vm1199_vm1, %v7234_v42  ;;  %v7258_v21 = vpack.c.bf16 %v1819_v27, %v1818_v4  ;;  %v1758_v4 = vrot.slane %v7035_v5, 1  ;;  %v1759_v27 = vrot.slane %v7091_v10, 1 }
 0x11d   : > { %v7260_v43 = vpop.permute.xlu1 %857  ;;  %v7262_v9 = vpop.permute.xlu0 %852  ;;  %v1773_v8 = vsel %vm1765_vm3, %v1756_v62, %v1757_v2  ;;  %v1760_v62 = vrot.slane %v7093_v58, 1  ;;  %v7327_v58 = vpack.c.bf16 %v6543_v41, %v7205_v17 }
 0x11e   : > { %10301 = vst [vmem:[#allocation62_spill] sm:$0xff] %v7260_v43  ;;  %10302 = vst [vmem:[#allocation63_spill] sm:$0xff] %v7262_v9  ;;  %v1182_v55 = vmul.f32 %v1119_v53, %v7260_v43  ;;  %v1181_v6 = vmul.f32 %v1120_v37, %v7262_v9  ;;  %1985 = vrot.lane.b32.xlu1 %v6975_v34, %s6089_s11  ;;  %v7288_v34 = vld [vmem:[#allocation3 + $0x30] sm:$0xff]  ;;  %v1771_v5 = vsel %vm1765_vm3, %v1758_v4, %v1759_v27  ;;  %v2045_v9 = vld [vmem:[#allocation3 + $0x38] sm:$0xff] }
 0x11f   : > { %1983 = vrot.lane.b32.xlu0 %v6919_v28, %s6089_s11  ;;  %1856 = vst.msk [vmem:[#allocation3 + $0x58] sm:$0xff] %vm1199_vm1, %v7258_v21  ;;  %v1772_v10 = vsel %vm1765_vm3, %v1757_v2, %v1758_v4  ;;  %v1770_v2 = vsel %vm1765_vm3, %v1759_v27, %v1760_v62  ;;  %v1763_v4 = vrot.slane %v7205_v17, 1  ;;  %v1764_v27 = vrot.slane %v6543_v41, 1 }
 0x120   : > { %v7282_v26 = vpack.c.bf16 %v1182_v55, %v1181_v6  ;;  %v1761_v55 = vrot.slane %v7149_v38, 1  ;;  %v10307_v41 = vrot.slane %v6541_v40, 1 }
 0x121   : > { %v7284_v53 = vpop.permute.xlu1 %1009  ;;  %v7286_v28 = vpop.permute.xlu0 %1004 }
 0x122   : > { %10303 = vst [vmem:[#allocation64_spill] sm:$0xff] %v7284_v53  ;;  %10304 = vst [vmem:[#allocation65_spill] sm:$0xff] %v7286_v28  ;;  %v7290_v37 = vld [vmem:[#allocation3 + $0x78] sm:$0xff]  ;;  %v1821_v43 = vmul.f32 %v1773_v8, %v7284_v53  ;;  %v1820_v16 = vmul.f32 %v1774_v13, %v7286_v28  ;;  %1276 = vrot.lane.b32.xlu1 %v6779_v19, %s6085_s20  ;;  %v7310_v19 = vld [vmem:[#allocation3 + $0x60] sm:$0xff]  ;;  %v1769_v38 = vsel %vm1765_vm3, %v1760_v62, %v1761_v55 }
 0x123   : > { %1215 = vst.msk [vmem:[#allocation3 + $0x80] sm:$0xff] %vm1199_vm1, %v7282_v26  ;;  %2080 = vrot.lane.b32.xlu0 %v7288_v34, %s6090_s29  ;;  %1456 = vst.msk [vmem:[#allocation3 + $0x78] sm:$0xff] %vm1199_vm1, %v7266_v52 }
 0x124   : > { %1247 = vst.msk [vmem:[#allocation4 + $0x78] sm:$0xff] %vm1199_vm1, %v7290_v37  ;;  %v7312_v6 = vpack.c.bf16 %v1821_v43, %v1820_v16  ;;  %v1762_v43 = vrot.slane %v7151_v44, 1 }
 0x125   : > { %v7314_v8 = vpop.permute.xlu1 %1019  ;;  %v7316_v13 = vpop.permute.xlu0 %1014 }
 0x126   : > { %10305 = vst [vmem:[#allocation66_spill] sm:$0xff] %v7314_v8  ;;  %10306 = vst [vmem:[#allocation67_spill] sm:$0xff] %v7316_v13  ;;  %v1823_v53 = vmul.f32 %v1771_v5, %v7314_v8  ;;  %v1822_v28 = vmul.f32 %v1772_v10, %v7316_v13  ;;  %1278 = vrot.lane.b32.xlu1 %v6836_v45, %s6085_s20  ;;  %v7335_v45 = vld [vmem:[#allocation3 + $0x68] sm:$0xff]  ;;  %v1767_v44 = vsel %vm1765_vm3, %v1762_v43, %v1763_v4 }
 0x127   : > { %2082 = vrot.lane.b32.xlu0 %v2045_v9, %s6090_s29  ;;  %1857 = vst.msk [vmem:[#allocation3 + $0x60] sm:$0xff] %vm1199_vm1, %v7312_v6  ;;  %v1768_v17 = vsel %vm1765_vm3, %v1761_v55, %v1762_v43  ;;  %v1766_v55 = vsel %vm1765_vm3, %v1763_v4, %v1764_v27 }
 0x128   : > { %v7337_v16 = vpack.c.bf16 %v1823_v53, %v1822_v28  ;;  %v7360_v53 = vld [vmem:[#allocation3 + $0x70] sm:$0xff] }
 0x129   : > { %v7339_v5 = vpop.permute.xlu1 %1029  ;;  %v7341_v10 = vpop.permute.xlu0 %1024 }
 0x12a   : > { %v7343_v8 = vld [vmem:[#allocation3 + $0x80] sm:$0xff]  ;;  %v1825_v13 = vmul.f32 %v1769_v38, %v7339_v5  ;;  %v1824_v56 = vmul.f32 %v1770_v2, %v7341_v10  ;;  %1375 = vrot.lane.b32.xlu1 %v6953_v14, %s6086_s26  ;;  %1858 = vst.msk [vmem:[#allocation3 + $0x68] sm:$0xff] %vm1199_vm1, %v7337_v16 }
 0x12b   : > { %1373 = vrot.lane.b32.xlu0 %v6897_v3, %s6086_s26  ;;  %1457 = vst.msk [vmem:[#allocation3 + $0x80] sm:$0xff] %vm1199_vm1, %v7327_v58 }
 0x12c   : > { %v7362_v14 = vpack.c.bf16 %v1825_v13, %v1824_v56  ;;  %v1797_v56 = vsel %vm1765_vm3, %v1764_v27, %v10307_v41  ;;  %v7382_v13 = vld [vmem:[#allocation3 + $0x78] sm:$0xff] }
 0x12d   : > { %v7364_v28 = vpop.permute.xlu1 %1039  ;;  %v7366_v3 = vpop.permute.xlu0 %1034 }
 0x12e   : > { %v1827_v62 = vmul.f32 %v1767_v44, %v7364_v28  ;;  %v1826_v38 = vmul.f32 %v1768_v17, %v7366_v3  ;;  %1504 = vrot.lane.b32.xlu1 %v7029_v46, %s6084_s28  ;;  %1859 = vst.msk [vmem:[#allocation3 + $0x70] sm:$0xff] %vm1199_vm1, %v7362_v14 }
 0x12f   : > { %1502 = vrot.lane.b32.xlu0 %v6973_v0, %s6084_s28 }
 0x130   : > { %v7384_v2 = vpack.c.bf16 %v1827_v62, %v1826_v38 }
 0x131   : > { %v7386_v43 = vpop.permute.xlu1 %1049  ;;  %v7388_v46 = vpop.permute.xlu0 %1044 }
 0x132   : > { %v1829_v0 = vmul.f32 %v1797_v56, %v7386_v43  ;;  %v1828_v44 = vmul.f32 %v1766_v55, %v7388_v46  ;;  %1585 = vrot.lane.b32.xlu1 %v6883_v30, %s6083_s24  ;;  %1860 = vst.msk [vmem:[#allocation3 + $0x78] sm:$0xff] %vm1199_vm1, %v7384_v2  ;;  %v7398_v40 = vld [vmem:[#allocation3 + $0x80] sm:$0xff] }
 0x133   : > { %1583 = vrot.lane.b32.xlu0 %v6818_v60, %s6083_s24  ;;  %v2046_v55 = vld [vmem:[#allocation3 + $0x40] sm:$0xff] }
 0x134   : > { %v7400_v4 = vpack.c.bf16 %v1829_v0, %v1828_v44 }
 0x135   : > { %v1574_v17 = vpop.permute.xlu1 %1573  ;;  %v1491_v27 = vpop.permute.xlu0 %1490 }
 0x136   : > { %1682 = vrot.lane.b32.xlu1 %v7145_v29, %s6088_s3  ;;  %1861 = vst.msk [vmem:[#allocation3 + $0x80] sm:$0xff] %vm1199_vm1, %v7400_v4 }
 0x137   : > { %1680 = vrot.lane.b32.xlu0 %v7087_v54, %s6088_s3 }
 0x139   : > { %v1267_v60 = vpop.permute.xlu1 %1266  ;;  %v1265_v30 = vpop.permute.xlu0 %1264 }
 0x13a   : > { %1314 = vst.msk [vmem:[#allocation4 + $0x8] sm:$0xff] %vm1312_vm5, %v1267_v60  ;;  %1313 = vst.msk [vmem:[#allocation4] sm:$0xff] %vm1312_vm5, %v1265_v30  ;;  %1908 = vrot.lane.b32.xlu1 %v2045_v9, %s6087_s0  ;;  %v2048_v30 = vld [vmem:[#allocation3 + $0x50] sm:$0xff] }
 0x13b   : > { %1906 = vrot.lane.b32.xlu0 %v7288_v34, %s6087_s0 }
 0x13d   : > { %v1364_v62 = vpop.permute.xlu1 %1363  ;;  %v1572_v38 = vpop.permute.xlu0 %1571 }
 0x13e   : > { %1411 = vst.msk [vmem:[#allocation4 + $0x8] sm:$0xff] %vm1409_vm6, %v1364_v62  ;;  %1989 = vrot.lane.b32.xlu1 %v7089_v22, %s6089_s11  ;;  %v2047_v22 = vld [vmem:[#allocation3 + $0x48] sm:$0xff] }
 0x13f   : > { %1987 = vrot.lane.b32.xlu0 %v7031_v63, %s6089_s11 }
 0x141   : > { %v1493_v41 = vpop.permute.xlu1 %1492  ;;  %v1362_v56 = vpop.permute.xlu0 %1361 }
 0x142   : > { %1540 = vst.msk [vmem:[#allocation4 + $0x8] sm:$0xff] %vm1538_vm7, %v1493_v41  ;;  %1280 = vrot.lane.b32.xlu1 %v6891_v59, %s6085_s20 }
 0x143   : > { %1410 = vst.msk [vmem:[#allocation4] sm:$0xff] %vm1409_vm6, %v1362_v56  ;;  %2084 = vrot.lane.b32.xlu0 %v2046_v55, %s6090_s29 }
 0x144   : > { %1539 = vst.msk [vmem:[#allocation4] sm:$0xff] %vm1538_vm7, %v1491_v27 }
 0x145   : > { %1621 = vst.msk [vmem:[#allocation4 + $0x8] sm:$0xff] %vm1619_vm8, %v1574_v17  ;;  %1620 = vst.msk [vmem:[#allocation4] sm:$0xff] %vm1619_vm8, %v1572_v38  ;;  %v1895_v63 = vpop.permute.xlu0 %1894 }
 0x146   : > { %1282 = vrot.lane.b32.xlu1 %v6947_v57, %s6085_s20 }
 0x147   : > { %2086 = vrot.lane.b32.xlu0 %v2047_v22, %s6090_s29 }
 0x148   : > { %v1978_v9 = vpop.permute.xlu1 %1977 }
 0x149   : > { %v1669_v34 = vpop.permute.xlu0 %1668 }
 0x14a   : > { %1717 = vst.msk [vmem:[#allocation4] sm:$0xff] %vm1716_vm9, %v1669_v34  ;;  %1379 = vrot.lane.b32.xlu1 %v7067_v24, %s6086_s26 }
 0x14b   : > { %1377 = vrot.lane.b32.xlu0 %v7009_v15, %s6086_s26  ;;  %1943 = vst.msk [vmem:[#allocation4] sm:$0xff] %vm1942_vm10, %v1895_v63 }
 0x14c   : > { %v1671_v59 = vpop.permute.xlu1 %1670 }
 0x14d   : > { %1718 = vst.msk [vmem:[#allocation4 + $0x8] sm:$0xff] %vm1716_vm9, %v1671_v59  ;;  %v1976_v57 = vpop.permute.xlu0 %1975  ;;  %v2050_v59 = vld [vmem:[#allocation3 + $0x60] sm:$0xff] }
 0x14e   : > { %2024 = vst.msk [vmem:[#allocation4] sm:$0xff] %vm2023_vm11, %v1976_v57  ;;  %1508 = vrot.lane.b32.xlu1 %v7145_v29, %s6084_s28 }
 0x14f   : > { %1506 = vrot.lane.b32.xlu0 %v7087_v54, %s6084_s28 }
 0x150   : > { %v1269_v24 = vpop.permute.xlu1 %1268 }
 0x151   : > { %1315 = vst.msk [vmem:[#allocation4 + $0x10] sm:$0xff] %vm1312_vm5, %v1269_v24  ;;  %v2073_v15 = vpop.permute.xlu0 %2072 }
 0x152   : > { %2121 = vst.msk [vmem:[#allocation4] sm:$0xff] %vm2120_vm12, %v2073_v15  ;;  %1589 = vrot.lane.b32.xlu1 %v6995_v7, %s6083_s24 }
 0x153   : > { %1587 = vrot.lane.b32.xlu0 %v6931_v35, %s6083_s24 }
 0x154   : > { %v1897_v0 = vpop.permute.xlu1 %1896 }
 0x155   : > { %1944 = vst.msk [vmem:[#allocation4 + $0x8] sm:$0xff] %vm1942_vm10, %v1897_v0 }
 0x156   : > { %2025 = vst.msk [vmem:[#allocation4 + $0x8] sm:$0xff] %vm2023_vm11, %v1978_v9  ;;  %1686 = vrot.lane.b32.xlu1 %v7256_v47, %s6088_s3 }
 0x157   : > { %1684 = vrot.lane.b32.xlu0 %v7201_v50, %s6088_s3 }
 0x158   : > { %v1271_v54 = vpop.permute.xlu1 %1270 }
 0x159   : > { %v2075_v29 = vpop.permute.xlu0 %2074  ;;  %1316 = vst.msk [vmem:[#allocation4 + $0x18] sm:$0xff] %vm1312_vm5, %v1271_v54  ;;  %v2137_v7 = vld [vmem:[#allocation4] sm:$0xff] }
 0x15a   : > { %2122 = vst.msk [vmem:[#allocation4 + $0x8] sm:$0xff] %vm2120_vm12, %v2075_v29  ;;  %1912 = vrot.lane.b32.xlu1 %v2047_v22, %s6087_s0  ;;  %5785 = vmatprep.mubr.msk.bf16.mxu0 %vm2196_vm13, %v2137_v7 }
 0x15b   : > { %1910 = vrot.lane.b32.xlu0 %v2046_v55, %s6087_s0 }
 0x15c   : > { %v1368_v35 = vpop.permute.xlu1 %1367 }
 0x15d   : > { %v1366_v44 = vpop.permute.xlu0 %1365  ;;  %1413 = vst.msk [vmem:[#allocation4 + $0x18] sm:$0xff] %vm1409_vm6, %v1368_v35 }
 0x15e   : > { %1412 = vst.msk [vmem:[#allocation4 + $0x10] sm:$0xff] %vm1409_vm6, %v1366_v44  ;;  %1993 = vrot.lane.b32.xlu1 %v7203_v12, %s6089_s11  ;;  %v2049_v12 = vld [vmem:[#allocation3 + $0x58] sm:$0xff] }
 0x15f   : > { %1991 = vrot.lane.b32.xlu0 %v7147_v49, %s6089_s11 }
 0x160   : > { %v1497_v17 = vpop.permute.xlu1 %1496 }
 0x161   : > { %v1495_v27 = vpop.permute.xlu0 %1494  ;;  %v2138_v60 = vld [vmem:[#allocation4 + $0x8] sm:$0xff]  ;;  %1542 = vst.msk [vmem:[#allocation4 + $0x18] sm:$0xff] %vm1538_vm7, %v1497_v17  ;;  %v2052_v17 = vld [vmem:[#allocation3 + $0x70] sm:$0xff] }
 0x162   : > { %1541 = vst.msk [vmem:[#allocation4 + $0x10] sm:$0xff] %vm1538_vm7, %v1495_v27  ;;  %5786 = vmatmul.mubr.msk.bf16.vlgmr.msra.gmra.mrb[0].mxu0 %vm2196_vm13, %v2138_v60  ;;  %1284 = vrot.lane.b32.xlu1 %v7003_v39, %s6085_s20  ;;  %v1344_v60 = vld [vmem:[#allocation3 + $0x88] sm:$0xff] }
 0x163   : > { %2088 = vrot.lane.b32.xlu0 %v2048_v30, %s6090_s29 }
 0x164   : > { %v1578_v62 = vpop.permute.xlu1 %1577 }
 0x165   : > { %v1576_v49 = vpop.permute.xlu0 %1575  ;;  %1623 = vst.msk [vmem:[#allocation4 + $0x18] sm:$0xff] %vm1619_vm8, %v1578_v62 }
 0x166   : > { %1622 = vst.msk [vmem:[#allocation4 + $0x10] sm:$0xff] %vm1619_vm8, %v1576_v49  ;;  %1286 = vrot.lane.b32.xlu1 %v7059_v20, %s6085_s20 }
 0x167   : > { %2090 = vrot.lane.b32.xlu0 %v2049_v12, %s6090_s29 }
 0x168   : > { %v1675_v38 = vpop.permute.xlu1 %1674 }
 0x169   : > { %v1673_v41 = vpop.permute.xlu0 %1672  ;;  %1720 = vst.msk [vmem:[#allocation4 + $0x18] sm:$0xff] %vm1716_vm9, %v1675_v38 }
 0x16a   : > { %1719 = vst.msk [vmem:[#allocation4 + $0x10] sm:$0xff] %vm1716_vm9, %v1673_v41  ;;  %1383 = vrot.lane.b32.xlu1 %v7181_v18, %s6086_s26 }
 0x16b   : > { %1381 = vrot.lane.b32.xlu0 %v7125_v11, %s6086_s26 }
 0x16c   : > { %v1901_v39 = vpop.permute.xlu1 %1900 }
 0x16d   : > { %v1899_v56 = vpop.permute.xlu0 %1898  ;;  %1946 = vst.msk [vmem:[#allocation4 + $0x18] sm:$0xff] %vm1942_vm10, %v1901_v39 }
 0x16e   : > { %1945 = vst.msk [vmem:[#allocation4 + $0x10] sm:$0xff] %vm1942_vm10, %v1899_v56  ;;  %1512 = vrot.lane.b32.xlu1 %v7256_v47, %s6084_s28 }
 0x16f   : > { %1510 = vrot.lane.b32.xlu0 %v7201_v50, %s6084_s28 }
 0x170   : > { %v1982_v20 = vpop.permute.xlu1 %1981 }
 0x171   : > { %v1980_v55 = vpop.permute.xlu0 %1979  ;;  %2027 = vst.msk [vmem:[#allocation4 + $0x18] sm:$0xff] %vm2023_vm11, %v1982_v20  ;;  %v2054_v20 = vld [vmem:[#allocation3 + $0x80] sm:$0xff] }
 0x172   : > { %2026 = vst.msk [vmem:[#allocation4 + $0x10] sm:$0xff] %vm2023_vm11, %v1980_v55  ;;  %1593 = vrot.lane.b32.xlu1 %v7111_v48, %s6083_s24  ;;  %v2810_v55 = vld [vmem:[#allocation3] sm:$0xff] }
 0x173   : > { %1591 = vrot.lane.b32.xlu0 %v7043_v23, %s6083_s24 }
 0x174   : > { %v1273_v11 = vpop.permute.xlu1 %1272 }
 0x175   : > { %v2077_v18 = vpop.permute.xlu0 %2076  ;;  %1317 = vst.msk [vmem:[#allocation4 + $0x20] sm:$0xff] %vm1312_vm5, %v1273_v11 }
 0x176   : > { %2123 = vst.msk [vmem:[#allocation4 + $0x10] sm:$0xff] %vm2120_vm12, %v2077_v18  ;;  %1690 = vrot.lane.b32.xlu1 %v7335_v45, %s6088_s3 }
 0x177   : > { %1688 = vrot.lane.b32.xlu0 %v7310_v19, %s6088_s3 }
 0x178   : > { %v1275_v50 = vpop.permute.xlu1 %1274 }
 0x179   : > { %v2079_v47 = vpop.permute.xlu0 %2078  ;;  %1318 = vst.msk [vmem:[#allocation4 + $0x28] sm:$0xff] %vm1312_vm5, %v1275_v50 }
 0x17a   : > { %2124 = vst.msk [vmem:[#allocation4 + $0x18] sm:$0xff] %vm2120_vm12, %v2079_v47  ;;  %1916 = vrot.lane.b32.xlu1 %v2049_v12, %s6087_s0 }
 0x17b   : > { %1914 = vrot.lane.b32.xlu0 %v2048_v30, %s6087_s0 }
 0x17c   : > { %v1372_v23 = vpop.permute.xlu1 %1371 }
 0x17d   : > { %v1370_v48 = vpop.permute.xlu0 %1369  ;;  %v2139_v63 = vld [vmem:[#allocation4 + $0x10] sm:$0xff]  ;;  %1415 = vst.msk [vmem:[#allocation4 + $0x28] sm:$0xff] %vm1409_vm6, %v1372_v23 }
 0x17e   : > { %1414 = vst.msk [vmem:[#allocation4 + $0x20] sm:$0xff] %vm1409_vm6, %v1370_v48  ;;  %5789 = vmatprep.mubr.msk.bf16.mxu0 %vm2196_vm13, %v2139_v63  ;;  %1997 = vrot.lane.b32.xlu1 %v7312_v6, %s6089_s11 }
 0x17f   : > { %1995 = vrot.lane.b32.xlu0 %v7258_v21, %s6089_s11  ;;  %v2051_v21 = vld [vmem:[#allocation3 + $0x68] sm:$0xff] }
 0x180   : > { %v1501_v22 = vpop.permute.xlu1 %1500 }
 0x181   : > { %v1499_v9 = vpop.permute.xlu0 %1498  ;;  %v2140_v34 = vld [vmem:[#allocation4 + $0x18] sm:$0xff]  ;;  %1544 = vst.msk [vmem:[#allocation4 + $0x28] sm:$0xff] %vm1538_vm7, %v1501_v22 }
 0x182   : > { %1543 = vst.msk [vmem:[#allocation4 + $0x20] sm:$0xff] %vm1538_vm7, %v1499_v9  ;;  %5790 = vmatmul.mubr.msk.bf16.gmra.mrb[4].mxu0 %vm2196_vm13, %v2140_v34  ;;  %1288 = vrot.lane.b32.xlu1 %v7119_v31, %s6085_s20 }
 0x183   : > { %2092 = vrot.lane.b32.xlu0 %v2050_v59, %s6090_s29 }
 0x184   : > { %v1582_v57 = vpop.permute.xlu1 %1581 }
 0x185   : > { %v1580_v6 = vpop.permute.xlu0 %1579  ;;  %1625 = vst.msk [vmem:[#allocation4 + $0x28] sm:$0xff] %vm1619_vm8, %v1582_v57 }
 0x186   : > { %1624 = vst.msk [vmem:[#allocation4 + $0x20] sm:$0xff] %vm1619_vm8, %v1580_v6  ;;  %1290 = vrot.lane.b32.xlu1 %v7175_v32, %s6085_s20 }
 0x187   : > { %2094 = vrot.lane.b32.xlu0 %v2051_v21, %s6090_s29 }
 0x188   : > { %v1679_v24 = vpop.permute.xlu1 %1678 }
 0x189   : > { %v1677_v15 = vpop.permute.xlu0 %1676  ;;  %1722 = vst.msk [vmem:[#allocation4 + $0x28] sm:$0xff] %vm1716_vm9, %v1679_v24 }
 0x18a   : > { %1721 = vst.msk [vmem:[#allocation4 + $0x20] sm:$0xff] %vm1716_vm9, %v1677_v15  ;;  %1387 = vrot.lane.b32.xlu1 %v7290_v37, %s6086_s26 }
 0x18b   : > { %1385 = vrot.lane.b32.xlu0 %v7234_v42, %s6086_s26 }
 0x18c   : > { %v1905_v31 = vpop.permute.xlu1 %1904 }
 0x18d   : > { %v1903_v0 = vpop.permute.xlu0 %1902  ;;  %1948 = vst.msk [vmem:[#allocation4 + $0x28] sm:$0xff] %vm1942_vm10, %v1905_v31 }
 0x18e   : > { %1947 = vst.msk [vmem:[#allocation4 + $0x20] sm:$0xff] %vm1942_vm10, %v1903_v0  ;;  %1516 = vrot.lane.b32.xlu1 %v7335_v45, %s6084_s28 }
 0x18f   : > { %1514 = vrot.lane.b32.xlu0 %v7310_v19, %s6084_s28 }
 0x190   : > { %v1986_v32 = vpop.permute.xlu1 %1985 }
 0x191   : > { %v1984_v54 = vpop.permute.xlu0 %1983  ;;  %2029 = vst.msk [vmem:[#allocation4 + $0x28] sm:$0xff] %vm2023_vm11, %v1986_v32 }
 0x192   : > { %2028 = vst.msk [vmem:[#allocation4 + $0x20] sm:$0xff] %vm2023_vm11, %v1984_v54  ;;  %1597 = vrot.lane.b32.xlu1 %v7221_v25, %s6083_s24 }
 0x193   : > { %1595 = vrot.lane.b32.xlu0 %v7159_v33, %s6083_s24 }
 0x194   : > { %v1277_v42 = vpop.permute.xlu1 %1276 }
 0x195   : > { %v2081_v37 = vpop.permute.xlu0 %2080  ;;  %1319 = vst.msk [vmem:[#allocation4 + $0x30] sm:$0xff] %vm1312_vm5, %v1277_v42 }
 0x196   : > { %2125 = vst.msk [vmem:[#allocation4 + $0x20] sm:$0xff] %vm2120_vm12, %v2081_v37  ;;  %1694 = vrot.lane.b32.xlu1 %v7382_v13, %s6088_s3 }
 0x197   : > { %1692 = vrot.lane.b32.xlu0 %v7360_v53, %s6088_s3 }
 0x198   : > { %v1279_v19 = vpop.permute.xlu1 %1278 }
 0x199   : > { %v2083_v45 = vpop.permute.xlu0 %2082  ;;  %1320 = vst.msk [vmem:[#allocation4 + $0x38] sm:$0xff] %vm1312_vm5, %v1279_v19 }
 0x19a   : > { %2126 = vst.msk [vmem:[#allocation4 + $0x28] sm:$0xff] %vm2120_vm12, %v2083_v45  ;;  %1920 = vrot.lane.b32.xlu1 %v2051_v21, %s6087_s0 }
 0x19b   : > { %1918 = vrot.lane.b32.xlu0 %v2050_v59, %s6087_s0 }
 0x19c   : > { %v1376_v33 = vpop.permute.xlu1 %1375 }
 0x19d   : > { %v1374_v25 = vpop.permute.xlu0 %1373  ;;  %v2141_v29 = vld [vmem:[#allocation4 + $0x20] sm:$0xff]  ;;  %1417 = vst.msk [vmem:[#allocation4 + $0x38] sm:$0xff] %vm1409_vm6, %v1376_v33 }
 0x19e   : > { %1416 = vst.msk [vmem:[#allocation4 + $0x30] sm:$0xff] %vm1409_vm6, %v1374_v25  ;;  %5793 = vmatprep.mubr.msk.bf16.mxu0 %vm2196_vm13, %v2141_v29  ;;  %2001 = vrot.lane.b32.xlu1 %v7362_v14, %s6089_s11 }
 0x19f   : > { %1999 = vrot.lane.b32.xlu0 %v7337_v16, %s6089_s11  ;;  %v2053_v16 = vld [vmem:[#allocation3 + $0x78] sm:$0xff] }
 0x1a0   : > { %v1505_v7 = vpop.permute.xlu1 %1504 }
 0x1a1   : > { %v1503_v35 = vpop.permute.xlu0 %1502  ;;  %v2142_v44 = vld [vmem:[#allocation4 + $0x28] sm:$0xff]  ;;  %1546 = vst.msk [vmem:[#allocation4 + $0x38] sm:$0xff] %vm1538_vm7, %v1505_v7 }
 0x1a2   : > { %1545 = vst.msk [vmem:[#allocation4 + $0x30] sm:$0xff] %vm1538_vm7, %v1503_v35  ;;  %5794 = vmatmul.mubr.msk.bf16.gmra.mrb[8].mxu0 %vm2196_vm13, %v2142_v44  ;;  %1292 = vrot.lane.b32.xlu1 %v7228_v1, %s6085_s20 }
 0x1a3   : > { %2096 = vrot.lane.b32.xlu0 %v2052_v17, %s6090_s29 }
 0x1a4   : > { %v1586_v27 = vpop.permute.xlu1 %1585 }
 0x1a5   : > { %v1584_v14 = vpop.permute.xlu0 %1583  ;;  %1627 = vst.msk [vmem:[#allocation4 + $0x38] sm:$0xff] %vm1619_vm8, %v1586_v27 }
 0x1a6   : > { %1626 = vst.msk [vmem:[#allocation4 + $0x30] sm:$0xff] %vm1619_vm8, %v1584_v14  ;;  %1294 = vrot.lane.b32.xlu1 %v7282_v26, %s6085_s20 }
 0x1a7   : > { %2098 = vrot.lane.b32.xlu0 %v2053_v16, %s6090_s29 }
 0x1a8   : > { %v1683_v30 = vpop.permute.xlu1 %1682 }
 0x1a9   : > { %v1681_v62 = vpop.permute.xlu0 %1680  ;;  %1724 = vst.msk [vmem:[#allocation4 + $0x38] sm:$0xff] %vm1716_vm9, %v1683_v30 }
 0x1aa   : > { %1723 = vst.msk [vmem:[#allocation4 + $0x30] sm:$0xff] %vm1716_vm9, %v1681_v62  ;;  %1391 = vrot.lane.b32.xlu1 %v1344_v60, %s6086_s26 }
 0x1ab   : > { %1389 = vrot.lane.b32.xlu0 %v7343_v8, %s6086_s26 }
 0x1ac   : > { %v1909_v1 = vpop.permute.xlu1 %1908 }
 0x1ad   : > { %v1907_v49 = vpop.permute.xlu0 %1906  ;;  %1950 = vst.msk [vmem:[#allocation4 + $0x38] sm:$0xff] %vm1942_vm10, %v1909_v1 }
 0x1ae   : > { %1949 = vst.msk [vmem:[#allocation4 + $0x30] sm:$0xff] %vm1942_vm10, %v1907_v49  ;;  %1520 = vrot.lane.b32.xlu1 %v7382_v13, %s6084_s28 }
 0x1af   : > { %1518 = vrot.lane.b32.xlu0 %v7360_v53, %s6084_s28 }
 0x1b0   : > { %v1990_v26 = vpop.permute.xlu1 %1989 }
 0x1b1   : > { %v1988_v12 = vpop.permute.xlu0 %1987  ;;  %2031 = vst.msk [vmem:[#allocation4 + $0x38] sm:$0xff] %vm2023_vm11, %v1990_v26 }
 0x1b2   : > { %2030 = vst.msk [vmem:[#allocation4 + $0x30] sm:$0xff] %vm2023_vm11, %v1988_v12  ;;  %1601 = vrot.lane.b32.xlu1 %v7327_v58, %s6083_s24 }
 0x1b3   : > { %1599 = vrot.lane.b32.xlu0 %v7266_v52, %s6083_s24 }
 0x1b4   : > { %v1281_v8 = vpop.permute.xlu1 %1280 }
 0x1b5   : > { %v2085_v38 = vpop.permute.xlu0 %2084  ;;  %1321 = vst.msk [vmem:[#allocation4 + $0x40] sm:$0xff] %vm1312_vm5, %v1281_v8 }
 0x1b6   : > { %2127 = vst.msk [vmem:[#allocation4 + $0x30] sm:$0xff] %vm2120_vm12, %v2085_v38  ;;  %1698 = vrot.lane.b32.xlu1 %v1344_v60, %s6088_s3 }
 0x1b7   : > { %1696 = vrot.lane.b32.xlu0 %v7398_v40, %s6088_s3 }
 0x1b8   : > { %v1283_v53 = vpop.permute.xlu1 %1282 }
 0x1b9   : > { %v2087_v13 = vpop.permute.xlu0 %2086  ;;  %1322 = vst.msk [vmem:[#allocation4 + $0x48] sm:$0xff] %vm1312_vm5, %v1283_v53 }
 0x1ba   : > { %2128 = vst.msk [vmem:[#allocation4 + $0x38] sm:$0xff] %vm2120_vm12, %v2087_v13  ;;  %1924 = vrot.lane.b32.xlu1 %v2053_v16, %s6087_s0 }
 0x1bb   : > { %1922 = vrot.lane.b32.xlu0 %v2052_v17, %s6087_s0 }
 0x1bc   : > { %v1380_v52 = vpop.permute.xlu1 %1379 }
 0x1bd   : > { %v1378_v58 = vpop.permute.xlu0 %1377  ;;  %v2143_v41 = vld [vmem:[#allocation4 + $0x30] sm:$0xff]  ;;  %1419 = vst.msk [vmem:[#allocation4 + $0x48] sm:$0xff] %vm1409_vm6, %v1380_v52 }
 0x1be   : > { %1418 = vst.msk [vmem:[#allocation4 + $0x40] sm:$0xff] %vm1409_vm6, %v1378_v58  ;;  %5797 = vmatprep.mubr.msk.bf16.mxu0 %vm2196_vm13, %v2143_v41  ;;  %2005 = vrot.lane.b32.xlu1 %v7400_v4, %s6089_s11 }
 0x1bf   : > { %2003 = vrot.lane.b32.xlu0 %v7384_v2, %s6089_s11 }
 0x1c0   : > { %v1509_v40 = vpop.permute.xlu1 %1508 }
 0x1c1   : > { %v1507_v39 = vpop.permute.xlu0 %1506  ;;  %v2144_v56 = vld [vmem:[#allocation4 + $0x38] sm:$0xff]  ;;  %1548 = vst.msk [vmem:[#allocation4 + $0x48] sm:$0xff] %vm1538_vm7, %v1509_v40 }
 0x1c2   : > { %1547 = vst.msk [vmem:[#allocation4 + $0x40] sm:$0xff] %vm1538_vm7, %v1507_v39  ;;  %5798 = vmatmul.mubr.msk.bf16.gmra.mrb[12].mxu0 %vm2196_vm13, %v2144_v56  ;;  %2102 = vrot.lane.b32.xlu1 %v1344_v60, %s6090_s29 }
 0x1c3   : > { %2100 = vrot.lane.b32.xlu0 %v2054_v20, %s6090_s29 }
 0x1c4   : > { %v1590_v11 = vpop.permute.xlu1 %1589 }
 0x1c5   : > { %v1588_v4 = vpop.permute.xlu0 %1587  ;;  %1629 = vst.msk [vmem:[#allocation4 + $0x48] sm:$0xff] %vm1619_vm8, %v1590_v11 }
 0x1c6   : > { %1628 = vst.msk [vmem:[#allocation4 + $0x40] sm:$0xff] %vm1619_vm8, %v1588_v4 }
 0x1c7   : > { %2842 = vrot.lane.b32.xlu0 %v2810_v55, %s6084_s28 }
 0x1c8   : > { %v1687_v2 = vpop.permute.xlu1 %1686 }
 0x1c9   : > { %v1685_v18 = vpop.permute.xlu0 %1684  ;;  %1726 = vst.msk [vmem:[#allocation4 + $0x48] sm:$0xff] %vm1716_vm9, %v1687_v2 }
 0x1ca   : > { %1725 = vst.msk [vmem:[#allocation4 + $0x40] sm:$0xff] %vm1716_vm9, %v1685_v18 }
 0x1cb   : > { %3242 = vrot.lane.b32.xlu0 %v2810_v55, %s6087_s0 }
 0x1cc   : > { %v1913_v50 = vpop.permute.xlu1 %1912 }
 0x1cd   : > { %v1911_v47 = vpop.permute.xlu0 %1910  ;;  %1952 = vst.msk [vmem:[#allocation4 + $0x48] sm:$0xff] %vm1942_vm10, %v1913_v50 }
 0x1ce   : > { %1951 = vst.msk [vmem:[#allocation4 + $0x40] sm:$0xff] %vm1942_vm10, %v1911_v47 }
 0x1d0   : > { %v1994_v23 = vpop.permute.xlu1 %1993 }
 0x1d1   : > { %v1992_v48 = vpop.permute.xlu0 %1991  ;;  %2033 = vst.msk [vmem:[#allocation4 + $0x48] sm:$0xff] %vm2023_vm11, %v1994_v23 }
 0x1d2   : > { %2032 = vst.msk [vmem:[#allocation4 + $0x40] sm:$0xff] %vm2023_vm11, %v1992_v48  ;;  %v7674_v48 = vld [vmem:[%s10308_s23] ss:$0 sm:$0xff] }
 0x1d4   : > { %v1285_v63 = vpop.permute.xlu1 %1284 }
 0x1d5   : > { %v2089_v22 = vpop.permute.xlu0 %2088  ;;  %1323 = vst.msk [vmem:[#allocation4 + $0x50] sm:$0xff] %vm1312_vm5, %v1285_v63 }
 0x1d6   : > { %2129 = vst.msk [vmem:[#allocation4 + $0x40] sm:$0xff] %vm2120_vm12, %v2089_v22 }
 0x1d8   : > { %v1287_v9 = vpop.permute.xlu1 %1286 }
 0x1d9   : > { %v2091_v34 = vpop.permute.xlu0 %2090  ;;  %1324 = vst.msk [vmem:[#allocation4 + $0x58] sm:$0xff] %vm1312_vm5, %v1287_v9 }
 0x1da   : > { %2130 = vst.msk [vmem:[#allocation4 + $0x48] sm:$0xff] %vm2120_vm12, %v2091_v34 }
 0x1dc   : > { %v1384_v59 = vpop.permute.xlu1 %1383 }
 0x1dd   : > { %v1382_v57 = vpop.permute.xlu0 %1381  ;;  %v2145_v6 = vld [vmem:[#allocation4 + $0x40] sm:$0xff]  ;;  %1421 = vst.msk [vmem:[#allocation4 + $0x58] sm:$0xff] %vm1409_vm6, %v1384_v59 }
 0x1de   : > { %1420 = vst.msk [vmem:[#allocation4 + $0x50] sm:$0xff] %vm1409_vm6, %v1382_v57  ;;  %5801 = vmatprep.mubr.msk.bf16.mxu0 %vm2196_vm13, %v2145_v6 }
 0x1e0   : > { %v1513_v21 = vpop.permute.xlu1 %1512 }
 0x1e1   : > { %v1511_v24 = vpop.permute.xlu0 %1510  ;;  %v2146_v15 = vld [vmem:[#allocation4 + $0x48] sm:$0xff]  ;;  %1550 = vst.msk [vmem:[#allocation4 + $0x58] sm:$0xff] %vm1538_vm7, %v1513_v21 }
 0x1e2   : > { %1549 = vst.msk [vmem:[#allocation4 + $0x50] sm:$0xff] %vm1538_vm7, %v1511_v24  ;;  %5802 = vmatmul.mubr.msk.bf16.gmra.mrb[16].mxu0 %vm2196_vm13, %v2146_v15 }
 0x1e4   : > { %v1594_v31 = vpop.permute.xlu1 %1593 }
 0x1e5   : > { %v1592_v0 = vpop.permute.xlu0 %1591  ;;  %1631 = vst.msk [vmem:[#allocation4 + $0x58] sm:$0xff] %vm1619_vm8, %v1594_v31 }
 0x1e6   : > { %1630 = vst.msk [vmem:[#allocation4 + $0x50] sm:$0xff] %vm1619_vm8, %v1592_v0 }
 0x1e8   : > { %v1691_v32 = vpop.permute.xlu1 %1690 }
 0x1e9   : > { %v1689_v54 = vpop.permute.xlu0 %1688  ;;  %1728 = vst.msk [vmem:[#allocation4 + $0x58] sm:$0xff] %vm1716_vm9, %v1691_v32 }
 0x1ea   : > { %1727 = vst.msk [vmem:[#allocation4 + $0x50] sm:$0xff] %vm1716_vm9, %v1689_v54 }
 0x1ec   : > { %v1917_v42 = vpop.permute.xlu1 %1916 }
 0x1ed   : > { %v1915_v37 = vpop.permute.xlu0 %1914  ;;  %1954 = vst.msk [vmem:[#allocation4 + $0x58] sm:$0xff] %vm1942_vm10, %v1917_v42 }
 0x1ee   : > { %1953 = vst.msk [vmem:[#allocation4 + $0x50] sm:$0xff] %vm1942_vm10, %v1915_v37 }
 0x1f0   : > { %v1998_v19 = vpop.permute.xlu1 %1997 }
 0x1f1   : > { %v1996_v45 = vpop.permute.xlu0 %1995  ;;  %2035 = vst.msk [vmem:[#allocation4 + $0x58] sm:$0xff] %vm2023_vm11, %v1998_v19 }
 0x1f2   : > { %2034 = vst.msk [vmem:[#allocation4 + $0x50] sm:$0xff] %vm2023_vm11, %v1996_v45 }
 0x1f4   : > { %v1289_v33 = vpop.permute.xlu1 %1288 }
 0x1f5   : > { %v2093_v25 = vpop.permute.xlu0 %2092  ;;  %1325 = vst.msk [vmem:[#allocation4 + $0x60] sm:$0xff] %vm1312_vm5, %v1289_v33 }
 0x1f6   : > { %2131 = vst.msk [vmem:[#allocation4 + $0x50] sm:$0xff] %vm2120_vm12, %v2093_v25 }
 0x1f8   : > { %v1291_v29 = vpop.permute.xlu1 %1290 }
 0x1f9   : > { %v2095_v7 = vpop.permute.xlu0 %2094  ;;  %1326 = vst.msk [vmem:[#allocation4 + $0x68] sm:$0xff] %vm1312_vm5, %v1291_v29 }
 0x1fa   : > { %2132 = vst.msk [vmem:[#allocation4 + $0x58] sm:$0xff] %vm2120_vm12, %v2095_v7 }
 0x1fc   : > { %v1388_v35 = vpop.permute.xlu1 %1387 }
 0x1fd   : > { %v1386_v44 = vpop.permute.xlu0 %1385  ;;  %v2147_v17 = vld [vmem:[#allocation4 + $0x50] sm:$0xff]  ;;  %1423 = vst.msk [vmem:[#allocation4 + $0x68] sm:$0xff] %vm1409_vm6, %v1388_v35 }
 0x1fe   : > { %1422 = vst.msk [vmem:[#allocation4 + $0x60] sm:$0xff] %vm1409_vm6, %v1386_v44  ;;  %5805 = vmatprep.mubr.msk.bf16.mxu0 %vm2196_vm13, %v2147_v17 }
 0x200   : > { %v1517_v27 = vpop.permute.xlu1 %1516 }
 0x201   : > { %v1515_v14 = vpop.permute.xlu0 %1514  ;;  %v2148_v16 = vld [vmem:[#allocation4 + $0x58] sm:$0xff]  ;;  %1552 = vst.msk [vmem:[#allocation4 + $0x68] sm:$0xff] %vm1538_vm7, %v1517_v27 }
 0x202   : > { %1551 = vst.msk [vmem:[#allocation4 + $0x60] sm:$0xff] %vm1538_vm7, %v1515_v14  ;;  %5806 = vmatmul.mubr.msk.bf16.gmra.mrb[20].mxu0 %vm2196_vm13, %v2148_v16 }
 0x204   : > { %v1598_v60 = vpop.permute.xlu1 %1597 }
 0x205   : > { %v1596_v30 = vpop.permute.xlu0 %1595  ;;  %1633 = vst.msk [vmem:[#allocation4 + $0x68] sm:$0xff] %vm1619_vm8, %v1598_v60 }
 0x206   : > { %1632 = vst.msk [vmem:[#allocation4 + $0x60] sm:$0xff] %vm1619_vm8, %v1596_v30 }
 0x208   : > { %v1695_v62 = vpop.permute.xlu1 %1694 }
 0x209   : > { %v1693_v1 = vpop.permute.xlu0 %1692  ;;  %1730 = vst.msk [vmem:[#allocation4 + $0x68] sm:$0xff] %vm1716_vm9, %v1695_v62 }
 0x20a   : > { %1729 = vst.msk [vmem:[#allocation4 + $0x60] sm:$0xff] %vm1716_vm9, %v1693_v1 }
 0x20c   : > { %v1921_v49 = vpop.permute.xlu1 %1920 }
 0x20d   : > { %v1919_v26 = vpop.permute.xlu0 %1918  ;;  %1956 = vst.msk [vmem:[#allocation4 + $0x68] sm:$0xff] %vm1942_vm10, %v1921_v49 }
 0x20e   : > { %1955 = vst.msk [vmem:[#allocation4 + $0x60] sm:$0xff] %vm1942_vm10, %v1919_v26 }
 0x210   : > { %v2002_v12 = vpop.permute.xlu1 %2001 }
 0x211   : > { %v2000_v8 = vpop.permute.xlu0 %1999  ;;  %2037 = vst.msk [vmem:[#allocation4 + $0x68] sm:$0xff] %vm2023_vm11, %v2002_v12  ;;  %v10309_v12 = vld [vmem:[#allocation21_spill] sm:$0xff] }
 0x212   : > { %2036 = vst.msk [vmem:[#allocation4 + $0x60] sm:$0xff] %vm2023_vm11, %v2000_v8 }
 0x214   : > { %v1293_v38 = vpop.permute.xlu1 %1292 }
 0x215   : > { %v2097_v53 = vpop.permute.xlu0 %2096  ;;  %1327 = vst.msk [vmem:[#allocation4 + $0x70] sm:$0xff] %vm1312_vm5, %v1293_v38  ;;  %v10310_v38 = vld [vmem:[#allocation20_spill] sm:$0xff] }
 0x216   : > { %2133 = vst.msk [vmem:[#allocation4 + $0x60] sm:$0xff] %vm2120_vm12, %v2097_v53 }
 0x218   : > { %v1295_v13 = vpop.permute.xlu1 %1294 }
 0x219   : > { %v2099_v52 = vpop.permute.xlu0 %2098  ;;  %1328 = vst.msk [vmem:[#allocation4 + $0x78] sm:$0xff] %vm1312_vm5, %v1295_v13 }
 0x21a   : > { %2134 = vst.msk [vmem:[#allocation4 + $0x68] sm:$0xff] %vm2120_vm12, %v2099_v52 }
 0x21c   : > { %v1392_v58 = vpop.permute.xlu1 %1391 }
 0x21d   : > { %v1390_v41 = vpop.permute.xlu0 %1389  ;;  %v2149_v40 = vld [vmem:[#allocation4 + $0x60] sm:$0xff]  ;;  %1425 = vst.msk [vmem:[#allocation4 + $0x78] sm:$0xff] %vm1409_vm6, %v1392_v58 }
 0x21e   : > { %1424 = vst.msk [vmem:[#allocation4 + $0x70] sm:$0xff] %vm1409_vm6, %v1390_v41  ;;  %5809 = vmatprep.mubr.msk.bf16.mxu0 %vm2196_vm13, %v2149_v40 }
 0x220   : > { %v1521_v39 = vpop.permute.xlu1 %1520 }
 0x221   : > { %v1519_v56 = vpop.permute.xlu0 %1518  ;;  %v2150_v20 = vld [vmem:[#allocation4 + $0x68] sm:$0xff]  ;;  %1554 = vst.msk [vmem:[#allocation4 + $0x78] sm:$0xff] %vm1538_vm7, %v1521_v39 }
 0x222   : > { %1553 = vst.msk [vmem:[#allocation4 + $0x70] sm:$0xff] %vm1538_vm7, %v1519_v56  ;;  %5810 = vmatmul.mubr.msk.bf16.gmra.mrb[24].mxu0 %vm2196_vm13, %v2150_v20 }
 0x224   : > { %v1602_v55 = vpop.permute.xlu1 %1601 }
 0x225   : > { %v1600_v11 = vpop.permute.xlu0 %1599  ;;  %1635 = vst.msk [vmem:[#allocation4 + $0x78] sm:$0xff] %vm1619_vm8, %v1602_v55 }
 0x226   : > { %1634 = vst.msk [vmem:[#allocation4 + $0x70] sm:$0xff] %vm1619_vm8, %v1600_v11 }
 0x228   : > { %v1699_v4 = vpop.permute.xlu1 %1698 }
 0x229   : > { %v1697_v2 = vpop.permute.xlu0 %1696  ;;  %1732 = vst.msk [vmem:[#allocation4 + $0x78] sm:$0xff] %vm1716_vm9, %v1699_v4 }
 0x22a   : > { %1731 = vst.msk [vmem:[#allocation4 + $0x70] sm:$0xff] %vm1716_vm9, %v1697_v2 }
 0x22c   : > { %v1925_v18 = vpop.permute.xlu1 %1924 }
 0x22d   : > { %v1923_v50 = vpop.permute.xlu0 %1922  ;;  %1958 = vst.msk [vmem:[#allocation4 + $0x78] sm:$0xff] %vm1942_vm10, %v1925_v18 }
 0x22e   : > { %1957 = vst.msk [vmem:[#allocation4 + $0x70] sm:$0xff] %vm1942_vm10, %v1923_v50 }
 0x230   : > { %v2006_v47 = vpop.permute.xlu1 %2005 }
 0x231   : > { %v2004_v23 = vpop.permute.xlu0 %2003  ;;  %2039 = vst.msk [vmem:[#allocation4 + $0x78] sm:$0xff] %vm2023_vm11, %v2006_v47  ;;  %v10311_v47 = vld [vmem:[#allocation25_spill] sm:$0xff] }
 0x232   : > { %2038 = vst.msk [vmem:[#allocation4 + $0x70] sm:$0xff] %vm2023_vm11, %v2004_v23 }
 0x234   : > { %v2103_v34 = vpop.permute.xlu1 %2102 }
 0x235   : > { %v5787_v63 = vpop.f32.mrb[0].mxu0  ;;  %v2101_v22 = vpop.permute.xlu0 %2100  ;;  %2136 = vst.msk [vmem:[#allocation4 + $0x78] sm:$0xff] %vm2120_vm12, %v2103_v34 }
 0x236   : > { %v2292_v9 = vadd.f32 %v5787_v63, %v7674_v48  ;;  %2135 = vst.msk [vmem:[#allocation4 + $0x70] sm:$0xff] %vm2120_vm12, %v2101_v22  ;;  %v2283_v59 = vpop.f32.mrb[1].mxu0 }
 0x237   : > { %v2284_v57 = vadd.f32 %v7674_v48, %v2283_v59  ;;  %v5788_v6 = vpop.f32.mrb[2].mxu0 }
 0x238   : > { %v2412_v21 = vmax.f32 %v2292_v9, 0.0  ;;  %v2295_v24 = vadd.f32 %v5788_v6, %v7674_v48  ;;  %v2286_v15 = vpop.f32.mrb[3].mxu0 }
 0x239   : > { %v7681_v31 = vmax.f32 %v2284_v57, 0.0  ;;  %v2287_v0 = vadd.f32 %v7674_v48, %v2286_v15 }
 0x23a   : > { %v2413_v32 = vmax.f32 %v2295_v24, 0.0  ;;  %v2444_v54 = vrot.slane %v2412_v21, 7  ;;  %v3084_v42 = vrot.slane %v2412_v21, 1 }
 0x23b   : > { %v2411_v37 = vmax.f32 %v2287_v0, 0.0  ;;  %v10205_v19 = vrot.slane %v7681_v31, 7  ;;  %v10204_v29 = vrot.slane %v7681_v31, 1 }
 0x23c   : > { %v2445_v45 = vrot.slane %v2413_v32, 7  ;;  %v2779_v33 = vpack.c.bf16 %v2413_v32, %v2412_v21  ;;  %v3085_v25 = vrot.slane %v2413_v32, 1  ;;  %v2152_v16 = vld [vmem:[#allocation4 + $0x78] sm:$0xff] }
 0x23d   : > { %v2443_v7 = vrot.slane %v2411_v37, 7  ;;  %v7687_v35 = vpack.c.bf16 %v2411_v37, %v7681_v31  ;;  %v3083_v44 = vrot.slane %v2411_v37, 1  ;;  %v2151_v17 = vld [vmem:[#allocation4 + $0x70] sm:$0xff] }
 0x23e   : > { %v2502_v27 = vsel %vm1118_vm2, %v2444_v54, %v2445_v45  ;;  %v3142_v14 = vsel %vm1765_vm3, %v3084_v42, %v3085_v25  ;;  %2924 = vrot.lane.b32.xlu1 %v2779_v33, %s6083_s24  ;;  %5813 = vmatprep.mubr.msk.bf16.mxu0 %vm2196_vm13, %v2151_v17 }
 0x23f   : > { %v2503_v60 = vsel %vm1118_vm2, %v2443_v7, %v2444_v54  ;;  %v7701_v30 = vsel %vm1118_vm2, %v10205_v19, %v2443_v7  ;;  %v3143_v62 = vsel %vm1765_vm3, %v3083_v44, %v3084_v42  ;;  %v3144_v1 = vsel %vm1765_vm3, %v10204_v29, %v3083_v44  ;;  %2922 = vrot.lane.b32.xlu0 %v7687_v35, %s6083_s24  ;;  %v10313_v44 = vld [vmem:[#allocation15_spill] sm:$0xff]  ;;  %v10358_v19 = vld [vmem:[#allocation66_spill] sm:$0xff] }
 0x240   : > { %5814 = vmatmul.mubr.msk.bf16.gmra.mrb[28].mxu0 %vm2196_vm13, %v2152_v16  ;;  %v2508_v49 = vmul.f32 %v2503_v60, %v6559_v51  ;;  %v2509_v26 = vmul.f32 %v2502_v27, %v6583_v61  ;;  %v3146_v8 = vmul.f32 %v3144_v1, %v10309_v12  ;;  %v3147_v53 = vmul.f32 %v3143_v62, %v10310_v38  ;;  %v10314_v27 = vld [vmem:[#allocation16_spill] sm:$0xff]  ;;  %v10315_v1 = vld [vmem:[#allocation14_spill] sm:$0xff] }
 0x241   : > { %v3148_v23 = vmul.f32 %v3142_v14, %v10311_v47  ;;  %v10367_v51 = vld [vmem:[#allocation58_spill] sm:$0xff] }
 0x242   : > { %v2539_v13 = vpack.c.bf16 %v2509_v26, %v2508_v49  ;;  %v7716_v52 = vpack.c.bf16 %v3147_v53, %v3146_v8  ;;  %v10316_v26 = vld [vmem:[#allocation29_spill] sm:$0xff]  ;;  %v10317_v8 = vld [vmem:[#allocation28_spill] sm:$0xff] }
 0x243   : > { %v10318_v53 = vld [vmem:[#allocation17_spill] sm:$0xff] }
 0x244   : > { %2620 = vrot.lane.b32.xlu1 %v2539_v13, %s6085_s20  ;;  %2555 = vst.msk [vmem:[#allocation3 + $0x10] sm:$0xff] %vm1199_vm1, %v2539_v13  ;;  %3322 = vrot.lane.b32.xlu0 %v7716_v52, %s6089_s11 }
 0x24b   : > { %v2572_v58 = vld [vmem:[#allocation3 + $0x10] sm:$0xff] }
 0x24c   : > { %2795 = vst.msk [vmem:[#allocation3 + $0x10] sm:$0xff] %vm1199_vm1, %v2779_v33  ;;  %2588 = vst.msk [vmem:[#allocation4 + $0x10] sm:$0xff] %vm1199_vm1, %v2572_v58  ;;  %v10312_v33 = vld [vmem:[#allocation24_spill] sm:$0xff] }
 0x255   : > { %v5791_v41 = vpop.f32.mrb[4].mxu0 }
 0x256   : > { %v2308_v40 = vadd.f32 %v5791_v41, %v7674_v48  ;;  %v2299_v39 = vpop.f32.mrb[5].mxu0  ;;  %v7763_v41 = vld [vmem:[#allocation3 + $0x10] sm:$0xff] }
 0x257   : > { %v2300_v56 = vadd.f32 %v7674_v48, %v2299_v39  ;;  %v5792_v20 = vpop.f32.mrb[6].mxu0 }
 0x258   : > { %v2416_v55 = vmax.f32 %v2308_v40, 0.0  ;;  %v2311_v11 = vadd.f32 %v5792_v20, %v7674_v48  ;;  %v2302_v4 = vpop.f32.mrb[7].mxu0 }
 0x259   : > { %v2414_v2 = vmax.f32 %v2300_v56, 0.0  ;;  %v2303_v18 = vadd.f32 %v7674_v48, %v2302_v4 }
 0x25a   : > { %v7728_v50 = vmax.f32 %v2311_v11, 0.0  ;;  %v2448_v63 = vrot.slane %v2416_v55, 7  ;;  %v3088_v59 = vrot.slane %v2416_v55, 1 }
 0x25b   : > { %v2446_v22 = vrot.slane %v2414_v2, 7  ;;  %v3086_v9 = vrot.slane %v2414_v2, 1  ;;  %v2415_v34 = vmax.f32 %v2303_v18, 0.0 }
 0x25c   : > { %v2449_v57 = vrot.slane %v7728_v50, 7  ;;  %v2781_v6 = vpack.c.bf16 %v7728_v50, %v2416_v55  ;;  %v3089_v21 = vrot.slane %v7728_v50, 1 }
 0x25d   : > { %v2501_v24 = vsel %vm1118_vm2, %v2445_v45, %v2446_v22  ;;  %v3141_v15 = vsel %vm1765_vm3, %v3085_v25, %v3086_v9  ;;  %v2447_v0 = vrot.slane %v2415_v34, 7  ;;  %v2780_v32 = vpack.c.bf16 %v2415_v34, %v2414_v2 }
 0x25e   : > { %v2498_v54 = vsel %vm1118_vm2, %v2448_v63, %v2449_v57  ;;  %v3138_v42 = vsel %vm1765_vm3, %v3088_v59, %v3089_v21  ;;  %v3087_v37 = vrot.slane %v2415_v34, 1  ;;  %2928 = vrot.lane.b32.xlu1 %v2781_v6, %s6083_s24  ;;  %v3149_v45 = vmul.f32 %v3141_v15, %v10312_v33 }
 0x25f   : > { %v2499_v25 = vsel %vm1118_vm2, %v2447_v0, %v2448_v63  ;;  %v2500_v7 = vsel %vm1118_vm2, %v2446_v22, %v2447_v0  ;;  %2926 = vrot.lane.b32.xlu0 %v2780_v32, %s6083_s24  ;;  %v2510_v17 = vmul.f32 %v2501_v24, %v10313_v44  ;;  %v2513_v14 = vmul.f32 %v2498_v54, %v10314_v27 }
 0x260   : > { %v3139_v16 = vsel %vm1765_vm3, %v3087_v37, %v3088_v59  ;;  %v3140_v60 = vsel %vm1765_vm3, %v3086_v9, %v3087_v37  ;;  %v3179_v62 = vpack.c.bf16 %v3149_v45, %v3148_v23  ;;  %v2511_v49 = vmul.f32 %v2500_v7, %v10315_v1 }
 0x261   : > { %v3150_v12 = vmul.f32 %v3140_v60, %v10316_v26  ;;  %v3151_v38 = vmul.f32 %v3139_v16, %v10317_v8  ;;  %v2512_v13 = vmul.f32 %v2499_v25, %v10318_v53  ;;  %v10323_v53 = vld [vmem:[#allocation18_spill] sm:$0xff] }
 0x262   : > { %3324 = vrot.lane.b32.xlu1 %v3179_v62, %s6089_s11  ;;  %v2540_v40 = vpack.c.bf16 %v2511_v49, %v2510_v17  ;;  %3195 = vst.msk [vmem:[#allocation3 + $0x10] sm:$0xff] %vm1199_vm1, %v3179_v62  ;;  %v10321_v62 = vld [vmem:[#allocation19_spill] sm:$0xff]  ;;  %v10322_v49 = vld [vmem:[#allocation22_spill] sm:$0xff] }
 0x263   : > { %2714 = vrot.lane.b32.xlu0 %v2572_v58, %s6086_s26  ;;  %v3180_v39 = vpack.c.bf16 %v3151_v38, %v3150_v12  ;;  %v2541_v56 = vpack.c.bf16 %v2513_v14, %v2512_v13 }
 0x264   : > { %2556 = vst.msk [vmem:[#allocation3 + $0x18] sm:$0xff] %vm1199_vm1, %v2540_v40 }
 0x265   : > { %2557 = vst.msk [vmem:[#allocation3 + $0x20] sm:$0xff] %vm1199_vm1, %v2541_v56 }
 0x266   : > { %2622 = vrot.lane.b32.xlu1 %v2540_v40, %s6085_s20  ;;  %v10324_v40 = vld [vmem:[#allocation23_spill] sm:$0xff] }
 0x267   : > { %3326 = vrot.lane.b32.xlu0 %v3180_v39, %s6089_s11 }
 0x26a   : > { %2624 = vrot.lane.b32.xlu1 %v2541_v56, %s6085_s20  ;;  %v10325_v56 = vld [vmem:[#allocation37_spill] sm:$0xff] }
 0x26b   : > { %v2573_v20 = vld [vmem:[#allocation3 + $0x18] sm:$0xff] }
 0x26c   : > { %2796 = vst.msk [vmem:[#allocation3 + $0x18] sm:$0xff] %vm1199_vm1, %v2780_v32  ;;  %2589 = vst.msk [vmem:[#allocation4 + $0x18] sm:$0xff] %vm1199_vm1, %v2573_v20  ;;  %v2574_v55 = vld [vmem:[#allocation3 + $0x20] sm:$0xff] }
 0x26d   : > { %2797 = vst.msk [vmem:[#allocation3 + $0x20] sm:$0xff] %vm1199_vm1, %v2781_v6  ;;  %2590 = vst.msk [vmem:[#allocation4 + $0x20] sm:$0xff] %vm1199_vm1, %v2574_v55  ;;  %v10319_v6 = vld [vmem:[#allocation33_spill] sm:$0xff] }
 0x26e   : > { %v3152_v24 = vmul.f32 %v3138_v42, %v10319_v6 }
 0x273   : > { %v7777_v58 = vld [vmem:[#allocation3 + $0x18] sm:$0xff] }
 0x274   : > { %3196 = vst.msk [vmem:[#allocation3 + $0x18] sm:$0xff] %vm1199_vm1, %v3180_v39 }
 0x275   : > { %v5795_v11 = vpop.f32.mrb[8].mxu0 }
 0x276   : > { %v2324_v4 = vadd.f32 %v5795_v11, %v7674_v48  ;;  %v2315_v2 = vpop.f32.mrb[9].mxu0 }
 0x277   : > { %v2316_v18 = vadd.f32 %v7674_v48, %v2315_v2  ;;  %v5796_v47 = vpop.f32.mrb[10].mxu0 }
 0x278   : > { %v2420_v23 = vmax.f32 %v2324_v4, 0.0  ;;  %v2327_v63 = vadd.f32 %v5796_v47, %v7674_v48  ;;  %v2318_v22 = vpop.f32.mrb[11].mxu0  ;;  %v10326_v4 = vld [vmem:[#allocation36_spill] sm:$0xff] }
 0x279   : > { %v2418_v9 = vmax.f32 %v2316_v18, 0.0  ;;  %v2319_v34 = vadd.f32 %v7674_v48, %v2318_v22  ;;  %v7823_v18 = vld [vmem:[#allocation3 + $0x20] sm:$0xff] }
 0x27a   : > { %v7784_v59 = vmax.f32 %v2327_v63, 0.0  ;;  %v2452_v15 = vrot.slane %v2420_v23, 7  ;;  %v3092_v37 = vrot.slane %v2420_v23, 1 }
 0x27b   : > { %v2450_v0 = vrot.slane %v2418_v9, 7  ;;  %v3090_v32 = vrot.slane %v2418_v9, 1  ;;  %v2419_v54 = vmax.f32 %v2319_v34, 0.0 }
 0x27c   : > { %v2453_v33 = vrot.slane %v7784_v59, 7  ;;  %v2783_v45 = vpack.c.bf16 %v7784_v59, %v2420_v23  ;;  %v3093_v25 = vrot.slane %v7784_v59, 1 }
 0x27d   : > { %v2497_v7 = vsel %vm1118_vm2, %v2449_v57, %v2450_v0  ;;  %v3137_v42 = vsel %vm1765_vm3, %v3089_v21, %v3090_v32  ;;  %v2451_v44 = vrot.slane %v2419_v54, 7  ;;  %v2782_v17 = vpack.c.bf16 %v2419_v54, %v2418_v9  ;;  %v10320_v57 = vld [vmem:[#allocation32_spill] sm:$0xff] }
 0x27e   : > { %v2494_v27 = vsel %vm1118_vm2, %v2452_v15, %v2453_v33  ;;  %v3134_v14 = vsel %vm1765_vm3, %v3092_v37, %v3093_v25  ;;  %v3091_v16 = vrot.slane %v2419_v54, 1  ;;  %2932 = vrot.lane.b32.xlu1 %v2783_v45, %s6083_s24  ;;  %v3153_v50 = vmul.f32 %v3137_v42, %v10320_v57 }
 0x27f   : > { %v2495_v21 = vsel %vm1118_vm2, %v2451_v44, %v2452_v15  ;;  %v2496_v60 = vsel %vm1118_vm2, %v2450_v0, %v2451_v44  ;;  %2930 = vrot.lane.b32.xlu0 %v2782_v17, %s6083_s24  ;;  %v2514_v1 = vmul.f32 %v2497_v7, %v10321_v62  ;;  %v2517_v26 = vmul.f32 %v2494_v27, %v10322_v49  ;;  %v10327_v7 = vld [vmem:[#allocation41_spill] sm:$0xff] }
 0x280   : > { %v3135_v12 = vsel %vm1765_vm3, %v3091_v16, %v3092_v37  ;;  %v3136_v8 = vsel %vm1765_vm3, %v3090_v32, %v3091_v16  ;;  %v3181_v38 = vpack.c.bf16 %v3153_v50, %v3152_v24  ;;  %v2515_v13 = vmul.f32 %v2496_v60, %v10323_v53  ;;  %v10329_v53 = vld [vmem:[#allocation27_spill] sm:$0xff] }
 0x281   : > { %v2516_v39 = vmul.f32 %v2495_v21, %v10324_v40  ;;  %v3154_v11 = vmul.f32 %v3136_v8, %v10325_v56  ;;  %v3155_v2 = vmul.f32 %v3135_v12, %v10326_v4  ;;  %v3156_v42 = vmul.f32 %v3134_v14, %v10327_v7  ;;  %v10330_v40 = vld [vmem:[#allocation30_spill] sm:$0xff] }
 0x282   : > { %3328 = vrot.lane.b32.xlu1 %v3181_v38, %s6089_s11  ;;  %v2542_v47 = vpack.c.bf16 %v2515_v13, %v2514_v1  ;;  %3197 = vst.msk [vmem:[#allocation3 + $0x20] sm:$0xff] %vm1199_vm1, %v3181_v38 }
 0x283   : > { %3018 = vrot.lane.b32.xlu0 %v7763_v41, %s6088_s3  ;;  %v2543_v23 = vpack.c.bf16 %v2517_v26, %v2516_v39  ;;  %v3182_v63 = vpack.c.bf16 %v3155_v2, %v3154_v11  ;;  %v10331_v2 = vld [vmem:[#allocation26_spill] sm:$0xff] }
 0x284   : > { %2558 = vst.msk [vmem:[#allocation3 + $0x28] sm:$0xff] %vm1199_vm1, %v2542_v47 }
 0x285   : > { %2559 = vst.msk [vmem:[#allocation3 + $0x30] sm:$0xff] %vm1199_vm1, %v2543_v23 }
 0x286   : > { %2716 = vrot.lane.b32.xlu1 %v2573_v20, %s6086_s26 }
 0x287   : > { %2718 = vrot.lane.b32.xlu0 %v2574_v55, %s6086_s26 }
 0x28a   : > { %2626 = vrot.lane.b32.xlu1 %v2542_v47, %s6085_s20 }
 0x28b   : > { %2846 = vrot.lane.b32.xlu0 %v7763_v41, %s6084_s28  ;;  %v2575_v22 = vld [vmem:[#allocation3 + $0x28] sm:$0xff] }
 0x28c   : > { %2798 = vst.msk [vmem:[#allocation3 + $0x28] sm:$0xff] %vm1199_vm1, %v2782_v17  ;;  %2591 = vst.msk [vmem:[#allocation4 + $0x28] sm:$0xff] %vm1199_vm1, %v2575_v22  ;;  %v7838_v9 = vld [vmem:[#allocation3 + $0x30] sm:$0xff] }
 0x28d   : > { %2799 = vst.msk [vmem:[#allocation3 + $0x30] sm:$0xff] %vm1199_vm1, %v2783_v45  ;;  %2592 = vst.msk [vmem:[#allocation4 + $0x30] sm:$0xff] %vm1199_vm1, %v7838_v9 }
 0x28e   : > { %2628 = vrot.lane.b32.xlu1 %v2543_v23, %s6085_s20  ;;  %v10332_v23 = vld [vmem:[#allocation31_spill] sm:$0xff] }
 0x28f   : > { %3330 = vrot.lane.b32.xlu0 %v3182_v63, %s6089_s11 }
 0x293   : > { %v7845_v20 = vld [vmem:[#allocation3 + $0x28] sm:$0xff] }
 0x294   : > { %3198 = vst.msk [vmem:[#allocation3 + $0x28] sm:$0xff] %vm1199_vm1, %v3182_v63 }
 0x295   : > { %v5799_v41 = vpop.f32.mrb[12].mxu0 }
 0x296   : > { %v2340_v55 = vadd.f32 %v5799_v41, %v7674_v48  ;;  %v2331_v34 = vpop.f32.mrb[13].mxu0  ;;  %v10333_v41 = vld [vmem:[#allocation45_spill] sm:$0xff] }
 0x297   : > { %v2332_v6 = vadd.f32 %v7674_v48, %v2331_v34  ;;  %v5800_v24 = vpop.f32.mrb[14].mxu0  ;;  %v10334_v34 = vld [vmem:[#allocation44_spill] sm:$0xff] }
 0x298   : > { %v2424_v15 = vmax.f32 %v2340_v55, 0.0  ;;  %v2343_v0 = vadd.f32 %v5800_v24, %v7674_v48  ;;  %v2334_v32 = vpop.f32.mrb[15].mxu0  ;;  %v7891_v24 = vld [vmem:[#allocation3 + $0x30] sm:$0xff] }
 0x299   : > { %v2422_v54 = vmax.f32 %v2332_v6, 0.0  ;;  %v2335_v37 = vadd.f32 %v7674_v48, %v2334_v32 }
 0x29a   : > { %v7852_v45 = vmax.f32 %v2343_v0, 0.0  ;;  %v2456_v44 = vrot.slane %v2424_v15, 7  ;;  %v3096_v57 = vrot.slane %v2424_v15, 1 }
 0x29b   : > { %v2454_v17 = vrot.slane %v2422_v54, 7  ;;  %v3094_v27 = vrot.slane %v2422_v54, 1  ;;  %v2423_v16 = vmax.f32 %v2335_v37, 0.0 }
 0x29c   : > { %v2457_v50 = vrot.slane %v7852_v45, 7  ;;  %v2785_v21 = vpack.c.bf16 %v7852_v45, %v2424_v15  ;;  %v3097_v60 = vrot.slane %v7852_v45, 1  ;;  %v3386_v15 = vld [vmem:[#allocation3 + $0x10] sm:$0xff]  ;;  %v10336_v45 = vld [vmem:[#allocation48_spill] sm:$0xff] }
 0x29d   : > { %v2493_v62 = vsel %vm1118_vm2, %v2453_v33, %v2454_v17  ;;  %v3133_v14 = vsel %vm1765_vm3, %v3093_v25, %v3094_v27  ;;  %v2455_v1 = vrot.slane %v2423_v16, 7  ;;  %v2784_v49 = vpack.c.bf16 %v2423_v16, %v2422_v54  ;;  %v10328_v33 = vld [vmem:[#allocation40_spill] sm:$0xff] }
 0x29e   : > { %v2490_v26 = vsel %vm1118_vm2, %v2456_v44, %v2457_v50  ;;  %v3130_v12 = vsel %vm1765_vm3, %v3096_v57, %v3097_v60  ;;  %v3095_v8 = vrot.slane %v2423_v16, 1  ;;  %2936 = vrot.lane.b32.xlu1 %v2785_v21, %s6083_s24  ;;  %v3157_v59 = vmul.f32 %v3133_v14, %v10328_v33  ;;  %v10335_v14 = vld [vmem:[#allocation49_spill] sm:$0xff] }
 0x29f   : > { %v2491_v25 = vsel %vm1118_vm2, %v2455_v1, %v2456_v44  ;;  %v2492_v38 = vsel %vm1118_vm2, %v2454_v17, %v2455_v1  ;;  %2934 = vrot.lane.b32.xlu0 %v2784_v49, %s6083_s24  ;;  %v2518_v13 = vmul.f32 %v2493_v62, %v10329_v53  ;;  %v2521_v39 = vmul.f32 %v2490_v26, %v10330_v40 }
 0x2a0   : > { %v3131_v56 = vsel %vm1765_vm3, %v3095_v8, %v3096_v57  ;;  %v3132_v11 = vsel %vm1765_vm3, %v3094_v27, %v3095_v8  ;;  %v3183_v4 = vpack.c.bf16 %v3157_v59, %v3156_v42  ;;  %v2519_v47 = vmul.f32 %v2492_v38, %v10331_v2 }
 0x2a1   : > { %v2520_v63 = vmul.f32 %v2491_v25, %v10332_v23  ;;  %v3158_v55 = vmul.f32 %v3132_v11, %v10333_v41  ;;  %v3159_v6 = vmul.f32 %v3131_v56, %v10334_v34  ;;  %v3160_v1 = vmul.f32 %v3130_v12, %v10335_v14 }
 0x2a2   : > { %3332 = vrot.lane.b32.xlu1 %v3183_v4, %s6089_s11  ;;  %v2544_v0 = vpack.c.bf16 %v2519_v47, %v2518_v13  ;;  %3199 = vst.msk [vmem:[#allocation3 + $0x30] sm:$0xff] %vm1199_vm1, %v3183_v4  ;;  %v10337_v47 = vld [vmem:[#allocation35_spill] sm:$0xff] }
 0x2a3   : > { %3418 = vrot.lane.b32.xlu0 %v3386_v15, %s6090_s29  ;;  %v2545_v32 = vpack.c.bf16 %v2521_v39, %v2520_v63  ;;  %v3184_v54 = vpack.c.bf16 %v3159_v6, %v3158_v55  ;;  %v10338_v63 = vld [vmem:[#allocation38_spill] sm:$0xff] }
 0x2a4   : > { %2560 = vst.msk [vmem:[#allocation3 + $0x38] sm:$0xff] %vm1199_vm1, %v2544_v0 }
 0x2a5   : > { %2561 = vst.msk [vmem:[#allocation3 + $0x40] sm:$0xff] %vm1199_vm1, %v2545_v32 }
 0x2a6   : > { %3020 = vrot.lane.b32.xlu1 %v7777_v58, %s6088_s3 }
 0x2a7   : > { %3022 = vrot.lane.b32.xlu0 %v7823_v18, %s6088_s3 }
 0x2aa   : > { %2720 = vrot.lane.b32.xlu1 %v2575_v22, %s6086_s26 }
 0x2ab   : > { %3246 = vrot.lane.b32.xlu0 %v3386_v15, %s6087_s0  ;;  %v7904_v37 = vld [vmem:[#allocation3 + $0x38] sm:$0xff]  ;;  %v10339_v15 = vld [vmem:[#allocation34_spill] sm:$0xff] }
 0x2ac   : > { %2800 = vst.msk [vmem:[#allocation3 + $0x38] sm:$0xff] %vm1199_vm1, %v2784_v49  ;;  %2593 = vst.msk [vmem:[#allocation4 + $0x38] sm:$0xff] %vm1199_vm1, %v7904_v37  ;;  %v7909_v7 = vld [vmem:[#allocation3 + $0x40] sm:$0xff] }
 0x2ad   : > { %2801 = vst.msk [vmem:[#allocation3 + $0x40] sm:$0xff] %vm1199_vm1, %v2785_v21  ;;  %2594 = vst.msk [vmem:[#allocation4 + $0x40] sm:$0xff] %vm1199_vm1, %v7909_v7 }
 0x2ae   : > { %2848 = vrot.lane.b32.xlu1 %v7777_v58, %s6084_s28 }
 0x2af   : > { %2722 = vrot.lane.b32.xlu0 %v7838_v9, %s6086_s26 }
 0x2b0   : > { %v7981_v14 = vpop.permute.xlu1 %2924 }
 0x2b2   : > { %2630 = vrot.lane.b32.xlu1 %v2544_v0, %s6085_s20 }
 0x2b3   : > { %2850 = vrot.lane.b32.xlu0 %v7823_v18, %s6084_s28  ;;  %v7921_v22 = vld [vmem:[#allocation3 + $0x38] sm:$0xff] }
 0x2b4   : > { %3200 = vst.msk [vmem:[#allocation3 + $0x38] sm:$0xff] %vm1199_vm1, %v3184_v54 }
 0x2b5   : > { %v5803_v42 = vpop.f32.mrb[16].mxu0 }
 0x2b6   : > { %v2356_v44 = vadd.f32 %v5803_v42, %v7674_v48  ;;  %2632 = vrot.lane.b32.xlu1 %v2545_v32, %s6085_s20  ;;  %v2347_v17 = vpop.f32.mrb[17].mxu0  ;;  %v10340_v32 = vld [vmem:[#allocation39_spill] sm:$0xff]  ;;  %v10341_v42 = vld [vmem:[#allocation53_spill] sm:$0xff] }
 0x2b7   : > { %v2348_v58 = vadd.f32 %v7674_v48, %v2347_v17  ;;  %3334 = vrot.lane.b32.xlu0 %v3184_v54, %s6089_s11  ;;  %v5804_v9 = vpop.f32.mrb[18].mxu0  ;;  %v10342_v17 = vld [vmem:[#allocation52_spill] sm:$0xff] }
 0x2b8   : > { %v2428_v27 = vmax.f32 %v2356_v44, 0.0  ;;  %v2359_v16 = vadd.f32 %v5804_v9, %v7674_v48  ;;  %v2350_v57 = vpop.f32.mrb[19].mxu0  ;;  %v7971_v9 = vld [vmem:[#allocation3 + $0x40] sm:$0xff] }
 0x2b9   : > { %v2426_v18 = vmax.f32 %v2348_v58, 0.0  ;;  %v2351_v21 = vadd.f32 %v7674_v48, %v2350_v57 }
 0x2ba   : > { %v7930_v62 = vmax.f32 %v2359_v16, 0.0  ;;  %v2460_v49 = vrot.slane %v2428_v27, 7  ;;  %v3100_v59 = vrot.slane %v2428_v27, 1 }
 0x2bb   : > { %v2458_v26 = vrot.slane %v2426_v18, 7  ;;  %v3098_v8 = vrot.slane %v2426_v18, 1  ;;  %v2427_v33 = vmax.f32 %v2351_v21, 0.0  ;;  %v3388_v21 = vld [vmem:[#allocation3 + $0x20] sm:$0xff] }
 0x2bc   : > { %v2461_v25 = vrot.slane %v7930_v62, 7  ;;  %v2787_v38 = vpack.c.bf16 %v7930_v62, %v2428_v27  ;;  %v3101_v53 = vrot.slane %v7930_v62, 1  ;;  %v3387_v27 = vld [vmem:[#allocation3 + $0x18] sm:$0xff]  ;;  %v10345_v62 = vld [vmem:[#allocation56_spill] sm:$0xff] }
 0x2bd   : > { %v2489_v13 = vsel %vm1118_vm2, %v2457_v50, %v2458_v26  ;;  %v3129_v12 = vsel %vm1765_vm3, %v3097_v60, %v3098_v8  ;;  %v2459_v40 = vrot.slane %v2427_v33, 7  ;;  %v2786_v39 = vpack.c.bf16 %v2427_v33, %v2426_v18 }
 0x2be   : > { %v2486_v56 = vsel %vm1118_vm2, %v2460_v49, %v2461_v25  ;;  %v7952_v11 = vsel %vm1765_vm3, %v3100_v59, %v3101_v53  ;;  %v3099_v4 = vrot.slane %v2427_v33, 1  ;;  %2940 = vrot.lane.b32.xlu1 %v2787_v38, %s6083_s24  ;;  %v3161_v50 = vmul.f32 %v3129_v12, %v10336_v45 }
 0x2bf   : > { %v2487_v60 = vsel %vm1118_vm2, %v2459_v40, %v2460_v49  ;;  %v2488_v2 = vsel %vm1118_vm2, %v2458_v26, %v2459_v40  ;;  %2938 = vrot.lane.b32.xlu0 %v2786_v39, %s6083_s24  ;;  %v2522_v23 = vmul.f32 %v2489_v13, %v10337_v47  ;;  %v2525_v41 = vmul.f32 %v2486_v56, %v10338_v63  ;;  %v7990_v26 = vpop.permute.xlu1 %2620 }
 0x2c0   : > { %v3127_v55 = vsel %vm1765_vm3, %v3099_v4, %v3100_v59  ;;  %v3128_v34 = vsel %vm1765_vm3, %v3098_v8, %v3099_v4  ;;  %v3185_v6 = vpack.c.bf16 %v3161_v50, %v3160_v1  ;;  %v2523_v0 = vmul.f32 %v2488_v2, %v10339_v15  ;;  %v7984_v1 = vpop.permute.xlu0 %2842 }
 0x2c1   : > { %v2524_v54 = vmul.f32 %v2487_v60, %v10340_v32  ;;  %v3162_v44 = vmul.f32 %v3128_v34, %v10341_v42  ;;  %v3163_v58 = vmul.f32 %v3127_v55, %v10342_v17 }
 0x2c2   : > { %3336 = vrot.lane.b32.xlu1 %v3185_v6, %s6089_s11  ;;  %v2546_v16 = vpack.c.bf16 %v2523_v0, %v2522_v23  ;;  %3201 = vst.msk [vmem:[#allocation3 + $0x40] sm:$0xff] %vm1199_vm1, %v3185_v6  ;;  %v10344_v23 = vld [vmem:[#allocation57_spill] sm:$0xff] }
 0x2c3   : > { %3420 = vrot.lane.b32.xlu0 %v3387_v27, %s6090_s29  ;;  %v2547_v57 = vpack.c.bf16 %v2525_v41, %v2524_v54  ;;  %v3186_v18 = vpack.c.bf16 %v3163_v58, %v3162_v44  ;;  %v3164_v63 = vmul.f32 %v7952_v11, %v10344_v23  ;;  %v10350_v23 = vld [vmem:[#allocation61_spill] sm:$0xff] }
 0x2c4   : > { %2562 = vst.msk [vmem:[#allocation3 + $0x48] sm:$0xff] %vm1199_vm1, %v2546_v16  ;;  %v8005_v59 = vpop.permute.xlu0 %3242 }
 0x2c5   : > { %2563 = vst.msk [vmem:[#allocation3 + $0x50] sm:$0xff] %vm1199_vm1, %v2547_v57 }
 0x2c6   : > { %3024 = vrot.lane.b32.xlu1 %v7845_v20, %s6088_s3 }
 0x2c7   : > { %3422 = vrot.lane.b32.xlu0 %v3388_v21, %s6090_s29 }
 0x2ca   : > { %3248 = vrot.lane.b32.xlu1 %v3387_v27, %s6087_s0 }
 0x2cb   : > { %3026 = vrot.lane.b32.xlu0 %v7891_v24, %s6088_s3  ;;  %v7988_v49 = vld [vmem:[#allocation3 + $0x48] sm:$0xff] }
 0x2cc   : > { %2802 = vst.msk [vmem:[#allocation3 + $0x48] sm:$0xff] %vm1199_vm1, %v2786_v39  ;;  %2595 = vst.msk [vmem:[#allocation4 + $0x48] sm:$0xff] %vm1199_vm1, %v7988_v49  ;;  %v7995_v8 = vld [vmem:[#allocation3 + $0x50] sm:$0xff]  ;;  %v8018_v39 = vpop.permute.xlu0 %2922 }
 0x2cd   : > { %2803 = vst.msk [vmem:[#allocation3 + $0x50] sm:$0xff] %vm1199_vm1, %v2787_v38  ;;  %2596 = vst.msk [vmem:[#allocation4 + $0x50] sm:$0xff] %vm1199_vm1, %v7995_v8 }
 0x2ce   : > { %2724 = vrot.lane.b32.xlu1 %v7904_v37, %s6086_s26 }
 0x2cf   : > { %3250 = vrot.lane.b32.xlu0 %v3388_v21, %s6087_s0  ;;  %v10346_v21 = vld [vmem:[#allocation43_spill] sm:$0xff] }
 0x2d0   : > { %v8003_v33 = vpop.permute.xlu1 %2928  ;;  %v8035_v42 = vpop.permute.xlu0 %3322 }
 0x2d2   : > { %2852 = vrot.lane.b32.xlu1 %v7845_v20, %s6084_s28 }
 0x2d3   : > { %2726 = vrot.lane.b32.xlu0 %v7909_v7, %s6086_s26  ;;  %v8011_v13 = vld [vmem:[#allocation3 + $0x48] sm:$0xff] }
 0x2d4   : > { %v8013_v38 = vpop.permute.xlu1 %3324  ;;  %3202 = vst.msk [vmem:[#allocation3 + $0x48] sm:$0xff] %vm1199_vm1, %v3186_v18 }
 0x2d5   : > { %10343 = vst [vmem:[#allocation68_spill] sm:$0xff] %v8013_v38  ;;  %v5807_v12 = vpop.f32.mrb[20].mxu0 }
 0x2d6   : > { %v2372_v37 = vadd.f32 %v5807_v12, %v7674_v48  ;;  %2634 = vrot.lane.b32.xlu1 %v2546_v16, %s6085_s20  ;;  %v2363_v40 = vpop.f32.mrb[21].mxu0 }
 0x2d7   : > { %v2364_v56 = vadd.f32 %v7674_v48, %v2363_v40  ;;  %2854 = vrot.lane.b32.xlu0 %v7891_v24, %s6084_s28  ;;  %v5808_v20 = vpop.f32.mrb[22].mxu0 }
 0x2d8   : > { %v2432_v7 = vmax.f32 %v2372_v37, 0.0  ;;  %v2375_v4 = vadd.f32 %v5808_v20, %v7674_v48  ;;  %v2623_v45 = vpop.permute.xlu1 %2622  ;;  %v2366_v50 = vpop.f32.mrb[23].mxu0  ;;  %v10347_v37 = vld [vmem:[#allocation46_spill] sm:$0xff] }
 0x2d9   : > { %v2430_v60 = vmax.f32 %v2364_v56, 0.0  ;;  %2668 = vst.msk [vmem:[#allocation4 + $0x10] sm:$0xff] %vm1312_vm5, %v2623_v45  ;;  %v2367_v2 = vadd.f32 %v7674_v48, %v2366_v50  ;;  %v8070_v50 = vpop.permute.xlu0 %2926 }
 0x2da   : > { %v8026_v47 = vmax.f32 %v2375_v4, 0.0  ;;  %2636 = vrot.lane.b32.xlu1 %v2547_v57, %s6085_s20  ;;  %v2464_v41 = vrot.slane %v2432_v7, 7  ;;  %v3104_v6 = vrot.slane %v2432_v7, 1  ;;  %v10348_v4 = vld [vmem:[#allocation42_spill] sm:$0xff] }
 0x2db   : > { %v2462_v24 = vrot.slane %v2430_v60, 7  ;;  %v3102_v55 = vrot.slane %v2430_v60, 1  ;;  %v2431_v34 = vmax.f32 %v2367_v2, 0.0  ;;  %3338 = vrot.lane.b32.xlu0 %v3186_v18, %s6089_s11 }
 0x2dc   : > { %v2465_v15 = vrot.slane %v8026_v47, 7  ;;  %v2789_v0 = vpack.c.bf16 %v8026_v47, %v2432_v7  ;;  %v3105_v32 = vrot.slane %v8026_v47, 1  ;;  %v2625_v54 = vpop.permute.xlu1 %2624 }
 0x2dd   : > { %v2485_v11 = vsel %vm1118_vm2, %v2461_v25, %v2462_v24  ;;  %v3125_v44 = vsel %vm1765_vm3, %v3101_v53, %v3102_v55  ;;  %v2463_v17 = vrot.slane %v2431_v34, 7  ;;  %v2788_v58 = vpack.c.bf16 %v2431_v34, %v2430_v60  ;;  %2669 = vst.msk [vmem:[#allocation4 + $0x18] sm:$0xff] %vm1312_vm5, %v2625_v54  ;;  %v10349_v60 = vld [vmem:[#allocation47_spill] sm:$0xff]  ;;  %v8075_v54 = vld [vmem:[#allocation3 + $0x50] sm:$0xff] }
 0x2de   : > { %v2482_v27 = vsel %vm1118_vm2, %v2464_v41, %v2465_v15  ;;  %v8054_v16 = vsel %vm1765_vm3, %v3104_v6, %v3105_v32  ;;  %v3103_v25 = vrot.slane %v2431_v34, 1  ;;  %2944 = vrot.lane.b32.xlu1 %v2789_v0, %s6083_s24  ;;  %v3165_v53 = vmul.f32 %v3125_v44, %v10345_v62  ;;  %v3390_v44 = vld [vmem:[#allocation3 + $0x30] sm:$0xff] }
 0x2df   : > { %v2483_v57 = vsel %vm1118_vm2, %v2463_v17, %v2464_v41  ;;  %v2484_v18 = vsel %vm1118_vm2, %v2462_v24, %v2463_v17  ;;  %2942 = vrot.lane.b32.xlu0 %v2788_v58, %s6083_s24  ;;  %v2526_v12 = vmul.f32 %v2485_v11, %v10346_v21  ;;  %v2529_v40 = vmul.f32 %v2482_v27, %v10347_v37  ;;  %v10351_v24 = vld [vmem:[#allocation60_spill] sm:$0xff]  ;;  %v3389_v11 = vld [vmem:[#allocation3 + $0x28] sm:$0xff]  ;;  %v8084_v17 = vpop.permute.xlu0 %2714 }
 0x2e0   : > { %v3123_v56 = vsel %vm1765_vm3, %v3103_v25, %v3104_v6  ;;  %v3124_v20 = vsel %vm1765_vm3, %v3102_v55, %v3103_v25  ;;  %v3187_v7 = vpack.c.bf16 %v3165_v53, %v3164_v63  ;;  %v2527_v45 = vmul.f32 %v2484_v18, %v10348_v4 }
 0x2e1   : > { %v2528_v2 = vmul.f32 %v2483_v57, %v10349_v60  ;;  %v3166_v41 = vmul.f32 %v3124_v20, %v10350_v23  ;;  %v3167_v34 = vmul.f32 %v3123_v56, %v10351_v24 }
 0x2e2   : > { %3340 = vrot.lane.b32.xlu1 %v3187_v7, %s6089_s11  ;;  %v2548_v6 = vpack.c.bf16 %v2527_v45, %v2526_v12  ;;  %3203 = vst.msk [vmem:[#allocation3 + $0x50] sm:$0xff] %vm1199_vm1, %v3187_v7 }
 0x2e3   : > { %3424 = vrot.lane.b32.xlu0 %v3389_v11, %s6090_s29  ;;  %v2549_v63 = vpack.c.bf16 %v2529_v40, %v2528_v2  ;;  %v3188_v55 = vpack.c.bf16 %v3167_v34, %v3166_v41  ;;  %v8097_v62 = vpop.permute.xlu0 %3326  ;;  %v10352_v2 = vld [vmem:[#allocation65_spill] sm:$0xff] }
 0x2e4   : > { %2564 = vst.msk [vmem:[#allocation3 + $0x58] sm:$0xff] %vm1199_vm1, %v2548_v6 }
 0x2e5   : > { %2565 = vst.msk [vmem:[#allocation3 + $0x60] sm:$0xff] %vm1199_vm1, %v2549_v63 }
 0x2e6   : > { %3028 = vrot.lane.b32.xlu1 %v7921_v22, %s6088_s3 }
 0x2e7   : > { %3426 = vrot.lane.b32.xlu0 %v3390_v44, %s6090_s29 }
 0x2ea   : > { %3252 = vrot.lane.b32.xlu1 %v3389_v11, %s6087_s0 }
 0x2eb   : > { %3030 = vrot.lane.b32.xlu0 %v7971_v9, %s6088_s3  ;;  %v8090_v27 = vld [vmem:[#allocation3 + $0x58] sm:$0xff] }
 0x2ec   : > { %2804 = vst.msk [vmem:[#allocation3 + $0x58] sm:$0xff] %vm1199_vm1, %v2788_v58  ;;  %2597 = vst.msk [vmem:[#allocation4 + $0x58] sm:$0xff] %vm1199_vm1, %v8090_v27  ;;  %v8095_v25 = vld [vmem:[#allocation3 + $0x60] sm:$0xff] }
 0x2ed   : > { %2805 = vst.msk [vmem:[#allocation3 + $0x60] sm:$0xff] %vm1199_vm1, %v2789_v0  ;;  %2598 = vst.msk [vmem:[#allocation4 + $0x60] sm:$0xff] %vm1199_vm1, %v8095_v25 }
 0x2ee   : > { %2728 = vrot.lane.b32.xlu1 %v7988_v49, %s6086_s26 }
 0x2ef   : > { %3254 = vrot.lane.b32.xlu0 %v3390_v44, %s6087_s0 }
 0x2f0   : > { %v8105_v53 = vpop.permute.xlu1 %2932 }
 0x2f1   : > { %v8107_v58 = vpop.permute.xlu0 %2930 }
 0x2f2   : > { %2856 = vrot.lane.b32.xlu1 %v7921_v22, %s6084_s28 }
 0x2f3   : > { %2730 = vrot.lane.b32.xlu0 %v7995_v8, %s6086_s26  ;;  %v8113_v57 = vld [vmem:[#allocation3 + $0x58] sm:$0xff] }
 0x2f4   : > { %v8115_v0 = vpop.permute.xlu1 %3328  ;;  %3204 = vst.msk [vmem:[#allocation3 + $0x58] sm:$0xff] %vm1199_vm1, %v3188_v55 }
 0x2f5   : > { %v5811_v18 = vpop.f32.mrb[24].mxu0  ;;  %v8118_v49 = vpop.permute.xlu0 %3018 }
 0x2f6   : > { %v2388_v21 = vadd.f32 %v5811_v18, %v7674_v48  ;;  %2638 = vrot.lane.b32.xlu1 %v2548_v6, %s6085_s20  ;;  %v2379_v12 = vpop.f32.mrb[25].mxu0 }
 0x2f7   : > { %v2380_v37 = vadd.f32 %v7674_v48, %v2379_v12  ;;  %2858 = vrot.lane.b32.xlu0 %v7971_v9, %s6084_s28  ;;  %v5812_v22 = vpop.f32.mrb[26].mxu0  ;;  %v3168_v9 = vmul.f32 %v8054_v16, %v10352_v2  ;;  %v10355_v2 = vld [vmem:[#allocation54_spill] sm:$0xff] }
 0x2f8   : > { %v2436_v8 = vmax.f32 %v2388_v21, 0.0  ;;  %v2391_v40 = vadd.f32 %v5812_v22, %v7674_v48  ;;  %v8126_v56 = vpop.permute.xlu1 %2716  ;;  %v2382_v20 = vpop.f32.mrb[27].mxu0 }
 0x2f9   : > { %v2434_v7 = vmax.f32 %v2380_v37, 0.0  ;;  %v2383_v4 = vadd.f32 %v7674_v48, %v2382_v20  ;;  %v2719_v45 = vpop.permute.xlu0 %2718 }
 0x2fa   : > { %v8129_v60 = vmax.f32 %v2391_v40, 0.0  ;;  %2764 = vst.msk [vmem:[#allocation4 + $0x10] sm:$0xff] %vm1409_vm6, %v2719_v45  ;;  %2640 = vrot.lane.b32.xlu1 %v2549_v63, %s6085_s20  ;;  %v2468_v23 = vrot.slane %v2436_v8, 7  ;;  %v3108_v11 = vrot.slane %v2436_v8, 1 }
 0x2fb   : > { %v2466_v41 = vrot.slane %v2434_v7, 7  ;;  %v3106_v24 = vrot.slane %v2434_v7, 1  ;;  %v2435_v34 = vmax.f32 %v2383_v4, 0.0  ;;  %3342 = vrot.lane.b32.xlu0 %v3188_v55, %s6089_s11  ;;  %v10354_v4 = vld [vmem:[#allocation51_spill] sm:$0xff] }
 0x2fc   : > { %v10207_v6 = vrot.slane %v8129_v60, 7  ;;  %v8138_v44 = vpack.c.bf16 %v8129_v60, %v2436_v8  ;;  %v10206_v18 = vrot.slane %v8129_v60, 1  ;;  %v2627_v21 = vpop.permute.xlu1 %2626  ;;  %v10353_v8 = vld [vmem:[#allocation64_spill] sm:$0xff] }
 0x2fd   : > { %v2481_v16 = vsel %vm1118_vm2, %v2465_v15, %v2466_v41  ;;  %v3121_v63 = vsel %vm1765_vm3, %v3105_v32, %v3106_v24  ;;  %v2467_v55 = vrot.slane %v2435_v34, 7  ;;  %v8149_v12 = vpack.c.bf16 %v2435_v34, %v2434_v7  ;;  %2670 = vst.msk [vmem:[#allocation4 + $0x20] sm:$0xff] %vm1312_vm5, %v2627_v21  ;;  %v2847_v37 = vpop.permute.xlu0 %2846  ;;  %v3391_v32 = vld [vmem:[#allocation3 + $0x38] sm:$0xff] }
 0x2fe   : > { %v2478_v22 = vsel %vm1118_vm2, %v2468_v23, %v10207_v6  ;;  %v8160_v15 = vsel %vm1765_vm3, %v3108_v11, %v10206_v18  ;;  %v3107_v47 = vrot.slane %v2435_v34, 1  ;;  %2892 = vst.msk [vmem:[#allocation4 + $0x10] sm:$0xff] %vm1538_vm7, %v2847_v37  ;;  %v3169_v40 = vmul.f32 %v3121_v63, %v10353_v8  ;;  %v10356_v8 = vld [vmem:[#allocation50_spill] sm:$0xff]  ;;  %v10359_v18 = vld [vmem:[#allocation55_spill] sm:$0xff] }
 0x2ff   : > { %v2479_v20 = vsel %vm1118_vm2, %v2467_v55, %v2468_v23  ;;  %v2480_v7 = vsel %vm1118_vm2, %v2466_v41, %v2467_v55  ;;  %2972 = vst.msk [vmem:[#allocation4 + $0x10] sm:$0xff] %vm1619_vm8, %v8070_v50  ;;  %3428 = vrot.lane.b32.xlu0 %v3391_v32, %s6090_s29  ;;  %v2530_v45 = vmul.f32 %v2481_v16, %v10354_v4  ;;  %v10357_v41 = vld [vmem:[#allocation67_spill] sm:$0xff]  ;;  %v8182_v4 = vld [vmem:[#allocation3 + $0x60] sm:$0xff] }
 0x300   : > { %v2533_v34 = vmul.f32 %v2478_v22, %v10355_v2  ;;  %v3119_v21 = vsel %vm1765_vm3, %v3107_v47, %v3108_v11  ;;  %v3120_v63 = vsel %vm1765_vm3, %v3106_v24, %v3107_v47  ;;  %v2629_v37 = vpop.permute.xlu1 %2628  ;;  %v3189_v23 = vpack.c.bf16 %v3169_v40, %v3168_v9  ;;  %v3392_v11 = vld [vmem:[#allocation3 + $0x40] sm:$0xff] }
 0x301   : > { %v2531_v29 = vmul.f32 %v2480_v7, %v10356_v8  ;;  %v3170_v55 = vmul.f32 %v3120_v63, %v10357_v41  ;;  %v3171_v50 = vmul.f32 %v3119_v21, %v10358_v19  ;;  %2671 = vst.msk [vmem:[#allocation4 + $0x28] sm:$0xff] %vm1312_vm5, %v2629_v37  ;;  %v2532_v16 = vmul.f32 %v2479_v20, %v10359_v18  ;;  %v8205_v18 = vpop.permute.xlu0 %3330  ;;  %v2570_v40 = vld [vmem:[#allocation3] sm:$0xff] }
 0x302   : > { %3344 = vrot.lane.b32.xlu1 %v3189_v23, %s6089_s11  ;;  %3205 = vst.msk [vmem:[#allocation3 + $0x60] sm:$0xff] %vm1199_vm1, %v3189_v23  ;;  %2586 = vst.msk [vmem:[#allocation4] sm:$0xff] %vm1199_vm1, %v2570_v40 }
 0x303   : > { %v2550_v22 = vpack.c.bf16 %v2531_v29, %v2530_v45  ;;  %v8186_v24 = vpack.c.bf16 %v3171_v50, %v3170_v55  ;;  %3430 = vrot.lane.b32.xlu0 %v3392_v11, %s6090_s29  ;;  %v2551_v9 = vpack.c.bf16 %v2533_v34, %v2532_v16  ;;  %v10361_v55 = vld [vmem:[#allocation13_spill] sm:$0xff] }
 0x304   : > { %v2507_v50 = vmul.f32 %v7701_v30, %v10361_v55  ;;  %v10363_v30 = vrot.slane %v8129_v60, 1 }
 0x305   : > { %2566 = vst.msk [vmem:[#allocation3 + $0x68] sm:$0xff] %vm1199_vm1, %v2550_v22  ;;  %2567 = vst.msk [vmem:[#allocation3 + $0x70] sm:$0xff] %vm1199_vm1, %v2551_v9 }
 0x306   : > { %3032 = vrot.lane.b32.xlu1 %v8011_v13, %s6088_s3 }
 0x307   : > { %3034 = vrot.lane.b32.xlu0 %v8075_v54, %s6088_s3 }
 0x30a   : > { %3256 = vrot.lane.b32.xlu1 %v3391_v32, %s6087_s0 }
 0x30b   : > { %3258 = vrot.lane.b32.xlu0 %v3392_v11, %s6087_s0 }
 0x30c   : > { %v8197_v19 = vld [vmem:[#allocation3 + $0x68] sm:$0xff]  ;;  %v8203_v29 = vld [vmem:[#allocation3 + $0x70] sm:$0xff] }
 0x30d   : > { %2806 = vst.msk [vmem:[#allocation3 + $0x68] sm:$0xff] %vm1199_vm1, %v8149_v12  ;;  %2599 = vst.msk [vmem:[#allocation4 + $0x68] sm:$0xff] %vm1199_vm1, %v8197_v19 }
 0x30e   : > { %2807 = vst.msk [vmem:[#allocation3 + $0x70] sm:$0xff] %vm1199_vm1, %v8138_v44  ;;  %2600 = vst.msk [vmem:[#allocation4 + $0x70] sm:$0xff] %vm1199_vm1, %v8203_v29  ;;  %2732 = vrot.lane.b32.xlu1 %v8090_v27, %s6086_s26 }
 0x30f   : > { %2734 = vrot.lane.b32.xlu0 %v8095_v25, %s6086_s26 }
 0x310   : > { %v8215_v47 = vpop.permute.xlu1 %2936 }
 0x311   : > { %v8217_v32 = vpop.permute.xlu0 %2934 }
 0x312   : > { %2860 = vrot.lane.b32.xlu1 %v8011_v13, %s6084_s28 }
 0x313   : > { %v5815_v20 = vpop.f32.mrb[28].mxu0  ;;  %2862 = vrot.lane.b32.xlu0 %v8075_v54, %s6084_s28 }
 0x314   : > { %v8224_v7 = vld [vmem:[#allocation3 + $0x68] sm:$0xff]  ;;  %v2404_v27 = vadd.f32 %v5815_v20, %v7674_v48  ;;  %v2395_v45 = vpop.f32.mrb[29].mxu0  ;;  %v8227_v25 = vpop.permute.xlu1 %3332 }
 0x315   : > { %3206 = vst.msk [vmem:[#allocation3 + $0x68] sm:$0xff] %vm1199_vm1, %v8186_v24  ;;  %v2396_v2 = vadd.f32 %v7674_v48, %v2395_v45  ;;  %v5816_v34 = vpop.f32.mrb[30].mxu0  ;;  %v8232_v13 = vpop.permute.xlu0 %3418 }
 0x316   : > { %v2440_v21 = vmax.f32 %v2404_v27, 0.0  ;;  %v2407_v63 = vadd.f32 %v5816_v34, %v7674_v48  ;;  %v2398_v37 = vpop.f32.mrb[31].mxu0  ;;  %2642 = vrot.lane.b32.xlu1 %v2550_v22, %s6085_s20 }
 0x317   : > { %v2438_v54 = vmax.f32 %v2396_v2, 0.0  ;;  %v2399_v23 = vadd.f32 %v7674_v48, %v2398_v37  ;;  %v10362_v48 = vrot.slane %v8129_v60, 7 }
 0x318   : > { %v2441_v8 = vmax.f32 %v2407_v63, 0.0  ;;  %v8237_v41 = vpop.permute.xlu1 %3020  ;;  %v2472_v16 = vrot.slane %v2440_v21, 7  ;;  %v3112_v27 = vrot.slane %v2440_v21, 1 }
 0x319   : > { %10360 = vst [vmem:[#allocation69_spill] sm:$0xff] %v8237_v41  ;;  %v2470_v11 = vrot.slane %v2438_v54, 7  ;;  %v3110_v40 = vrot.slane %v2438_v54, 1  ;;  %v2439_v20 = vmax.f32 %v2399_v23, 0.0  ;;  %v3023_v45 = vpop.permute.xlu0 %3022 }
 0x31a   : > { %v2473_v6 = vrot.slane %v2441_v8, 7  ;;  %v8241_v34 = vpack.c.bf16 %v2441_v8, %v2440_v21  ;;  %v3113_v61 = vrot.slane %v2441_v8, 1  ;;  %3068 = vst.msk [vmem:[#allocation4 + $0x10] sm:$0xff] %vm1716_vm9, %v3023_v45  ;;  %2644 = vrot.lane.b32.xlu1 %v2551_v9, %s6085_s20  ;;  %v10364_v21 = vld [vmem:[#allocation59_spill] sm:$0xff]  ;;  %v10365_v9 = vrot.slane %v7681_v31, 7 }
 0x31b   : > { %v2477_v22 = vsel %vm1118_vm2, %v10362_v48, %v2470_v11  ;;  %v3117_v2 = vsel %vm1765_vm3, %v10363_v30, %v3110_v40  ;;  %v2471_v63 = vrot.slane %v2439_v20, 7  ;;  %v8253_v37 = vpack.c.bf16 %v2439_v20, %v2438_v54 }
 0x31c   : > { %v2534_v23 = vmul.f32 %v2477_v22, %v10364_v21  ;;  %v2474_v8 = vsel %vm1118_vm2, %v2472_v16, %v2473_v6  ;;  %v2505_v55 = vsel %vm1118_vm2, %v2473_v6, %v10365_v9  ;;  %v3114_v45 = vsel %vm1765_vm3, %v3112_v27, %v3113_v61  ;;  %v2721_v60 = vpop.permute.xlu1 %2720 }
 0x31d   : > { %v10366_v48 = vrot.slane %v7681_v31, 1  ;;  %v3176_v30 = vmul.f32 %v3114_v45, %v7388_v46  ;;  %v2475_v22 = vsel %vm1118_vm2, %v2471_v63, %v2472_v16  ;;  %v2476_v21 = vsel %vm1118_vm2, %v2470_v11, %v2471_v63  ;;  %2765 = vst.msk [vmem:[#allocation4 + $0x18] sm:$0xff] %vm1409_vm6, %v2721_v60  ;;  %v3247_v6 = vpop.permute.xlu0 %3246  ;;  %v10369_v63 = vld [vmem:[#allocation63_spill] sm:$0xff]  ;;  %v10370_v60 = vld [vmem:[#allocation62_spill] sm:$0xff] }
 0x31e   : > { %v2535_v38 = vmul.f32 %v2476_v21, %v10367_v51  ;;  %v3111_v41 = vrot.slane %v2439_v20, 1  ;;  %3292 = vst.msk [vmem:[#allocation4 + $0x10] sm:$0xff] %vm1942_vm10, %v3247_v6  ;;  %3036 = vrot.lane.b32.xlu1 %v8113_v57, %s6088_s3  ;;  %v3172_v16 = vmul.f32 %v8160_v15, %v7341_v10  ;;  %v3173_v11 = vmul.f32 %v3117_v2, %v7339_v5 }
 0x31f   : > { %v3145_v54 = vsel %vm1765_vm3, %v3113_v61, %v10366_v48  ;;  %v10368_v61 = vld [vmem:[#allocation11_spill] sm:$0xff]  ;;  %3372 = vst.msk [vmem:[#allocation4 + $0x10] sm:$0xff] %vm2023_vm11, %v8097_v62  ;;  %v2536_v45 = vmul.f32 %v2475_v22, %v10369_v63  ;;  %v2537_v51 = vmul.f32 %v2474_v8, %v10370_v60  ;;  %v3219_v8 = vld [vmem:[#allocation3 + $0x48] sm:$0xff] }
 0x320   : > { %v3177_v9 = vmul.f32 %v3145_v54, %v7386_v43  ;;  %v2506_v31 = vmul.f32 %v2505_v55, %v10368_v61  ;;  %v8289_v48 = vpack.c.bf16 %v2535_v38, %v2534_v23  ;;  %v3115_v54 = vsel %vm1765_vm3, %v3111_v41, %v3112_v27  ;;  %v2849_v62 = vpop.permute.xlu1 %2848  ;;  %v8306_v38 = vld [vmem:[#allocation3 + $0x70] sm:$0xff]  ;;  %v5995_v27 = vld [vmem:[%s6229_s17] sm:$0xff]   ;;  %v5998_v63 = vld [vmem:[%s6229_s17 + $0x18] sm:$0xff]  }
 0x321   : > { %v3116_v55 = vsel %vm1765_vm3, %v3110_v40, %v3111_v41  ;;  %v3175_v15 = vmul.f32 %v3115_v54, %v7364_v28  ;;  %2893 = vst.msk [vmem:[#allocation4 + $0x18] sm:$0xff] %vm1538_vm7, %v2849_v62  ;;  %v2723_v22 = vpop.permute.xlu0 %2722  ;;  %v8308_v41 = vpack.c.bf16 %v2537_v51, %v2536_v45  ;;  %5817 = vmatprep.subr.bf16.mxu1 %v5995_v27  ;;  %v3394_v61 = vld [vmem:[#allocation3 + $0x50] sm:$0xff]  ;;  %v5999_v54 = vld [vmem:[%s6229_s17 + $0x20] ss:$0 sps:$4 sm:$0xff]  }
 0x322   : > { %v8287_v20 = vpack.c.bf16 %v3177_v9, %v3176_v30  ;;  %v3174_v21 = vmul.f32 %v3116_v55, %v7366_v3  ;;  %v2538_v2 = vpack.c.bf16 %v2507_v50, %v2506_v31  ;;  %v8298_v30 = vpack.c.bf16 %v3173_v11, %v3172_v16  ;;  %2568 = vst.msk [vmem:[#allocation3 + $0x78] sm:$0xff] %vm1199_vm1, %v8289_v48  ;;  %v5996_v9 = vld [vmem:[%s6229_s17 + $0x8] sm:$0xff]   ;;  %v3221_v16 = vld [vmem:[#allocation3 + $0x58] sm:$0xff] }
 0x323   : > { %2973 = vst.msk [vmem:[#allocation4 + $0x18] sm:$0xff] %vm1619_vm8, %v8003_v33  ;;  %3260 = vrot.lane.b32.xlu1 %v3219_v8, %s6087_s0  ;;  %5818 = vmatpush3.bf16.msra.mxu1 %v5995_v27 }
 0x324   : > { %2766 = vst.msk [vmem:[#allocation4 + $0x20] sm:$0xff] %vm1409_vm6, %v2723_v22  ;;  %v8310_v50 = vpack.c.bf16 %v3175_v15, %v3174_v21  ;;  %2618 = vrot.lane.b32.xlu0 %v2538_v2, %s6085_s20  ;;  %v2631_v40 = vpop.permute.xlu1 %2630  ;;  %5819 = vmatprep.subr.bf16.mxu1 %v5996_v9  ;;  %v3396_v21 = vld [vmem:[#allocation3 + $0x60] sm:$0xff] }
 0x325   : > { %2554 = vst.msk [vmem:[#allocation3 + $0x8] sm:$0xff] %vm1199_vm1, %v2538_v2  ;;  %3207 = vst.msk [vmem:[#allocation3 + $0x70] sm:$0xff] %vm1199_vm1, %v8298_v30  ;;  %v2851_v33 = vpop.permute.xlu0 %2850 }
 0x326   : > { %2569 = vst.msk [vmem:[#allocation3 + $0x80] sm:$0xff] %vm1199_vm1, %v8308_v41 }
 0x327   : > { %2672 = vst.msk [vmem:[#allocation4 + $0x30] sm:$0xff] %vm1312_vm5, %v2631_v40  ;;  %2736 = vrot.lane.b32.xlu1 %v8197_v19, %s6086_s26  ;;  %5820 = vmatpush3.bf16.msra.mxu1 %v5996_v9  ;;  %v5997_v19 = vld [vmem:[%s6229_s17 + $0x10] sm:$0xff]  }
 0x328   : > { %2894 = vst.msk [vmem:[#allocation4 + $0x20] sm:$0xff] %vm1538_vm7, %v2851_v33  ;;  %3432 = vrot.lane.b32.xlu0 %v3219_v8, %s6090_s29  ;;  %v2633_v23 = vpop.permute.xlu1 %2632  ;;  %5821 = vmatprep.subr.bf16.mxu1 %v5997_v19  ;;  %v3397_v33 = vld [vmem:[#allocation3 + $0x68] sm:$0xff] }
 0x329   : > { %2974 = vst.msk [vmem:[#allocation4 + $0x20] sm:$0xff] %vm1619_vm8, %v8107_v58  ;;  %v2695_v6 = vld [vmem:[#allocation3 + $0x78] sm:$0xff] }
 0x32a   : > { %2673 = vst.msk [vmem:[#allocation4 + $0x38] sm:$0xff] %vm1312_vm5, %v2633_v23 }
 0x32b   : > { %2864 = vrot.lane.b32.xlu1 %v8113_v57, %s6084_s28  ;;  %2808 = vst.msk [vmem:[#allocation3 + $0x78] sm:$0xff] %vm1199_vm1, %v8253_v37  ;;  %2601 = vst.msk [vmem:[#allocation4 + $0x78] sm:$0xff] %vm1199_vm1, %v2695_v6  ;;  %v8343_v57 = vpop.permute.xlu0 %3334  ;;  %5822 = vmatpush3.bf16.msra.mxu1 %v5997_v19 }
 0x32c   : > { %v2571_v31 = vld [vmem:[#allocation3 + $0x8] sm:$0xff]  ;;  %3434 = vrot.lane.b32.xlu0 %v3394_v61, %s6090_s29  ;;  %5823 = vmatprep.subr.bf16.mxu1 %v5998_v63  ;;  %v3398_v9 = vld [vmem:[#allocation3 + $0x70] sm:$0xff] }
 0x32d   : > { %2794 = vst.msk [vmem:[#allocation3 + $0x8] sm:$0xff] %vm1199_vm1, %v7687_v35  ;;  %2587 = vst.msk [vmem:[#allocation4 + $0x8] sm:$0xff] %vm1199_vm1, %v2571_v31  ;;  %v8337_v58 = vld [vmem:[#allocation3 + $0x80] sm:$0xff] }
 0x32e   : > { %2667 = vst.msk [vmem:[#allocation4 + $0x8] sm:$0xff] %vm1312_vm5, %v7990_v26 }
 0x32f   : > { %2809 = vst.msk [vmem:[#allocation3 + $0x80] sm:$0xff] %vm1199_vm1, %v8241_v34  ;;  %3040 = vrot.lane.b32.xlu1 %v8224_v7, %s6088_s3  ;;  %5824 = vmatpush3.bf16.msra.mxu1 %v5998_v63 }
 0x330   : > { %2763 = vst.msk [vmem:[#allocation4 + $0x8] sm:$0xff] %vm1409_vm6, %v8126_v56  ;;  %3038 = vrot.lane.b32.xlu0 %v8182_v4, %s6088_s3  ;;  %v8352_v35 = vpop.permute.xlu1 %2940  ;;  %5924 = vmatprep.subr.msk.bf16.mxu1 %vm2245_vm4, %v5999_v54 }
 0x331   : > { %v8354_v26 = vpop.permute.xlu0 %2938 }
 0x332   : > { %v8356_v11 = vld [vmem:[#allocation3 + $0x78] sm:$0xff] }
 0x333   : > { %3264 = vrot.lane.b32.xlu1 %v3221_v16, %s6087_s0  ;;  %3208 = vst.msk [vmem:[#allocation3 + $0x78] sm:$0xff] %vm1199_vm1, %v8310_v50 }
 0x334   : > { %v2811_v56 = vld [vmem:[#allocation3 + $0x8] sm:$0xff]  ;;  %3262 = vrot.lane.b32.xlu0 %v3394_v61, %s6087_s0  ;;  %v8367_v60 = vpop.permute.xlu1 %3336 }
 0x335   : > { %3194 = vst.msk [vmem:[#allocation3 + $0x8] sm:$0xff] %vm1199_vm1, %v7716_v52  ;;  %v8371_v51 = vpop.permute.xlu0 %3420  ;;  %v3590_v52 = vsel %vm2245_vm4, %v5999_v54, 0  ;;  %v2697_v61 = vld [vmem:[#allocation3 + $0x88] sm:$0xff] }
 0x336   : > { %v8365_v45 = vld [vmem:[#allocation3 + $0x80] sm:$0xff]  ;;  %5826 = vmatpush3.bf16.msra.mxu1 %v3590_v52 }
 0x337   : > { %3209 = vst.msk [vmem:[#allocation3 + $0x80] sm:$0xff] %vm1199_vm1, %v8287_v20  ;;  %2844 = vrot.lane.b32.xlu1 %v2811_v56, %s6084_s28 }
 0x338   : > { %3436 = vrot.lane.b32.xlu0 %v3221_v16, %s6090_s29  ;;  %v3025_v55 = vpop.permute.xlu1 %3024 }
 0x339   : > { %3069 = vst.msk [vmem:[#allocation4 + $0x18] sm:$0xff] %vm1716_vm9, %v3025_v55  ;;  %v3423_v62 = vpop.permute.xlu0 %3422 }
 0x33a   : > { %3468 = vst.msk [vmem:[#allocation4 + $0x10] sm:$0xff] %vm2120_vm12, %v3423_v62 }
 0x33c   : > { %v3211_v15 = vld [vmem:[#allocation3 + $0x8] sm:$0xff]  ;;  %3438 = vrot.lane.b32.xlu0 %v3396_v21, %s6090_s29  ;;  %v3249_v2 = vpop.permute.xlu1 %3248 }
 0x33d   : > { %3244 = vrot.lane.b32.xlu1 %v3211_v15, %s6087_s0  ;;  %3293 = vst.msk [vmem:[#allocation4 + $0x18] sm:$0xff] %vm1942_vm10, %v3249_v2  ;;  %v3027_v22 = vpop.permute.xlu0 %3026 }
 0x33e   : > { %3373 = vst.msk [vmem:[#allocation4 + $0x18] sm:$0xff] %vm2023_vm11, %v8115_v0  ;;  %v3400_v63 = vld [vmem:[#allocation3 + $0x80] sm:$0xff] }
 0x33f   : > { %3070 = vst.msk [vmem:[#allocation4 + $0x20] sm:$0xff] %vm1716_vm9, %v3027_v22 }
 0x340   : > { %2738 = vrot.lane.b32.xlu0 %v8203_v29, %s6086_s26  ;;  %v2725_v8 = vpop.permute.xlu1 %2724 }
 0x341   : > { %2740 = vrot.lane.b32.xlu1 %v2695_v6, %s6086_s26  ;;  %2767 = vst.msk [vmem:[#allocation4 + $0x28] sm:$0xff] %vm1409_vm6, %v2725_v8  ;;  %v3251_v40 = vpop.permute.xlu0 %3250 }
 0x342   : > { %3294 = vst.msk [vmem:[#allocation4 + $0x20] sm:$0xff] %vm1942_vm10, %v3251_v40  ;;  %v10371_v40 = vld [vmem:[#allocation69_spill] sm:$0xff] }
 0x343   : > { %3374 = vst.msk [vmem:[#allocation4 + $0x20] sm:$0xff] %vm2023_vm11, %v8205_v18 }
 0x344   : > { %3440 = vrot.lane.b32.xlu0 %v3397_v33, %s6090_s29  ;;  %v2853_v0 = vpop.permute.xlu1 %2852 }
 0x345   : > { %2868 = vrot.lane.b32.xlu1 %v8224_v7, %s6084_s28  ;;  %2895 = vst.msk [vmem:[#allocation4 + $0x28] sm:$0xff] %vm1538_vm7, %v2853_v0  ;;  %v2727_v29 = vpop.permute.xlu0 %2726 }
 0x346   : > { %2975 = vst.msk [vmem:[#allocation4 + $0x28] sm:$0xff] %vm1619_vm8, %v8105_v53 }
 0x347   : > { %2768 = vst.msk [vmem:[#allocation4 + $0x30] sm:$0xff] %vm1409_vm6, %v2727_v29  ;;  %v10372_v29 = vld [vmem:[#allocation68_spill] sm:$0xff] }
 0x348   : > { %2866 = vrot.lane.b32.xlu0 %v8182_v4, %s6084_s28  ;;  %v2635_v27 = vpop.permute.xlu1 %2634 }
 0x349   : > { %2948 = vrot.lane.b32.xlu1 %v8138_v44, %s6083_s24  ;;  %2674 = vst.msk [vmem:[#allocation4 + $0x40] sm:$0xff] %vm1312_vm5, %v2635_v27  ;;  %v2855_v18 = vpop.permute.xlu0 %2854 }
 0x34a   : > { %2896 = vst.msk [vmem:[#allocation4 + $0x30] sm:$0xff] %vm1538_vm7, %v2855_v18 }
 0x34b   : > { %2976 = vst.msk [vmem:[#allocation4 + $0x30] sm:$0xff] %vm1619_vm8, %v8217_v32 }
 0x34c   : > { %2946 = vrot.lane.b32.xlu0 %v8149_v12, %s6083_s24  ;;  %v2637_v53 = vpop.permute.xlu1 %2636 }
 0x34d   : > { %3044 = vrot.lane.b32.xlu1 %v8356_v11, %s6088_s3  ;;  %2675 = vst.msk [vmem:[#allocation4 + $0x48] sm:$0xff] %vm1312_vm5, %v2637_v53  ;;  %v8413_v4 = vpop.permute.xlu0 %3338 }
 0x350   : > { %3042 = vrot.lane.b32.xlu0 %v8306_v38, %s6088_s3  ;;  %v8418_v44 = vpop.permute.xlu1 %2944 }
 0x351   : > { %3268 = vrot.lane.b32.xlu1 %v3397_v33, %s6087_s0  ;;  %v8420_v7 = vpop.permute.xlu0 %2942 }
 0x354   : > { %3266 = vrot.lane.b32.xlu0 %v3396_v21, %s6087_s0  ;;  %v8425_v12 = vpop.permute.xlu1 %3340 }
 0x355   : > { %3348 = vrot.lane.b32.xlu1 %v8298_v30, %s6089_s11  ;;  %v3425_v32 = vpop.permute.xlu0 %3424 }
 0x356   : > { %3469 = vst.msk [vmem:[#allocation4 + $0x18] sm:$0xff] %vm2120_vm12, %v3425_v32 }
 0x358   : > { %3346 = vrot.lane.b32.xlu0 %v8186_v24, %s6089_s11  ;;  %v3029_v23 = vpop.permute.xlu1 %3028 }
 0x359   : > { %2646 = vrot.lane.b32.xlu1 %v8289_v48, %s6085_s20  ;;  %3071 = vst.msk [vmem:[#allocation4 + $0x28] sm:$0xff] %vm1716_vm9, %v3029_v23  ;;  %v3427_v6 = vpop.permute.xlu0 %3426  ;;  %v3399_v48 = vld [vmem:[#allocation3 + $0x78] sm:$0xff] }
 0x35a   : > { %3470 = vst.msk [vmem:[#allocation4 + $0x20] sm:$0xff] %vm2120_vm12, %v3427_v6 }
 0x35c   : > { %3442 = vrot.lane.b32.xlu0 %v3398_v9, %s6090_s29  ;;  %v3253_v30 = vpop.permute.xlu1 %3252 }
 0x35d   : > { %2648 = vrot.lane.b32.xlu1 %v8308_v41, %s6085_s20  ;;  %3295 = vst.msk [vmem:[#allocation4 + $0x28] sm:$0xff] %vm1942_vm10, %v3253_v30  ;;  %v3031_v24 = vpop.permute.xlu0 %3030  ;;  %v3485_v23 = vld [vmem:[#allocation4 + $0x18] sm:$0xff] }
 0x35e   : > { %3375 = vst.msk [vmem:[#allocation4 + $0x28] sm:$0xff] %vm2023_vm11, %v8227_v25 }
 0x35f   : > { %3072 = vst.msk [vmem:[#allocation4 + $0x30] sm:$0xff] %vm1716_vm9, %v3031_v24 }
 0x360   : > { %3444 = vrot.lane.b32.xlu0 %v3399_v48, %s6090_s29  ;;  %v2729_v31 = vpop.permute.xlu1 %2728 }
 0x361   : > { %2744 = vrot.lane.b32.xlu1 %v2697_v61, %s6086_s26  ;;  %2769 = vst.msk [vmem:[#allocation4 + $0x38] sm:$0xff] %vm1409_vm6, %v2729_v31  ;;  %v3255_v19 = vpop.permute.xlu0 %3254  ;;  %v3486_v6 = vld [vmem:[#allocation4 + $0x20] sm:$0xff] }
 0x362   : > { %3296 = vst.msk [vmem:[#allocation4 + $0x30] sm:$0xff] %vm1942_vm10, %v3255_v19 }
 0x363   : > { %3376 = vst.msk [vmem:[#allocation4 + $0x30] sm:$0xff] %vm2023_vm11, %v8343_v57 }
 0x364   : > { %2742 = vrot.lane.b32.xlu0 %v8337_v58, %s6086_s26  ;;  %v2857_v25 = vpop.permute.xlu1 %2856 }
 0x365   : > { %2872 = vrot.lane.b32.xlu1 %v8356_v11, %s6084_s28  ;;  %2897 = vst.msk [vmem:[#allocation4 + $0x38] sm:$0xff] %vm1538_vm7, %v2857_v25  ;;  %v2731_v41 = vpop.permute.xlu0 %2730 }
 0x366   : > { %2977 = vst.msk [vmem:[#allocation4 + $0x38] sm:$0xff] %vm1619_vm8, %v8215_v47 }
 0x367   : > { %2770 = vst.msk [vmem:[#allocation4 + $0x40] sm:$0xff] %vm1409_vm6, %v2731_v41 }
 0x368   : > { %2870 = vrot.lane.b32.xlu0 %v8306_v38, %s6084_s28  ;;  %v2639_v58 = vpop.permute.xlu1 %2638 }
 0x369   : > { %2952 = vrot.lane.b32.xlu1 %v8241_v34, %s6083_s24  ;;  %2676 = vst.msk [vmem:[#allocation4 + $0x50] sm:$0xff] %vm1312_vm5, %v2639_v58  ;;  %v2859_v57 = vpop.permute.xlu0 %2858 }
 0x36a   : > { %2898 = vst.msk [vmem:[#allocation4 + $0x40] sm:$0xff] %vm1538_vm7, %v2859_v57 }
 0x36b   : > { %2978 = vst.msk [vmem:[#allocation4 + $0x40] sm:$0xff] %vm1619_vm8, %v8354_v26 }
 0x36c   : > { %2950 = vrot.lane.b32.xlu0 %v8253_v37, %s6083_s24  ;;  %v2641_v47 = vpop.permute.xlu1 %2640 }
 0x36d   : > { %3048 = vrot.lane.b32.xlu1 %v2697_v61, %s6088_s3  ;;  %2677 = vst.msk [vmem:[#allocation4 + $0x58] sm:$0xff] %vm1312_vm5, %v2641_v47  ;;  %v8467_v38 = vpop.permute.xlu0 %3342 }
 0x370   : > { %3046 = vrot.lane.b32.xlu0 %v8365_v45, %s6088_s3 }
 0x371   : > { %3272 = vrot.lane.b32.xlu1 %v3399_v48, %s6087_s0  ;;  %v3429_v34 = vpop.permute.xlu0 %3428 }
 0x372   : > { %3471 = vst.msk [vmem:[#allocation4 + $0x28] sm:$0xff] %vm2120_vm12, %v3429_v34 }
 0x374   : > { %3270 = vrot.lane.b32.xlu0 %v3398_v9, %s6087_s0  ;;  %v8476_v37 = vpop.permute.xlu1 %3344 }
 0x375   : > { %3352 = vrot.lane.b32.xlu1 %v8287_v20, %s6089_s11  ;;  %v3431_v26 = vpop.permute.xlu0 %3430 }
 0x376   : > { %3472 = vst.msk [vmem:[#allocation4 + $0x30] sm:$0xff] %vm2120_vm12, %v3431_v26 }
 0x378   : > { %3350 = vrot.lane.b32.xlu0 %v8310_v50, %s6089_s11  ;;  %v3033_v16 = vpop.permute.xlu1 %3032 }
 0x379   : > { %3448 = vrot.lane.b32.xlu1 %v2697_v61, %s6090_s29  ;;  %3073 = vst.msk [vmem:[#allocation4 + $0x38] sm:$0xff] %vm1716_vm9, %v3033_v16  ;;  %v3035_v11 = vpop.permute.xlu0 %3034  ;;  %v3487_v48 = vld [vmem:[#allocation4 + $0x28] sm:$0xff] }
 0x37a   : > { %3074 = vst.msk [vmem:[#allocation4 + $0x40] sm:$0xff] %vm1716_vm9, %v3035_v11 }
 0x37c   : > { %3446 = vrot.lane.b32.xlu0 %v3400_v63, %s6090_s29  ;;  %v3257_v20 = vpop.permute.xlu1 %3256 }
 0x37d   : > { %3297 = vst.msk [vmem:[#allocation4 + $0x38] sm:$0xff] %vm1942_vm10, %v3257_v20  ;;  %v3259_v56 = vpop.permute.xlu0 %3258  ;;  %v3488_v31 = vld [vmem:[#allocation4 + $0x30] sm:$0xff] }
 0x37e   : > { %3377 = vst.msk [vmem:[#allocation4 + $0x38] sm:$0xff] %vm2023_vm11, %v8367_v60 }
 0x37f   : > { %3298 = vst.msk [vmem:[#allocation4 + $0x40] sm:$0xff] %vm1942_vm10, %v3259_v56 }
 0x380   : > { %3378 = vst.msk [vmem:[#allocation4 + $0x40] sm:$0xff] %vm2023_vm11, %v8413_v4  ;;  %v2733_v50 = vpop.permute.xlu1 %2732 }
 0x381   : > { %2771 = vst.msk [vmem:[#allocation4 + $0x48] sm:$0xff] %vm1409_vm6, %v2733_v50  ;;  %v2735_v45 = vpop.permute.xlu0 %2734 }
 0x382   : > { %2772 = vst.msk [vmem:[#allocation4 + $0x50] sm:$0xff] %vm1409_vm6, %v2735_v45 }
 0x384   : > { %v2861_v54 = vpop.permute.xlu1 %2860 }
 0x385   : > { %2899 = vst.msk [vmem:[#allocation4 + $0x48] sm:$0xff] %vm1538_vm7, %v2861_v54  ;;  %v2863_v52 = vpop.permute.xlu0 %2862 }
 0x386   : > { %2979 = vst.msk [vmem:[#allocation4 + $0x48] sm:$0xff] %vm1619_vm8, %v8352_v35 }
 0x387   : > { %2900 = vst.msk [vmem:[#allocation4 + $0x50] sm:$0xff] %vm1538_vm7, %v2863_v52 }
 0x388   : > { %2980 = vst.msk [vmem:[#allocation4 + $0x50] sm:$0xff] %vm1619_vm8, %v8420_v7  ;;  %v2643_v60 = vpop.permute.xlu1 %2642 }
 0x389   : > { %2678 = vst.msk [vmem:[#allocation4 + $0x60] sm:$0xff] %vm1312_vm5, %v2643_v60 }
 0x38c   : > { %v2645_v55 = vpop.permute.xlu1 %2644 }
 0x38d   : > { %2679 = vst.msk [vmem:[#allocation4 + $0x68] sm:$0xff] %vm1312_vm5, %v2645_v55 }
 0x390   : > { %v3037_v62 = vpop.permute.xlu1 %3036 }
 0x391   : > { %3075 = vst.msk [vmem:[#allocation4 + $0x48] sm:$0xff] %vm1716_vm9, %v3037_v62 }
 0x395   : > { %v3261_v21 = vpop.permute.xlu1 %3260 }
 0x396   : > { %v2619_v15 = vpop.permute.xlu0 %2618  ;;  %3299 = vst.msk [vmem:[#allocation4 + $0x48] sm:$0xff] %vm1942_vm10, %v3261_v21 }
 0x397   : > { %2666 = vst.msk [vmem:[#allocation4] sm:$0xff] %vm1312_vm5, %v2619_v15 }
 0x398   : > { %3379 = vst.msk [vmem:[#allocation4 + $0x48] sm:$0xff] %vm2023_vm11, %v8425_v12 }
 0x399   : > { %2762 = vst.msk [vmem:[#allocation4] sm:$0xff] %vm1409_vm6, %v8084_v17  ;;  %v2737_v35 = vpop.permute.xlu1 %2736 }
 0x39a   : > { %2890 = vst.msk [vmem:[#allocation4] sm:$0xff] %vm1538_vm7, %v7984_v1  ;;  %v3433_v2 = vpop.permute.xlu0 %3432 }
 0x39b   : > { %2970 = vst.msk [vmem:[#allocation4] sm:$0xff] %vm1619_vm8, %v8018_v39 }
 0x39c   : > { %2773 = vst.msk [vmem:[#allocation4 + $0x58] sm:$0xff] %vm1409_vm6, %v2737_v35 }
 0x39d   : > { %3066 = vst.msk [vmem:[#allocation4] sm:$0xff] %vm1716_vm9, %v8118_v49  ;;  %v2865_v17 = vpop.permute.xlu1 %2864 }
 0x39e   : > { %3473 = vst.msk [vmem:[#allocation4 + $0x38] sm:$0xff] %vm2120_vm12, %v3433_v2  ;;  %v3435_v1 = vpop.permute.xlu0 %3434 }
 0x39f   : > { %3290 = vst.msk [vmem:[#allocation4] sm:$0xff] %vm1942_vm10, %v8005_v59 }
 0x3a0   : > { %3370 = vst.msk [vmem:[#allocation4] sm:$0xff] %vm2023_vm11, %v8035_v42 }
 0x3a1   : > { %3466 = vst.msk [vmem:[#allocation4] sm:$0xff] %vm2120_vm12, %v8232_v13  ;;  %3474 = vst.msk [vmem:[#allocation4 + $0x40] sm:$0xff] %vm2120_vm12, %v3435_v1  ;;  %v3041_v39 = vpop.permute.xlu1 %3040 }
 0x3a2   : > { %2901 = vst.msk [vmem:[#allocation4 + $0x58] sm:$0xff] %vm1538_vm7, %v2865_v17  ;;  %v3039_v49 = vpop.permute.xlu0 %3038 }
 0x3a3   : > { %2981 = vst.msk [vmem:[#allocation4 + $0x58] sm:$0xff] %vm1619_vm8, %v8418_v44  ;;  %v3484_v44 = vld [vmem:[#allocation4 + $0x10] sm:$0xff] }
 0x3a4   : > { %3077 = vst.msk [vmem:[#allocation4 + $0x58] sm:$0xff] %vm1716_vm9, %v3041_v39  ;;  %3076 = vst.msk [vmem:[#allocation4 + $0x50] sm:$0xff] %vm1716_vm9, %v3039_v49  ;;  %v3825_v39 = vld [vmem:[%s6239_s14] sm:$0xf]  ;;  %v6091_v49 = vmov 0.0   ;;  %s10373_s14 = scalar_lea.vmem %s10134_s6, %s6205_s15 }
 0x3a5   : > { %v3265_v42 = vpop.permute.xlu1 %3264  ;;  %v3489_v57 = vld [vmem:[#allocation4 + $0x38] sm:$0xff]  ;;  %5859 = vmatprep.subr.bf16.mxu0 %v6091_v49  ;;  %5865 = vmatprep.subr.bf16.mxu1 %v6091_v49 }
 0x3a6   : > { %v3263_v22 = vpop.permute.xlu0 %3262  ;;  %3301 = vst.msk [vmem:[#allocation4 + $0x58] sm:$0xff] %vm1942_vm10, %v3265_v42  ;;  %5861 = vmatprep.mubr.msk.bf16.mxu0 %vm6092_vm14, %v6091_v49  ;;  %v3875_v42 = vld [vmem:[%s571_s27] sm:$0x1] }
 0x3a7   : > { %3300 = vst.msk [vmem:[#allocation4 + $0x50] sm:$0xff] %vm1942_vm10, %v3263_v22  ;;  %v3883_v22 = vsel %vm3881_vm15, %v3875_v42, 0 }
 0x3a8   : > { %v3482_v59 = vld [vmem:[#allocation4] sm:$0xff]  ;;  %3381 = vst.msk [vmem:[#allocation4 + $0x58] sm:$0xff] %vm2023_vm11, %v8476_v37  ;;  %3380 = vst.msk [vmem:[#allocation4 + $0x50] sm:$0xff] %vm2023_vm11, %v8467_v38 }
 0x3a9   : > { %5827 = vmatprep.mubr.msk.bf16.mxu1 %vm2196_vm13, %v3482_v59  ;;  %v2845_v13 = vpop.permute.xlu1 %2844  ;;  %v3490_v47 = vld [vmem:[#allocation4 + $0x40] sm:$0xff]  ;;  %v3831_v59 = vsel %vm2245_vm4, %v3825_v39, 0 }
 0x3aa   : > { %v3437_v8 = vpop.permute.xlu0 %3436  ;;  %2891 = vst.msk [vmem:[#allocation4 + $0x8] sm:$0xff] %vm1538_vm7, %v2845_v13  ;;  %5860 = vmatpush3.bf16.msra.mxu0 %v3831_v59  ;;  %v8605_v13 = vld [vmem:[%s10373_s14] ss:$0 sm:$0xff] }
 0x3ab   : > { %3475 = vst.msk [vmem:[#allocation4 + $0x48] sm:$0xff] %vm2120_vm12, %v3437_v8 }
 0x3ac   : > { %2971 = vst.msk [vmem:[#allocation4 + $0x8] sm:$0xff] %vm1619_vm8, %v7981_v14 }
 0x3ad   : > { %3067 = vst.msk [vmem:[#allocation4 + $0x8] sm:$0xff] %vm1716_vm9, %v10371_v40 }
 0x3ae   : > { %v3439_v33 = vpop.permute.xlu0 %3438 }
 0x3af   : > { %v3245_v0 = vpop.permute.xlu1 %3244  ;;  %3476 = vst.msk [vmem:[#allocation4 + $0x50] sm:$0xff] %vm2120_vm12, %v3439_v33 }
 0x3b0   : > { %3291 = vst.msk [vmem:[#allocation4 + $0x8] sm:$0xff] %vm1942_vm10, %v3245_v0 }
 0x3b1   : > { %3371 = vst.msk [vmem:[#allocation4 + $0x8] sm:$0xff] %vm2023_vm11, %v10372_v29 }
 0x3b2   : > { %3467 = vst.msk [vmem:[#allocation4 + $0x8] sm:$0xff] %vm2120_vm12, %v8371_v51  ;;  %v2739_v27 = vpop.permute.xlu0 %2738  ;;  %v3491_v16 = vld [vmem:[#allocation4 + $0x48] sm:$0xff] }
 0x3b3   : > { %v2741_v18 = vpop.permute.xlu1 %2740  ;;  %2774 = vst.msk [vmem:[#allocation4 + $0x60] sm:$0xff] %vm1409_vm6, %v2739_v27 }
 0x3b4   : > { %2775 = vst.msk [vmem:[#allocation4 + $0x68] sm:$0xff] %vm1409_vm6, %v2741_v18 }
 0x3b6   : > { %v3441_v14 = vpop.permute.xlu0 %3440  ;;  %v3492_v11 = vld [vmem:[#allocation4 + $0x50] sm:$0xff] }
 0x3b7   : > { %v2869_v53 = vpop.permute.xlu1 %2868  ;;  %3477 = vst.msk [vmem:[#allocation4 + $0x58] sm:$0xff] %vm2120_vm12, %v3441_v14 }
 0x3b8   : > { %2903 = vst.msk [vmem:[#allocation4 + $0x68] sm:$0xff] %vm1538_vm7, %v2869_v53 }
 0x3b9   : > { %v3483_v4 = vld [vmem:[#allocation4 + $0x8] sm:$0xff] }
 0x3ba   : > { %5828 = vmatmul.mubr.msk.bf16.vlgmr.msra.gmra.mrb[0].mxu1 %vm2196_vm13, %v3483_v4  ;;  %v2867_v7 = vpop.permute.xlu0 %2866 }
 0x3bb   : > { %v2949_v12 = vpop.permute.xlu1 %2948  ;;  %5831 = vmatprep.mubr.msk.bf16.mxu1 %vm2196_vm13, %v3484_v44  ;;  %2902 = vst.msk [vmem:[#allocation4 + $0x60] sm:$0xff] %vm1538_vm7, %v2867_v7  ;;  %5866 = vmatpush3.bf16.msra.mxu1 %v3883_v22 }
 0x3bc   : > { %2983 = vst.msk [vmem:[#allocation4 + $0x68] sm:$0xff] %vm1619_vm8, %v2949_v12 }
 0x3be   : > { %v2947_v51 = vpop.permute.xlu0 %2946  ;;  %v3493_v45 = vld [vmem:[#allocation4 + $0x58] sm:$0xff] }
 0x3bf   : > { %v3045_v32 = vpop.permute.xlu1 %3044  ;;  %2982 = vst.msk [vmem:[#allocation4 + $0x60] sm:$0xff] %vm1619_vm8, %v2947_v51 }
 0x3c0   : > { %3079 = vst.msk [vmem:[#allocation4 + $0x68] sm:$0xff] %vm1716_vm9, %v3045_v32 }
 0x3c2   : > { %5832 = vmatmul.mubr.msk.bf16.gmra.mrb[4].mxu1 %vm2196_vm13, %v3485_v23  ;;  %v3043_v9 = vpop.permute.xlu0 %3042 }
 0x3c3   : > { %v3269_v30 = vpop.permute.xlu1 %3268  ;;  %5835 = vmatprep.mubr.msk.bf16.mxu1 %vm2196_vm13, %v3486_v6  ;;  %3078 = vst.msk [vmem:[#allocation4 + $0x60] sm:$0xff] %vm1716_vm9, %v3043_v9 }
 0x3c4   : > { %3303 = vst.msk [vmem:[#allocation4 + $0x68] sm:$0xff] %vm1942_vm10, %v3269_v30 }
 0x3c6   : > { %v3267_v61 = vpop.permute.xlu0 %3266 }
 0x3c7   : > { %v3349_v24 = vpop.permute.xlu1 %3348  ;;  %3302 = vst.msk [vmem:[#allocation4 + $0x60] sm:$0xff] %vm1942_vm10, %v3267_v61 }
 0x3c8   : > { %3383 = vst.msk [vmem:[#allocation4 + $0x68] sm:$0xff] %vm2023_vm11, %v3349_v24 }
 0x3ca   : > { %5836 = vmatmul.mubr.msk.bf16.gmra.mrb[8].mxu1 %vm2196_vm13, %v3487_v48  ;;  %v3347_v19 = vpop.permute.xlu0 %3346 }
 0x3cb   : > { %v2647_v25 = vpop.permute.xlu1 %2646  ;;  %5839 = vmatprep.mubr.msk.bf16.mxu1 %vm2196_vm13, %v3488_v31  ;;  %3382 = vst.msk [vmem:[#allocation4 + $0x60] sm:$0xff] %vm2023_vm11, %v3347_v19 }
 0x3cc   : > { %2680 = vst.msk [vmem:[#allocation4 + $0x70] sm:$0xff] %vm1312_vm5, %v2647_v25 }
 0x3ce   : > { %v3443_v41 = vpop.permute.xlu0 %3442 }
 0x3cf   : > { %v2649_v58 = vpop.permute.xlu1 %2648  ;;  %3478 = vst.msk [vmem:[#allocation4 + $0x60] sm:$0xff] %vm2120_vm12, %v3443_v41 }
 0x3d0   : > { %2681 = vst.msk [vmem:[#allocation4 + $0x78] sm:$0xff] %vm1312_vm5, %v2649_v58 }
 0x3d2   : > { %5840 = vmatmul.mubr.msk.bf16.gmra.mrb[12].mxu1 %vm2196_vm13, %v3489_v57  ;;  %v3445_v38 = vpop.permute.xlu0 %3444 }
 0x3d3   : > { %v2745_v34 = vpop.permute.xlu1 %2744  ;;  %5843 = vmatprep.mubr.msk.bf16.mxu1 %vm2196_vm13, %v3490_v47  ;;  %3479 = vst.msk [vmem:[#allocation4 + $0x68] sm:$0xff] %vm2120_vm12, %v3445_v38 }
 0x3d4   : > { %2777 = vst.msk [vmem:[#allocation4 + $0x78] sm:$0xff] %vm1409_vm6, %v2745_v34 }
 0x3d6   : > { %v2743_v37 = vpop.permute.xlu0 %2742  ;;  %v3494_v54 = vld [vmem:[#allocation4 + $0x60] sm:$0xff] }
 0x3d7   : > { %v2873_v26 = vpop.permute.xlu1 %2872  ;;  %2776 = vst.msk [vmem:[#allocation4 + $0x70] sm:$0xff] %vm1409_vm6, %v2743_v37 }
 0x3d8   : > { %2905 = vst.msk [vmem:[#allocation4 + $0x78] sm:$0xff] %vm1538_vm7, %v2873_v26 }
 0x3da   : > { %5844 = vmatmul.mubr.msk.bf16.gmra.mrb[16].mxu1 %vm2196_vm13, %v3491_v16  ;;  %v2871_v63 = vpop.permute.xlu0 %2870  ;;  %v3495_v21 = vld [vmem:[#allocation4 + $0x68] sm:$0xff] }
 0x3db   : > { %v2953_v20 = vpop.permute.xlu1 %2952  ;;  %5847 = vmatprep.mubr.msk.bf16.mxu1 %vm2196_vm13, %v3492_v11  ;;  %2904 = vst.msk [vmem:[#allocation4 + $0x70] sm:$0xff] %vm1538_vm7, %v2871_v63 }
 0x3dc   : > { %2985 = vst.msk [vmem:[#allocation4 + $0x78] sm:$0xff] %vm1619_vm8, %v2953_v20 }
 0x3de   : > { %v2951_v56 = vpop.permute.xlu0 %2950 }
 0x3df   : > { %v3049_v50 = vpop.permute.xlu1 %3048  ;;  %2984 = vst.msk [vmem:[#allocation4 + $0x70] sm:$0xff] %vm1619_vm8, %v2951_v56 }
 0x3e0   : > { %3081 = vst.msk [vmem:[#allocation4 + $0x78] sm:$0xff] %vm1716_vm9, %v3049_v50 }
 0x3e2   : > { %5848 = vmatmul.mubr.msk.bf16.gmra.mrb[20].mxu1 %vm2196_vm13, %v3493_v45  ;;  %v3047_v52 = vpop.permute.xlu0 %3046 }
 0x3e3   : > { %v3273_v60 = vpop.permute.xlu1 %3272  ;;  %5851 = vmatprep.mubr.msk.bf16.mxu1 %vm2196_vm13, %v3494_v54  ;;  %3080 = vst.msk [vmem:[#allocation4 + $0x70] sm:$0xff] %vm1716_vm9, %v3047_v52 }
 0x3e4   : > { %3305 = vst.msk [vmem:[#allocation4 + $0x78] sm:$0xff] %vm1942_vm10, %v3273_v60 }
 0x3e6   : > { %v3271_v55 = vpop.permute.xlu0 %3270 }
 0x3e7   : > { %v3353_v62 = vpop.permute.xlu1 %3352  ;;  %3304 = vst.msk [vmem:[#allocation4 + $0x70] sm:$0xff] %vm1942_vm10, %v3271_v55 }
 0x3e8   : > { %3385 = vst.msk [vmem:[#allocation4 + $0x78] sm:$0xff] %vm2023_vm11, %v3353_v62 }
 0x3ea   : > { %5852 = vmatmul.mubr.msk.bf16.gmra.mrb[24].mxu1 %vm2196_vm13, %v3495_v21  ;;  %v3351_v15 = vpop.permute.xlu0 %3350 }
 0x3eb   : > { %v3449_v35 = vpop.permute.xlu1 %3448  ;;  %3384 = vst.msk [vmem:[#allocation4 + $0x70] sm:$0xff] %vm2023_vm11, %v3351_v15 }
 0x3ec   : > { %3481 = vst.msk [vmem:[#allocation4 + $0x78] sm:$0xff] %vm2120_vm12, %v3449_v35 }
 0x3ee   : > { %v3447_v2 = vpop.permute.xlu0 %3446 }
 0x3ef   : > { %3480 = vst.msk [vmem:[#allocation4 + $0x70] sm:$0xff] %vm2120_vm12, %v3447_v2 }
 0x3f3   : > { %v3497_v17 = vld [vmem:[#allocation4 + $0x78] sm:$0xff] }
 0x3f6   : > { %v3496_v1 = vld [vmem:[#allocation4 + $0x70] sm:$0xff] }
 0x3f7   : > { %5855 = vmatprep.mubr.msk.bf16.mxu1 %vm2196_vm13, %v3496_v1 }
 0x3f8   : > { %5856 = vmatmul.mubr.msk.bf16.gmra.mrb[28].mxu1 %vm2196_vm13, %v3497_v17 }
 0x3f9   : > { %5867 = vmatprep.mubr.msk.bf16.mxu1 %vm6092_vm14, %v6091_v49 }
 0x48d   : > { %v5829_v8 = vpop.f32.mrb[0].mxu1 }
 0x48e   : > { %v3626_v40 = vpop.f32.mrb[1].mxu1  ;;  %v8611_v27 = vadd.f32 %v5829_v8, %v8605_v13 }
 0x48f   : > { %v8608_v33 = vadd.f32 %v8605_v13, %v3626_v40  ;;  %v5830_v0 = vpop.f32.mrb[2].mxu1 }
 0x490   : > { %v3629_v29 = vpop.f32.mrb[3].mxu1  ;;  %v8619_v53 = vadd.f32 %v5830_v0, %v8605_v13  ;;  %v3756_v7 = vsel %vm1199_vm1, %v8611_v27, 0.0 }
 0x491   : > { %v8614_v18 = vadd.f32 %v8605_v13, %v3629_v29  ;;  %v3753_v14 = vsel %vm1199_vm1, %v8608_v33, 0.0 }
 0x492   : > { %v3758_v23 = vsel %vm1199_vm1, %v8619_v53, 0.0 }
 0x493   : > { %v3754_v4 = vsel %vm1199_vm1, %v8614_v18, 0.0 }
 0x494   : > { %v3755_v44 = vadd.f32 %v3754_v4, %v3753_v14 }
 0x495   : > { %v5833_v12 = vpop.f32.mrb[4].mxu1 }
 0x496   : > { %v3757_v51 = vadd.f32 %v3756_v7, %v3755_v44  ;;  %v3642_v32 = vpop.f32.mrb[5].mxu1  ;;  %v8631_v24 = vadd.f32 %v5833_v12, %v8605_v13 }
 0x497   : > { %v8628_v6 = vadd.f32 %v8605_v13, %v3642_v32  ;;  %v5834_v9 = vpop.f32.mrb[6].mxu1 }
 0x498   : > { %v3759_v30 = vadd.f32 %v3758_v23, %v3757_v51  ;;  %v3645_v61 = vpop.f32.mrb[7].mxu1  ;;  %v8639_v25 = vadd.f32 %v5834_v9, %v8605_v13  ;;  %v3764_v57 = vsel %vm1199_vm1, %v8631_v24, 0.0 }
 0x499   : > { %v3760_v48 = vsel %vm1199_vm1, %v8628_v6, 0.0  ;;  %v8636_v31 = vadd.f32 %v8605_v13, %v3645_v61 }
 0x49a   : > { %v3761_v19 = vadd.f32 %v3760_v48, %v3759_v30  ;;  %v3766_v37 = vsel %vm1199_vm1, %v8639_v25, 0.0 }
 0x49b   : > { %v3762_v41 = vsel %vm1199_vm1, %v8636_v31, 0.0 }
 0x49c   : > { %v3763_v58 = vadd.f32 %v3762_v41, %v3761_v19 }
 0x49d   : > { %v5837_v47 = vpop.f32.mrb[8].mxu1 }
 0x49e   : > { %v3765_v38 = vadd.f32 %v3764_v57, %v3763_v58  ;;  %v3658_v34 = vpop.f32.mrb[9].mxu1  ;;  %v8651_v20 = vadd.f32 %v5837_v47, %v8605_v13 }
 0x49f   : > { %v8648_v26 = vadd.f32 %v8605_v13, %v3658_v34  ;;  %v5838_v16 = vpop.f32.mrb[10].mxu1 }
 0x4a0   : > { %v3767_v11 = vadd.f32 %v3766_v37, %v3765_v38  ;;  %v3661_v63 = vpop.f32.mrb[11].mxu1  ;;  %v8659_v54 = vadd.f32 %v5838_v16, %v8605_v13  ;;  %v3772_v55 = vsel %vm1199_vm1, %v8651_v20, 0.0 }
 0x4a1   : > { %v3768_v56 = vsel %vm1199_vm1, %v8648_v26, 0.0  ;;  %v8656_v50 = vadd.f32 %v8605_v13, %v3661_v63 }
 0x4a2   : > { %v3769_v45 = vadd.f32 %v3768_v56, %v3767_v11  ;;  %v3774_v35 = vsel %vm1199_vm1, %v8659_v54, 0.0 }
 0x4a3   : > { %v3770_v52 = vsel %vm1199_vm1, %v8656_v50, 0.0 }
 0x4a4   : > { %v3771_v60 = vadd.f32 %v3770_v52, %v3769_v45 }
 0x4a5   : > { %v5841_v62 = vpop.f32.mrb[12].mxu1 }
 0x4a6   : > { %v3773_v21 = vadd.f32 %v3772_v55, %v3771_v60  ;;  %v3674_v15 = vpop.f32.mrb[13].mxu1  ;;  %v8671_v49 = vadd.f32 %v5841_v62, %v8605_v13 }
 0x4a7   : > { %v8668_v2 = vadd.f32 %v8605_v13, %v3674_v15  ;;  %v5842_v17 = vpop.f32.mrb[14].mxu1 }
 0x4a8   : > { %v3775_v1 = vadd.f32 %v3774_v35, %v3773_v21  ;;  %v3677_v39 = vpop.f32.mrb[15].mxu1  ;;  %v8679_v8 = vadd.f32 %v5842_v17, %v8605_v13  ;;  %v3780_v29 = vsel %vm1199_vm1, %v8671_v49, 0.0 }
 0x4a9   : > { %v3776_v59 = vsel %vm1199_vm1, %v8668_v2, 0.0  ;;  %v8676_v42 = vadd.f32 %v8605_v13, %v3677_v39 }
 0x4aa   : > { %v3777_v22 = vadd.f32 %v3776_v59, %v3775_v1  ;;  %v3782_v7 = vsel %vm1199_vm1, %v8679_v8, 0.0 }
 0x4ab   : > { %v3778_v40 = vsel %vm1199_vm1, %v8676_v42, 0.0 }
 0x4ac   : > { %v3779_v0 = vadd.f32 %v3778_v40, %v3777_v22 }
 0x4ad   : > { %v5845_v14 = vpop.f32.mrb[16].mxu1 }
 0x4ae   : > { %v3781_v4 = vadd.f32 %v3780_v29, %v3779_v0  ;;  %v3690_v44 = vpop.f32.mrb[17].mxu1  ;;  %v8691_v9 = vadd.f32 %v5845_v14, %v8605_v13 }
 0x4af   : > { %v8688_v12 = vadd.f32 %v8605_v13, %v3690_v44  ;;  %v5846_v51 = vpop.f32.mrb[18].mxu1 }
 0x4b0   : > { %v3783_v32 = vadd.f32 %v3782_v7, %v3781_v4  ;;  %v3693_v23 = vpop.f32.mrb[19].mxu1  ;;  %v8699_v19 = vadd.f32 %v5846_v51, %v8605_v13  ;;  %v3788_v57 = vsel %vm1199_vm1, %v8691_v9, 0.0 }
 0x4b1   : > { %v3784_v30 = vsel %vm1199_vm1, %v8688_v12, 0.0  ;;  %v8696_v61 = vadd.f32 %v8605_v13, %v3693_v23 }
 0x4b2   : > { %v3785_v48 = vadd.f32 %v3784_v30, %v3783_v32  ;;  %v3790_v37 = vsel %vm1199_vm1, %v8699_v19, 0.0 }
 0x4b3   : > { %v3786_v41 = vsel %vm1199_vm1, %v8696_v61, 0.0 }
 0x4b4   : > { %v3787_v58 = vadd.f32 %v3786_v41, %v3785_v48 }
 0x4b5   : > { %v5849_v47 = vpop.f32.mrb[20].mxu1 }
 0x4b6   : > { %v3789_v38 = vadd.f32 %v3788_v57, %v3787_v58  ;;  %v3706_v34 = vpop.f32.mrb[21].mxu1  ;;  %v8711_v45 = vadd.f32 %v5849_v47, %v8605_v13 }
 0x4b7   : > { %v8708_v16 = vadd.f32 %v8605_v13, %v3706_v34  ;;  %v5850_v11 = vpop.f32.mrb[22].mxu1 }
 0x4b8   : > { %v3791_v63 = vadd.f32 %v3790_v37, %v3789_v38  ;;  %v3709_v56 = vpop.f32.mrb[23].mxu1  ;;  %v8719_v62 = vadd.f32 %v5850_v11, %v8605_v13  ;;  %v3796_v35 = vsel %vm1199_vm1, %v8711_v45, 0.0 }
 0x4b9   : > { %v3792_v52 = vsel %vm1199_vm1, %v8708_v16, 0.0  ;;  %v8716_v60 = vadd.f32 %v8605_v13, %v3709_v56 }
 0x4ba   : > { %v3793_v55 = vadd.f32 %v3792_v52, %v3791_v63  ;;  %v3798_v59 = vsel %vm1199_vm1, %v8719_v62, 0.0 }
 0x4bb   : > { %v3794_v21 = vsel %vm1199_vm1, %v8716_v60, 0.0 }
 0x4bc   : > { %v3795_v15 = vadd.f32 %v3794_v21, %v3793_v55 }
 0x4bd   : > { %v5853_v17 = vpop.f32.mrb[24].mxu1 }
 0x4be   : > { %v3797_v1 = vadd.f32 %v3796_v35, %v3795_v15  ;;  %v3722_v39 = vpop.f32.mrb[25].mxu1  ;;  %v8738_v51 = vadd.f32 %v5853_v17, %v8605_v13 }
 0x4bf   : > { %v8728_v22 = vadd.f32 %v8605_v13, %v3722_v39  ;;  %v5854_v40 = vpop.f32.mrb[26].mxu1 }
 0x4c0   : > { %v3799_v0 = vadd.f32 %v3798_v59, %v3797_v1  ;;  %v3725_v29 = vpop.f32.mrb[27].mxu1  ;;  %v3804_v23 = vsel %vm1199_vm1, %v8738_v51, 0.0  ;;  %v8743_v30 = vadd.f32 %v5854_v40, %v8605_v13 }
 0x4c1   : > { %v3800_v14 = vsel %vm1199_vm1, %v8728_v22, 0.0  ;;  %v8733_v4 = vadd.f32 %v8605_v13, %v3725_v29 }
 0x4c2   : > { %v3801_v44 = vadd.f32 %v3800_v14, %v3799_v0  ;;  %v3806_v57 = vsel %vm1199_vm1, %v8743_v30, 0.0 }
 0x4c3   : > { %v3802_v7 = vsel %vm1199_vm1, %v8733_v4, 0.0 }
 0x4c4   : > { %v3803_v32 = vadd.f32 %v3802_v7, %v3801_v44 }
 0x4c6   : > { %v3805_v48 = vadd.f32 %v3804_v23, %v3803_v32  ;;  %v3826_v32 = vld [vmem:[%s568_s21] sm:$0x1] }
 0x4c8   : > { %v3807_v34 = vadd.f32 %v3806_v57, %v3805_v48 }
 0x4cb   : > { %v5857_v41 = vpop.f32.mrb[28].mxu1 }
 0x4cc   : > { %v3738_v58 = vpop.f32.mrb[29].mxu1  ;;  %v8751_v11 = vadd.f32 %v5857_v41, %v8605_v13 }
 0x4cd   : > { %v8748_v47 = vadd.f32 %v8605_v13, %v3738_v58  ;;  %v5858_v38 = vpop.f32.mrb[30].mxu1 }
 0x4ce   : > { %v3741_v37 = vpop.f32.mrb[31].mxu1  ;;  %v8759_v55 = vadd.f32 %v5858_v38, %v8605_v13  ;;  %v3812_v35 = vsel %vm1199_vm1, %v8751_v11, 0.0 }
 0x4cf   : > { %v3808_v63 = vsel %vm1199_vm1, %v8748_v47, 0.0  ;;  %v8756_v56 = vadd.f32 %v8605_v13, %v3741_v37  ;;  %v3876_v37 = vld [vmem:[%s574_s12] sm:$0x1] }
 0x4d0   : > { %v3809_v52 = vadd.f32 %v3808_v63, %v3807_v34  ;;  %v3814_v1 = vsel %vm1199_vm1, %v8759_v55, 0.0 }
 0x4d1   : > { %v3810_v21 = vsel %vm1199_vm1, %v8756_v56, 0.0 }
 0x4d2   : > { %v3811_v15 = vadd.f32 %v3810_v21, %v3809_v52 }
 0x4d4   : > { %v3813_v17 = vadd.f32 %v3812_v35, %v3811_v15 }
 0x4d6   : > { %v3815_v39 = vadd.f32 %v3814_v1, %v3813_v17 }
 0x4d8   : > { %v3816_v59 = vrot.slane %v3815_v39, 4 }
 0x4da   : > { %v3817_v40 = vadd.f32 %v3816_v59, %v3815_v39  ;;  %v3933_v59 = vsub.s32 0, %v6533_v36 }
 0x4dc   : > { %v3818_v0 = vrot.slane %v3817_v40, 2 }
 0x4de   : > { %v3819_v29 = vadd.f32 %v3818_v0, %v3817_v40 }
 0x4e0   : > { %v3820_v13 = vrot.slane %v3819_v29, 1 }
 0x4e2   : > { %v3821_v14 = vadd.f32 %v3820_v13, %v3819_v29 }
 0x4e4   : > { %v3823_v44 = vmul.f32 0.00390625, %v3821_v14 }
 0x4e6   : > { %v3824_v7 = vpack.c.bf16 %v3823_v44, %v3823_v44 }
 0x4e8   : > { %5862 = vmatmul.mubr.msk.bf16.vlgmr.msra.gmra.mrb[32].mxu0 %vm1199_vm1, %v3824_v7 }
 0x5bb   : > { %v3867_v23 = vpop.f32.mrb[32].mxu0 }
 0x5bc   : > { %v3868_v48 = vadd.f32 %v3867_v23, %v3826_v32  ;;  %v5863_v41 = vpop.f32.mrb[33].mxu0 }
 0x5bd   : > { %v3870_v58 = vpop.f32.mrb[34].mxu0 }
 0x5be   : > { %v3873_v57 = vmax.f32 %v3868_v48, 0.0  ;;  %v5864_v38 = vpop.f32.mrb[35].mxu0 }
 0x5c0   : > { %v3874_v34 = vpack.c.bf16 %v3873_v57, %v3873_v57 }
 0x5c2   : > { %5868 = vmatmul.mubr.msk.bf16.vlgmr.msra.gmra.mrb[32].mxu1 %vm3877_vm0, %v3874_v34  ;;  %v6008_v34 = vld [vmem:[#allocation2 + $0x20] sm:$0xff] }
 0x695   : > { %v3919_v63 = vpop.f32.mrb[32].mxu1 }
 0x696   : > { %v3920_v52 = vadd.f32 %v3919_v63, %v3876_v37  ;;  %v5869_v21 = vpop.f32.mrb[33].mxu1  ;;  %v6009_v37 = vld [vmem:[#allocation2 + $0x28] sm:$0xff] }
 0x697   : > { %v3922_v15 = vpop.f32.mrb[34].mxu1  ;;  %v6011_v21 = vld [vmem:[#allocation2 + $0x38] sm:$0xff] }
 0x698   : > { %v5680_v35 = vmul.f32 -1.442695, %v3920_v52  ;;  %v5870_v17 = vpop.f32.mrb[35].mxu1  ;;  %v6012_v15 = vld [vmem:[#allocation2 + $0x40] sm:$0xff] }
 0x69a   : > { %6000 = vpow2.f32 %v5680_v35 }
 0x6a4   : > { %v6001_v1 = vpop.eup %6000 }
 0x6a5   : > { %v3928_v39 = vadd.f32 1.0, %v6001_v1  ;;  %v6014_v1 = vld [vmem:[#allocation2 + $0x50] sm:$0xff] }
 0x6a7   : > { %6002 = vrcp.f32 %v3928_v39 }
 0x6b1   : > { %v6003_v40 = vpop.eup %6002 }
 0x6b2   : > { %v3934_v0 = vrot.slane %v6003_v40, %v3933_v59  ;;  %v6015_v59 = vld [vmem:[#allocation2 + $0x58] sm:$0xff] }
 0x6b4   : > { %v3935_v29 = vmul.f32 %v3934_v0, %v8608_v33  ;;  %v3936_v13 = vmul.f32 %v3934_v0, %v8614_v18  ;;  %v3937_v14 = vmul.f32 %v3934_v0, %v8611_v27  ;;  %v3938_v44 = vmul.f32 %v3934_v0, %v8619_v53 }
 0x6b5   : > { %v3939_v7 = vmul.f32 %v3934_v0, %v8628_v6  ;;  %v3940_v32 = vmul.f32 %v3934_v0, %v8636_v31  ;;  %v3941_v23 = vmul.f32 %v3934_v0, %v8631_v24  ;;  %v3942_v48 = vmul.f32 %v3934_v0, %v8639_v25 }
 0x6b6   : > { %v3943_v41 = vmul.f32 %v3934_v0, %v8648_v26  ;;  %v3944_v58 = vmul.f32 %v3934_v0, %v8656_v50  ;;  %v3945_v33 = vmul.f32 %v3934_v0, %v8651_v20  ;;  %v3946_v18 = vmul.f32 %v3934_v0, %v8659_v54 }
 0x6b7   : > { %v3947_v27 = vmul.f32 %v3934_v0, %v8668_v2  ;;  %v3948_v53 = vmul.f32 %v3934_v0, %v8676_v42  ;;  %v3949_v6 = vmul.f32 %v3934_v0, %v8671_v49  ;;  %v3950_v31 = vmul.f32 %v3934_v0, %v8679_v8 }
 0x6b8   : > { %v3951_v24 = vmul.f32 %v3934_v0, %v8688_v12  ;;  %v3952_v25 = vmul.f32 %v3934_v0, %v8696_v61  ;;  %v3953_v26 = vmul.f32 %v3934_v0, %v8691_v9  ;;  %v3954_v50 = vmul.f32 %v3934_v0, %v8699_v19 }
 0x6b9   : > { %v8800_v20 = vmul.f32 %v3934_v0, %v8708_v16  ;;  %v8803_v54 = vmul.f32 %v3934_v0, %v8716_v60  ;;  %v8806_v2 = vmul.f32 %v3934_v0, %v8711_v45  ;;  %v8809_v49 = vmul.f32 %v3934_v0, %v8719_v62  ;;  %v6004_v60 = vld [vmem:[#allocation2] sm:$0xff] }
 0x6ba   : > { %v8812_v42 = vmul.f32 %v3934_v0, %v8728_v22  ;;  %v8815_v8 = vmul.f32 %v3934_v0, %v8733_v4  ;;  %v8818_v12 = vmul.f32 %v3934_v0, %v8738_v51  ;;  %v8821_v9 = vmul.f32 %v3934_v0, %v8743_v30  ;;  %v6005_v22 = vld [vmem:[#allocation2 + $0x8] sm:$0xff]  ;;  %v6006_v51 = vld [vmem:[#allocation2 + $0x10] sm:$0xff]  ;;  %v6007_v30 = vld [vmem:[#allocation2 + $0x18] sm:$0xff] }
 0x6bb   : > { %v8824_v61 = vmul.f32 %v3934_v0, %v8748_v47  ;;  %v8827_v19 = vmul.f32 %v3934_v0, %v8756_v56  ;;  %v8830_v16 = vmul.f32 %v3934_v0, %v8751_v11  ;;  %v8833_v45 = vmul.f32 %v3934_v0, %v8759_v55  ;;  %v6010_v56 = vld [vmem:[#allocation2 + $0x30] sm:$0xff]  ;;  %v6013_v55 = vld [vmem:[#allocation2 + $0x48] sm:$0xff]  ;;  %v6016_v0 = vld [vmem:[#allocation2 + $0x60] sm:$0xff] }
 0x6bc   : > { %v3967_v62 = vadd.f32 %v6004_v60, %v3935_v29  ;;  %v3968_v4 = vadd.f32 %v6005_v22, %v3936_v13  ;;  %v3969_v57 = vadd.f32 %v6006_v51, %v3937_v14  ;;  %v3970_v38 = vadd.f32 %v6007_v30, %v3938_v44  ;;  %v6017_v13 = vld [vmem:[#allocation2 + $0x68] sm:$0xff]  ;;  %v6018_v44 = vld [vmem:[#allocation2 + $0x70] sm:$0xff]  ;;  %v6023_v60 = vld [vmem:[#allocation2 + $0x98] sm:$0xff] }
 0x6bd   : > { %v3971_v47 = vadd.f32 %v6008_v34, %v3939_v7  ;;  %v3972_v63 = vadd.f32 %v6009_v37, %v3940_v32  ;;  %v3973_v52 = vadd.f32 %v6010_v56, %v3941_v23  ;;  %v3974_v11 = vadd.f32 %v6011_v21, %v3942_v48  ;;  %v6019_v32 = vld [vmem:[#allocation2 + $0x78] sm:$0xff]  ;;  %v6020_v48 = vld [vmem:[#allocation2 + $0x80] sm:$0xff]  ;;  %v6026_v22 = vld [vmem:[#allocation2 + $0xb0] sm:$0xff] }
 0x6be   : > { %v3975_v35 = vadd.f32 %v6012_v15, %v3943_v41  ;;  %v3976_v17 = vadd.f32 %v6013_v55, %v3944_v58  ;;  %v3977_v39 = vadd.f32 %v6014_v1, %v3945_v33  ;;  %v3978_v40 = vadd.f32 %v6015_v59, %v3946_v18  ;;  %3999 = vst.msk [vmem:[#allocation2] sm:$0xff] %vm1199_vm1, %v3967_v62  ;;  %v6021_v58 = vld [vmem:[#allocation2 + $0x88] sm:$0xff]  ;;  %v6022_v18 = vld [vmem:[#allocation2 + $0x90] sm:$0xff]  ;;  %v6031_v30 = vld [vmem:[#allocation2 + $0xd8] sm:$0xff] }
 0x6bf   : > { %4000 = vst.msk [vmem:[#allocation2 + $0x8] sm:$0xff] %vm1199_vm1, %v3968_v4  ;;  %4001 = vst.msk [vmem:[#allocation2 + $0x10] sm:$0xff] %vm1199_vm1, %v3969_v57  ;;  %v3979_v29 = vadd.f32 %v6016_v0, %v3947_v27  ;;  %v3980_v14 = vadd.f32 %v6017_v13, %v3948_v53  ;;  %v3981_v7 = vadd.f32 %v6018_v44, %v3949_v6  ;;  %v6024_v6 = vld [vmem:[#allocation2 + $0xa0] sm:$0xff]  ;;  %v6025_v62 = vld [vmem:[#allocation2 + $0xa8] sm:$0xff] }
 0x6c0   : > { %4002 = vst.msk [vmem:[#allocation2 + $0x18] sm:$0xff] %vm1199_vm1, %v3970_v38  ;;  %v3982_v23 = vadd.f32 %v6019_v32, %v3950_v31  ;;  %4003 = vst.msk [vmem:[#allocation2 + $0x20] sm:$0xff] %vm1199_vm1, %v3971_v47  ;;  %v3983_v41 = vadd.f32 %v6020_v48, %v3951_v24  ;;  %v3984_v33 = vadd.f32 %v6021_v58, %v3952_v25  ;;  %v6028_v4 = vld [vmem:[#allocation2 + $0xc0] sm:$0xff]  ;;  %v6029_v51 = vld [vmem:[#allocation2 + $0xc8] sm:$0xff] }
 0x6c1   : > { %4004 = vst.msk [vmem:[#allocation2 + $0x28] sm:$0xff] %vm1199_vm1, %v3972_v63  ;;  %4005 = vst.msk [vmem:[#allocation2 + $0x30] sm:$0xff] %vm1199_vm1, %v3973_v52  ;;  %v3985_v27 = vadd.f32 %v6022_v18, %v3953_v26  ;;  %v3986_v53 = vadd.f32 %v6023_v60, %v3954_v50  ;;  %v3987_v31 = vadd.f32 %v6024_v6, %v8800_v20  ;;  %v6027_v26 = vld [vmem:[#allocation2 + $0xb8] sm:$0xff]  ;;  %v6030_v57 = vld [vmem:[#allocation2 + $0xd0] sm:$0xff] }
 0x6c2   : > { %4006 = vst.msk [vmem:[#allocation2 + $0x38] sm:$0xff] %vm1199_vm1, %v3974_v11  ;;  %4007 = vst.msk [vmem:[#allocation2 + $0x40] sm:$0xff] %vm1199_vm1, %v3975_v35  ;;  %v3988_v24 = vadd.f32 %v6025_v62, %v8803_v54  ;;  %v3989_v25 = vadd.f32 %v6026_v22, %v8806_v2  ;;  %v3990_v50 = vadd.f32 %v6027_v26, %v8809_v49  ;;  %v6032_v38 = vld [vmem:[#allocation2 + $0xe0] sm:$0xff]  ;;  %v6033_v34 = vld [vmem:[#allocation2 + $0xe8] sm:$0xff] }
 0x6c3   : > { %4008 = vst.msk [vmem:[#allocation2 + $0x48] sm:$0xff] %vm1199_vm1, %v3976_v17  ;;  %4009 = vst.msk [vmem:[#allocation2 + $0x50] sm:$0xff] %vm1199_vm1, %v3977_v39  ;;  %v3991_v20 = vadd.f32 %v6028_v4, %v8812_v42  ;;  %v3992_v54 = vadd.f32 %v6029_v51, %v8815_v8  ;;  %v3993_v2 = vadd.f32 %v6030_v57, %v8818_v12  ;;  %v6034_v47 = vld [vmem:[#allocation2 + $0xf0] sm:$0xff]  ;;  %v6035_v37 = vld [vmem:[#allocation2 + $0xf8] sm:$0xff] }
 0x6c4   : > { %4010 = vst.msk [vmem:[#allocation2 + $0x58] sm:$0xff] %vm1199_vm1, %v3978_v40  ;;  %4011 = vst.msk [vmem:[#allocation2 + $0x60] sm:$0xff] %vm1199_vm1, %v3979_v29  ;;  %v3994_v49 = vadd.f32 %v6031_v30, %v8821_v9  ;;  %v3995_v42 = vadd.f32 %v6032_v38, %v8824_v61  ;;  %v3996_v8 = vadd.f32 %v6033_v34, %v8827_v19 }
 0x6c5   : > { %4012 = vst.msk [vmem:[#allocation2 + $0x68] sm:$0xff] %vm1199_vm1, %v3980_v14  ;;  %4013 = vst.msk [vmem:[#allocation2 + $0x70] sm:$0xff] %vm1199_vm1, %v3981_v7  ;;  %v3997_v12 = vadd.f32 %v6034_v47, %v8830_v16  ;;  %v3998_v9 = vadd.f32 %v6035_v37, %v8833_v45 }
 0x6c6   : > { %4014 = vst.msk [vmem:[#allocation2 + $0x78] sm:$0xff] %vm1199_vm1, %v3982_v23  ;;  %4015 = vst.msk [vmem:[#allocation2 + $0x80] sm:$0xff] %vm1199_vm1, %v3983_v41 }
 0x6c7   : > { %4016 = vst.msk [vmem:[#allocation2 + $0x88] sm:$0xff] %vm1199_vm1, %v3984_v33  ;;  %4017 = vst.msk [vmem:[#allocation2 + $0x90] sm:$0xff] %vm1199_vm1, %v3985_v27 }
 0x6c8   : > { %4018 = vst.msk [vmem:[#allocation2 + $0x98] sm:$0xff] %vm1199_vm1, %v3986_v53  ;;  %4019 = vst.msk [vmem:[#allocation2 + $0xa0] sm:$0xff] %vm1199_vm1, %v3987_v31  ;;  %4034 = sbr.rel (%p5681_p8) target bundleno = 2354 (0x932), region = 80 }
 0x6c9   : > { %4020 = vst.msk [vmem:[#allocation2 + $0xa8] sm:$0xff] %vm1199_vm1, %v3988_v24  ;;  %4021 = vst.msk [vmem:[#allocation2 + $0xb0] sm:$0xff] %vm1199_vm1, %v3989_v25 }
 0x6ca   : > { %4022 = vst.msk [vmem:[#allocation2 + $0xb8] sm:$0xff] %vm1199_vm1, %v3990_v50  ;;  %4023 = vst.msk [vmem:[#allocation2 + $0xc0] sm:$0xff] %vm1199_vm1, %v3991_v20 }
 0x6cb   : > { %4024 = vst.msk [vmem:[#allocation2 + $0xc8] sm:$0xff] %vm1199_vm1, %v3992_v54  ;;  %4025 = vst.msk [vmem:[#allocation2 + $0xd0] sm:$0xff] %vm1199_vm1, %v3993_v2 }
 0x6cc   : > { %4026 = vst.msk [vmem:[#allocation2 + $0xd8] sm:$0xff] %vm1199_vm1, %v3994_v49  ;;  %4027 = vst.msk [vmem:[#allocation2 + $0xe0] sm:$0xff] %vm1199_vm1, %v3995_v42 }
 0x6cd   : > { %4028 = vst.msk [vmem:[#allocation2 + $0xe8] sm:$0xff] %vm1199_vm1, %v3996_v8  ;;  %4029 = vst.msk [vmem:[#allocation2 + $0xf0] sm:$0xff] %vm1199_vm1, %v3997_v12 }
 0x6ce   : > { %4030 = vst.msk [vmem:[#allocation2 + $0xf8] sm:$0xff] %vm1199_vm1, %v3998_v9 }
 0x6cf   : > { %v8880_v61 = vld [vmem:[#allocation3] sm:$0xff]  ;;  %v8882_v19 = vld [vmem:[#allocation2 + $0x8] sm:$0xff]  ;;  %v8884_v16 = vld [vmem:[#allocation2 + $0x10] sm:$0xff]  ;;  %s6093_s15 = smov 8   ;;  %s6094_s25 = smov 24  }
 0x6d0   : > { %4467 = vrot.lane.b32.xlu0 %v8880_v61, %s6093_s15  ;;  %v8888_v45 = vld [vmem:[#allocation2 + $0x18] sm:$0xff]  ;;  %v8890_v63 = vld [vmem:[#allocation2 + $0x20] sm:$0xff]  ;;  %v8892_v56 = vld [vmem:[#allocation2 + $0x28] sm:$0xff]  ;;  %v4068_v52 = vrot.slane %v8882_v19, 7  ;;  %v4069_v21 = vrot.slane %v8884_v16, 7  ;;  %4211 = vst.msk [vmem:[#allocation4] sm:$0xff] %vm1199_vm1, %v8880_v61 }
 0x6d1   : > { %v4070_v11 = vrot.slane %v8888_v45, 7  ;;  %v4071_v15 = vrot.slane %v8890_v63, 7  ;;  %v4072_v35 = vrot.slane %v8892_v56, 7  ;;  %v8901_v55 = vld [vmem:[#allocation2] sm:$0xff]  ;;  %v4708_v39 = vrot.slane %v8882_v19, 1  ;;  %v8910_v0 = vld [vmem:[#allocation2 + $0x88] sm:$0xff] }
 0x6d2   : > { %v4128_v1 = vsel %vm1118_vm2, %v4068_v52, %v4069_v21  ;;  %v4067_v59 = vrot.slane %v8901_v55, 7  ;;  %v8912_v29 = vld [vmem:[#allocation2 + $0x90] sm:$0xff]  ;;  %v8923_v23 = vld [vmem:[#allocation2 + $0x98] sm:$0xff]  ;;  %v10375_v48 = vld [vmem:[#allocation12_spill] sm:$0xff]  ;;  %v4084_v24 = vrot.slane %v8910_v0, 7  ;;  %v4724_v30 = vrot.slane %v8910_v0, 1 }
 0x6d3   : > { %v4125_v13 = vsel %vm1118_vm2, %v4071_v15, %v4072_v35  ;;  %v4126_v14 = vsel %vm1118_vm2, %v4070_v11, %v4071_v15  ;;  %v4127_v44 = vsel %vm1118_vm2, %v4069_v21, %v4070_v11  ;;  %v10374_v7 = vld [vmem:[#allocation10_spill] sm:$0xff]  ;;  %v10376_v58 = vld [vmem:[#allocation15_spill] sm:$0xff]  ;;  %v8930_v53 = vld [vmem:[#allocation2 + $0xa0] sm:$0xff]  ;;  %v4085_v22 = vrot.slane %v8912_v29, 7  ;;  %s6095_s21 = smov 48   ;;  %s6096_s12 = smov 32  }
 0x6d4   : > { %v4133_v32 = vmul.f32 %v4128_v1, %v10374_v7  ;;  %v4134_v41 = vmul.f32 %v4127_v44, %v10375_v48  ;;  %v4135_v33 = vmul.f32 %v4126_v14, %v10376_v58  ;;  %v10377_v18 = vld [vmem:[#allocation14_spill] sm:$0xff]  ;;  %v4129_v60 = vsel %vm1118_vm2, %v4067_v59, %v4068_v52  ;;  %v10378_v31 = vld [vmem:[#allocation13_spill] sm:$0xff]  ;;  %v10379_v4 = vld [vmem:[#allocation11_spill] sm:$0xff]  ;;  %s6097_s0 = smov 56   ;;  %s10441_s29 = sld [smem:[#allocation89_spill]] }
 0x6d5   : > { %v8903_v17 = vld [vmem:[#allocation2 + $0xf8] sm:$0xff]  ;;  %v4136_v27 = vmul.f32 %v4125_v13, %v10377_v18  ;;  %v4132_v62 = vmul.f32 %v4129_v60, %v10378_v31  ;;  %v8939_v25 = vld [vmem:[#allocation2 + $0x68] sm:$0xff]  ;;  %v4086_v51 = vrot.slane %v8923_v23, 7  ;;  %v8945_v54 = vld [vmem:[#allocation2 + $0x70] sm:$0xff]  ;;  %v4087_v57 = vrot.slane %v8930_v53, 7  ;;  %s6098_s16 = smov 16  }
 0x6d6   : > { %v10211_v40 = vrot.slane %v8903_v17, 7  ;;  %v4164_v26 = vpack.c.bf16 %v4134_v41, %v4133_v32  ;;  %v4112_v2 = vsel %vm1118_vm2, %v4084_v24, %v4085_v22  ;;  %v4725_v49 = vrot.slane %v8912_v29, 1  ;;  %v4050_v38 = vld [vmem:[#allocation2 + $0x78] sm:$0xff]  ;;  %v4051_v42 = vld [vmem:[#allocation2 + $0x80] sm:$0xff]  ;;  %v10381_v52 = vld [vmem:[#allocation38_spill] sm:$0xff]  ;;  %s6099_s24 = smov 40  }
 0x6d7   : > { %v8941_v50 = vpack.c.bf16 %v4136_v27, %v4135_v33  ;;  %v4111_v8 = vsel %vm1118_vm2, %v4085_v22, %v4086_v51  ;;  %v10380_v47 = vld [vmem:[#allocation39_spill] sm:$0xff]  ;;  %v10213_v37 = vrot.slane %v8939_v25, 7  ;;  %v4110_v9 = vsel %vm1118_vm2, %v4086_v51, %v4087_v57  ;;  %v10383_v32 = vld [vmem:[#allocation52_spill] sm:$0xff]  ;;  %v8980_v33 = vld [vmem:[#allocation2 + $0xa8] sm:$0xff]  ;;  %s6100_s26 = smov 64  }
 0x6d8   : > { %v4130_v6 = vsel %vm1118_vm2, %v10211_v40, %v4067_v59  ;;  %4245 = vrot.lane.b32.xlu1 %v4164_v26, %s6094_s25  ;;  %4180 = vst.msk [vmem:[#allocation3 + $0x10] sm:$0xff] %vm1199_vm1, %v4164_v26  ;;  %v4149_v12 = vmul.f32 %v4112_v2, %v10380_v47  ;;  %v4150_v21 = vmul.f32 %v4111_v8, %v10381_v52  ;;  %v4081_v15 = vrot.slane %v8945_v54, 7  ;;  %v10382_v59 = vld [vmem:[#allocation43_spill] sm:$0xff] }
 0x6d9   : > { %v4131_v20 = vmul.f32 %v4130_v6, %v10379_v4  ;;  %4181 = vst.msk [vmem:[#allocation3 + $0x18] sm:$0xff] %vm1199_vm1, %v8941_v50  ;;  %v4752_v11 = vsel %vm1765_vm3, %v4724_v30, %v4725_v49  ;;  %v4709_v1 = vrot.slane %v8884_v16, 1  ;;  %v4151_v13 = vmul.f32 %v4110_v9, %v10382_v59  ;;  %v10384_v6 = vld [vmem:[#allocation31_spill] sm:$0xff] }
 0x6da   : > { %v4082_v14 = vrot.slane %v4050_v38, 7  ;;  %v4083_v44 = vrot.slane %v4051_v42, 7  ;;  %v4172_v7 = vpack.c.bf16 %v4150_v21, %v4149_v12  ;;  %v8973_v48 = vmul.f32 %v4752_v11, %v10383_v32  ;;  %v10386_v26 = vld [vmem:[#allocation35_spill] sm:$0xff]  ;;  %s10442_s30 = smov %s10441_s29 }
 0x6db   : > { %v4163_v34 = vpack.c.bf16 %v4132_v62, %v4131_v20  ;;  %v4116_v41 = vsel %vm1118_vm2, %v10213_v37, %v4081_v15  ;;  %v10212_v58 = vrot.slane %v8945_v54, 1  ;;  %v10385_v62 = vld [vmem:[#allocation30_spill] sm:$0xff]  ;;  %v4722_v2 = vrot.slane %v4050_v38, 1 }
 0x6dc   : > { %v4113_v18 = vsel %vm1118_vm2, %v4083_v44, %v4084_v24  ;;  %v4114_v27 = vsel %vm1118_vm2, %v4082_v14, %v4083_v44  ;;  %v4115_v60 = vsel %vm1118_vm2, %v4081_v15, %v4082_v14  ;;  %v4145_v31 = vmul.f32 %v4116_v41, %v10384_v6  ;;  %4188 = vst.msk [vmem:[#allocation3 + $0x50] sm:$0xff] %vm1199_vm1, %v4172_v7  ;;  %v10387_v20 = vld [vmem:[#allocation34_spill] sm:$0xff]  ;;  %v10390_v14 = vld [vmem:[#allocation49_spill] sm:$0xff] }
 0x6dd   : > { %4243 = vrot.lane.b32.xlu0 %v4163_v34, %s6094_s25  ;;  %4179 = vst.msk [vmem:[#allocation3 + $0x8] sm:$0xff] %vm1199_vm1, %v4163_v34  ;;  %4261 = vrot.lane.b32.xlu1 %v4172_v7, %s6094_s25  ;;  %v4146_v22 = vmul.f32 %v4115_v60, %v10385_v62  ;;  %v4147_v4 = vmul.f32 %v4114_v27, %v10386_v26  ;;  %v4723_v34 = vrot.slane %v4051_v42, 1  ;;  %v4088_v47 = vrot.slane %v8980_v33, 7  ;;  %v10392_v7 = vld [vmem:[#allocation42_spill] sm:$0xff]  ;;  %v10393_v26 = vld [vmem:[#allocation53_spill] sm:$0xff] }
 0x6de   : > { %v4148_v51 = vmul.f32 %v4113_v18, %v10387_v20  ;;  %v8995_v24 = vpack.c.bf16 %v4050_v38, %v8945_v54  ;;  %v8999_v8 = vpack.c.bf16 %v8892_v56, %v8890_v63  ;;  %v4755_v52 = vsel %vm1765_vm3, %v10212_v58, %v4722_v2  ;;  %v9038_v27 = vld [vmem:[#allocation2 + $0x30] sm:$0xff] }
 0x6df   : > { %v9002_v12 = vpack.c.bf16 %v4146_v22, %v4145_v31  ;;  %v4307_v21 = vld [vmem:[#allocation3 + $0x10] sm:$0xff]  ;;  %v9009_v11 = vpack.c.bf16 %v8910_v0, %v4051_v42  ;;  %v4753_v15 = vsel %vm1765_vm3, %v4723_v34, %v4724_v30  ;;  %v4754_v59 = vsel %vm1765_vm3, %v4722_v2, %v4723_v34  ;;  %v10391_v30 = vld [vmem:[#allocation48_spill] sm:$0xff] }
 0x6e0   : > { %10388 = vst [vmem:[#allocation70_spill] sm:$0xff] %v8995_v24  ;;  %v4171_v9 = vpack.c.bf16 %v4148_v51, %v4147_v4  ;;  %v4198_v38 = vld [vmem:[#allocation3 + $0x18] sm:$0xff]  ;;  %v4785_v44 = vmul.f32 %v4755_v52, %v10390_v14  ;;  %v4109_v0 = vsel %vm1118_vm2, %v4087_v57, %v4088_v47  ;;  %4213 = vst.msk [vmem:[#allocation4 + $0x10] sm:$0xff] %vm1199_vm1, %v4307_v21  ;;  %v10210_v60 = vrot.slane %v8901_v55, 1  ;;  %v9056_v22 = vld [vmem:[#allocation2 + $0xb0] sm:$0xff] }
 0x6e1   : > { %10389 = vst [vmem:[#allocation71_spill] sm:$0xff] %v9002_v12  ;;  %4421 = vst.msk [vmem:[#allocation3 + $0x18] sm:$0xff] %vm1199_vm1, %v8999_v8  ;;  %v4786_v42 = vmul.f32 %v4754_v59, %v10391_v30  ;;  %v4152_v32 = vmul.f32 %v4109_v0, %v10392_v7  ;;  %v9032_v41 = vpack.c.bf16 %v8980_v33, %v8930_v53  ;;  %v10395_v2 = vld [vmem:[#allocation20_spill] sm:$0xff]  ;;  %v4713_v59 = vrot.slane %v9038_v27, 1  ;;  %v10414_v58 = vld [vmem:[#allocation46_spill] sm:$0xff] }
 0x6e2   : > { %4214 = vst.msk [vmem:[#allocation4 + $0x18] sm:$0xff] %vm1199_vm1, %v4198_v38  ;;  %4187 = vst.msk [vmem:[#allocation3 + $0x48] sm:$0xff] %vm1199_vm1, %v4171_v9  ;;  %4259 = vrot.lane.b32.xlu0 %v4171_v9, %s6094_s25  ;;  %v9036_v57 = vpack.c.bf16 %v8882_v19, %v8901_v55  ;;  %v4768_v6 = vsel %vm1765_vm3, %v4708_v39, %v4709_v1  ;;  %v9050_v31 = vpack.c.bf16 %v8888_v45, %v8884_v16  ;;  %v10396_v19 = vld [vmem:[#allocation21_spill] sm:$0xff] }
 0x6e3   : > { %4186 = vst.msk [vmem:[#allocation3 + $0x40] sm:$0xff] %vm1199_vm1, %v9002_v12  ;;  %v9054_v62 = vpack.c.bf16 %v8923_v23, %v8912_v29  ;;  %v4787_v4 = vmul.f32 %v4753_v15, %v10393_v26  ;;  %v9059_v20 = vpack.c.bf16 %v4152_v32, %v4151_v13  ;;  %v9061_v51 = vpack.c.bf16 %v4786_v42, %v4785_v44  ;;  %v4315_v9 = vld [vmem:[#allocation3 + $0x50] sm:$0xff]  ;;  %v10397_v32 = vld [vmem:[#allocation29_spill] sm:$0xff] }
 0x6e4   : > { %v4196_v18 = vld [vmem:[#allocation3 + $0x8] sm:$0xff]  ;;  %v4772_v34 = vmul.f32 %v4768_v6, %v10395_v2  ;;  %v4769_v52 = vsel %vm1765_vm3, %v10210_v60, %v4708_v39  ;;  %4420 = vst.msk [vmem:[#allocation3 + $0x10] sm:$0xff] %vm1199_vm1, %v9050_v31  ;;  %v4711_v13 = vrot.slane %v8890_v63, 1  ;;  %v4712_v15 = vrot.slane %v8892_v56, 1  ;;  %4355 = vrot.lane.b32.xlu1 %v4315_v9, %s6095_s21  ;;  %4221 = vst.msk [vmem:[#allocation4 + $0x50] sm:$0xff] %vm1199_vm1, %v4315_v9  ;;  %v9104_v2 = vld [vmem:[#allocation2 + $0x38] sm:$0xff] }
 0x6e5   : > { %4212 = vst.msk [vmem:[#allocation4 + $0x8] sm:$0xff] %vm1199_vm1, %v4196_v18  ;;  %10394 = vst [vmem:[#allocation72_spill] sm:$0xff] %v9061_v51  ;;  %v4771_v14 = vmul.f32 %v4769_v52, %v10396_v19  ;;  %v4727_v63 = vrot.slane %v8930_v53, 1  ;;  %v4728_v39 = vrot.slane %v8980_v33, 1  ;;  %v10217_v44 = vrot.slane %v9056_v22, 1  ;;  %v10398_v18 = vld [vmem:[#allocation28_spill] sm:$0xff] }
 0x6e6   : > { %4419 = vst.msk [vmem:[#allocation3 + $0x8] sm:$0xff] %vm1199_vm1, %v9036_v57  ;;  %4339 = vrot.lane.b32.xlu0 %v4307_v21, %s6095_s21  ;;  %4189 = vst.msk [vmem:[#allocation3 + $0x58] sm:$0xff] %vm1199_vm1, %v9059_v20  ;;  %v4764_v21 = vsel %vm1765_vm3, %v4712_v15, %v4713_v59  ;;  %v4765_v0 = vsel %vm1765_vm3, %v4711_v13, %v4712_v15  ;;  %v4710_v30 = vrot.slane %v8888_v45, 1  ;;  %v4726_v42 = vrot.slane %v8923_v23, 1  ;;  %v9121_v19 = vld [vmem:[#allocation2 + $0x40] sm:$0xff] }
 0x6e7   : > { %4428 = vst.msk [vmem:[#allocation3 + $0x50] sm:$0xff] %vm1199_vm1, %v9054_v62  ;;  %v9096_v7 = vpack.c.bf16 %v4772_v34, %v4771_v14  ;;  %v4775_v53 = vmul.f32 %v4765_v0, %v10397_v32  ;;  %v4776_v6 = vmul.f32 %v4764_v21, %v10398_v18  ;;  %v4748_v26 = vsel %vm1765_vm3, %v4728_v39, %v10217_v44  ;;  %v10404_v21 = vld [vmem:[#allocation24_spill] sm:$0xff]  ;;  %v10405_v18 = vld [vmem:[#allocation61_spill] sm:$0xff] }
 0x6e8   : > { %v9111_v45 = vpack.c.bf16 %v8973_v48, %v4787_v4  ;;  %v4749_v23 = vsel %vm1765_vm3, %v4727_v63, %v4728_v39  ;;  %v4766_v34 = vsel %vm1765_vm3, %v4710_v30, %v4711_v13  ;;  %v4767_v15 = vsel %vm1765_vm3, %v4709_v1, %v4710_v30  ;;  %4563 = vrot.lane.b32.xlu1 %v9009_v11, %s6096_s12  ;;  %v10402_v1 = vld [vmem:[#allocation60_spill] sm:$0xff]  ;;  %v10403_v4 = vld [vmem:[#allocation25_spill] sm:$0xff]  ;;  %v9139_v39 = vld [vmem:[#allocation3 + $0x18] sm:$0xff] }
 0x6e9   : > { %v9108_v52 = vld [vmem:[#allocation3 + $0x48] sm:$0xff]  ;;  %v9134_v16 = vpack.c.bf16 %v4776_v6, %v4775_v53  ;;  %v4792_v48 = vmul.f32 %v4748_v26, %v10402_v1  ;;  %v4773_v13 = vmul.f32 %v4767_v15, %v10403_v4  ;;  %v4774_v0 = vmul.f32 %v4766_v34, %v10404_v21  ;;  %v9149_v53 = vld [vmem:[#allocation2 + $0xb8] sm:$0xff]  ;;  %v9159_v1 = vld [vmem:[#allocation2 + $0xc0] sm:$0xff] }
 0x6ea   : > { %v9106_v9 = vld [vmem:[#allocation3 + $0x40] sm:$0xff]  ;;  %10400 = vst [vmem:[#allocation74_spill] sm:$0xff] %v9108_v52  ;;  %4341 = vrot.lane.b32.xlu0 %v4198_v38, %s6095_s21  ;;  %4427 = vst.msk [vmem:[#allocation3 + $0x48] sm:$0xff] %vm1199_vm1, %v9009_v11  ;;  %v4073_v38 = vrot.slane %v9038_v27, 7  ;;  %v4750_v30 = vsel %vm1765_vm3, %v4726_v42, %v4727_v63  ;;  %v4751_v11 = vsel %vm1765_vm3, %v4725_v49, %v4726_v42  ;;  %v4074_v32 = vrot.slane %v9104_v2, 7  ;;  %v10406_v26 = vld [vmem:[#allocation57_spill] sm:$0xff] }
 0x6eb   : > { %10399 = vst [vmem:[#allocation73_spill] sm:$0xff] %v9106_v9  ;;  %4426 = vst.msk [vmem:[#allocation3 + $0x40] sm:$0xff] %vm1199_vm1, %v8995_v24  ;;  %v4791_v6 = vmul.f32 %v4749_v23, %v10405_v18  ;;  %v4789_v34 = vmul.f32 %v4751_v11, %v10406_v26  ;;  %v10407_v63 = vld [vmem:[#allocation56_spill] sm:$0xff]  ;;  %v4075_v29 = vrot.slane %v9121_v19, 7  ;;  %v9161_v42 = vpack.c.bf16 %v4774_v0, %v4773_v13  ;;  %v9170_v11 = vld [vmem:[#allocation2 + $0x48] sm:$0xff] }
 0x6ec   : > { %4219 = vst.msk [vmem:[#allocation4 + $0x40] sm:$0xff] %vm1199_vm1, %v9106_v9  ;;  %4220 = vst.msk [vmem:[#allocation4 + $0x48] sm:$0xff] %vm1199_vm1, %v9108_v52  ;;  %v4790_v15 = vmul.f32 %v4750_v30, %v10407_v63  ;;  %v4123_v4 = vsel %vm1118_vm2, %v4073_v38, %v4074_v32  ;;  %v4124_v21 = vsel %vm1118_vm2, %v4072_v35, %v4073_v38  ;;  %v4089_v23 = vrot.slane %v9056_v22, 7  ;;  %v9178_v13 = vld [vmem:[#allocation3 + $0x10] sm:$0xff]  ;;  %v10408_v38 = vld [vmem:[#allocation17_spill] sm:$0xff] }
 0x6ed   : > { %10401 = vst [vmem:[#allocation75_spill] sm:$0xff] %v9134_v16  ;;  %v4436_v14 = vld [vmem:[#allocation3 + $0x8] sm:$0xff]  ;;  %4821 = vst.msk [vmem:[#allocation3 + $0x18] sm:$0xff] %vm1199_vm1, %v9134_v16  ;;  %v4206_v49 = vld [vmem:[#allocation3 + $0x58] sm:$0xff]  ;;  %v4122_v35 = vsel %vm1118_vm2, %v4074_v32, %v4075_v29  ;;  %v4137_v0 = vmul.f32 %v4124_v21, %v10408_v38  ;;  %v4090_v30 = vrot.slane %v9149_v53, 7  ;;  %v10214_v40 = vrot.slane %v9170_v11, 7 }
 0x6ee   : > { %4819 = vst.msk [vmem:[#allocation3 + $0x8] sm:$0xff] %vm1199_vm1, %v9096_v7  ;;  %4429 = vst.msk [vmem:[#allocation3 + $0x58] sm:$0xff] %vm1199_vm1, %v9032_v41  ;;  %4357 = vrot.lane.b32.xlu1 %v4206_v49, %s6095_s21  ;;  %4547 = vrot.lane.b32.xlu0 %v9036_v57, %s6096_s12  ;;  %v9180_v56 = vpack.c.bf16 %v4790_v15, %v4789_v34  ;;  %v9186_v18 = vld [vmem:[#allocation2 + $0xc8] sm:$0xff]  ;;  %v9188_v26 = vld [vmem:[#allocation3 + $0x50] sm:$0xff]  ;;  %v4108_v32 = vsel %vm1118_vm2, %v4088_v47, %v4089_v23 }
 0x6ef   : > { %4222 = vst.msk [vmem:[#allocation4 + $0x58] sm:$0xff] %vm1199_vm1, %v4206_v49  ;;  %4820 = vst.msk [vmem:[#allocation3 + $0x10] sm:$0xff] %vm1199_vm1, %v9161_v42  ;;  %v10409_v63 = vld [vmem:[#allocation16_spill] sm:$0xff]  ;;  %v4091_v49 = vrot.slane %v9159_v1, 7  ;;  %v10410_v34 = vld [vmem:[#allocation19_spill] sm:$0xff]  ;;  %v4107_v21 = vsel %vm1118_vm2, %v4089_v23, %v4090_v30  ;;  %v9224_v23 = vpack.c.bf16 %v4792_v48, %v4791_v6 }
 0x6f0   : > { %v4138_v57 = vmul.f32 %v4123_v4, %v10409_v63  ;;  %4828 = vst.msk [vmem:[#allocation3 + $0x50] sm:$0xff] %vm1199_vm1, %v9180_v56  ;;  %v4139_v15 = vmul.f32 %v4122_v35, %v10410_v34  ;;  %v10411_v38 = vld [vmem:[#allocation47_spill] sm:$0xff]  ;;  %v4154_v37 = vmul.f32 %v4107_v21, %v10414_v58  ;;  %v10216_v35 = vrot.slane %v9186_v18, 7  ;;  %v9215_v34 = vld [vmem:[#allocation2 + $0x50] sm:$0xff] }
 0x6f1   : > { %v4153_v60 = vmul.f32 %v4108_v32, %v10411_v38  ;;  %v9207_v63 = vld [vmem:[#allocation3 + $0x48] sm:$0xff]  ;;  %v4106_v47 = vsel %vm1118_vm2, %v4090_v30, %v4091_v49  ;;  %10415 = vst [vmem:[#allocation78_spill] sm:$0xff] %v9224_v23  ;;  %v4121_v58 = vsel %vm1118_vm2, %v4075_v29, %v10214_v40  ;;  %v10418_v6 = vld [vmem:[#allocation50_spill] sm:$0xff]  ;;  %v4716_v29 = vrot.slane %v9170_v11, 1  ;;  %v10425_v24 = vld [vmem:[#allocation67_spill] sm:$0xff] }
 0x6f2   : > { %v9205_v4 = vld [vmem:[#allocation3 + $0x40] sm:$0xff]  ;;  %10413 = vst [vmem:[#allocation77_spill] sm:$0xff] %v9207_v63  ;;  %v9209_v33 = vpack.c.bf16 %v4138_v57, %v4137_v0  ;;  %4469 = vrot.lane.b32.xlu0 %v4436_v14, %s6093_s15  ;;  %4827 = vst.msk [vmem:[#allocation3 + $0x48] sm:$0xff] %vm1199_vm1, %v9111_v45  ;;  %v10416_v0 = vld [vmem:[#allocation51_spill] sm:$0xff]  ;;  %v4105_v48 = vsel %vm1118_vm2, %v4091_v49, %v10216_v35 }
 0x6f3   : > { %10412 = vst [vmem:[#allocation76_spill] sm:$0xff] %v9205_v4  ;;  %4826 = vst.msk [vmem:[#allocation3 + $0x40] sm:$0xff] %vm1199_vm1, %v9061_v51  ;;  %4483 = vrot.lane.b32.xlu1 %v9205_v4, %s6093_s15  ;;  %v4155_v30 = vmul.f32 %v4106_v47, %v10416_v0  ;;  %v9231_v57 = vld [vmem:[#allocation2 + $0xd0] sm:$0xff]  ;;  %v9235_v32 = vpack.c.bf16 %v4154_v37, %v4153_v60  ;;  %v4156_v38 = vmul.f32 %v4105_v48, %v10418_v6  ;;  %v10423_v49 = vld [vmem:[#allocation36_spill] sm:$0xff] }
 0x6f4   : > { %4182 = vst.msk [vmem:[#allocation3 + $0x20] sm:$0xff] %vm1199_vm1, %v9209_v33  ;;  %v10417_v14 = vld [vmem:[#allocation18_spill] sm:$0xff]  ;;  %v4715_v47 = vrot.slane %v9121_v19, 1  ;;  %v10215_v0 = vrot.slane %v9215_v34, 1  ;;  %v4731_v60 = vrot.slane %v9159_v1, 1  ;;  %v4714_v48 = vrot.slane %v9104_v2, 1 }
 0x6f5   : > { %v4140_v21 = vmul.f32 %v4121_v58, %v10417_v14  ;;  %v9246_v40 = vld [vmem:[#allocation3 + $0x58] sm:$0xff]  ;;  %4190 = vst.msk [vmem:[#allocation3 + $0x60] sm:$0xff] %vm1199_vm1, %v9235_v32  ;;  %v4732_v58 = vrot.slane %v9186_v18, 1  ;;  %v9261_v14 = vpack.c.bf16 %v4156_v38, %v4155_v30  ;;  %v9278_v30 = vpack.c.bf16 %v9186_v18, %v9159_v1  ;;  %v10422_v1 = vld [vmem:[#allocation37_spill] sm:$0xff]  ;;  %v10429_v9 = vld [vmem:[#allocation66_spill] sm:$0xff] }
 0x6f6   : > { %4549 = vrot.lane.b32.xlu0 %v9050_v31, %s6096_s12  ;;  %4829 = vst.msk [vmem:[#allocation3 + $0x58] sm:$0xff] %vm1199_vm1, %v9224_v23  ;;  %v9274_v31 = vpack.c.bf16 %v9170_v11, %v9121_v19  ;;  %v9282_v6 = vpack.c.bf16 %v9104_v2, %v9038_v27  ;;  %v9294_v19 = vpack.c.bf16 %v9149_v53, %v9056_v22  ;;  %v10440_v16 = vld [vmem:[#allocation26_spill] sm:$0xff] }
 0x6f7   : > { %v9250_v37 = vpack.c.bf16 %v4140_v21, %v4139_v15  ;;  %4485 = vrot.lane.b32.xlu1 %v9207_v63, %s6093_s15  ;;  %10420 = vst [vmem:[#allocation80_spill] sm:$0xff] %v9261_v14  ;;  %v4760_v15 = vsel %vm1765_vm3, %v4716_v29, %v10215_v0  ;;  %v4761_v21 = vsel %vm1765_vm3, %v4715_v47, %v4716_v29  ;;  %v9286_v29 = vld [vmem:[#allocation2 + $0x58] sm:$0xff]  ;;  %v9288_v0 = vld [vmem:[#allocation2 + $0x60] sm:$0xff]  ;;  %4191 = vst.msk [vmem:[#allocation3 + $0x68] sm:$0xff] %vm1199_vm1, %v9261_v14 }
 0x6f8   : > { %10421 = vst [vmem:[#allocation81_spill] sm:$0xff] %v9274_v31  ;;  %v4745_v38 = vsel %vm1765_vm3, %v4731_v60, %v4732_v58  ;;  %v9297_v35 = vmul.f32 %v4761_v21, %v10422_v1  ;;  %v4762_v2 = vsel %vm1765_vm3, %v4714_v48, %v4715_v47  ;;  %v4763_v44 = vsel %vm1765_vm3, %v4713_v59, %v4714_v48  ;;  %v10426_v59 = vld [vmem:[#allocation33_spill] sm:$0xff] }
 0x6f9   : > { %10419 = vst [vmem:[#allocation79_spill] sm:$0xff] %v9250_v37  ;;  %4183 = vst.msk [vmem:[#allocation3 + $0x28] sm:$0xff] %vm1199_vm1, %v9250_v37  ;;  %v9306_v51 = vmul.f32 %v4760_v15, %v10423_v49  ;;  %v10424_v63 = vrot.slane %v9231_v57, 1  ;;  %v9313_v52 = vmul.f32 %v4745_v38, %v10425_v24  ;;  %v4730_v21 = vrot.slane %v9149_v53, 1  ;;  %v9339_v38 = vld [vmem:[#allocation2 + $0xe0] sm:$0xff]  ;;  %v10430_v14 = vld [vmem:[#allocation65_spill] sm:$0xff] }
 0x6fa   : > { %4643 = vrot.lane.b32.xlu0 %v9178_v13, %s6097_s0  ;;  %v4777_v47 = vmul.f32 %v4763_v44, %v10426_v59  ;;  %v4077_v49 = vrot.slane %v9215_v34, 7  ;;  %v4079_v24 = vrot.slane %v9288_v0, 7  ;;  %v10428_v44 = vrot.slane %v9056_v22, 1  ;;  %v10431_v22 = vld [vmem:[#allocation64_spill] sm:$0xff] }
 0x6fb   : > { %v4744_v4 = vsel %vm1765_vm3, %v4732_v58, %v10424_v63  ;;  %4565 = vrot.lane.b32.xlu1 %v9054_v62, %s6096_s12  ;;  %v9320_v27 = vld [vmem:[#allocation3 + $0x20] sm:$0xff]  ;;  %v4078_v63 = vrot.slane %v9286_v29, 7  ;;  %v9326_v58 = vld [vmem:[#allocation2 + $0xd8] sm:$0xff]  ;;  %v4746_v15 = vsel %vm1765_vm3, %v4730_v21, %v4731_v60  ;;  %v4093_v1 = vrot.slane %v9231_v57, 7 }
 0x6fc   : > { %4422 = vst.msk [vmem:[#allocation3 + $0x20] sm:$0xff] %vm1199_vm1, %v9282_v6  ;;  %4215 = vst.msk [vmem:[#allocation4 + $0x20] sm:$0xff] %vm1199_vm1, %v9320_v27  ;;  %v10427_v62 = vld [vmem:[#allocation32_spill] sm:$0xff]  ;;  %v4747_v48 = vsel %vm1765_vm3, %v10428_v44, %v4730_v21  ;;  %v4796_v12 = vmul.f32 %v4744_v4, %v10429_v9  ;;  %v4794_v21 = vmul.f32 %v4746_v15, %v10431_v22  ;;  %v10433_v4 = vld [vmem:[#allocation22_spill] sm:$0xff]  ;;  %v4094_v44 = vrot.slane %v9326_v58, 7 }
 0x6fd   : > { %v4778_v53 = vmul.f32 %v4762_v2, %v10427_v62  ;;  %v9342_v59 = vld [vmem:[#allocation3 + $0x60] sm:$0xff]  ;;  %v4793_v37 = vmul.f32 %v4747_v48, %v10430_v14  ;;  %v4118_v2 = vsel %vm1118_vm2, %v4078_v63, %v4079_v24  ;;  %v4119_v60 = vsel %vm1118_vm2, %v4077_v49, %v4078_v63  ;;  %v10434_v48 = vld [vmem:[#allocation23_spill] sm:$0xff] }
 0x6fe   : > { %4430 = vst.msk [vmem:[#allocation3 + $0x60] sm:$0xff] %vm1199_vm1, %v9294_v19  ;;  %4223 = vst.msk [vmem:[#allocation4 + $0x60] sm:$0xff] %vm1199_vm1, %v9342_v59  ;;  %v10432_v62 = vrot.slane %v9170_v11, 7  ;;  %v4142_v14 = vmul.f32 %v4119_v60, %v10433_v4  ;;  %4645 = vrot.lane.b32.xlu0 %v9139_v39, %s6097_s0  ;;  %v10435_v15 = vld [vmem:[#allocation27_spill] sm:$0xff]  ;;  %v4095_v11 = vrot.slane %v9339_v38, 7  ;;  %v9380_v4 = vld [vmem:[#allocation3 + $0x68] sm:$0xff] }
 0x6ff   : > { %4659 = vrot.lane.b32.xlu1 %v9188_v26, %s6097_s0  ;;  %v4143_v22 = vmul.f32 %v4118_v2, %v10435_v15  ;;  %v4103_v2 = vsel %vm1118_vm2, %v4093_v1, %v4094_v44  ;;  %v10438_v15 = vrot.slane %v8939_v25, 7  ;;  %4431 = vst.msk [vmem:[#allocation3 + $0x68] sm:$0xff] %vm1199_vm1, %v9278_v30  ;;  %4224 = vst.msk [vmem:[#allocation4 + $0x68] sm:$0xff] %vm1199_vm1, %v9380_v4 }
 0x700   : > { %v4120_v9 = vsel %vm1118_vm2, %v10432_v62, %v4077_v49  ;;  %v9365_v63 = vld [vmem:[#allocation3 + $0x28] sm:$0xff]  ;;  %v10436_v49 = vrot.slane %v9186_v18, 7 }
 0x701   : > { %v4141_v23 = vmul.f32 %v4120_v9, %v10434_v48  ;;  %v9374_v62 = vld [vmem:[#allocation2 + $0xe8] sm:$0xff]  ;;  %4423 = vst.msk [vmem:[#allocation3 + $0x28] sm:$0xff] %vm1199_vm1, %v9274_v31  ;;  %4216 = vst.msk [vmem:[#allocation4 + $0x28] sm:$0xff] %vm1199_vm1, %v9365_v63  ;;  %v9382_v9 = vpack.c.bf16 %v4778_v53, %v4777_v47  ;;  %v10437_v48 = vld [vmem:[#allocation55_spill] sm:$0xff]  ;;  %v4102_v47 = vsel %vm1118_vm2, %v4094_v44, %v4095_v11 }
 0x702   : > { %v4104_v60 = vsel %vm1118_vm2, %v10436_v49, %v4093_v1  ;;  %v4117_v49 = vsel %vm1118_vm2, %v4079_v24, %v10438_v15  ;;  %v10439_v53 = vld [vmem:[#allocation54_spill] sm:$0xff]  ;;  %v9404_v24 = vpack.c.bf16 %v4794_v21, %v4793_v37  ;;  %v10230_v15 = vrot.slane %v9374_v62, 7  ;;  %4867 = vrot.lane.b32.xlu0 %v8880_v61, %s6098_s16  ;;  %v4843_v21 = vld [vmem:[#allocation3 + $0x40] sm:$0xff] }
 0x703   : > { %v4157_v18 = vmul.f32 %v4104_v60, %v10437_v48  ;;  %v9395_v31 = vpack.c.bf16 %v4142_v14, %v4141_v23  ;;  %v4158_v1 = vmul.f32 %v4103_v2, %v10439_v53  ;;  %v4144_v60 = vmul.f32 %v4117_v49, %v10440_v16  ;;  %v6036_v48 = vld [vmem:[%s10441_s29] sm:$0xff]   ;;  %4661 = vrot.lane.b32.xlu1 %v9246_v40, %s6097_s0  ;;  %v10443_v16 = vld [vmem:[#allocation59_spill] sm:$0xff]  ;;  %v4836_v2 = vld [vmem:[#allocation3 + $0x8] sm:$0xff] }
 0x704   : > { %v9411_v23 = vld [vmem:[#allocation3 + $0x20] sm:$0xff]  ;;  %v4159_v14 = vmul.f32 %v4102_v47, %v10443_v16  ;;  %v9422_v49 = vpack.c.bf16 %v9306_v51, %v9297_v35  ;;  %v4101_v61 = vsel %vm1118_vm2, %v4095_v11, %v10230_v15  ;;  %v4719_v47 = vrot.slane %v9288_v0, 1  ;;  %5871 = vmatprep.subr.bf16.mxu0 %v6036_v48  ;;  %5913 = vmatprep.subr.bf16.mxu1 %v6036_v48  ;;  %v10447_v51 = vld [vmem:[#allocation58_spill] sm:$0xff]  ;;  %v6037_v11 = vld [vmem:[%s10442_s30 + $0x8] sm:$0xff]  }
 0x705   : > { %4184 = vst.msk [vmem:[#allocation3 + $0x30] sm:$0xff] %vm1199_vm1, %v9395_v31  ;;  %v9416_v44 = vpack.c.bf16 %v4158_v1, %v4157_v18  ;;  %v9418_v37 = vpack.c.bf16 %v4144_v60, %v4143_v22  ;;  %4822 = vst.msk [vmem:[#allocation3 + $0x20] sm:$0xff] %vm1199_vm1, %v9382_v9  ;;  %v9431_v22 = vld [vmem:[#allocation3 + $0x60] sm:$0xff]  ;;  %v9434_v18 = vpack.c.bf16 %v4796_v12, %v9313_v52  ;;  %v4720_v53 = vrot.slane %v8939_v25, 1  ;;  %v9459_v16 = vld [vmem:[#allocation2 + $0xf0] sm:$0xff] }
 0x706   : > { %10445 = vst [vmem:[#allocation83_spill] sm:$0xff] %v9422_v49  ;;  %v4160_v35 = vmul.f32 %v4101_v61, %v10447_v51  ;;  %5872 = vmatpush3.bf16.msra.mxu0 %v6036_v48  ;;  %5918 = vmatpush3.bf16.msra.mxu1 %v6036_v48  ;;  %v4718_v1 = vrot.slane %v9286_v29, 1  ;;  %4830 = vst.msk [vmem:[#allocation3 + $0x60] sm:$0xff] %vm1199_vm1, %v9404_v24  ;;  %v4735_v12 = vrot.slane %v9339_v38, 1  ;;  %v4844_v61 = vld [vmem:[#allocation3 + $0x48] sm:$0xff]  ;;  %v10449_v15 = vrot.slane %v9215_v34, 1 }
 0x707   : > { %10444 = vst [vmem:[#allocation82_spill] sm:$0xff] %v9418_v37  ;;  %10446 = vst [vmem:[#allocation84_spill] sm:$0xff] %v9434_v18  ;;  %4883 = vrot.lane.b32.xlu1 %v4843_v21, %s6098_s16  ;;  %4869 = vrot.lane.b32.xlu0 %v4836_v2, %s6098_s16  ;;  %v9457_v48 = vpack.c.bf16 %v9286_v29, %v9215_v34  ;;  %v9463_v51 = vld [vmem:[#allocation3 + $0x68] sm:$0xff]  ;;  %v9467_v21 = vpack.c.bf16 %v8939_v25, %v9288_v0  ;;  %v4736_v2 = vrot.slane %v9374_v62, 1  ;;  %v6038_v0 = vld [vmem:[%s10442_s30 + $0x10] sm:$0xff]  }
 0x708   : > { %4192 = vst.msk [vmem:[#allocation3 + $0x70] sm:$0xff] %vm1199_vm1, %v9416_v44  ;;  %4185 = vst.msk [vmem:[#allocation3 + $0x38] sm:$0xff] %vm1199_vm1, %v9418_v37  ;;  %v9451_v52 = vld [vmem:[#allocation3 + $0x28] sm:$0xff]  ;;  %v9453_v60 = vpack.c.bf16 %v4160_v35, %v4159_v14  ;;  %5873 = vmatprep.subr.bf16.mxu0 %v6037_v11  ;;  %5914 = vmatprep.subr.bf16.mxu1 %v6037_v11  ;;  %v4758_v29 = vsel %vm1765_vm3, %v4718_v1, %v4719_v47  ;;  %v4734_v14 = vrot.slane %v9326_v58, 1 }
 0x709   : > { %4823 = vst.msk [vmem:[#allocation3 + $0x28] sm:$0xff] %vm1199_vm1, %v9422_v49  ;;  %4831 = vst.msk [vmem:[#allocation3 + $0x68] sm:$0xff] %vm1199_vm1, %v9434_v18  ;;  %v9479_v35 = vpack.c.bf16 %v9326_v58, %v9231_v57  ;;  %v4757_v25 = vsel %vm1765_vm3, %v4719_v47, %v4720_v53  ;;  %v4759_v37 = vsel %vm1765_vm3, %v10449_v15, %v4718_v1  ;;  %v4737_v47 = vrot.slane %v9459_v16, 1 }
 0x70a   : > { %10448 = vst [vmem:[#allocation85_spill] sm:$0xff] %v9453_v60  ;;  %4193 = vst.msk [vmem:[#allocation3 + $0x78] sm:$0xff] %vm1199_vm1, %v9453_v60  ;;  %5874 = vmatpush3.bf16.msra.mxu0 %v6037_v11  ;;  %5919 = vmatpush3.bf16.msra.mxu1 %v6037_v11  ;;  %v10450_v60 = vrot.slane %v8945_v54, 1  ;;  %v4742_v11 = vsel %vm1765_vm3, %v4734_v14, %v4735_v12  ;;  %v10451_v49 = vrot.slane %v9231_v57, 1  ;;  %v10452_v54 = vld [vmem:[#allocation41_spill] sm:$0xff] }
 0x70b   : > { %4885 = vrot.lane.b32.xlu1 %v4844_v61, %s6098_s16  ;;  %4947 = vrot.lane.b32.xlu0 %v9096_v7, %s6099_s24  ;;  %v4781_v15 = vmul.f32 %v4759_v37, %v10452_v54  ;;  %v10454_v61 = vld [vmem:[#allocation45_spill] sm:$0xff]  ;;  %v4740_v54 = vsel %vm1765_vm3, %v4736_v2, %v4737_v47 }
 0x70c   : > { %v9490_v18 = vld [vmem:[#allocation3 + $0x30] sm:$0xff]  ;;  %v4756_v58 = vsel %vm1765_vm3, %v4720_v53, %v10450_v60  ;;  %v4743_v34 = vsel %vm1765_vm3, %v10451_v49, %v4734_v14  ;;  %v10453_v53 = vld [vmem:[#allocation40_spill] sm:$0xff]  ;;  %v9518_v49 = vpack.c.bf16 %v9374_v62, %v9339_v38  ;;  %v4783_v7 = vmul.f32 %v4757_v25, %v10454_v61  ;;  %5875 = vmatprep.subr.bf16.mxu0 %v6038_v0 }
 0x70d   : > { %4424 = vst.msk [vmem:[#allocation3 + $0x30] sm:$0xff] %vm1199_vm1, %v9457_v48  ;;  %4217 = vst.msk [vmem:[#allocation4 + $0x30] sm:$0xff] %vm1199_vm1, %v9490_v18  ;;  %v4782_v1 = vmul.f32 %v4758_v29, %v10453_v53  ;;  %v4741_v14 = vsel %vm1765_vm3, %v4735_v12, %v4736_v2  ;;  %5915 = vmatprep.subr.bf16.mxu1 %v6038_v0  ;;  %v10455_v38 = vld [vmem:[#allocation44_spill] sm:$0xff]  ;;  %v6039_v12 = vld [vmem:[%s10442_s30 + $0x18] sm:$0xff]   ;;  %v4797_v29 = vmul.f32 %v4743_v34, %v7341_v10 }
 0x70e   : > { %v4784_v37 = vmul.f32 %v4756_v58, %v10455_v38  ;;  %5876 = vmatpush3.bf16.msra.mxu0 %v6038_v0  ;;  %5920 = vmatpush3.bf16.msra.mxu1 %v6038_v0  ;;  %v4798_v25 = vmul.f32 %v4742_v11, %v7339_v5  ;;  %v9547_v58 = vld [vmem:[#allocation3 + $0x10] sm:$0xff]  ;;  %v4799_v10 = vmul.f32 %v4741_v14, %v7366_v3  ;;  %v10456_v14 = vrot.slane %v8903_v17, 7 }
 0x70f   : > { %v9512_v57 = vld [vmem:[#allocation3 + $0x70] sm:$0xff]  ;;  %v9514_v60 = vld [vmem:[#allocation3 + $0x38] sm:$0xff]  ;;  %4963 = vrot.lane.b32.xlu1 %v9111_v45, %s6099_s24  ;;  %4949 = vrot.lane.b32.xlu0 %v9161_v42, %s6099_s24  ;;  %v9545_v0 = vpack.c.bf16 %v4782_v1, %v4781_v15  ;;  %v4800_v45 = vmul.f32 %v4740_v54, %v7364_v28  ;;  %v6040_v42 = vld [vmem:[%s10442_s30 + $0x20] ss:$0 sps:$4 sm:$0xff]  }
 0x710   : > { %4425 = vst.msk [vmem:[#allocation3 + $0x38] sm:$0xff] %vm1199_vm1, %v9467_v21  ;;  %4218 = vst.msk [vmem:[#allocation4 + $0x38] sm:$0xff] %vm1199_vm1, %v9514_v60  ;;  %5877 = vmatprep.subr.bf16.mxu0 %v6039_v12  ;;  %5916 = vmatprep.subr.bf16.mxu1 %v6039_v12  ;;  %v9556_v5 = vpack.c.bf16 %v4784_v37, %v4783_v7  ;;  %v9562_v2 = vpack.c.bf16 %v4798_v25, %v4797_v29  ;;  %v5215_v28 = vsel %vm2245_vm4, %v6040_v42, 0  ;;  %v5019_v11 = vld [vmem:[#allocation3 + $0x50] sm:$0xff]  ;;  %v5012_v1 = vld [vmem:[#allocation3 + $0x18] sm:$0xff] }
 0x711   : > { %4432 = vst.msk [vmem:[#allocation3 + $0x70] sm:$0xff] %vm1199_vm1, %v9479_v35  ;;  %4225 = vst.msk [vmem:[#allocation4 + $0x70] sm:$0xff] %vm1199_vm1, %v9512_v57  ;;  %v9549_v53 = vld [vmem:[#allocation3 + $0x78] sm:$0xff]  ;;  %v4097_v7 = vrot.slane %v9459_v16, 7  ;;  %v10457_v37 = vrot.slane %v9374_v62, 7  ;;  %v10459_v25 = vld [vmem:[#allocation62_spill] sm:$0xff] }
 0x712   : > { %4433 = vst.msk [vmem:[#allocation3 + $0x78] sm:$0xff] %vm1199_vm1, %v9518_v49  ;;  %4226 = vst.msk [vmem:[#allocation4 + $0x78] sm:$0xff] %vm1199_vm1, %v9549_v53  ;;  %5878 = vmatpush3.bf16.msra.mxu0 %v6039_v12  ;;  %5921 = vmatpush3.bf16.msra.mxu1 %v6039_v12  ;;  %v10463_v62 = vld [vmem:[#allocation79_spill] sm:$0xff] }
 0x713   : > { %4965 = vrot.lane.b32.xlu1 %v9180_v56, %s6099_s24  ;;  %5043 = vrot.lane.b32.xlu0 %v9547_v58, %s6100_s26  ;;  %v9581_v56 = vpack.c.bf16 %v4800_v45, %v4799_v10  ;;  %v4099_v38 = vsel %vm1118_vm2, %v4097_v7, %v10456_v14  ;;  %v4100_v12 = vsel %vm1118_vm2, %v10457_v37, %v4097_v7  ;;  %v5020_v10 = vld [vmem:[#allocation3 + $0x58] sm:$0xff] }
 0x714   : > { %v9564_v3 = vld [vmem:[#allocation3 + $0x30] sm:$0xff]  ;;  %5925 = vmatprep.subr.msk.bf16.mxu0 %vm2245_vm4, %v6040_v42  ;;  %5926 = vmatprep.subr.msk.bf16.mxu1 %vm2245_vm4, %v6040_v42  ;;  %v4162_v54 = vmul.f32 %v4099_v38, %v10459_v25  ;;  %v10466_v25 = vld [vmem:[#allocation83_spill] sm:$0xff] }
 0x715   : > { %4824 = vst.msk [vmem:[#allocation3 + $0x30] sm:$0xff] %vm1199_vm1, %v9545_v0 }
 0x716   : > { %5880 = vmatpush3.bf16.msra.mxu0 %v5215_v28  ;;  %5922 = vmatpush3.bf16.msra.mxu1 %v5215_v28 }
 0x717   : > { %v9575_v15 = vld [vmem:[#allocation3 + $0x38] sm:$0xff]  ;;  %5059 = vrot.lane.b32.xlu1 %v5019_v11, %s6100_s26  ;;  %4247 = vrot.lane.b32.xlu0 %v8941_v50, %s6094_s25 }
 0x718   : > { %v9573_v34 = vld [vmem:[#allocation3 + $0x70] sm:$0xff]  ;;  %4825 = vst.msk [vmem:[#allocation3 + $0x38] sm:$0xff] %vm1199_vm1, %v9556_v5  ;;  %v10458_v50 = vld [vmem:[#allocation63_spill] sm:$0xff] }
 0x719   : > { %4832 = vst.msk [vmem:[#allocation3 + $0x70] sm:$0xff] %vm1199_vm1, %v9562_v2  ;;  %v9588_v61 = vld [vmem:[#allocation3 + $0x78] sm:$0xff]  ;;  %v4161_v29 = vmul.f32 %v4100_v12, %v10458_v50 }
 0x71a   : > { %4833 = vst.msk [vmem:[#allocation3 + $0x78] sm:$0xff] %vm1199_vm1, %v9581_v56 }
 0x71b   : > { %4263 = vrot.lane.b32.xlu1 %v9059_v20, %s6094_s25  ;;  %5045 = vrot.lane.b32.xlu0 %v5012_v1, %s6100_s26  ;;  %v9606_v45 = vpack.c.bf16 %v4162_v54, %v4161_v29  ;;  %v9619_v20 = vpack.c.bf16 %v8903_v17, %v9459_v16 }
 0x71d   : > { %4194 = vst.msk [vmem:[#allocation3 + $0x80] sm:$0xff] %vm1199_vm1, %v9606_v45 }
 0x71f   : > { %5061 = vrot.lane.b32.xlu1 %v5020_v10, %s6100_s26  ;;  %4249 = vrot.lane.b32.xlu0 %v9209_v33, %s6094_s25 }
 0x723   : > { %4265 = vrot.lane.b32.xlu1 %v9235_v32, %s6094_s25  ;;  %4343 = vrot.lane.b32.xlu0 %v9320_v27, %s6095_s21 }
 0x724   : > { %v9625_v33 = vld [vmem:[#allocation3 + $0x80] sm:$0xff] }
 0x725   : > { %4434 = vst.msk [vmem:[#allocation3 + $0x80] sm:$0xff] %vm1199_vm1, %v9619_v20 }
 0x727   : > { %4359 = vrot.lane.b32.xlu1 %v9342_v59, %s6095_s21  ;;  %4345 = vrot.lane.b32.xlu0 %v9365_v63, %s6095_s21  ;;  %v9692_v59 = vld [vmem:[#allocation3 + $0x60] sm:$0xff] }
 0x72b   : > { %4361 = vrot.lane.b32.xlu1 %v9380_v4, %s6095_s21  ;;  %4471 = vrot.lane.b32.xlu0 %v9178_v13, %s6093_s15  ;;  %v4738_v13 = vrot.slane %v8903_v17, 1  ;;  %v10460_v17 = vrot.slane %v8901_v55, 1  ;;  %v9699_v4 = vld [vmem:[#allocation3 + $0x28] sm:$0xff] }
 0x72c   : > { %v9670_v32 = vld [vmem:[#allocation3 + $0x80] sm:$0xff] }
 0x72f   : > { %4487 = vrot.lane.b32.xlu1 %v9188_v26, %s6093_s15  ;;  %4473 = vrot.lane.b32.xlu0 %v9139_v39, %s6093_s15 }
 0x733   : > { %4489 = vrot.lane.b32.xlu1 %v9246_v40, %s6093_s15  ;;  %4551 = vrot.lane.b32.xlu0 %v8999_v8, %s6096_s12  ;;  %v4739_v40 = vsel %vm1765_vm3, %v4737_v47, %v4738_v13  ;;  %v9708_v47 = vld [vmem:[#allocation3 + $0x68] sm:$0xff] }
 0x734   : > { %v4801_v8 = vmul.f32 %v4739_v40, %v7388_v46  ;;  %v10467_v40 = vld [vmem:[#allocation84_spill] sm:$0xff] }
 0x737   : > { %4567 = vrot.lane.b32.xlu1 %v9032_v41, %s6096_s12  ;;  %4553 = vrot.lane.b32.xlu0 %v9282_v6, %s6096_s12  ;;  %v4770_v41 = vsel %vm1765_vm3, %v4738_v13, %v10460_v17  ;;  %v10462_v6 = vld [vmem:[#allocation78_spill] sm:$0xff] }
 0x738   : > { %v4802_v39 = vmul.f32 %v4770_v41, %v7386_v43  ;;  %v10461_v43 = vld [vmem:[#allocation75_spill] sm:$0xff] }
 0x73a   : > { %v9664_v26 = vpack.c.bf16 %v4802_v39, %v4801_v8  ;;  %v9789_v8 = vld [vmem:[#allocation3 + $0x30] sm:$0xff] }
 0x73b   : > { %4569 = vrot.lane.b32.xlu1 %v9294_v19, %s6096_s12  ;;  %4647 = vrot.lane.b32.xlu0 %v9411_v23, %s6097_s0  ;;  %v9685_v19 = vld [vmem:[#allocation3 + $0x20] sm:$0xff] }
 0x73c   : > { %4834 = vst.msk [vmem:[#allocation3 + $0x80] sm:$0xff] %vm1199_vm1, %v9664_v26 }
 0x73f   : > { %4663 = vrot.lane.b32.xlu1 %v9431_v22, %s6097_s0  ;;  %4649 = vrot.lane.b32.xlu0 %v9451_v52, %s6097_s0 }
 0x742   : > { %v4468_v36 = vpop.permute.xlu0 %4467 }
 0x743   : > { %4665 = vrot.lane.b32.xlu1 %v9463_v51, %s6097_s0  ;;  %4871 = vrot.lane.b32.xlu0 %v9547_v58, %s6098_s16 }
 0x747   : > { %4887 = vrot.lane.b32.xlu1 %v5019_v11, %s6098_s16  ;;  %4873 = vrot.lane.b32.xlu0 %v5012_v1, %s6098_s16 }
 0x74a   : > { %v4246_v46 = vpop.permute.xlu1 %4245 }
 0x74b   : > { %4889 = vrot.lane.b32.xlu1 %v5020_v10, %s6098_s16  ;;  %4951 = vrot.lane.b32.xlu0 %v10461_v43, %s6099_s24  ;;  %4292 = vst.msk [vmem:[#allocation4 + $0x8] sm:$0xff] %vm1312_vm5, %v4246_v46 }
 0x74f   : > { %v4244_v55 = vpop.permute.xlu0 %4243  ;;  %4967 = vrot.lane.b32.xlu1 %v10462_v6, %s6099_s24  ;;  %4953 = vrot.lane.b32.xlu0 %v9382_v9, %s6099_s24  ;;  %v4262_v27 = vpop.permute.xlu1 %4261 }
 0x750   : > { %4291 = vst.msk [vmem:[#allocation4] sm:$0xff] %vm1312_vm5, %v4244_v55  ;;  %4300 = vst.msk [vmem:[#allocation4 + $0x48] sm:$0xff] %vm1312_vm5, %v4262_v27  ;;  %v10468_v55 = vld [vmem:[#allocation82_spill] sm:$0xff] }
 0x753   : > { %4969 = vrot.lane.b32.xlu1 %v9404_v24, %s6099_s24  ;;  %5047 = vrot.lane.b32.xlu0 %v9685_v19, %s6100_s26  ;;  %v10464_v24 = vld [vmem:[#allocation80_spill] sm:$0xff] }
 0x754   : > { %v4260_v63 = vpop.permute.xlu0 %4259 }
 0x755   : > { %4299 = vst.msk [vmem:[#allocation4 + $0x40] sm:$0xff] %vm1312_vm5, %v4260_v63  ;;  %v9816_v63 = vld [vmem:[#allocation3 + $0x78] sm:$0xff] }
 0x756   : > { %v4356_v9 = vpop.permute.xlu1 %4355 }
 0x757   : > { %5063 = vrot.lane.b32.xlu1 %v9692_v59, %s6100_s26  ;;  %4251 = vrot.lane.b32.xlu0 %v10463_v62, %s6094_s25  ;;  %4395 = vst.msk [vmem:[#allocation4 + $0x40] sm:$0xff] %vm1409_vm6, %v4356_v9  ;;  %v10470_v9 = vld [vmem:[#allocation71_spill] sm:$0xff] }
 0x758   : > { %v4340_v16 = vpop.permute.xlu0 %4339 }
 0x759   : > { %4387 = vst.msk [vmem:[#allocation4] sm:$0xff] %vm1409_vm6, %v4340_v16 }
 0x75a   : > { %4515 = vst.msk [vmem:[#allocation4] sm:$0xff] %vm1538_vm7, %v4468_v36  ;;  %v4564_v58 = vpop.permute.xlu1 %4563  ;;  %v9798_v36 = vld [vmem:[#allocation3 + $0x70] sm:$0xff] }
 0x75b   : > { %4267 = vrot.lane.b32.xlu1 %v10464_v24, %s6094_s25  ;;  %5049 = vrot.lane.b32.xlu0 %v9699_v4, %s6100_s26 }
 0x75c   : > { %v4342_v42 = vpop.permute.xlu0 %4341 }
 0x75d   : > { %4388 = vst.msk [vmem:[#allocation4 + $0x8] sm:$0xff] %vm1409_vm6, %v4342_v42 }
 0x75f   : > { %5065 = vrot.lane.b32.xlu1 %v9708_v47, %s6100_s26  ;;  %4253 = vrot.lane.b32.xlu0 %v9395_v31, %s6094_s25 }
 0x760   : > { %v4358_v28 = vpop.permute.xlu1 %4357  ;;  %v4548_v11 = vpop.permute.xlu0 %4547 }
 0x761   : > { %4396 = vst.msk [vmem:[#allocation4 + $0x48] sm:$0xff] %vm1409_vm6, %v4358_v28  ;;  %v10472_v28 = vld [vmem:[#allocation74_spill] sm:$0xff] }
 0x762   : > { %4595 = vst.msk [vmem:[#allocation4] sm:$0xff] %vm1619_vm8, %v4548_v11  ;;  %v9836_v11 = vld [vmem:[#allocation3 + $0x88] sm:$0xff] }
 0x763   : > { %4269 = vrot.lane.b32.xlu1 %v9416_v44, %s6094_s25  ;;  %4347 = vrot.lane.b32.xlu0 %v9490_v18, %s6095_s21 }
 0x764   : > { %v4470_v7 = vpop.permute.xlu0 %4469 }
 0x765   : > { %v4484_v1 = vpop.permute.xlu1 %4483  ;;  %4516 = vst.msk [vmem:[#allocation4 + $0x8] sm:$0xff] %vm1538_vm7, %v4470_v7 }
 0x766   : > { %4523 = vst.msk [vmem:[#allocation4 + $0x40] sm:$0xff] %vm1538_vm7, %v4484_v1 }
 0x767   : > { %4603 = vst.msk [vmem:[#allocation4 + $0x40] sm:$0xff] %vm1619_vm8, %v4564_v58  ;;  %4363 = vrot.lane.b32.xlu1 %v9512_v57, %s6095_s21  ;;  %4349 = vrot.lane.b32.xlu0 %v9514_v60, %s6095_s21 }
 0x768   : > { %v4550_v14 = vpop.permute.xlu0 %4549 }
 0x769   : > { %v4486_v31 = vpop.permute.xlu1 %4485  ;;  %4596 = vst.msk [vmem:[#allocation4 + $0x8] sm:$0xff] %vm1619_vm8, %v4550_v14 }
 0x76a   : > { %4524 = vst.msk [vmem:[#allocation4 + $0x48] sm:$0xff] %vm1538_vm7, %v4486_v31 }
 0x76b   : > { %4365 = vrot.lane.b32.xlu1 %v9549_v53, %s6095_s21  ;;  %4475 = vrot.lane.b32.xlu0 %v9411_v23, %s6093_s15  ;;  %v10465_v23 = vld [vmem:[#allocation81_spill] sm:$0xff] }
 0x76c   : > { %v4644_v18 = vpop.permute.xlu0 %4643 }
 0x76d   : > { %v4566_v44 = vpop.permute.xlu1 %4565  ;;  %4691 = vst.msk [vmem:[#allocation4] sm:$0xff] %vm1716_vm9, %v4644_v18 }
 0x76e   : > { %4604 = vst.msk [vmem:[#allocation4 + $0x48] sm:$0xff] %vm1619_vm8, %v4566_v44 }
 0x76f   : > { %4491 = vrot.lane.b32.xlu1 %v9431_v22, %s6093_s15  ;;  %4477 = vrot.lane.b32.xlu0 %v9451_v52, %s6093_s15 }
 0x770   : > { %v4646_v60 = vpop.permute.xlu0 %4645 }
 0x771   : > { %v4660_v57 = vpop.permute.xlu1 %4659  ;;  %4692 = vst.msk [vmem:[#allocation4 + $0x8] sm:$0xff] %vm1716_vm9, %v4646_v60 }
 0x772   : > { %4699 = vst.msk [vmem:[#allocation4 + $0x40] sm:$0xff] %vm1716_vm9, %v4660_v57 }
 0x773   : > { %4493 = vrot.lane.b32.xlu1 %v9463_v51, %s6093_s15  ;;  %4555 = vrot.lane.b32.xlu0 %v10465_v23, %s6096_s12 }
 0x774   : > { %v4868_v38 = vpop.permute.xlu0 %4867 }
 0x775   : > { %v4662_v53 = vpop.permute.xlu1 %4661  ;;  %4915 = vst.msk [vmem:[#allocation4] sm:$0xff] %vm1942_vm10, %v4868_v38 }
 0x776   : > { %4700 = vst.msk [vmem:[#allocation4 + $0x48] sm:$0xff] %vm1716_vm9, %v4662_v53 }
 0x777   : > { %4571 = vrot.lane.b32.xlu1 %v9278_v30, %s6096_s12  ;;  %4557 = vrot.lane.b32.xlu0 %v9457_v48, %s6096_s12 }
 0x779   : > { %v4884_v22 = vpop.permute.xlu1 %4883  ;;  %v4870_v52 = vpop.permute.xlu0 %4869 }
 0x77a   : > { %4923 = vst.msk [vmem:[#allocation4 + $0x40] sm:$0xff] %vm1942_vm10, %v4884_v22  ;;  %4916 = vst.msk [vmem:[#allocation4 + $0x8] sm:$0xff] %vm1942_vm10, %v4870_v52 }
 0x77b   : > { %4573 = vrot.lane.b32.xlu1 %v9479_v35, %s6096_s12  ;;  %4651 = vrot.lane.b32.xlu0 %v9564_v3, %s6097_s0 }
 0x77d   : > { %v4886_v51 = vpop.permute.xlu1 %4885  ;;  %v4948_v37 = vpop.permute.xlu0 %4947 }
 0x77e   : > { %4924 = vst.msk [vmem:[#allocation4 + $0x48] sm:$0xff] %vm1942_vm10, %v4886_v51 }
 0x77f   : > { %4995 = vst.msk [vmem:[#allocation4] sm:$0xff] %vm2023_vm11, %v4948_v37  ;;  %4667 = vrot.lane.b32.xlu1 %v9573_v34, %s6097_s0  ;;  %4653 = vrot.lane.b32.xlu0 %v9575_v15, %s6097_s0  ;;  %v10476_v37 = vld [vmem:[#allocation72_spill] sm:$0xff] }
 0x781   : > { %v4964_v30 = vpop.permute.xlu1 %4963  ;;  %v4950_v48 = vpop.permute.xlu0 %4949 }
 0x782   : > { %5003 = vst.msk [vmem:[#allocation4 + $0x40] sm:$0xff] %vm2023_vm11, %v4964_v30  ;;  %4996 = vst.msk [vmem:[#allocation4 + $0x8] sm:$0xff] %vm2023_vm11, %v4950_v48  ;;  %v5017_v30 = vld [vmem:[#allocation3 + $0x40] sm:$0xff] }
 0x783   : > { %4669 = vrot.lane.b32.xlu1 %v9588_v61, %s6097_s0  ;;  %4875 = vrot.lane.b32.xlu0 %v9685_v19, %s6098_s16 }
 0x785   : > { %v4966_v35 = vpop.permute.xlu1 %4965  ;;  %v5044_v12 = vpop.permute.xlu0 %5043 }
 0x786   : > { %5004 = vst.msk [vmem:[#allocation4 + $0x48] sm:$0xff] %vm2023_vm11, %v4966_v35 }
 0x787   : > { %5091 = vst.msk [vmem:[#allocation4] sm:$0xff] %vm2120_vm12, %v5044_v12  ;;  %4891 = vrot.lane.b32.xlu1 %v9692_v59, %s6098_s16  ;;  %4877 = vrot.lane.b32.xlu0 %v9699_v4, %s6098_s16  ;;  %v10469_v59 = vld [vmem:[#allocation85_spill] sm:$0xff] }
 0x789   : > { %v5060_v50 = vpop.permute.xlu1 %5059  ;;  %v4248_v29 = vpop.permute.xlu0 %4247 }
 0x78a   : > { %5099 = vst.msk [vmem:[#allocation4 + $0x40] sm:$0xff] %vm2120_vm12, %v5060_v50 }
 0x78b   : > { %4293 = vst.msk [vmem:[#allocation4 + $0x10] sm:$0xff] %vm1312_vm5, %v4248_v29  ;;  %4893 = vrot.lane.b32.xlu1 %v9708_v47, %s6098_s16  ;;  %4955 = vrot.lane.b32.xlu0 %v10466_v25, %s6099_s24  ;;  %v10471_v47 = vld [vmem:[#allocation73_spill] sm:$0xff] }
 0x78d   : > { %v4264_v54 = vpop.permute.xlu1 %4263  ;;  %v5046_v10 = vpop.permute.xlu0 %5045 }
 0x78e   : > { %v5107_v13 = vld [vmem:[#allocation4] sm:$0xff]  ;;  %4301 = vst.msk [vmem:[#allocation4 + $0x50] sm:$0xff] %vm1312_vm5, %v4264_v54 }
 0x78f   : > { %5092 = vst.msk [vmem:[#allocation4 + $0x8] sm:$0xff] %vm2120_vm12, %v5046_v10  ;;  %5881 = vmatprep.mubr.msk.bf16.mxu0 %vm2196_vm13, %v5107_v13  ;;  %4971 = vrot.lane.b32.xlu1 %v10467_v40, %s6099_s24 }
 0x790   : > { %4957 = vrot.lane.b32.xlu0 %v9545_v0, %s6099_s24 }
 0x791   : > { %v5062_v17 = vpop.permute.xlu1 %5061  ;;  %v5115_v41 = vld [vmem:[#allocation4 + $0x40] sm:$0xff]  ;;  %v4250_v39 = vpop.permute.xlu0 %4249 }
 0x792   : > { %5100 = vst.msk [vmem:[#allocation4 + $0x48] sm:$0xff] %vm2120_vm12, %v5062_v17  ;;  %5897 = vmatprep.mubr.msk.bf16.mxu1 %vm2196_vm13, %v5115_v41 }
 0x793   : > { %4294 = vst.msk [vmem:[#allocation4 + $0x18] sm:$0xff] %vm1312_vm5, %v4250_v39  ;;  %4973 = vrot.lane.b32.xlu1 %v9562_v2, %s6099_s24  ;;  %v9807_v2 = vld [vmem:[#allocation3 + $0x38] sm:$0xff] }
 0x794   : > { %5051 = vrot.lane.b32.xlu0 %v9789_v8, %s6100_s26 }
 0x795   : > { %v4266_v0 = vpop.permute.xlu1 %4265  ;;  %v4344_v43 = vpop.permute.xlu0 %4343 }
 0x796   : > { %v5108_v46 = vld [vmem:[#allocation4 + $0x8] sm:$0xff]  ;;  %4302 = vst.msk [vmem:[#allocation4 + $0x58] sm:$0xff] %vm1312_vm5, %v4266_v0 }
 0x797   : > { %4389 = vst.msk [vmem:[#allocation4 + $0x10] sm:$0xff] %vm1409_vm6, %v4344_v43  ;;  %5882 = vmatmul.mubr.msk.bf16.vlgmr.msra.gmra.mrb[0].mxu0 %vm2196_vm13, %v5108_v46  ;;  %5067 = vrot.lane.b32.xlu1 %v9798_v36, %s6100_s26 }
 0x798   : > { %4255 = vrot.lane.b32.xlu0 %v10468_v55, %s6094_s25 }
 0x799   : > { %v4360_v6 = vpop.permute.xlu1 %4359  ;;  %v5116_v19 = vld [vmem:[#allocation4 + $0x48] sm:$0xff]  ;;  %v4346_v27 = vpop.permute.xlu0 %4345 }
 0x79a   : > { %4397 = vst.msk [vmem:[#allocation4 + $0x50] sm:$0xff] %vm1409_vm6, %v4360_v6  ;;  %5898 = vmatmul.mubr.msk.bf16.vlgmr.msra.gmra.mrb[0].mxu1 %vm2196_vm13, %v5116_v19  ;;  %4390 = vst.msk [vmem:[#allocation4 + $0x18] sm:$0xff] %vm1409_vm6, %v4346_v27 }
 0x79b   : > { %4271 = vrot.lane.b32.xlu1 %v10469_v59, %s6094_s25 }
 0x79c   : > { %5053 = vrot.lane.b32.xlu0 %v9807_v2, %s6100_s26 }
 0x79d   : > { %v4362_v62 = vpop.permute.xlu1 %4361  ;;  %v4472_v4 = vpop.permute.xlu0 %4471 }
 0x79e   : > { %4398 = vst.msk [vmem:[#allocation4 + $0x58] sm:$0xff] %vm1409_vm6, %v4362_v62 }
 0x79f   : > { %4517 = vst.msk [vmem:[#allocation4 + $0x10] sm:$0xff] %vm1538_vm7, %v4472_v4  ;;  %5069 = vrot.lane.b32.xlu1 %v9816_v63, %s6100_s26 }
 0x7a0   : > { %4257 = vrot.lane.b32.xlu0 %v10470_v9, %s6094_s25 }
 0x7a1   : > { %v4488_v16 = vpop.permute.xlu1 %4487  ;;  %v4474_v24 = vpop.permute.xlu0 %4473 }
 0x7a2   : > { %4525 = vst.msk [vmem:[#allocation4 + $0x50] sm:$0xff] %vm1538_vm7, %v4488_v16  ;;  %4518 = vst.msk [vmem:[#allocation4 + $0x18] sm:$0xff] %vm1538_vm7, %v4474_v24 }
 0x7a3   : > { %4273 = vrot.lane.b32.xlu1 %v9606_v45, %s6094_s25 }
 0x7a4   : > { %4351 = vrot.lane.b32.xlu0 %v10471_v47, %s6095_s21 }
 0x7a5   : > { %v4490_v58 = vpop.permute.xlu1 %4489  ;;  %v4552_v42 = vpop.permute.xlu0 %4551 }
 0x7a6   : > { %4526 = vst.msk [vmem:[#allocation4 + $0x58] sm:$0xff] %vm1538_vm7, %v4490_v58 }
 0x7a7   : > { %4597 = vst.msk [vmem:[#allocation4 + $0x10] sm:$0xff] %vm1619_vm8, %v4552_v42  ;;  %4367 = vrot.lane.b32.xlu1 %v9625_v33, %s6095_s21 }
 0x7a8   : > { %4353 = vrot.lane.b32.xlu0 %v10472_v28, %s6095_s21 }
 0x7a9   : > { %v4568_v1 = vpop.permute.xlu1 %4567  ;;  %v4554_v7 = vpop.permute.xlu0 %4553 }
 0x7aa   : > { %4605 = vst.msk [vmem:[#allocation4 + $0x50] sm:$0xff] %vm1619_vm8, %v4568_v1  ;;  %4598 = vst.msk [vmem:[#allocation4 + $0x18] sm:$0xff] %vm1619_vm8, %v4554_v7 }
 0x7ab   : > { %4369 = vrot.lane.b32.xlu1 %v9836_v11, %s6095_s21  ;;  %s10477_s21 = sld [smem:[#allocation90_spill]] }
 0x7ac   : > { %4479 = vrot.lane.b32.xlu0 %v9564_v3, %s6093_s15 }
 0x7ad   : > { %v4570_v45 = vpop.permute.xlu1 %4569  ;;  %v4648_v31 = vpop.permute.xlu0 %4647 }
 0x7ae   : > { %4606 = vst.msk [vmem:[#allocation4 + $0x58] sm:$0xff] %vm1619_vm8, %v4570_v45 }
 0x7af   : > { %4693 = vst.msk [vmem:[#allocation4 + $0x10] sm:$0xff] %vm1716_vm9, %v4648_v31  ;;  %4495 = vrot.lane.b32.xlu1 %v9573_v34, %s6093_s15  ;;  %v10473_v34 = vld [vmem:[#allocation70_spill] sm:$0xff] }
 0x7b0   : > { %4481 = vrot.lane.b32.xlu0 %v9575_v15, %s6093_s15 }
 0x7b1   : > { %v4664_v33 = vpop.permute.xlu1 %4663  ;;  %v4650_v14 = vpop.permute.xlu0 %4649 }
 0x7b2   : > { %4701 = vst.msk [vmem:[#allocation4 + $0x50] sm:$0xff] %vm1716_vm9, %v4664_v33  ;;  %4694 = vst.msk [vmem:[#allocation4 + $0x18] sm:$0xff] %vm1716_vm9, %v4650_v14 }
 0x7b3   : > { %4497 = vrot.lane.b32.xlu1 %v9588_v61, %s6093_s15 }
 0x7b4   : > { %4559 = vrot.lane.b32.xlu0 %v9467_v21, %s6096_s12  ;;  %v10474_v21 = vld [vmem:[#allocation76_spill] sm:$0xff] }
 0x7b5   : > { %v4666_v3 = vpop.permute.xlu1 %4665  ;;  %v4872_v44 = vpop.permute.xlu0 %4871 }
 0x7b6   : > { %4702 = vst.msk [vmem:[#allocation4 + $0x58] sm:$0xff] %vm1716_vm9, %v4666_v3 }
 0x7b7   : > { %4917 = vst.msk [vmem:[#allocation4 + $0x10] sm:$0xff] %vm1942_vm10, %v4872_v44  ;;  %4575 = vrot.lane.b32.xlu1 %v9518_v49, %s6096_s12  ;;  %v10475_v49 = vld [vmem:[#allocation77_spill] sm:$0xff] }
 0x7b8   : > { %4561 = vrot.lane.b32.xlu0 %v10473_v34, %s6096_s12 }
 0x7b9   : > { %v4888_v15 = vpop.permute.xlu1 %4887  ;;  %v4874_v18 = vpop.permute.xlu0 %4873 }
 0x7ba   : > { %4925 = vst.msk [vmem:[#allocation4 + $0x50] sm:$0xff] %vm1942_vm10, %v4888_v15  ;;  %4918 = vst.msk [vmem:[#allocation4 + $0x18] sm:$0xff] %vm1942_vm10, %v4874_v18 }
 0x7bb   : > { %4577 = vrot.lane.b32.xlu1 %v9619_v20, %s6096_s12 }
 0x7bc   : > { %4655 = vrot.lane.b32.xlu0 %v10474_v21, %s6097_s0 }
 0x7bd   : > { %v4890_v61 = vpop.permute.xlu1 %4889  ;;  %v4952_v57 = vpop.permute.xlu0 %4951 }
 0x7be   : > { %4926 = vst.msk [vmem:[#allocation4 + $0x58] sm:$0xff] %vm1942_vm10, %v4890_v61 }
 0x7bf   : > { %4997 = vst.msk [vmem:[#allocation4 + $0x10] sm:$0xff] %vm2023_vm11, %v4952_v57  ;;  %4671 = vrot.lane.b32.xlu1 %v9670_v32, %s6097_s0 }
 0x7c0   : > { %4657 = vrot.lane.b32.xlu0 %v10475_v49, %s6097_s0 }
 0x7c1   : > { %v4968_v60 = vpop.permute.xlu1 %4967  ;;  %v4954_v23 = vpop.permute.xlu0 %4953 }
 0x7c2   : > { %5005 = vst.msk [vmem:[#allocation4 + $0x50] sm:$0xff] %vm2023_vm11, %v4968_v60  ;;  %4998 = vst.msk [vmem:[#allocation4 + $0x18] sm:$0xff] %vm2023_vm11, %v4954_v23 }
 0x7c3   : > { %4673 = vrot.lane.b32.xlu1 %v9836_v11, %s6097_s0 }
 0x7c4   : > { %4879 = vrot.lane.b32.xlu0 %v9789_v8, %s6098_s16 }
 0x7c5   : > { %v4970_v20 = vpop.permute.xlu1 %4969  ;;  %v5048_v53 = vpop.permute.xlu0 %5047 }
 0x7c6   : > { %5006 = vst.msk [vmem:[#allocation4 + $0x58] sm:$0xff] %vm2023_vm11, %v4970_v20 }
 0x7c7   : > { %5093 = vst.msk [vmem:[#allocation4 + $0x10] sm:$0xff] %vm2120_vm12, %v5048_v53  ;;  %4895 = vrot.lane.b32.xlu1 %v9798_v36, %s6098_s16 }
 0x7c8   : > { %4881 = vrot.lane.b32.xlu0 %v9807_v2, %s6098_s16 }
 0x7c9   : > { %v5064_v32 = vpop.permute.xlu1 %5063  ;;  %v4252_v38 = vpop.permute.xlu0 %4251 }
 0x7ca   : > { %5101 = vst.msk [vmem:[#allocation4 + $0x50] sm:$0xff] %vm2120_vm12, %v5064_v32 }
 0x7cb   : > { %4295 = vst.msk [vmem:[#allocation4 + $0x20] sm:$0xff] %vm1312_vm5, %v4252_v38  ;;  %4897 = vrot.lane.b32.xlu1 %v9816_v63, %s6098_s16 }
 0x7cc   : > { %4959 = vrot.lane.b32.xlu0 %v9556_v5, %s6099_s24  ;;  %v5025_v5 = vld [vmem:[#allocation3 + $0x80] sm:$0xff] }
 0x7cd   : > { %v4268_v22 = vpop.permute.xlu1 %4267  ;;  %v5050_v52 = vpop.permute.xlu0 %5049 }
 0x7ce   : > { %v5109_v51 = vld [vmem:[#allocation4 + $0x10] sm:$0xff]  ;;  %4303 = vst.msk [vmem:[#allocation4 + $0x60] sm:$0xff] %vm1312_vm5, %v4268_v22 }
 0x7cf   : > { %5094 = vst.msk [vmem:[#allocation4 + $0x18] sm:$0xff] %vm2120_vm12, %v5050_v52  ;;  %5885 = vmatprep.mubr.msk.bf16.mxu0 %vm2196_vm13, %v5109_v51  ;;  %4975 = vrot.lane.b32.xlu1 %v9581_v56, %s6099_s24  ;;  %v5018_v56 = vld [vmem:[#allocation3 + $0x48] sm:$0xff] }
 0x7d0   : > { %4961 = vrot.lane.b32.xlu0 %v10476_v37, %s6099_s24 }
 0x7d1   : > { %v5066_v48 = vpop.permute.xlu1 %5065  ;;  %v5117_v35 = vld [vmem:[#allocation4 + $0x50] sm:$0xff]  ;;  %v4254_v12 = vpop.permute.xlu0 %4253 }
 0x7d2   : > { %5102 = vst.msk [vmem:[#allocation4 + $0x58] sm:$0xff] %vm2120_vm12, %v5066_v48  ;;  %5901 = vmatprep.mubr.msk.bf16.mxu1 %vm2196_vm13, %v5117_v35 }
 0x7d3   : > { %4296 = vst.msk [vmem:[#allocation4 + $0x28] sm:$0xff] %vm1312_vm5, %v4254_v12  ;;  %4977 = vrot.lane.b32.xlu1 %v9664_v26, %s6099_s24 }
 0x7d4   : > { %5055 = vrot.lane.b32.xlu0 %v5017_v30, %s6100_s26 }
 0x7d5   : > { %v4270_v50 = vpop.permute.xlu1 %4269  ;;  %v4348_v29 = vpop.permute.xlu0 %4347 }
 0x7d6   : > { %v5110_v25 = vld [vmem:[#allocation4 + $0x18] sm:$0xff]  ;;  %4304 = vst.msk [vmem:[#allocation4 + $0x68] sm:$0xff] %vm1312_vm5, %v4270_v50 }
 0x7d7   : > { %4391 = vst.msk [vmem:[#allocation4 + $0x20] sm:$0xff] %vm1409_vm6, %v4348_v29  ;;  %5886 = vmatmul.mubr.msk.bf16.gmra.mrb[4].mxu0 %vm2196_vm13, %v5110_v25  ;;  %5071 = vrot.lane.b32.xlu1 %v5025_v5, %s6100_s26 }
 0x7d8   : > { %5057 = vrot.lane.b32.xlu0 %v5018_v56, %s6100_s26 }
 0x7d9   : > { %v4364_v54 = vpop.permute.xlu1 %4363  ;;  %v5118_v10 = vld [vmem:[#allocation4 + $0x58] sm:$0xff]  ;;  %v4350_v26 = vpop.permute.xlu0 %4349 }
 0x7da   : > { %4399 = vst.msk [vmem:[#allocation4 + $0x60] sm:$0xff] %vm1409_vm6, %v4364_v54  ;;  %5902 = vmatmul.mubr.msk.bf16.gmra.mrb[4].mxu1 %vm2196_vm13, %v5118_v10  ;;  %4392 = vst.msk [vmem:[#allocation4 + $0x28] sm:$0xff] %vm1409_vm6, %v4350_v26 }
 0x7db   : > { %5073 = vrot.lane.b32.xlu1 %v9836_v11, %s6100_s26 }
 0x7dd   : > { %v4366_v13 = vpop.permute.xlu1 %4365  ;;  %v4476_v40 = vpop.permute.xlu0 %4475 }
 0x7de   : > { %4400 = vst.msk [vmem:[#allocation4 + $0x68] sm:$0xff] %vm1409_vm6, %v4366_v13 }
 0x7df   : > { %4519 = vst.msk [vmem:[#allocation4 + $0x20] sm:$0xff] %vm1538_vm7, %v4476_v40  ;;  %v9983_v40 = vld [vmem:[%s10477_s21] ss:$0 sm:$0xff] }
 0x7e1   : > { %v4492_v8 = vpop.permute.xlu1 %4491  ;;  %v4478_v17 = vpop.permute.xlu0 %4477 }
 0x7e2   : > { %4527 = vst.msk [vmem:[#allocation4 + $0x60] sm:$0xff] %vm1538_vm7, %v4492_v8  ;;  %4520 = vst.msk [vmem:[#allocation4 + $0x28] sm:$0xff] %vm1538_vm7, %v4478_v17  ;;  %v5380_v17 = vld [vmem:[%s6210_s19 + $0x10] sm:$0xff] }
 0x7e5   : > { %v4494_v41 = vpop.permute.xlu1 %4493  ;;  %v4556_v39 = vpop.permute.xlu0 %4555 }
 0x7e6   : > { %4528 = vst.msk [vmem:[#allocation4 + $0x68] sm:$0xff] %vm1538_vm7, %v4494_v41 }
 0x7e7   : > { %4599 = vst.msk [vmem:[#allocation4 + $0x20] sm:$0xff] %vm1619_vm8, %v4556_v39 }
 0x7e9   : > { %v4572_v36 = vpop.permute.xlu1 %4571  ;;  %v4558_v0 = vpop.permute.xlu0 %4557 }
 0x7ea   : > { %4607 = vst.msk [vmem:[#allocation4 + $0x60] sm:$0xff] %vm1619_vm8, %v4572_v36  ;;  %4600 = vst.msk [vmem:[#allocation4 + $0x28] sm:$0xff] %vm1619_vm8, %v4558_v0  ;;  %v5378_v36 = vld [vmem:[%s6210_s19] sm:$0xff] }
 0x7ed   : > { %v4574_v43 = vpop.permute.xlu1 %4573  ;;  %v4652_v46 = vpop.permute.xlu0 %4651 }
 0x7ee   : > { %4608 = vst.msk [vmem:[#allocation4 + $0x68] sm:$0xff] %vm1619_vm8, %v4574_v43 }
 0x7ef   : > { %4695 = vst.msk [vmem:[#allocation4 + $0x20] sm:$0xff] %vm1716_vm9, %v4652_v46  ;;  %v5381_v46 = vld [vmem:[%s6210_s19 + $0x18] sm:$0xff] }
 0x7f1   : > { %v4668_v55 = vpop.permute.xlu1 %4667  ;;  %v4654_v2 = vpop.permute.xlu0 %4653 }
 0x7f2   : > { %4703 = vst.msk [vmem:[#allocation4 + $0x60] sm:$0xff] %vm1716_vm9, %v4668_v55  ;;  %4696 = vst.msk [vmem:[#allocation4 + $0x28] sm:$0xff] %vm1716_vm9, %v4654_v2 }
 0x7f5   : > { %v4670_v6 = vpop.permute.xlu1 %4669  ;;  %v4876_v19 = vpop.permute.xlu0 %4875 }
 0x7f6   : > { %4704 = vst.msk [vmem:[#allocation4 + $0x68] sm:$0xff] %vm1716_vm9, %v4670_v6 }
 0x7f7   : > { %4919 = vst.msk [vmem:[#allocation4 + $0x20] sm:$0xff] %vm1942_vm10, %v4876_v19  ;;  %v5379_v19 = vld [vmem:[%s6210_s19 + $0x8] sm:$0xff] }
 0x7f9   : > { %v4892_v27 = vpop.permute.xlu1 %4891  ;;  %v4878_v59 = vpop.permute.xlu0 %4877 }
 0x7fa   : > { %4927 = vst.msk [vmem:[#allocation4 + $0x60] sm:$0xff] %vm1942_vm10, %v4892_v27  ;;  %4920 = vst.msk [vmem:[#allocation4 + $0x28] sm:$0xff] %vm1942_vm10, %v4878_v59 }
 0x7fd   : > { %v4894_v63 = vpop.permute.xlu1 %4893  ;;  %v4956_v62 = vpop.permute.xlu0 %4955 }
 0x7fe   : > { %4928 = vst.msk [vmem:[#allocation4 + $0x68] sm:$0xff] %vm1942_vm10, %v4894_v63 }
 0x7ff   : > { %4999 = vst.msk [vmem:[#allocation4 + $0x20] sm:$0xff] %vm2023_vm11, %v4956_v62  ;;  %v5396_v62 = vld [vmem:[%s6210_s19 + $0x90] sm:$0xff] }
 0x801   : > { %v4972_v4 = vpop.permute.xlu1 %4971 }
 0x802   : > { %v4958_v9 = vpop.permute.xlu0 %4957  ;;  %5007 = vst.msk [vmem:[#allocation4 + $0x60] sm:$0xff] %vm2023_vm11, %v4972_v4 }
 0x803   : > { %5000 = vst.msk [vmem:[#allocation4 + $0x28] sm:$0xff] %vm2023_vm11, %v4958_v9 }
 0x805   : > { %v4974_v16 = vpop.permute.xlu1 %4973 }
 0x806   : > { %v5052_v24 = vpop.permute.xlu0 %5051  ;;  %5008 = vst.msk [vmem:[#allocation4 + $0x68] sm:$0xff] %vm2023_vm11, %v4974_v16 }
 0x807   : > { %5095 = vst.msk [vmem:[#allocation4 + $0x20] sm:$0xff] %vm2120_vm12, %v5052_v24  ;;  %v5394_v24 = vld [vmem:[%s6210_s19 + $0x80] sm:$0xff] }
 0x809   : > { %v5068_v47 = vpop.permute.xlu1 %5067 }
 0x80a   : > { %v4256_v58 = vpop.permute.xlu0 %4255  ;;  %5103 = vst.msk [vmem:[#allocation4 + $0x60] sm:$0xff] %vm2120_vm12, %v5068_v47 }
 0x80b   : > { %4297 = vst.msk [vmem:[#allocation4 + $0x30] sm:$0xff] %vm1312_vm5, %v4256_v58 }
 0x80d   : > { %v4272_v42 = vpop.permute.xlu1 %4271 }
 0x80e   : > { %v5054_v28 = vpop.permute.xlu0 %5053  ;;  %v5111_v11 = vld [vmem:[#allocation4 + $0x20] sm:$0xff]  ;;  %4305 = vst.msk [vmem:[#allocation4 + $0x70] sm:$0xff] %vm1312_vm5, %v4272_v42 }
 0x80f   : > { %5096 = vst.msk [vmem:[#allocation4 + $0x28] sm:$0xff] %vm2120_vm12, %v5054_v28  ;;  %5889 = vmatprep.mubr.msk.bf16.mxu0 %vm2196_vm13, %v5111_v11  ;;  %v5397_v28 = vld [vmem:[%s6210_s19 + $0x98] sm:$0xff] }
 0x811   : > { %v5070_v1 = vpop.permute.xlu1 %5069  ;;  %v5119_v7 = vld [vmem:[#allocation4 + $0x60] sm:$0xff] }
 0x812   : > { %v4258_v45 = vpop.permute.xlu0 %4257  ;;  %5104 = vst.msk [vmem:[#allocation4 + $0x68] sm:$0xff] %vm2120_vm12, %v5070_v1  ;;  %5905 = vmatprep.mubr.msk.bf16.mxu1 %vm2196_vm13, %v5119_v7 }
 0x813   : > { %4298 = vst.msk [vmem:[#allocation4 + $0x38] sm:$0xff] %vm1312_vm5, %v4258_v45  ;;  %v5395_v45 = vld [vmem:[%s6210_s19 + $0x88] sm:$0xff] }
 0x815   : > { %v4274_v31 = vpop.permute.xlu1 %4273 }
 0x816   : > { %v4352_v33 = vpop.permute.xlu0 %4351  ;;  %v5112_v14 = vld [vmem:[#allocation4 + $0x28] sm:$0xff]  ;;  %4306 = vst.msk [vmem:[#allocation4 + $0x78] sm:$0xff] %vm1312_vm5, %v4274_v31 }
 0x817   : > { %4393 = vst.msk [vmem:[#allocation4 + $0x30] sm:$0xff] %vm1409_vm6, %v4352_v33  ;;  %5890 = vmatmul.mubr.msk.bf16.gmra.mrb[8].mxu0 %vm2196_vm13, %v5112_v14 }
 0x819   : > { %v4368_v3 = vpop.permute.xlu1 %4367  ;;  %v5120_v44 = vld [vmem:[#allocation4 + $0x68] sm:$0xff] }
 0x81a   : > { %v4354_v34 = vpop.permute.xlu0 %4353  ;;  %4401 = vst.msk [vmem:[#allocation4 + $0x70] sm:$0xff] %vm1409_vm6, %v4368_v3  ;;  %5906 = vmatmul.mubr.msk.bf16.gmra.mrb[8].mxu1 %vm2196_vm13, %v5120_v44 }
 0x81b   : > { %4394 = vst.msk [vmem:[#allocation4 + $0x38] sm:$0xff] %vm1409_vm6, %v4354_v34  ;;  %v5384_v34 = vld [vmem:[%s6210_s19 + $0x30] sm:$0xff] }
 0x81d   : > { %v4370_v15 = vpop.permute.xlu1 %4369 }
 0x81e   : > { %v4480_v18 = vpop.permute.xlu0 %4479  ;;  %4402 = vst.msk [vmem:[#allocation4 + $0x78] sm:$0xff] %vm1409_vm6, %v4370_v15 }
 0x81f   : > { %4521 = vst.msk [vmem:[#allocation4 + $0x30] sm:$0xff] %vm1538_vm7, %v4480_v18 }
 0x821   : > { %v4496_v21 = vpop.permute.xlu1 %4495 }
 0x822   : > { %v4482_v61 = vpop.permute.xlu0 %4481  ;;  %4529 = vst.msk [vmem:[#allocation4 + $0x70] sm:$0xff] %vm1538_vm7, %v4496_v21  ;;  %v5382_v21 = vld [vmem:[%s6210_s19 + $0x20] sm:$0xff] }
 0x823   : > { %4522 = vst.msk [vmem:[#allocation4 + $0x38] sm:$0xff] %vm1538_vm7, %v4482_v61 }
 0x825   : > { %v4498_v57 = vpop.permute.xlu1 %4497 }
 0x826   : > { %v4560_v49 = vpop.permute.xlu0 %4559  ;;  %4530 = vst.msk [vmem:[#allocation4 + $0x78] sm:$0xff] %vm1538_vm7, %v4498_v57 }
 0x827   : > { %4601 = vst.msk [vmem:[#allocation4 + $0x30] sm:$0xff] %vm1619_vm8, %v4560_v49  ;;  %v5385_v49 = vld [vmem:[%s6210_s19 + $0x38] sm:$0xff] }
 0x829   : > { %v4576_v60 = vpop.permute.xlu1 %4575 }
 0x82a   : > { %v4562_v23 = vpop.permute.xlu0 %4561  ;;  %4609 = vst.msk [vmem:[#allocation4 + $0x70] sm:$0xff] %vm1619_vm8, %v4576_v60 }
 0x82b   : > { %4602 = vst.msk [vmem:[#allocation4 + $0x38] sm:$0xff] %vm1619_vm8, %v4562_v23 }
 0x82d   : > { %v4578_v20 = vpop.permute.xlu1 %4577 }
 0x82e   : > { %v4656_v53 = vpop.permute.xlu0 %4655  ;;  %4610 = vst.msk [vmem:[#allocation4 + $0x78] sm:$0xff] %vm1619_vm8, %v4578_v20 }
 0x82f   : > { %4697 = vst.msk [vmem:[#allocation4 + $0x30] sm:$0xff] %vm1716_vm9, %v4656_v53  ;;  %v5383_v53 = vld [vmem:[%s6210_s19 + $0x28] sm:$0xff] }
 0x831   : > { %v4672_v32 = vpop.permute.xlu1 %4671 }
 0x832   : > { %v4658_v38 = vpop.permute.xlu0 %4657  ;;  %4705 = vst.msk [vmem:[#allocation4 + $0x70] sm:$0xff] %vm1716_vm9, %v4672_v32 }
 0x833   : > { %4698 = vst.msk [vmem:[#allocation4 + $0x38] sm:$0xff] %vm1716_vm9, %v4658_v38 }
 0x835   : > { %v4674_v22 = vpop.permute.xlu1 %4673 }
 0x836   : > { %v4880_v52 = vpop.permute.xlu0 %4879  ;;  %4706 = vst.msk [vmem:[#allocation4 + $0x78] sm:$0xff] %vm1716_vm9, %v4674_v22 }
 0x837   : > { %4921 = vst.msk [vmem:[#allocation4 + $0x30] sm:$0xff] %vm1942_vm10, %v4880_v52  ;;  %v5400_v52 = vld [vmem:[%s6210_s19 + $0xb0] sm:$0xff] }
 0x839   : > { %v4896_v51 = vpop.permute.xlu1 %4895 }
 0x83a   : > { %v4882_v37 = vpop.permute.xlu0 %4881  ;;  %4929 = vst.msk [vmem:[#allocation4 + $0x70] sm:$0xff] %vm1942_vm10, %v4896_v51 }
 0x83b   : > { %4922 = vst.msk [vmem:[#allocation4 + $0x38] sm:$0xff] %vm1942_vm10, %v4882_v37 }
 0x83d   : > { %v4898_v30 = vpop.permute.xlu1 %4897 }
 0x83e   : > { %v4960_v48 = vpop.permute.xlu0 %4959  ;;  %4930 = vst.msk [vmem:[#allocation4 + $0x78] sm:$0xff] %vm1942_vm10, %v4898_v30 }
 0x83f   : > { %5001 = vst.msk [vmem:[#allocation4 + $0x30] sm:$0xff] %vm2023_vm11, %v4960_v48  ;;  %v5398_v48 = vld [vmem:[%s6210_s19 + $0xa0] sm:$0xff] }
 0x841   : > { %v4976_v35 = vpop.permute.xlu1 %4975 }
 0x842   : > { %v4962_v12 = vpop.permute.xlu0 %4961  ;;  %5009 = vst.msk [vmem:[#allocation4 + $0x70] sm:$0xff] %vm2023_vm11, %v4976_v35 }
 0x843   : > { %5002 = vst.msk [vmem:[#allocation4 + $0x38] sm:$0xff] %vm2023_vm11, %v4962_v12 }
 0x845   : > { %v4978_v5 = vpop.permute.xlu1 %4977 }
 0x846   : > { %v5056_v56 = vpop.permute.xlu0 %5055  ;;  %5010 = vst.msk [vmem:[#allocation4 + $0x78] sm:$0xff] %vm2023_vm11, %v4978_v5 }
 0x847   : > { %5097 = vst.msk [vmem:[#allocation4 + $0x30] sm:$0xff] %vm2120_vm12, %v5056_v56  ;;  %v5401_v56 = vld [vmem:[%s6210_s19 + $0xb8] sm:$0xff] }
 0x849   : > { %v5072_v50 = vpop.permute.xlu1 %5071 }
 0x84a   : > { %v5058_v29 = vpop.permute.xlu0 %5057  ;;  %5105 = vst.msk [vmem:[#allocation4 + $0x70] sm:$0xff] %vm2120_vm12, %v5072_v50 }
 0x84b   : > { %5098 = vst.msk [vmem:[#allocation4 + $0x38] sm:$0xff] %vm2120_vm12, %v5058_v29 }
 0x84d   : > { %v5074_v25 = vpop.permute.xlu1 %5073 }
 0x84e   : > { %v5113_v54 = vld [vmem:[#allocation4 + $0x30] sm:$0xff]  ;;  %5106 = vst.msk [vmem:[#allocation4 + $0x78] sm:$0xff] %vm2120_vm12, %v5074_v25 }
 0x84f   : > { %5893 = vmatprep.mubr.msk.bf16.mxu0 %vm2196_vm13, %v5113_v54  ;;  %v5399_v54 = vld [vmem:[%s6210_s19 + $0xa8] sm:$0xff] }
 0x851   : > { %v5121_v10 = vld [vmem:[#allocation4 + $0x70] sm:$0xff] }
 0x852   : > { %v5114_v26 = vld [vmem:[#allocation4 + $0x38] sm:$0xff]  ;;  %5909 = vmatprep.mubr.msk.bf16.mxu1 %vm2196_vm13, %v5121_v10 }
 0x853   : > { %5894 = vmatmul.mubr.msk.bf16.gmra.mrb[12].mxu0 %vm2196_vm13, %v5114_v26 }
 0x855   : > { %v5122_v13 = vld [vmem:[#allocation4 + $0x78] sm:$0xff] }
 0x856   : > { %5910 = vmatmul.mubr.msk.bf16.gmra.mrb[12].mxu1 %vm2196_vm13, %v5122_v13 }
 0x86a   : > { %v5883_v8 = vpop.f32.mrb[0].mxu0 }
 0x86b   : > { %v5260_v41 = vadd.f32 %v5883_v8, %v9983_v40  ;;  %v5251_v39 = vpop.f32.mrb[1].mxu0 }
 0x86c   : > { %v5252_v0 = vadd.f32 %v9983_v40, %v5251_v39  ;;  %v5884_v43 = vpop.f32.mrb[2].mxu0 }
 0x86d   : > { %v5412_v55 = vadd.f32 %v5380_v17, %v5260_v41  ;;  %v5263_v2 = vadd.f32 %v5884_v43, %v9983_v40  ;;  %v5254_v6 = vpop.f32.mrb[3].mxu0  ;;  %v5899_v63 = vpop.f32.mrb[0].mxu1  ;;  %v5388_v41 = vld [vmem:[%s6210_s19 + $0x50] sm:$0xff] }
 0x86e   : > { %v5410_v27 = vadd.f32 %v5378_v36, %v5252_v0  ;;  %v5255_v59 = vadd.f32 %v9983_v40, %v5254_v6  ;;  %v5324_v9 = vadd.f32 %v5899_v63, %v9983_v40  ;;  %v5315_v16 = vpop.f32.mrb[1].mxu1  ;;  %v5386_v0 = vld [vmem:[%s6210_s19 + $0x40] sm:$0xff] }
 0x86f   : > { %5444 = vst.msk [vmem:[%s6252_s5 + $0x10] sm:$0xff] %vm1199_vm1, %v5412_v55  ;;  %v5413_v4 = vadd.f32 %v5381_v46, %v5263_v2  ;;  %v5316_v58 = vadd.f32 %v9983_v40, %v5315_v16  ;;  %v5900_v42 = vpop.f32.mrb[2].mxu1  ;;  %v5389_v55 = vld [vmem:[%s6210_s19 + $0x58] sm:$0xff] }
 0x870   : > { %5442 = vst.msk [vmem:[%s6252_s5] sm:$0xff] %vm1199_vm1, %v5410_v27  ;;  %v5411_v47 = vadd.f32 %v5379_v19, %v5255_v59  ;;  %v5428_v11 = vadd.f32 %v5396_v62, %v5324_v9  ;;  %v5327_v1 = vadd.f32 %v5900_v42, %v9983_v40  ;;  %v5318_v7 = vpop.f32.mrb[3].mxu1  ;;  %v5387_v27 = vld [vmem:[%s6210_s19 + $0x48] sm:$0xff] }
 0x871   : > { %5445 = vst.msk [vmem:[%s6252_s5 + $0x18] sm:$0xff] %vm1199_vm1, %v5413_v4  ;;  %v5426_v31 = vadd.f32 %v5394_v24, %v5316_v58  ;;  %v5319_v33 = vadd.f32 %v9983_v40, %v5318_v7  ;;  %v5404_v4 = vld [vmem:[%s6210_s19 + $0xd0] sm:$0xff] }
 0x872   : > { %5443 = vst.msk [vmem:[%s6252_s5 + $0x8] sm:$0xff] %vm1199_vm1, %v5411_v47  ;;  %5460 = vst.msk [vmem:[%s6252_s5 + $0x90] sm:$0xff] %vm1199_vm1, %v5428_v11  ;;  %v5429_v14 = vadd.f32 %v5397_v28, %v5327_v1  ;;  %v5402_v47 = vld [vmem:[%s6210_s19 + $0xc0] sm:$0xff]  ;;  %v5405_v11 = vld [vmem:[%s6210_s19 + $0xd8] sm:$0xff] }
 0x873   : > { %5458 = vst.msk [vmem:[%s6252_s5 + $0x80] sm:$0xff] %vm1199_vm1, %v5426_v31  ;;  %v5427_v3 = vadd.f32 %v5395_v45, %v5319_v33  ;;  %v5403_v31 = vld [vmem:[%s6210_s19 + $0xc8] sm:$0xff] }
 0x874   : > { %5461 = vst.msk [vmem:[%s6252_s5 + $0x98] sm:$0xff] %vm1199_vm1, %v5429_v14 }
 0x875   : > { %5459 = vst.msk [vmem:[%s6252_s5 + $0x88] sm:$0xff] %vm1199_vm1, %v5427_v3 }
 0x8aa   : > { %v5887_v44 = vpop.f32.mrb[4].mxu0 }
 0x8ab   : > { %v5276_v15 = vadd.f32 %v5887_v44, %v9983_v40  ;;  %v5267_v18 = vpop.f32.mrb[5].mxu0 }
 0x8ac   : > { %v5268_v61 = vadd.f32 %v9983_v40, %v5267_v18  ;;  %v5888_v57 = vpop.f32.mrb[6].mxu0 }
 0x8ad   : > { %v5416_v60 = vadd.f32 %v5384_v34, %v5276_v15  ;;  %v5279_v23 = vadd.f32 %v5888_v57, %v9983_v40  ;;  %v5270_v20 = vpop.f32.mrb[7].mxu0  ;;  %v5903_v22 = vpop.f32.mrb[4].mxu1  ;;  %v5392_v15 = vld [vmem:[%s6210_s19 + $0x70] sm:$0xff] }
 0x8ae   : > { %v5414_v32 = vadd.f32 %v5382_v21, %v5268_v61  ;;  %v5271_v38 = vadd.f32 %v9983_v40, %v5270_v20  ;;  %v5340_v37 = vadd.f32 %v5903_v22, %v9983_v40  ;;  %v5331_v30 = vpop.f32.mrb[5].mxu1  ;;  %v5390_v61 = vld [vmem:[%s6210_s19 + $0x60] sm:$0xff] }
 0x8af   : > { %5448 = vst.msk [vmem:[%s6252_s5 + $0x30] sm:$0xff] %vm1199_vm1, %v5416_v60  ;;  %v5417_v51 = vadd.f32 %v5385_v49, %v5279_v23  ;;  %v5332_v12 = vadd.f32 %v9983_v40, %v5331_v30  ;;  %v5904_v5 = vpop.f32.mrb[6].mxu1  ;;  %v5393_v60 = vld [vmem:[%s6210_s19 + $0x78] sm:$0xff] }
 0x8b0   : > { %5446 = vst.msk [vmem:[%s6252_s5 + $0x20] sm:$0xff] %vm1199_vm1, %v5414_v32  ;;  %v5415_v35 = vadd.f32 %v5383_v53, %v5271_v38  ;;  %v5432_v50 = vadd.f32 %v5400_v52, %v5340_v37  ;;  %v5343_v29 = vadd.f32 %v5904_v5, %v9983_v40  ;;  %v5334_v25 = vpop.f32.mrb[7].mxu1  ;;  %v5391_v32 = vld [vmem:[%s6210_s19 + $0x68] sm:$0xff] }
 0x8b1   : > { %5449 = vst.msk [vmem:[%s6252_s5 + $0x38] sm:$0xff] %vm1199_vm1, %v5417_v51  ;;  %v5430_v10 = vadd.f32 %v5398_v48, %v5332_v12  ;;  %v5335_v26 = vadd.f32 %v9983_v40, %v5334_v25  ;;  %v5408_v51 = vld [vmem:[%s6210_s19 + $0xf0] sm:$0xff] }
 0x8b2   : > { %5447 = vst.msk [vmem:[%s6252_s5 + $0x28] sm:$0xff] %vm1199_vm1, %v5415_v35  ;;  %5464 = vst.msk [vmem:[%s6252_s5 + $0xb0] sm:$0xff] %vm1199_vm1, %v5432_v50  ;;  %v5433_v13 = vadd.f32 %v5401_v56, %v5343_v29  ;;  %v5406_v35 = vld [vmem:[%s6210_s19 + $0xe0] sm:$0xff]  ;;  %v5409_v50 = vld [vmem:[%s6210_s19 + $0xf8] sm:$0xff] }
 0x8b3   : > { %5462 = vst.msk [vmem:[%s6252_s5 + $0xa0] sm:$0xff] %vm1199_vm1, %v5430_v10  ;;  %v5431_v8 = vadd.f32 %v5399_v54, %v5335_v26  ;;  %v5407_v10 = vld [vmem:[%s6210_s19 + $0xe8] sm:$0xff] }
 0x8b4   : > { %5465 = vst.msk [vmem:[%s6252_s5 + $0xb8] sm:$0xff] %vm1199_vm1, %v5433_v13 }
 0x8b5   : > { %5463 = vst.msk [vmem:[%s6252_s5 + $0xa8] sm:$0xff] %vm1199_vm1, %v5431_v8 }
 0x8ea   : > { %v5891_v17 = vpop.f32.mrb[8].mxu0 }
 0x8eb   : > { %v5292_v39 = vadd.f32 %v5891_v17, %v9983_v40  ;;  %v5283_v36 = vpop.f32.mrb[9].mxu0 }
 0x8ec   : > { %v5284_v43 = vadd.f32 %v9983_v40, %v5283_v36  ;;  %v5892_v46 = vpop.f32.mrb[10].mxu0 }
 0x8ed   : > { %v5420_v2 = vadd.f32 %v5388_v41, %v5292_v39  ;;  %v5295_v6 = vadd.f32 %v5892_v46, %v9983_v40  ;;  %v5286_v19 = vpop.f32.mrb[11].mxu0  ;;  %v5907_v62 = vpop.f32.mrb[8].mxu1 }
 0x8ee   : > { %v5418_v59 = vadd.f32 %v5386_v0, %v5284_v43  ;;  %v5287_v63 = vadd.f32 %v9983_v40, %v5286_v19  ;;  %v5356_v16 = vadd.f32 %v5907_v62, %v9983_v40  ;;  %v5347_v24 = vpop.f32.mrb[9].mxu1 }
 0x8ef   : > { %5452 = vst.msk [vmem:[%s6252_s5 + $0x50] sm:$0xff] %vm1199_vm1, %v5420_v2  ;;  %v5421_v9 = vadd.f32 %v5389_v55, %v5295_v6  ;;  %v5348_v42 = vadd.f32 %v9983_v40, %v5347_v24  ;;  %v5908_v28 = vpop.f32.mrb[10].mxu1 }
 0x8f0   : > { %5450 = vst.msk [vmem:[%s6252_s5 + $0x40] sm:$0xff] %vm1199_vm1, %v5418_v59  ;;  %v5419_v58 = vadd.f32 %v5387_v27, %v5287_v63  ;;  %v5436_v1 = vadd.f32 %v5404_v4, %v5356_v16  ;;  %v5359_v7 = vadd.f32 %v5908_v28, %v9983_v40  ;;  %v5350_v45 = vpop.f32.mrb[11].mxu1 }
 0x8f1   : > { %5453 = vst.msk [vmem:[%s6252_s5 + $0x58] sm:$0xff] %vm1199_vm1, %v5421_v9  ;;  %v5434_v33 = vadd.f32 %v5402_v47, %v5348_v42  ;;  %v5351_v14 = vadd.f32 %v9983_v40, %v5350_v45 }
 0x8f2   : > { %5451 = vst.msk [vmem:[%s6252_s5 + $0x48] sm:$0xff] %vm1199_vm1, %v5419_v58  ;;  %5468 = vst.msk [vmem:[%s6252_s5 + $0xd0] sm:$0xff] %vm1199_vm1, %v5436_v1  ;;  %v5437_v3 = vadd.f32 %v5405_v11, %v5359_v7 }
 0x8f3   : > { %5466 = vst.msk [vmem:[%s6252_s5 + $0xc0] sm:$0xff] %vm1199_vm1, %v5434_v33  ;;  %v5435_v44 = vadd.f32 %v5403_v31, %v5351_v14 }
 0x8f4   : > { %5469 = vst.msk [vmem:[%s6252_s5 + $0xd8] sm:$0xff] %vm1199_vm1, %v5437_v3 }
 0x8f5   : > { %5467 = vst.msk [vmem:[%s6252_s5 + $0xc8] sm:$0xff] %vm1199_vm1, %v5435_v44 }
 0x926   : > { %v5895_v34 = vpop.f32.mrb[12].mxu0 }
 0x927   : > { %v5308_v18 = vadd.f32 %v5895_v34, %v9983_v40  ;;  %v5299_v21 = vpop.f32.mrb[13].mxu0 }
 0x928   : > { %v5300_v57 = vadd.f32 %v9983_v40, %v5299_v21  ;;  %v5896_v49 = vpop.f32.mrb[14].mxu0 }
 0x929   : > { %v5424_v23 = vadd.f32 %v5392_v15, %v5308_v18  ;;  %v5311_v20 = vadd.f32 %v5896_v49, %v9983_v40  ;;  %v5302_v53 = vpop.f32.mrb[15].mxu0  ;;  %v5911_v52 = vpop.f32.mrb[12].mxu1 }
 0x92a   : > { %v5422_v38 = vadd.f32 %v5390_v61, %v5300_v57  ;;  %v5303_v22 = vadd.f32 %v9983_v40, %v5302_v53  ;;  %v5372_v30 = vadd.f32 %v5911_v52, %v9983_v40  ;;  %v5363_v48 = vpop.f32.mrb[13].mxu1 }
 0x92b   : > { %5456 = vst.msk [vmem:[%s6252_s5 + $0x70] sm:$0xff] %vm1199_vm1, %v5424_v23  ;;  %v5425_v37 = vadd.f32 %v5393_v60, %v5311_v20  ;;  %v5364_v5 = vadd.f32 %v9983_v40, %v5363_v48  ;;  %v5912_v56 = vpop.f32.mrb[14].mxu1 }
 0x92c   : > { %5454 = vst.msk [vmem:[%s6252_s5 + $0x60] sm:$0xff] %vm1199_vm1, %v5422_v38  ;;  %v5423_v12 = vadd.f32 %v5391_v32, %v5303_v22  ;;  %v5440_v29 = vadd.f32 %v5408_v51, %v5372_v30  ;;  %v5375_v25 = vadd.f32 %v5912_v56, %v9983_v40  ;;  %v5366_v54 = vpop.f32.mrb[15].mxu1 }
 0x92d   : > { %5457 = vst.msk [vmem:[%s6252_s5 + $0x78] sm:$0xff] %vm1199_vm1, %v5425_v37  ;;  %v5438_v26 = vadd.f32 %v5406_v35, %v5364_v5  ;;  %v5367_v13 = vadd.f32 %v9983_v40, %v5366_v54 }
 0x92e   : > { %5455 = vst.msk [vmem:[%s6252_s5 + $0x68] sm:$0xff] %vm1199_vm1, %v5423_v12  ;;  %5472 = vst.msk [vmem:[%s6252_s5 + $0xf0] sm:$0xff] %vm1199_vm1, %v5440_v29  ;;  %v5441_v8 = vadd.f32 %v5409_v50, %v5375_v25 }
 0x92f   : > { %5470 = vst.msk [vmem:[%s6252_s5 + $0xe0] sm:$0xff] %vm1199_vm1, %v5438_v26  ;;  %v5439_v17 = vadd.f32 %v5407_v10, %v5367_v13 }
 0x930   : > { %5473 = vst.msk [vmem:[%s6252_s5 + $0xf8] sm:$0xff] %vm1199_vm1, %v5441_v8 }
 0x931   : > { %5471 = vst.msk [vmem:[%s6252_s5 + $0xe8] sm:$0xff] %vm1199_vm1, %v5439_v17 }
 0x932 PF: > { %s10478_s12 = sld [smem:[#allocation7_spill]]  ;;  %s10479_s25 = sld [smem:[#allocation5_spill]] }
 0x933   : > { %s10480_s26 = sld [smem:[#allocation6_spill]]  ;;  %s10481_s27 = sld [smem:[#allocation8_spill]] }
 0x934   : > { %s10482_s28 = sld [smem:[#allocation9_spill]] }
 0x938   : > { %s23_s29 = sadd.s32 1, %s10478_s12  }
 0x939   : > { %p20_p9 = scmp.ge.s32.totalorder %s23_s29, 6  }
 0x93b   :  { %22 = sbr.rel (!%p20_p9) target bundleno = 6 (0x6), region = 134 }

</bundles_post_ra>
